<compile_context>
chip_gen: v6e
topology: v6e:2x2x1
jax: 0.10.0
libtpu: 0.0.40
codegen_flags: <defaults>
</compile_context>

<pallas_src>
import functools

import jax
import jax.numpy as jnp
from jax import lax
from jax.experimental import pallas as pl
from jax.experimental.pallas import tpu as pltpu

EPS = 1e-5


# ---------------------------------------------------------------------------
# Fused Pallas kernel: one (batch, row-tile) grid step computes the whole block.
# ---------------------------------------------------------------------------

def _extra_dw_kernel(xm_ref, xprev_ref, xnext_ref,
                     wdw1_ref, b1_ref, wpw1_ref, b2_ref,
                     wdw2_ref, b3_ref, wpw2_ref, b4_ref,
                     o_ref, *, stride, H, Ho, skip):
  """Refs (batch dim squeezed away by the BlockSpec):
       xm/xprev/xnext : (s*TH, W, C)   this / previous / next input row tile
       wdw1 (9,C)  wpw1 (C,E)  wdw2 (9,E)  wpw2 (E,Cout)   (BN scale already folded in)
       b1..b4 (1, C/E/E/Cout) float32   folded BN biases
       o_ref (TH, Wo, Cout)
  """
  s = stride
  TH, Wo, Cout = o_ref.shape
  TH2 = TH + 2                                  # y1/y2 rows incl. the dw2 halo
  C = xm_ref.shape[-1]
  E = wpw1_ref.shape[-1]
  t = pl.program_id(1)

  # ---- assemble the input row window (s*TH + s + 3 rows) from neighbouring tiles ----
  xm = xm_ref[...]
  top = xprev_ref[s * TH - (s + 1):s * TH, :, :]      # last s+1 rows of previous tile
  bot = xnext_ref[0:2, :, :]                          # first 2 rows of next tile
  xw = jnp.concatenate([top, xm, bot], axis=0)        # (R, W, C)
  R = s * TH + s + 3
  # Zero every row that lies outside the image.  This also neutralises the clamped neighbour
  # copies at t == 0 / t == last, whose target rows are exactly the out-of-range ones.
  g = s * TH * t - (s + 1) + lax.broadcasted_iota(jnp.int32, (R, 1, 1), 0)
  xw = jnp.where((g >= 0) & (g < H), xw, jnp.zeros_like(xw))
  zc = jnp.zeros((R, 1, C), xw.dtype)                 # 1-px zero pad along W (VMEM only)
  xw = jnp.concatenate([zc, xw, zc], axis=1)          # (R, W + 2, C)

  # ---- depthwise 3x3, stride s, + folded BN + SiLU (VPU/EUP) ----
  wd1 = wdw1_ref[...]
  acc = None
  for di in range(3):
    for dj in range(3):
      tap = (xw[di:di + s * (TH2 - 1) + 1:s, dj:dj + s * (Wo - 1) + 1:s, :]
             * wd1[di * 3 + dj, :])
      acc = tap if acc is None else acc + tap         # first tap initialises acc
  y1 = acc.astype(jnp.float32) + b1_ref[0, :]
  y1 = y1 * jax.nn.sigmoid(y1)                        # (TH2, Wo, C)

  # ---- pointwise expand (MXU, activation-dtype in / f32 acc) + BN + SiLU ----
  a1 = y1.astype(wpw1_ref.dtype).reshape(TH2 * Wo, C)
  y2 = jnp.dot(a1, wpw1_ref[...], preferred_element_type=jnp.float32) + b2_ref[0, :]
  y2 = y2 * jax.nn.sigmoid(y2)
  y2 = y2.reshape(TH2, Wo, E)
  # Rows outside [0, Ho) play the role of dw2's zero padding.
  r = TH * t - 1 + lax.broadcasted_iota(jnp.int32, (TH2, 1, 1), 0)
  y2 = jnp.where((r >= 0) & (r < Ho), y2, jnp.zeros_like(y2))
  zc2 = jnp.zeros((TH2, 1, E), y2.dtype)
  y2p = jnp.concatenate([zc2, y2, zc2], axis=1)       # (TH2, Wo + 2, E)

  # ---- depthwise 3x3, stride 1, + folded BN + SiLU ----
  wd2 = wdw2_ref[...]
  acc = None
  for di in range(3):
    for dj in range(3):
      tap = y2p[di:di + TH, dj:dj + Wo, :] * wd2[di * 3 + dj, :]
      acc = tap if acc is None else acc + tap
  y3 = acc + b3_ref[0, :]
  y3 = y3 * jax.nn.sigmoid(y3)                        # (TH, Wo, E)

  # ---- pointwise project (MXU) + folded BN (+ residual) ----
  a3 = y3.astype(wpw2_ref.dtype).reshape(TH * Wo, E)
  y4 = jnp.dot(a3, wpw2_ref[...], preferred_element_type=jnp.float32) + b4_ref[0, :]
  y4 = y4.reshape(TH, Wo, Cout)
  if skip:                                            # static: stride == 1 and C == Cout
    y4 = y4 + xm.astype(jnp.float32)
  o_ref[...] = y4.astype(o_ref.dtype)


# ---------------------------------------------------------------------------
# Wrapper: BN folding, tile choice, BlockSpecs / grid.
# ---------------------------------------------------------------------------

def _fold_bn(gamma, beta, mean, var):
  scale = gamma * lax.rsqrt(var + EPS)
  bias = beta - mean * scale
  return scale, bias


def extra_dw_block_nhwc(x, params, *, stride=1, row_tile=None,
                        vmem_limit_bytes=32 * 1024 * 1024):
  """Fused ExtraDWBlock forward on an NHWC tensor."""
  N, H, W, C = x.shape
  E = params["w_pw1"].shape[1]
  Cout = params["w_pw2"].shape[1]
  s = int(stride)
  Ho = (H - 1) // s + 1
  Wo = (W - 1) // s + 1
  skip = (s == 1) and (C == Cout)

  # Fold BN scale into the conv weights (linear), keep bias as a per-channel vector.
  s1, b1 = _fold_bn(*params["bn1"])
  s2, b2 = _fold_bn(*params["bn2"])
  s3, b3 = _fold_bn(*params["bn3"])
  s4, b4 = _fold_bn(*params["bn4"])
  cdt = x.dtype                    # MXU operand dtype follows activations (bf16-ready)
  wdw1 = (params["w_dw1"].reshape(9, C) * s1[None, :]).astype(cdt)
  wpw1 = (params["w_pw1"] * s2[None, :]).astype(cdt)
  wdw2 = (params["w_dw2"].reshape(9, E) * s3[None, :]).astype(cdt)
  wpw2 = (params["w_pw2"] * s4[None, :]).astype(cdt)
  b1 = b1.reshape(1, C).astype(jnp.float32)
  b2 = b2.reshape(1, E).astype(jnp.float32)
  b3 = b3.reshape(1, E).astype(jnp.float32)
  b4 = b4.reshape(1, Cout).astype(jnp.float32)

  # Row-tile size: keep per-tile live buffers to ~3 MiB so double-buffered blocks fit
  # comfortably under the scoped-VMEM limit on every generation (v5e/v6e/v7x).
  if row_tile is None:
    bytes_per_row = (s * (W + 2) * C * x.dtype.itemsize      # input window (activation dtype)
                     + Wo * (C + 3 * E + Cout) * 4)          # f32 intermediates
    row_tile = (3 * 1024 * 1024) // max(bytes_per_row, 1)
  th = int(max(2, min(row_tile, Ho)))
  while Ho % th != 0 and th > 2:   # prefer tiles that divide Ho (full blocks); not required
    th -= 1
  nt = pl.cdiv(Ho, th)

  x_block = (None, s * th, W, C)   # batch dim squeezed in-kernel

  def rep(arr):                    # tiny parameter arrays: one full block, resident across grid
    nd = arr.ndim
    return pl.BlockSpec(arr.shape, lambda n, t, _z=(0,) * nd: _z)

  kernel = functools.partial(_extra_dw_kernel, stride=s, H=H, Ho=Ho, skip=skip)
  return pl.pallas_call(
      kernel,
      grid=(N, nt),
      in_specs=[
          pl.BlockSpec(x_block, lambda n, t: (n, t, 0, 0)),                           # this tile
          pl.BlockSpec(x_block, lambda n, t: (n, jnp.maximum(t - 1, 0), 0, 0)),       # prev tile
          pl.BlockSpec(x_block, lambda n, t: (n, jnp.minimum(t + 1, nt - 1), 0, 0)),  # next tile
          rep(wdw1), rep(b1), rep(wpw1), rep(b2),
          rep(wdw2), rep(b3), rep(wpw2), rep(b4),
      ],
      out_specs=pl.BlockSpec((None, th, Wo, Cout), lambda n, t: (n, t, 0, 0)),
      out_shape=jax.ShapeDtypeStruct((N, Ho, Wo, Cout), x.dtype),
      compiler_params=pltpu.CompilerParams(
          dimension_semantics=("parallel", "parallel"),
          vmem_limit_bytes=vmem_limit_bytes),
  )(x, x, x, wdw1, b1, wpw1, b2, wdw2, b3, wpw2, b4)


@functools.partial(jax.jit, static_argnames=("stride", "row_tile"))
def extra_dw_block(x_nchw, params, stride=1, row_tile=None):
  """ExtraDWBlock forward.  Input/output: NCHW (PyTorch convention)."""
  x = jnp.transpose(x_nchw, (0, 2, 3, 1))            # NCHW -> NHWC (left to XLA)
  y = extra_dw_block_nhwc(x, params, stride=stride, row_tile=row_tile)
  return jnp.transpose(y, (0, 3, 1, 2))              # NHWC -> NCHW


# ---------------------------------------------------------------------------
# Parameters
# ---------------------------------------------------------------------------

def init_params(key, in_channels, out_channels, expansion_factor=4):
  exp = in_channels * expansion_factor
  ks = jax.random.split(key, 8)

  def bn_params(k, c):
    k1, k2, k3, k4 = jax.random.split(k, 4)
    gamma = jax.random.uniform(k1, (c,), jnp.float32, 0.5, 1.5)
    beta = jax.random.normal(k2, (c,), jnp.float32) * 0.1
    mean = jax.random.normal(k3, (c,), jnp.float32) * 0.1
    var = jax.random.uniform(k4, (c,), jnp.float32, 0.5, 1.5)
    return (gamma, beta, mean, var)

  return {
      "w_dw1": jax.random.normal(ks[0], (3, 3, in_channels), jnp.float32) * 0.2,
      "bn1": bn_params(ks[1], in_channels),
      "w_pw1": jax.random.normal(ks[2], (in_channels, exp), jnp.float32) * 0.2,
      "bn2": bn_params(ks[3], exp),
      "w_dw2": jax.random.normal(ks[4], (3, 3, exp), jnp.float32) * 0.2,
      "bn3": bn_params(ks[5], exp),
      "w_pw2": jax.random.normal(ks[6], (exp, out_channels), jnp.float32) * 0.2,
      "bn4": bn_params(ks[7], out_channels),
  }


# ---------------------------------------------------------------------------
# Pure-JAX reference (lax.conv) for verification
# ---------------------------------------------------------------------------

def ref_forward(x_nchw, p, stride=1):
  x = jnp.transpose(x_nchw, (0, 2, 3, 1))
  dn = ("NHWC", "HWIO", "NHWC")

  def bn(y, g, b, m, v):
    return (y - m) * lax.rsqrt(v + EPS) * g + b

  def silu(y):
    return y * jax.nn.sigmoid(y)

  C = x.shape[-1]
  y = lax.conv_general_dilated(x, p["w_dw1"].reshape(3, 3, 1, C),
                               (stride, stride), ((1, 1), (1, 1)),
                               dimension_numbers=dn, feature_group_count=C)
  y = silu(bn(y, *p["bn1"]))
  y = lax.conv_general_dilated(y, p["w_pw1"][None, None], (1, 1), "VALID",
                               dimension_numbers=dn)
  y = silu(bn(y, *p["bn2"]))
  E = y.shape[-1]
  y = lax.conv_general_dilated(y, p["w_dw2"].reshape(3, 3, 1, E),
                               (1, 1), ((1, 1), (1, 1)),
                               dimension_numbers=dn, feature_group_count=E)
  y = silu(bn(y, *p["bn3"]))
  y = lax.conv_general_dilated(y, p["w_pw2"][None, None], (1, 1), "VALID",
                               dimension_numbers=dn)
  y = bn(y, *p["bn4"])
  if stride == 1 and y.shape[-1] == x.shape[-1]:
    y = x + y
  return jnp.transpose(y, (0, 3, 1, 2))


# ---------------------------------------------------------------------------

if __name__ == "__main__":
  key = jax.random.PRNGKey(0)
  kx, kp = jax.random.split(key)

  N, C, H, W = 2, 4, 16, 16                  # small test shapes; expansion 4 -> 16 channels
  x = jax.random.normal(kx, (N, C, H, W), jnp.float32)
  params = init_params(kp, in_channels=C, out_channels=C, expansion_factor=4)
  ref = jax.block_until_ready(ref_forward(x, params, stride=1))

  # 1) auto row tile (single tile) and 2) explicit multi-tile (exercises halo assembly + residual)
  for rt in (None, 4):
    out = jax.block_until_ready(extra_dw_block(x, params, stride=1, row_tile=rt))
    assert out.shape == (N, C, H, W), out.shape
    err = float(jnp.max(jnp.abs(out - ref)))
    assert jnp.allclose(out, ref, atol=1e-4, rtol=1e-4), err

  # 3) non-residual path (in_channels != out_channels), multi-tile
  params2 = init_params(kp, in_channels=C, out_channels=8, expansion_factor=4)
  out2 = jax.block_until_ready(extra_dw_block(x, params2, stride=1, row_tile=8))
  ref2 = jax.block_until_ready(ref_forward(x, params2, stride=1))
  assert out2.shape == (N, 8, H, W), out2.shape
  err2 = float(jnp.max(jnp.abs(out2 - ref2)))
  assert jnp.allclose(out2, ref2, atol=1e-4, rtol=1e-4), err2

  # TODO(synk): stride=2 is supported in-kernel (strided taps) but only stride=1 is exercised here.
  print("KERNEL_OK")
</pallas_src>

<mosaic_0001>
module attributes {stable_mosaic.version = 11 : i64} {
  func.func @_extra_dw_kernel(%arg0: i32, %arg1: i32, %arg2: memref<1x16x16x4xf32, #tpu.memory_space<vmem>>, %arg3: memref<1x16x16x4xf32, #tpu.memory_space<vmem>>, %arg4: memref<1x16x16x4xf32, #tpu.memory_space<vmem>>, %arg5: memref<9x4xf32, #tpu.memory_space<vmem>>, %arg6: memref<1x4xf32, #tpu.memory_space<vmem>>, %arg7: memref<4x16xf32, #tpu.memory_space<vmem>>, %arg8: memref<1x16xf32, #tpu.memory_space<vmem>>, %arg9: memref<9x16xf32, #tpu.memory_space<vmem>>, %arg10: memref<1x16xf32, #tpu.memory_space<vmem>>, %arg11: memref<16x4xf32, #tpu.memory_space<vmem>>, %arg12: memref<1x4xf32, #tpu.memory_space<vmem>>, %arg13: memref<1x16x16x4xf32, #tpu.memory_space<vmem>>) attributes {dimension_semantics = [#tpu.dimension_semantics<parallel>, #tpu.dimension_semantics<parallel>], iteration_bounds = array<i64: 2, 1>, scalar_prefetch = 0 : i64, scratch_operands = 0 : i64, tpu.core_type = #tpu.core_type<tc>, window_params = [{transform_indices = @transform_0, window_bounds = array<i64: 1, 16, 16, 4>}, {transform_indices = @transform_1, window_bounds = array<i64: 1, 16, 16, 4>}, {transform_indices = @transform_2, window_bounds = array<i64: 1, 16, 16, 4>}, {pipeline_mode = #tpu.pipeline_mode<synchronous>, transform_indices = @transform_3, window_bounds = array<i64: 9, 4>}, {pipeline_mode = #tpu.pipeline_mode<synchronous>, transform_indices = @transform_4, window_bounds = array<i64: 1, 4>}, {pipeline_mode = #tpu.pipeline_mode<synchronous>, transform_indices = @transform_5, window_bounds = array<i64: 4, 16>}, {pipeline_mode = #tpu.pipeline_mode<synchronous>, transform_indices = @transform_6, window_bounds = array<i64: 1, 16>}, {pipeline_mode = #tpu.pipeline_mode<synchronous>, transform_indices = @transform_7, window_bounds = array<i64: 9, 16>}, {pipeline_mode = #tpu.pipeline_mode<synchronous>, transform_indices = @transform_8, window_bounds = array<i64: 1, 16>}, {pipeline_mode = #tpu.pipeline_mode<synchronous>, transform_indices = @transform_9, window_bounds = array<i64: 16, 4>}, {pipeline_mode = #tpu.pipeline_mode<synchronous>, transform_indices = @transform_10, window_bounds = array<i64: 1, 4>}, {transform_indices = @transform_11, window_bounds = array<i64: 1, 16, 16, 4>}]} {
    %c0 = arith.constant 0 : index
    %c0_0 = arith.constant 0 : index
    %c0_1 = arith.constant 0 : index
    %c0_2 = arith.constant 0 : index
    %0 = vector.load %arg2[%c0, %c0_0, %c0_1, %c0_2] : memref<1x16x16x4xf32, #tpu.memory_space<vmem>>, vector<1x16x16x4xf32>
    %1 = vector.shape_cast %0 : vector<1x16x16x4xf32> to vector<16x16x4xf32>
    %c0_3 = arith.constant 0 : index
    %c14 = arith.constant 14 : index
    %c0_4 = arith.constant 0 : index
    %c0_5 = arith.constant 0 : index
    %2 = vector.load %arg3[%c0_3, %c14, %c0_4, %c0_5] : memref<1x16x16x4xf32, #tpu.memory_space<vmem>>, vector<1x2x16x4xf32>
    %3 = vector.shape_cast %2 : vector<1x2x16x4xf32> to vector<2x16x4xf32>
    %c0_6 = arith.constant 0 : index
    %c0_7 = arith.constant 0 : index
    %c0_8 = arith.constant 0 : index
    %c0_9 = arith.constant 0 : index
    %4 = vector.load %arg4[%c0_6, %c0_7, %c0_8, %c0_9] : memref<1x16x16x4xf32, #tpu.memory_space<vmem>>, vector<1x2x16x4xf32>
    %5 = vector.shape_cast %4 : vector<1x2x16x4xf32> to vector<2x16x4xf32>
    %6 = tpu.concatenate %3, %1, %5 in 0 : vector<2x16x4xf32>, vector<16x16x4xf32>, vector<2x16x4xf32> -> vector<20x16x4xf32>
    %c16_i32 = arith.constant 16 : i32
    %7 = arith.muli %c16_i32, %arg1 : i32
    %c2_i32 = arith.constant 2 : i32
    %8 = arith.subi %7, %c2_i32 : i32
    %9 = tpu.iota {dimensions = array<i32: 0>} : vector<20x1x1xi32>
    %10 = vector.broadcast %8 : i32 to vector<20x1x1xi32>
    %11 = arith.addi %10, %9 : vector<20x1x1xi32>
    %c0_i32 = arith.constant 0 : i32
    %12 = vector.broadcast %c0_i32 : i32 to vector<20x1x1xi32>
    %13 = arith.cmpi sge, %11, %12 : vector<20x1x1xi32>
    %c16_i32_10 = arith.constant 16 : i32
    %14 = vector.broadcast %c16_i32_10 : i32 to vector<20x1x1xi32>
    %15 = arith.cmpi slt, %11, %14 : vector<20x1x1xi32>
    %16 = arith.andi %13, %15 : vector<20x1x1xi1>
    %cst = arith.constant 0.000000e+00 : f32
    %17 = vector.broadcast %cst : f32 to vector<20x16x4xf32>
    %18 = vector.shape_cast %16 : vector<20x1x1xi1> to vector<20x1x1xi1>
    %19 = vector.broadcast %18 : vector<20x1x1xi1> to vector<20x16x4xi1>
    %20 = arith.select %19, %6, %17 : vector<20x16x4xi1>, vector<20x16x4xf32>
    %cst_11 = arith.constant 0.000000e+00 : f32
    %21 = vector.broadcast %cst_11 : f32 to vector<20x1x4xf32>
    %22 = tpu.concatenate %21, %20, %21 in 1 : vector<20x1x4xf32>, vector<20x16x4xf32>, vector<20x1x4xf32> -> vector<20x18x4xf32>
    %c0_12 = arith.constant 0 : index
    %c0_13 = arith.constant 0 : index
    %23 = vector.load %arg5[%c0_12, %c0_13] : memref<9x4xf32, #tpu.memory_space<vmem>>, vector<9x4xf32>
    %24 = vector.extract_strided_slice %22 {offsets = [0, 0, 0], sizes = [18, 16, 4], strides = [1, 1, 1]} : vector<20x18x4xf32> to vector<18x16x4xf32>
    %25 = vector.extract_strided_slice %23 {offsets = [0, 0], sizes = [1, 4], strides = [1, 1]} : vector<9x4xf32> to vector<1x4xf32>
    %26 = vector.shape_cast %25 : vector<1x4xf32> to vector<4xf32>
    %27 = vector.shape_cast %26 : vector<4xf32> to vector<1x1x4xf32>
    %28 = vector.broadcast %27 : vector<1x1x4xf32> to vector<18x16x4xf32>
    %29 = arith.mulf %24, %28 : vector<18x16x4xf32>
    %30 = vector.extract_strided_slice %22 {offsets = [0, 1, 0], sizes = [18, 16, 4], strides = [1, 1, 1]} : vector<20x18x4xf32> to vector<18x16x4xf32>
    %31 = vector.extract_strided_slice %23 {offsets = [1, 0], sizes = [1, 4], strides = [1, 1]} : vector<9x4xf32> to vector<1x4xf32>
    %32 = vector.shape_cast %31 : vector<1x4xf32> to vector<4xf32>
    %33 = vector.shape_cast %32 : vector<4xf32> to vector<1x1x4xf32>
    %34 = vector.broadcast %33 : vector<1x1x4xf32> to vector<18x16x4xf32>
    %35 = arith.mulf %30, %34 : vector<18x16x4xf32>
    %36 = arith.addf %29, %35 : vector<18x16x4xf32>
    %37 = vector.extract_strided_slice %22 {offsets = [0, 2, 0], sizes = [18, 16, 4], strides = [1, 1, 1]} : vector<20x18x4xf32> to vector<18x16x4xf32>
    %38 = vector.extract_strided_slice %23 {offsets = [2, 0], sizes = [1, 4], strides = [1, 1]} : vector<9x4xf32> to vector<1x4xf32>
    %39 = vector.shape_cast %38 : vector<1x4xf32> to vector<4xf32>
    %40 = vector.shape_cast %39 : vector<4xf32> to vector<1x1x4xf32>
    %41 = vector.broadcast %40 : vector<1x1x4xf32> to vector<18x16x4xf32>
    %42 = arith.mulf %37, %41 : vector<18x16x4xf32>
    %43 = arith.addf %36, %42 : vector<18x16x4xf32>
    %44 = vector.extract_strided_slice %22 {offsets = [1, 0, 0], sizes = [18, 16, 4], strides = [1, 1, 1]} : vector<20x18x4xf32> to vector<18x16x4xf32>
    %45 = vector.extract_strided_slice %23 {offsets = [3, 0], sizes = [1, 4], strides = [1, 1]} : vector<9x4xf32> to vector<1x4xf32>
    %46 = vector.shape_cast %45 : vector<1x4xf32> to vector<4xf32>
    %47 = vector.shape_cast %46 : vector<4xf32> to vector<1x1x4xf32>
    %48 = vector.broadcast %47 : vector<1x1x4xf32> to vector<18x16x4xf32>
    %49 = arith.mulf %44, %48 : vector<18x16x4xf32>
    %50 = arith.addf %43, %49 : vector<18x16x4xf32>
    %51 = vector.extract_strided_slice %22 {offsets = [1, 1, 0], sizes = [18, 16, 4], strides = [1, 1, 1]} : vector<20x18x4xf32> to vector<18x16x4xf32>
    %52 = vector.extract_strided_slice %23 {offsets = [4, 0], sizes = [1, 4], strides = [1, 1]} : vector<9x4xf32> to vector<1x4xf32>
    %53 = vector.shape_cast %52 : vector<1x4xf32> to vector<4xf32>
    %54 = vector.shape_cast %53 : vector<4xf32> to vector<1x1x4xf32>
    %55 = vector.broadcast %54 : vector<1x1x4xf32> to vector<18x16x4xf32>
    %56 = arith.mulf %51, %55 : vector<18x16x4xf32>
    %57 = arith.addf %50, %56 : vector<18x16x4xf32>
    %58 = vector.extract_strided_slice %22 {offsets = [1, 2, 0], sizes = [18, 16, 4], strides = [1, 1, 1]} : vector<20x18x4xf32> to vector<18x16x4xf32>
    %59 = vector.extract_strided_slice %23 {offsets = [5, 0], sizes = [1, 4], strides = [1, 1]} : vector<9x4xf32> to vector<1x4xf32>
    %60 = vector.shape_cast %59 : vector<1x4xf32> to vector<4xf32>
    %61 = vector.shape_cast %60 : vector<4xf32> to vector<1x1x4xf32>
    %62 = vector.broadcast %61 : vector<1x1x4xf32> to vector<18x16x4xf32>
    %63 = arith.mulf %58, %62 : vector<18x16x4xf32>
    %64 = arith.addf %57, %63 : vector<18x16x4xf32>
    %65 = vector.extract_strided_slice %22 {offsets = [2, 0, 0], sizes = [18, 16, 4], strides = [1, 1, 1]} : vector<20x18x4xf32> to vector<18x16x4xf32>
    %66 = vector.extract_strided_slice %23 {offsets = [6, 0], sizes = [1, 4], strides = [1, 1]} : vector<9x4xf32> to vector<1x4xf32>
    %67 = vector.shape_cast %66 : vector<1x4xf32> to vector<4xf32>
    %68 = vector.shape_cast %67 : vector<4xf32> to vector<1x1x4xf32>
    %69 = vector.broadcast %68 : vector<1x1x4xf32> to vector<18x16x4xf32>
    %70 = arith.mulf %65, %69 : vector<18x16x4xf32>
    %71 = arith.addf %64, %70 : vector<18x16x4xf32>
    %72 = vector.extract_strided_slice %22 {offsets = [2, 1, 0], sizes = [18, 16, 4], strides = [1, 1, 1]} : vector<20x18x4xf32> to vector<18x16x4xf32>
    %73 = vector.extract_strided_slice %23 {offsets = [7, 0], sizes = [1, 4], strides = [1, 1]} : vector<9x4xf32> to vector<1x4xf32>
    %74 = vector.shape_cast %73 : vector<1x4xf32> to vector<4xf32>
    %75 = vector.shape_cast %74 : vector<4xf32> to vector<1x1x4xf32>
    %76 = vector.broadcast %75 : vector<1x1x4xf32> to vector<18x16x4xf32>
    %77 = arith.mulf %72, %76 : vector<18x16x4xf32>
    %78 = arith.addf %71, %77 : vector<18x16x4xf32>
    %79 = vector.extract_strided_slice %22 {offsets = [2, 2, 0], sizes = [18, 16, 4], strides = [1, 1, 1]} : vector<20x18x4xf32> to vector<18x16x4xf32>
    %80 = vector.extract_strided_slice %23 {offsets = [8, 0], sizes = [1, 4], strides = [1, 1]} : vector<9x4xf32> to vector<1x4xf32>
    %81 = vector.shape_cast %80 : vector<1x4xf32> to vector<4xf32>
    %82 = vector.shape_cast %81 : vector<4xf32> to vector<1x1x4xf32>
    %83 = vector.broadcast %82 : vector<1x1x4xf32> to vector<18x16x4xf32>
    %84 = arith.mulf %79, %83 : vector<18x16x4xf32>
    %85 = arith.addf %78, %84 : vector<18x16x4xf32>
    %c0_14 = arith.constant 0 : index
    %c0_15 = arith.constant 0 : index
    %86 = vector.load %arg6[%c0_14, %c0_15] : memref<1x4xf32, #tpu.memory_space<vmem>>, vector<1x4xf32>
    %87 = vector.shape_cast %86 : vector<1x4xf32> to vector<4xf32>
    %88 = vector.shape_cast %87 : vector<4xf32> to vector<1x1x4xf32>
    %89 = vector.broadcast %88 : vector<1x1x4xf32> to vector<18x16x4xf32>
    %90 = arith.addf %85, %89 : vector<18x16x4xf32>
    %91 = arith.negf %90 : vector<18x16x4xf32>
    %92 = math.exp %91 : vector<18x16x4xf32>
    %cst_16 = arith.constant 1.000000e+00 : f32
    %93 = vector.broadcast %cst_16 : f32 to vector<18x16x4xf32>
    %94 = arith.addf %93, %92 : vector<18x16x4xf32>
    %95 = arith.divf %93, %94 : vector<18x16x4xf32>
    %96 = arith.mulf %90, %95 : vector<18x16x4xf32>
    %97 = vector.shape_cast %96 : vector<18x16x4xf32> to vector<288x4xf32>
    %c0_17 = arith.constant 0 : index
    %c0_18 = arith.constant 0 : index
    %98 = vector.load %arg7[%c0_17, %c0_18] : memref<4x16xf32, #tpu.memory_space<vmem>>, vector<4x16xf32>
    %cst_19 = arith.constant dense<0.000000e+00> : vector<288x16xf32>
    %99 = tpu.matmul %97, %98, %cst_19 {dimension_numbers = #tpu.dot_dimension_numbers<[1], [0], [0], [1], [0, 0, 1, 1], [], []>} : vector<288x4xf32>, vector<4x16xf32>, vector<288x16xf32> -> vector<288x16xf32>
    %c0_20 = arith.constant 0 : index
    %c0_21 = arith.constant 0 : index
    %100 = vector.load %arg8[%c0_20, %c0_21] : memref<1x16xf32, #tpu.memory_space<vmem>>, vector<1x16xf32>
    %101 = vector.shape_cast %100 : vector<1x16xf32> to vector<16xf32>
    %102 = vector.shape_cast %101 : vector<16xf32> to vector<1x16xf32>
    %103 = vector.broadcast %102 : vector<1x16xf32> to vector<288x16xf32>
    %104 = arith.addf %99, %103 : vector<288x16xf32>
    %105 = arith.negf %104 : vector<288x16xf32>
    %106 = math.exp %105 : vector<288x16xf32>
    %cst_22 = arith.constant 1.000000e+00 : f32
    %107 = vector.broadcast %cst_22 : f32 to vector<288x16xf32>
    %108 = arith.addf %107, %106 : vector<288x16xf32>
    %109 = arith.divf %107, %108 : vector<288x16xf32>
    %110 = arith.mulf %104, %109 : vector<288x16xf32>
    %111 = vector.shape_cast %110 : vector<288x16xf32> to vector<18x16x16xf32>
    %c16_i32_23 = arith.constant 16 : i32
    %112 = arith.muli %c16_i32_23, %arg1 : i32
    %c1_i32 = arith.constant 1 : i32
    %113 = arith.subi %112, %c1_i32 : i32
    %114 = tpu.iota {dimensions = array<i32: 0>} : vector<18x1x1xi32>
    %115 = vector.broadcast %113 : i32 to vector<18x1x1xi32>
    %116 = arith.addi %115, %114 : vector<18x1x1xi32>
    %c0_i32_24 = arith.constant 0 : i32
    %117 = vector.broadcast %c0_i32_24 : i32 to vector<18x1x1xi32>
    %118 = arith.cmpi sge, %116, %117 : vector<18x1x1xi32>
    %c16_i32_25 = arith.constant 16 : i32
    %119 = vector.broadcast %c16_i32_25 : i32 to vector<18x1x1xi32>
    %120 = arith.cmpi slt, %116, %119 : vector<18x1x1xi32>
    %121 = arith.andi %118, %120 : vector<18x1x1xi1>
    %cst_26 = arith.constant 0.000000e+00 : f32
    %122 = vector.broadcast %cst_26 : f32 to vector<18x16x16xf32>
    %123 = vector.shape_cast %121 : vector<18x1x1xi1> to vector<18x1x1xi1>
    %124 = vector.broadcast %123 : vector<18x1x1xi1> to vector<18x16x16xi1>
    %125 = arith.select %124, %111, %122 : vector<18x16x16xi1>, vector<18x16x16xf32>
    %cst_27 = arith.constant 0.000000e+00 : f32
    %126 = vector.broadcast %cst_27 : f32 to vector<18x1x16xf32>
    %127 = tpu.concatenate %126, %125, %126 in 1 : vector<18x1x16xf32>, vector<18x16x16xf32>, vector<18x1x16xf32> -> vector<18x18x16xf32>
    %c0_28 = arith.constant 0 : index
    %c0_29 = arith.constant 0 : index
    %128 = vector.load %arg9[%c0_28, %c0_29] : memref<9x16xf32, #tpu.memory_space<vmem>>, vector<9x16xf32>
    %129 = vector.extract_strided_slice %127 {offsets = [0, 0, 0], sizes = [16, 16, 16], strides = [1, 1, 1]} : vector<18x18x16xf32> to vector<16x16x16xf32>
    %130 = vector.extract_strided_slice %128 {offsets = [0, 0], sizes = [1, 16], strides = [1, 1]} : vector<9x16xf32> to vector<1x16xf32>
    %131 = vector.shape_cast %130 : vector<1x16xf32> to vector<16xf32>
    %132 = vector.shape_cast %131 : vector<16xf32> to vector<1x1x16xf32>
    %133 = vector.broadcast %132 : vector<1x1x16xf32> to vector<16x16x16xf32>
    %134 = arith.mulf %129, %133 : vector<16x16x16xf32>
    %135 = vector.extract_strided_slice %127 {offsets = [0, 1, 0], sizes = [16, 16, 16], strides = [1, 1, 1]} : vector<18x18x16xf32> to vector<16x16x16xf32>
    %136 = vector.extract_strided_slice %128 {offsets = [1, 0], sizes = [1, 16], strides = [1, 1]} : vector<9x16xf32> to vector<1x16xf32>
    %137 = vector.shape_cast %136 : vector<1x16xf32> to vector<16xf32>
    %138 = vector.shape_cast %137 : vector<16xf32> to vector<1x1x16xf32>
    %139 = vector.broadcast %138 : vector<1x1x16xf32> to vector<16x16x16xf32>
    %140 = arith.mulf %135, %139 : vector<16x16x16xf32>
    %141 = arith.addf %134, %140 : vector<16x16x16xf32>
    %142 = vector.extract_strided_slice %127 {offsets = [0, 2, 0], sizes = [16, 16, 16], strides = [1, 1, 1]} : vector<18x18x16xf32> to vector<16x16x16xf32>
    %143 = vector.extract_strided_slice %128 {offsets = [2, 0], sizes = [1, 16], strides = [1, 1]} : vector<9x16xf32> to vector<1x16xf32>
    %144 = vector.shape_cast %143 : vector<1x16xf32> to vector<16xf32>
    %145 = vector.shape_cast %144 : vector<16xf32> to vector<1x1x16xf32>
    %146 = vector.broadcast %145 : vector<1x1x16xf32> to vector<16x16x16xf32>
    %147 = arith.mulf %142, %146 : vector<16x16x16xf32>
    %148 = arith.addf %141, %147 : vector<16x16x16xf32>
    %149 = vector.extract_strided_slice %127 {offsets = [1, 0, 0], sizes = [16, 16, 16], strides = [1, 1, 1]} : vector<18x18x16xf32> to vector<16x16x16xf32>
    %150 = vector.extract_strided_slice %128 {offsets = [3, 0], sizes = [1, 16], strides = [1, 1]} : vector<9x16xf32> to vector<1x16xf32>
    %151 = vector.shape_cast %150 : vector<1x16xf32> to vector<16xf32>
    %152 = vector.shape_cast %151 : vector<16xf32> to vector<1x1x16xf32>
    %153 = vector.broadcast %152 : vector<1x1x16xf32> to vector<16x16x16xf32>
    %154 = arith.mulf %149, %153 : vector<16x16x16xf32>
    %155 = arith.addf %148, %154 : vector<16x16x16xf32>
    %156 = vector.extract_strided_slice %127 {offsets = [1, 1, 0], sizes = [16, 16, 16], strides = [1, 1, 1]} : vector<18x18x16xf32> to vector<16x16x16xf32>
    %157 = vector.extract_strided_slice %128 {offsets = [4, 0], sizes = [1, 16], strides = [1, 1]} : vector<9x16xf32> to vector<1x16xf32>
    %158 = vector.shape_cast %157 : vector<1x16xf32> to vector<16xf32>
    %159 = vector.shape_cast %158 : vector<16xf32> to vector<1x1x16xf32>
    %160 = vector.broadcast %159 : vector<1x1x16xf32> to vector<16x16x16xf32>
    %161 = arith.mulf %156, %160 : vector<16x16x16xf32>
    %162 = arith.addf %155, %161 : vector<16x16x16xf32>
    %163 = vector.extract_strided_slice %127 {offsets = [1, 2, 0], sizes = [16, 16, 16], strides = [1, 1, 1]} : vector<18x18x16xf32> to vector<16x16x16xf32>
    %164 = vector.extract_strided_slice %128 {offsets = [5, 0], sizes = [1, 16], strides = [1, 1]} : vector<9x16xf32> to vector<1x16xf32>
    %165 = vector.shape_cast %164 : vector<1x16xf32> to vector<16xf32>
    %166 = vector.shape_cast %165 : vector<16xf32> to vector<1x1x16xf32>
    %167 = vector.broadcast %166 : vector<1x1x16xf32> to vector<16x16x16xf32>
    %168 = arith.mulf %163, %167 : vector<16x16x16xf32>
    %169 = arith.addf %162, %168 : vector<16x16x16xf32>
    %170 = vector.extract_strided_slice %127 {offsets = [2, 0, 0], sizes = [16, 16, 16], strides = [1, 1, 1]} : vector<18x18x16xf32> to vector<16x16x16xf32>
    %171 = vector.extract_strided_slice %128 {offsets = [6, 0], sizes = [1, 16], strides = [1, 1]} : vector<9x16xf32> to vector<1x16xf32>
    %172 = vector.shape_cast %171 : vector<1x16xf32> to vector<16xf32>
    %173 = vector.shape_cast %172 : vector<16xf32> to vector<1x1x16xf32>
    %174 = vector.broadcast %173 : vector<1x1x16xf32> to vector<16x16x16xf32>
    %175 = arith.mulf %170, %174 : vector<16x16x16xf32>
    %176 = arith.addf %169, %175 : vector<16x16x16xf32>
    %177 = vector.extract_strided_slice %127 {offsets = [2, 1, 0], sizes = [16, 16, 16], strides = [1, 1, 1]} : vector<18x18x16xf32> to vector<16x16x16xf32>
    %178 = vector.extract_strided_slice %128 {offsets = [7, 0], sizes = [1, 16], strides = [1, 1]} : vector<9x16xf32> to vector<1x16xf32>
    %179 = vector.shape_cast %178 : vector<1x16xf32> to vector<16xf32>
    %180 = vector.shape_cast %179 : vector<16xf32> to vector<1x1x16xf32>
    %181 = vector.broadcast %180 : vector<1x1x16xf32> to vector<16x16x16xf32>
    %182 = arith.mulf %177, %181 : vector<16x16x16xf32>
    %183 = arith.addf %176, %182 : vector<16x16x16xf32>
    %184 = vector.extract_strided_slice %127 {offsets = [2, 2, 0], sizes = [16, 16, 16], strides = [1, 1, 1]} : vector<18x18x16xf32> to vector<16x16x16xf32>
    %185 = vector.extract_strided_slice %128 {offsets = [8, 0], sizes = [1, 16], strides = [1, 1]} : vector<9x16xf32> to vector<1x16xf32>
    %186 = vector.shape_cast %185 : vector<1x16xf32> to vector<16xf32>
    %187 = vector.shape_cast %186 : vector<16xf32> to vector<1x1x16xf32>
    %188 = vector.broadcast %187 : vector<1x1x16xf32> to vector<16x16x16xf32>
    %189 = arith.mulf %184, %188 : vector<16x16x16xf32>
    %190 = arith.addf %183, %189 : vector<16x16x16xf32>
    %c0_30 = arith.constant 0 : index
    %c0_31 = arith.constant 0 : index
    %191 = vector.load %arg10[%c0_30, %c0_31] : memref<1x16xf32, #tpu.memory_space<vmem>>, vector<1x16xf32>
    %192 = vector.shape_cast %191 : vector<1x16xf32> to vector<16xf32>
    %193 = vector.shape_cast %192 : vector<16xf32> to vector<1x1x16xf32>
    %194 = vector.broadcast %193 : vector<1x1x16xf32> to vector<16x16x16xf32>
    %195 = arith.addf %190, %194 : vector<16x16x16xf32>
    %196 = arith.negf %195 : vector<16x16x16xf32>
    %197 = math.exp %196 : vector<16x16x16xf32>
    %cst_32 = arith.constant 1.000000e+00 : f32
    %198 = vector.broadcast %cst_32 : f32 to vector<16x16x16xf32>
    %199 = arith.addf %198, %197 : vector<16x16x16xf32>
    %200 = arith.divf %198, %199 : vector<16x16x16xf32>
    %201 = arith.mulf %195, %200 : vector<16x16x16xf32>
    %202 = vector.shape_cast %201 : vector<16x16x16xf32> to vector<256x16xf32>
    %c0_33 = arith.constant 0 : index
    %c0_34 = arith.constant 0 : index
    %203 = vector.load %arg11[%c0_33, %c0_34] : memref<16x4xf32, #tpu.memory_space<vmem>>, vector<16x4xf32>
    %cst_35 = arith.constant dense<0.000000e+00> : vector<256x4xf32>
    %204 = tpu.matmul %202, %203, %cst_35 {dimension_numbers = #tpu.dot_dimension_numbers<[1], [0], [0], [1], [0, 0, 1, 1], [], []>} : vector<256x16xf32>, vector<16x4xf32>, vector<256x4xf32> -> vector<256x4xf32>
    %c0_36 = arith.constant 0 : index
    %c0_37 = arith.constant 0 : index
    %205 = vector.load %arg12[%c0_36, %c0_37] : memref<1x4xf32, #tpu.memory_space<vmem>>, vector<1x4xf32>
    %206 = vector.shape_cast %205 : vector<1x4xf32> to vector<4xf32>
    %207 = vector.shape_cast %206 : vector<4xf32> to vector<1x4xf32>
    %208 = vector.broadcast %207 : vector<1x4xf32> to vector<256x4xf32>
    %209 = arith.addf %204, %208 : vector<256x4xf32>
    %210 = vector.shape_cast %209 : vector<256x4xf32> to vector<16x16x4xf32>
    %211 = arith.addf %210, %1 : vector<16x16x4xf32>
    %c0_38 = arith.constant 0 : index
    %c0_39 = arith.constant 0 : index
    %c0_40 = arith.constant 0 : index
    %c0_41 = arith.constant 0 : index
    %212 = vector.load %arg13[%c0_38, %c0_39, %c0_40, %c0_41] : memref<1x16x16x4xf32, #tpu.memory_space<vmem>>, vector<1x16x16x4xf32>
    %213 = vector.shape_cast %212 : vector<1x16x16x4xf32> to vector<16x16x4xf32>
    %214 = vector.shape_cast %211 : vector<16x16x4xf32> to vector<1x16x16x4xf32>
    tpu.vector_store %arg13[%c0_38, %c0_39, %c0_40, %c0_41], %214 {strides = array<i32>} : memref<1x16x16x4xf32, #tpu.memory_space<vmem>>, vector<1x16x16x4xf32>,
    return
  }
  func.func @transform_0(%arg0: i32, %arg1: i32) -> (i32, i32, i32, i32) {
    %c0_i32 = arith.constant 0 : i32
    %c0_i32_0 = arith.constant 0 : i32
    %c0_i32_1 = arith.constant 0 : i32
    return %arg0, %arg1, %c0_i32, %c0_i32_0 : i32, i32, i32, i32
  }
  func.func @transform_1(%arg0: i32, %arg1: i32) -> (i32, i32, i32, i32) {
    %c1_i32 = arith.constant 1 : i32
    %0 = arith.subi %arg1, %c1_i32 : i32
    %c0_i32 = arith.constant 0 : i32
    %1 = arith.maxsi %0, %c0_i32 : i32
    %c0_i32_0 = arith.constant 0 : i32
    %c0_i32_1 = arith.constant 0 : i32
    %c0_i32_2 = arith.constant 0 : i32
    return %arg0, %1, %c0_i32_0, %c0_i32_1 : i32, i32, i32, i32
  }
  func.func @transform_2(%arg0: i32, %arg1: i32) -> (i32, i32, i32, i32) {
    %c1_i32 = arith.constant 1 : i32
    %0 = arith.addi %arg1, %c1_i32 : i32
    %c0_i32 = arith.constant 0 : i32
    %1 = arith.minsi %0, %c0_i32 : i32
    %c0_i32_0 = arith.constant 0 : i32
    %c0_i32_1 = arith.constant 0 : i32
    %c0_i32_2 = arith.constant 0 : i32
    return %arg0, %1, %c0_i32_0, %c0_i32_1 : i32, i32, i32, i32
  }
  func.func @transform_3(%arg0: i32, %arg1: i32) -> (i32, i32) {
    %c0_i32 = arith.constant 0 : i32
    %c0_i32_0 = arith.constant 0 : i32
    %c0_i32_1 = arith.constant 0 : i32
    return %c0_i32, %c0_i32_0 : i32, i32
  }
  func.func @transform_4(%arg0: i32, %arg1: i32) -> (i32, i32) {
    %c0_i32 = arith.constant 0 : i32
    %c0_i32_0 = arith.constant 0 : i32
    %c0_i32_1 = arith.constant 0 : i32
    return %c0_i32, %c0_i32_0 : i32, i32
  }
  func.func @transform_5(%arg0: i32, %arg1: i32) -> (i32, i32) {
    %c0_i32 = arith.constant 0 : i32
    %c0_i32_0 = arith.constant 0 : i32
    %c0_i32_1 = arith.constant 0 : i32
    return %c0_i32, %c0_i32_0 : i32, i32
  }
  func.func @transform_6(%arg0: i32, %arg1: i32) -> (i32, i32) {
    %c0_i32 = arith.constant 0 : i32
    %c0_i32_0 = arith.constant 0 : i32
    %c0_i32_1 = arith.constant 0 : i32
    return %c0_i32, %c0_i32_0 : i32, i32
  }
  func.func @transform_7(%arg0: i32, %arg1: i32) -> (i32, i32) {
    %c0_i32 = arith.constant 0 : i32
    %c0_i32_0 = arith.constant 0 : i32
    %c0_i32_1 = arith.constant 0 : i32
    return %c0_i32, %c0_i32_0 : i32, i32
  }
  func.func @transform_8(%arg0: i32, %arg1: i32) -> (i32, i32) {
    %c0_i32 = arith.constant 0 : i32
    %c0_i32_0 = arith.constant 0 : i32
    %c0_i32_1 = arith.constant 0 : i32
    return %c0_i32, %c0_i32_0 : i32, i32
  }
  func.func @transform_9(%arg0: i32, %arg1: i32) -> (i32, i32) {
    %c0_i32 = arith.constant 0 : i32
    %c0_i32_0 = arith.constant 0 : i32
    %c0_i32_1 = arith.constant 0 : i32
    return %c0_i32, %c0_i32_0 : i32, i32
  }
  func.func @transform_10(%arg0: i32, %arg1: i32) -> (i32, i32) {
    %c0_i32 = arith.constant 0 : i32
    %c0_i32_0 = arith.constant 0 : i32
    %c0_i32_1 = arith.constant 0 : i32
    return %c0_i32, %c0_i32_0 : i32, i32
  }
  func.func @transform_11(%arg0: i32, %arg1: i32) -> (i32, i32, i32, i32) {
    %c0_i32 = arith.constant 0 : i32
    %c0_i32_0 = arith.constant 0 : i32
    %c0_i32_1 = arith.constant 0 : i32
    return %arg0, %arg1, %c0_i32, %c0_i32_0 : i32, i32, i32, i32
  }
}

</mosaic_0001>

<bundles_post_ra>
// kernel: extra_dw_block.1
= control target key start
LH: loop header
LB: loop body
LE: loop exit
PB: predicated region body
PF: predicated region fallthrough
CT: control target
= control target key end

     0   :  { %s7403_s15 = smov 0   ;;  %s7405_s16 = smov 0   ;;  %s11866_s0 = inlined_call_operand.vmem [shape: f32[2,16,16,4], index: 0, kind: input, shape index: {}, may-alias: {0,1,2}]   ;;  %s11867_s1 = inlined_call_operand.vmem [shape: f32[2,16,16,4], index: 1, kind: input, shape index: {}, may-alias: {0,1,2}]   ;;  %s11868_s2 = inlined_call_operand.vmem [shape: f32[2,16,16,4], index: 2, kind: input, shape index: {}, may-alias: {0,1,2}]   ;;  %s11869_s3 = inlined_call_operand.vmem [shape: f32[9,4], index: 3, kind: input, shape index: {}]   ;;  %s11870_s4 = inlined_call_operand.vmem [shape: f32[1,4], index: 4, kind: input, shape index: {}]   ;;  %s11871_s5 = inlined_call_operand.vmem [shape: f32[4,16], index: 5, kind: input, shape index: {}]   ;;  %s11872_s6 = inlined_call_operand.vmem [shape: f32[1,16], index: 6, kind: input, shape index: {}]   ;;  %s11873_s7 = inlined_call_operand.vmem [shape: f32[9,16], index: 7, kind: input, shape index: {}]   ;;  %s11874_s8 = inlined_call_operand.vmem [shape: f32[1,16], index: 8, kind: input, shape index: {}]   ;;  %s11875_s9 = inlined_call_operand.vmem [shape: f32[16,4], index: 9, kind: input, shape index: {}]   ;;  %s11876_s10 = inlined_call_operand.vmem [shape: f32[1,4], index: 10, kind: input, shape index: {}]   ;;  %s11877_s11 = inlined_call_operand.vmem [shape: f32[2,16,16,4], index: 11, kind: output, shape index: {}]  }
   0x1   :  { %s7407_s17 = smov 0  }
   0x2 LB: > { %s33_s18 = sadd.s32 1, %s7336_s16  ;;  %p6471_p0 = scmp.ge.s32.totalorder %s7340_s17, 1  ;;  %s7340_s17 = sphi %s7407_s17, %s21_s17   ;;  %s7336_s16 = sphi %s7405_s16, %s12628_s16   ;;  %s7332_s15 = sphi %s7403_s15, %s12627_s15  }
   0x3   : > { %p35_p1 = scmp.ge.s32.totalorder %s33_s18, 2  ;;  %p419_p2 = scmp.lt.s32.totalorder %s7340_s17, 3 }
   0x5   : > { %s12630_s18 = smov (%p35_p1, %s33_s18), 0  ;;  %p420_p3 = pnand %p6471_p0, %p419_p2 }
   0x7   : > { %423 = sbr.rel (%p420_p3) target bundleno = 1078 (0x436), region = 64 }
   0xc   : > { %v3090_v0 = vld [vmem:[%s11871_s5] sm:$0xf]  ;;  %vm3207_vm0 = vcmask 1043456   ;;  %p496_p4 = scmp.lt.s32.totalorder %s7332_s15, 1  ;;  %vm794_vm1 = vcmask 1040384   ;;  %v957_v1 = vlaneseq  ;;  %v7342_v2 = vmov 0.0  }
   0xd   : > { %6740 = vmatprep.subr.msk.mxu0 %vm3207_vm0, %v3090_v0  ;;  %v7424_v3 = vrot.slane %v7342_v2, 7  ;;  %6848 = vmatprep.subr.msk.mxu1 %vm3207_vm0, %v3090_v0  ;;  %v955_v6 = vld [vmem:[%s11869_s3] sm:$0xff]  ;;  %vm1109_vm2 = vcmask 1046528   ;;  %vm1384_vm3 = vcmask 1045504   ;;  %v7514_v42 = vld [vmem:[%s11869_s3 + $0x8] ss:$0 sm:$0xff] }
   0xe   : > { %6741 = vmatpush3.msk.msra.mxu0 %vm3207_vm0, %v3090_v0  ;;  %s12632_s15 = smov (!%p496_p4, %s7332_s15), 1  ;;  %v7428_v4 = vshrl.u32 %v957_v1, 7  ;;  %6849 = vmatpush3.msk.msra.mxu1 %vm3207_vm0, %v3090_v0  ;;  %vm3098_vm4 = vcmask 31744   ;;  %vm5943_vm5 = vcmask 130048  }
   0xf   : > { %12079 = vst [vmem:[#allocation2_spill] sm:$0xff] %v7424_v3  ;;  %v7432_v5 = vsel %vm794_vm1, 0.0, %v7424_v3  ;;  %v7439_v7 = vsel %vm794_vm1, %v7424_v3, 0.0  ;;  %s6665_s23 = sshll.u32 %s12632_s15, 8 }
  0x10   : > { %12080 = vst [vmem:[#allocation3_spill] sm:$0xff] %v7432_v5  ;;  %12081 = vst [vmem:[#allocation4_spill] sm:$0xff] %v7439_v7  ;;  %v11883_v8 = vsub.s32 0, %v7428_v4  ;;  %v999_v9 = vsub.s32 1, %v7428_v4  ;;  %v11884_v10 = vsub.s32 2, %v7428_v4  ;;  %v11880_v11 = vsub.s32 3, %v7428_v4  ;;  %s7451_s26 = scalar_lea.vmem %s11866_s0, %s6665_s23  ;;  %s11710_s22 = scalar_lea.vmem %s11877_s11, %s6665_s23 }
  0x11   : > { %v11882_v12 = vsub.s32 4, %v7428_v4  ;;  %v11881_v13 = vsub.s32 5, %v7428_v4  ;;  %v11878_v14 = vsub.s32 6, %v7428_v4  ;;  %v11879_v15 = vsub.s32 7, %v7428_v4  ;;  %v551_v16 = vld [vmem:[%s7451_s26] sm:$0xff]  ;;  %v552_v17 = vld [vmem:[%s7451_s26 + $0x8] sm:$0xff] }
  0x12   : > { %v7461_v18 = vrot.slane %v955_v6, %v11883_v8  ;;  %v7465_v19 = vrot.slane %v955_v6, %v999_v9  ;;  %v7469_v20 = vrot.slane %v955_v6, %v11884_v10  ;;  %v7473_v21 = vrot.slane %v955_v6, %v11880_v11 }
  0x13   : > { %v801_v22 = vrot.slane %v551_v16, 7  ;;  %v802_v23 = vrot.slane %v552_v17, 7  ;;  %v7477_v24 = vrot.slane %v955_v6, %v11882_v12  ;;  %v7481_v25 = vrot.slane %v955_v6, %v11881_v13 }
  0x14   : > { %v961_v26 = vmul.f32 %v7461_v18, %v7432_v5  ;;  %v1001_v27 = vmul.f32 %v7465_v19, %v7432_v5  ;;  %v1002_v28 = vmul.f32 %v7465_v19, %v7424_v3  ;;  %v1276_v29 = vmul.f32 %v7469_v20, %v7432_v5 }
  0x15   : > { %v7492_v30 = vsel %vm794_vm1, %v801_v22, %v802_v23  ;;  %v7495_v31 = vsel %vm794_vm1, 0.0, %v801_v22  ;;  %v1277_v32 = vmul.f32 %v7469_v20, %v7424_v3  ;;  %v7501_v33 = vmul.f32 %v7473_v21, %v7432_v5 }
  0x16   : > { %v1110_v34 = vrot.slane %v1001_v27, 1  ;;  %v1111_v35 = vrot.slane %v1002_v28, 1  ;;  %v1385_v36 = vrot.slane %v1276_v29, 2  ;;  %v1553_v37 = vmul.f32 %v7473_v21, %v7495_v31 }
  0x17   : > { %v1386_v38 = vrot.slane %v1277_v32, 2  ;;  %v1627_v39 = vmul.f32 %v7477_v24, %v7432_v5  ;;  %v1628_v40 = vmul.f32 %v7477_v24, %v7424_v3  ;;  %v1901_v41 = vmul.f32 %v7481_v25, %v7432_v5 }
  0x18   : > { %v1112_v43 = vsel %vm1109_vm2, %v1110_v34, %v1111_v35  ;;  %v1902_v44 = vmul.f32 %v7481_v25, %v7424_v3  ;;  %v7521_v45 = vrot.slane %v955_v6, %v11878_v14  ;;  %v7525_v46 = vrot.slane %v955_v6, %v11879_v15 }
  0x19   : > { %v1236_v47 = vadd.f32 %v1112_v43, %v961_v26  ;;  %v1387_v48 = vsel %vm1384_vm3, %v1385_v36, %v1386_v38  ;;  %v1735_v49 = vrot.slane %v1627_v39, 1  ;;  %v1736_v50 = vrot.slane %v1628_v40, 1  ;;  %v553_v43 = vld [vmem:[%s7451_s26 + $0x10] sm:$0xff] }
  0x1a   : > { %v2009_v51 = vrot.slane %v1901_v41, 2  ;;  %v2010_v52 = vrot.slane %v1902_v44, 2  ;;  %v2175_v53 = vmul.f32 %v7521_v45, %v7495_v31  ;;  %v2251_v54 = vmul.f32 %v7525_v46, %v7495_v31  ;;  %v554_v44 = vld [vmem:[%s7451_s26 + $0x18] sm:$0xff] }
  0x1b   : > { %v1511_v55 = vadd.f32 %v1387_v48, %v1236_v47  ;;  %v7533_v56 = vsel %vm1109_vm2, %v1735_v49, %v1736_v50  ;;  %v2252_v57 = vmul.f32 %v7525_v46, %v7492_v30  ;;  %v2525_v58 = vmul.f32 %v7514_v42, %v7495_v31 }
  0x1c   : > { %v7540_v59 = vsel %vm1384_vm3, %v2009_v51, %v2010_v52  ;;  %v2359_v60 = vrot.slane %v2251_v54, 1  ;;  %v2526_v61 = vmul.f32 %v7514_v42, %v7492_v30  ;;  %v7545_v62 = vsel %vm794_vm1, %v802_v23, 0.0 }
  0x1d   : > { %v1587_v63 = vadd.f32 %v7501_v33, %v1511_v55  ;;  %v1589_v0 = vadd.f32 %v1553_v37, %v1511_v55  ;;  %v2360_v1 = vrot.slane %v2252_v57, 1  ;;  %v2633_v2 = vrot.slane %v2525_v58, 2 }
  0x1e   : > { %v2634_v6 = vrot.slane %v2526_v61, 2  ;;  %v962_v16 = vmul.f32 %v7461_v18, %v7424_v3  ;;  %v1003_v17 = vmul.f32 %v7465_v19, %v7439_v7  ;;  %v1278_v22 = vmul.f32 %v7469_v20, %v7439_v7 }
  0x1f   : > { %v1861_v23 = vadd.f32 %v7533_v56, %v1587_v63  ;;  %v2361_v26 = vsel %vm1109_vm2, %v2359_v60, %v2360_v1  ;;  %v7558_v27 = vmul.f32 %v7473_v21, %v7424_v3  ;;  %v1629_v28 = vmul.f32 %v7477_v24, %v7439_v7 }
  0x20   : > { %v2635_v29 = vsel %vm1384_vm3, %v2633_v2, %v2634_v6  ;;  %v1113_v32 = vrot.slane %v1003_v17, 1  ;;  %v1388_v34 = vrot.slane %v1278_v22, 2  ;;  %v1903_v36 = vmul.f32 %v7481_v25, %v7439_v7 }
  0x21   : > { %v2135_v37 = vadd.f32 %v7540_v59, %v1861_v23  ;;  %v1738_v39 = vrot.slane %v1629_v28, 1  ;;  %v2176_v40 = vmul.f32 %v7521_v45, %v7492_v30  ;;  %v2253_v41 = vmul.f32 %v7525_v46, %v7545_v62 }
  0x22   : > { %v1114_v47 = vsel %vm1109_vm2, %v1111_v35, %v1113_v32  ;;  %v1389_v48 = vsel %vm1384_vm3, %v1386_v38, %v1388_v34  ;;  %v2012_v49 = vrot.slane %v1903_v36, 2  ;;  %v2527_v51 = vmul.f32 %v7514_v42, %v7545_v62 }
  0x23   : > { %v2211_v54 = vadd.f32 %v2175_v53, %v2135_v37  ;;  %v1237_v55 = vadd.f32 %v1114_v47, %v962_v16  ;;  %v7577_v57 = vsel %vm1109_vm2, %v1736_v50, %v1738_v39  ;;  %v2362_v58 = vrot.slane %v2253_v41, 1  ;;  %v7588_v53 = vld [vmem:[%s11870_s4] ss:$0 sm:$0xff] }
  0x24   : > { %v7580_v60 = vsel %vm1384_vm3, %v2010_v52, %v2012_v49  ;;  %v2636_v61 = vrot.slane %v2527_v51, 2  ;;  %v804_v63 = vrot.slane %v553_v43, 7  ;;  %v805_v2 = vrot.slane %v554_v44, 7 }
  0x25   : > { %12082 = vst [vmem:[#allocation5_spill] sm:$0xff] %v7580_v60  ;;  %v2485_v17 = vadd.f32 %v2361_v26, %v2211_v54  ;;  %v1512_v35 = vadd.f32 %v1389_v48, %v1237_v55  ;;  %v2363_v38 = vsel %vm1109_vm2, %v2360_v1, %v2362_v58  ;;  %v1630_v22 = vmul.f32 %v7477_v24, %v7495_v31 }
  0x26   : > { %v2637_v50 = vsel %vm1384_vm3, %v2634_v6, %v2636_v61  ;;  %v7592_v52 = vsel %vm794_vm1, %v804_v63, %v805_v2  ;;  %v7595_v16 = vsel %vm794_vm1, 0.0, %v804_v63  ;;  %v1631_v23 = vmul.f32 %v7477_v24, %v7492_v30 }
  0x27   : > { %v2759_v1 = vadd.f32 %v2635_v29, %v2485_v17  ;;  %v1588_v26 = vadd.f32 %v7558_v27, %v1512_v35  ;;  %v1740_v28 = vrot.slane %v1630_v22, 1  ;;  %v1904_v32 = vmul.f32 %v7481_v25, %v7495_v31 }
  0x28   : > { %v1741_v34 = vrot.slane %v1631_v23, 1  ;;  %v1905_v6 = vmul.f32 %v7481_v25, %v7492_v30  ;;  %v2177_v36 = vmul.f32 %v7521_v45, %v7595_v16  ;;  %v2254_v37 = vmul.f32 %v7525_v46, %v7595_v16 }
  0x29   : > { %v7609_v39 = vadd.f32 %v7588_v53, %v2759_v1  ;;  %v1862_v29 = vadd.f32 %v7577_v57, %v1588_v26  ;;  %v2014_v41 = vrot.slane %v1904_v32, 2  ;;  %v2255_v43 = vmul.f32 %v7525_v46, %v7592_v52 }
  0x2a   : > { %v1742_v44 = vsel %vm1109_vm2, %v1740_v28, %v1741_v34  ;;  %v2015_v47 = vrot.slane %v1905_v6, 2  ;;  %v2364_v48 = vrot.slane %v2254_v37, 1  ;;  %v2528_v49 = vmul.f32 %v7514_v42, %v7595_v16 }
  0x2b   : > { %v6486_v51 = vmul.f32 -1.442695, %v7609_v39  ;;  %v2136_v54 = vadd.f32 %v7580_v60, %v1862_v29  ;;  %v1863_v55 = vadd.f32 %v1742_v44, %v1589_v0  ;;  %v2365_v58 = vrot.slane %v2255_v43, 1  ;;  %v7638_v43 = vld [vmem:[%s7451_s26 + $0x28] sm:$0xff] }
  0x2c   : > { %v2016_v61 = vsel %vm1384_vm3, %v2014_v41, %v2015_v47  ;;  %v2529_v63 = vmul.f32 %v7514_v42, %v7592_v52  ;;  %v2638_v17 = vrot.slane %v2528_v49, 2  ;;  %v7623_v22 = vsel %vm794_vm1, %v805_v2, 0.0  ;;  %v555_v41 = vld [vmem:[%s7451_s26 + $0x20] sm:$0xff] }
  0x2d   : > { %6875 = vpow2.f32 %v6486_v51  ;;  %v2212_v23 = vadd.f32 %v2176_v40, %v2136_v54  ;;  %v2137_v1 = vadd.f32 %v2016_v61, %v1863_v55  ;;  %v2366_v26 = vsel %vm1109_vm2, %v2364_v48, %v2365_v58 }
  0x2e   : > { %v2639_v28 = vrot.slane %v2529_v63, 2  ;;  %v1554_v0 = vmul.f32 %v7473_v21, %v7492_v30  ;;  %v1632_v32 = vmul.f32 %v7477_v24, %v7545_v62  ;;  %v1906_v6 = vmul.f32 %v7481_v25, %v7545_v62 }
  0x2f   : > { %v2486_v37 = vadd.f32 %v2363_v38, %v2212_v23  ;;  %v2213_v29 = vadd.f32 %v2177_v36, %v2137_v1  ;;  %v2178_v2 = vmul.f32 %v7521_v45, %v7592_v52  ;;  %v2256_v40 = vmul.f32 %v7525_v46, %v7623_v22 }
  0x30   : > { %v2640_v44 = vsel %vm1384_vm3, %v2638_v17, %v2639_v28  ;;  %v1590_v48 = vadd.f32 %v1554_v0, %v1512_v35  ;;  %v1743_v49 = vrot.slane %v1632_v32, 1  ;;  %v2017_v51 = vrot.slane %v1906_v6, 2 }
  0x31   : > { %v2760_v54 = vadd.f32 %v2637_v50, %v2486_v37  ;;  %v2487_v55 = vadd.f32 %v2366_v26, %v2213_v29  ;;  %v2367_v61 = vrot.slane %v2256_v40, 1  ;;  %v2530_v38 = vmul.f32 %v7514_v42, %v7623_v22 }
  0x32   : > { %v1744_v36 = vsel %vm1109_vm2, %v1741_v34, %v1743_v49  ;;  %v2018_v63 = vsel %vm1384_vm3, %v2015_v47, %v2017_v51  ;;  %v807_v23 = vrot.slane %v555_v41, 7  ;;  %v808_v1 = vrot.slane %v7638_v43, 7 }
  0x33   : > { %v7647_v14 = vadd.f32 %v7588_v53, %v2760_v54  ;;  %v2761_v17 = vadd.f32 %v2640_v44, %v2487_v55  ;;  %v1864_v35 = vadd.f32 %v1744_v36, %v1590_v48  ;;  %v2368_v0 = vsel %vm1109_vm2, %v2365_v58, %v2367_v61 }
  0x34   : > { %v2641_v50 = vrot.slane %v2530_v38, 2  ;;  %v7651_v26 = vsel %vm794_vm1, %v807_v23, %v808_v1  ;;  %v7654_v32 = vsel %vm794_vm1, 0.0, %v807_v23  ;;  %v965_v34 = vmul.f32 %v7461_v18, %v7495_v31 }
  0x35   : > { %v6487_v47 = vmul.f32 -1.442695, %v7647_v14  ;;  %v7660_v6 = vadd.f32 %v7588_v53, %v2761_v17  ;;  %v2138_v37 = vadd.f32 %v2018_v63, %v1864_v35  ;;  %v1007_v29 = vmul.f32 %v7465_v19, %v7495_v31 }
  0x36   : > { %v2642_v58 = vsel %vm1384_vm3, %v2639_v28, %v2641_v50  ;;  %v7667_v40 = vmul.f32 %v7465_v19, %v7492_v30  ;;  %v1282_v41 = vmul.f32 %v7469_v20, %v7495_v31  ;;  %v7673_v43 = vmul.f32 %v7469_v20, %v7492_v30 }
  0x37   : > { %6877 = vpow2.f32 %v6487_v47  ;;  %v6488_v44 = vmul.f32 -1.442695, %v7660_v6  ;;  %v2214_v48 = vadd.f32 %v2178_v2, %v2138_v37  ;;  %v1120_v49 = vrot.slane %v1007_v29, 1 }
  0x38   : > { %v1121_v51 = vrot.slane %v7667_v40, 1  ;;  %v1395_v54 = vrot.slane %v1282_v41, 2  ;;  %v1396_v28 = vrot.slane %v7673_v43, 2  ;;  %v1555_v55 = vmul.f32 %v7473_v21, %v7595_v16 }
  0x39   : > { %6879 = vpow2.f32 %v6488_v44  ;;  %v2488_v61 = vadd.f32 %v2368_v0, %v2214_v48  ;;  %v1633_v31 = vmul.f32 %v7477_v24, %v7595_v16  ;;  %v1634_v38 = vmul.f32 %v7477_v24, %v7592_v52 }
  0x3a   : > { %v6876_v36 = vpop.eup %6875  ;;  %v1122_v2 = vsel %vm1109_vm2, %v1120_v49, %v1121_v51  ;;  %v1397_v63 = vsel %vm1384_vm3, %v1395_v54, %v1396_v28  ;;  %v1907_v23 = vmul.f32 %v7481_v25, %v7595_v16  ;;  %v1908_v17 = vmul.f32 %v7481_v25, %v7592_v52 }
  0x3b   : > { %v2946_v35 = vadd.f32 1.0, %v6876_v36  ;;  %v2762_v50 = vadd.f32 %v2642_v58, %v2488_v61  ;;  %v1240_v0 = vadd.f32 %v1122_v2, %v965_v34  ;;  %v1745_v47 = vrot.slane %v1633_v31, 1 }
  0x3c   : > { %v1746_v37 = vrot.slane %v1634_v38, 1  ;;  %v2019_v29 = vrot.slane %v1907_v23, 2  ;;  %v2020_v40 = vrot.slane %v1908_v17, 2  ;;  %v2179_v41 = vmul.f32 %v7521_v45, %v7654_v32 }
  0x3d   : > { %6881 = vrcp.f32 %v2946_v35  ;;  %v7693_v43 = vadd.f32 %v7588_v53, %v2762_v50  ;;  %v1515_v44 = vadd.f32 %v1397_v63, %v1240_v0  ;;  %v2257_v48 = vmul.f32 %v7525_v46, %v7654_v32 }
  0x3e   : > { %v1747_v49 = vsel %vm1109_vm2, %v1745_v47, %v1746_v37  ;;  %v2021_v58 = vsel %vm1384_vm3, %v2019_v29, %v2020_v40  ;;  %v2258_v34 = vmul.f32 %v7525_v46, %v7651_v26  ;;  %v2531_v54 = vmul.f32 %v7514_v42, %v7654_v32 }
  0x3f   : > { %v6489_v61 = vmul.f32 -1.442695, %v7693_v43  ;;  %v1591_v31 = vadd.f32 %v1555_v55, %v1515_v44  ;;  %v2369_v38 = vrot.slane %v2257_v48, 1  ;;  %v2532_v36 = vmul.f32 %v7514_v42, %v7651_v26 }
  0x40   : > { %v2370_v2 = vrot.slane %v2258_v34, 1  ;;  %v2643_v63 = vrot.slane %v2531_v54, 2  ;;  %v7707_v23 = vsel %vm794_vm1, %v808_v1, 0.0  ;;  %v966_v17 = vmul.f32 %v7461_v18, %v7492_v30 }
  0x41   : > { %6883 = vpow2.f32 %v6489_v61  ;;  %v1865_v35 = vadd.f32 %v1747_v49, %v1591_v31  ;;  %v2644_v50 = vrot.slane %v2532_v36, 2  ;;  %v1009_v0 = vmul.f32 %v7465_v19, %v7545_v62 }
  0x42   : > { %v2371_v55 = vsel %vm1109_vm2, %v2369_v38, %v2370_v2  ;;  %v1284_v47 = vmul.f32 %v7469_v20, %v7545_v62  ;;  %v1556_v1 = vmul.f32 %v7473_v21, %v7592_v52  ;;  %v1635_v29 = vmul.f32 %v7477_v24, %v7623_v22 }
  0x43   : > { %v2139_v30 = vadd.f32 %v2021_v58, %v1865_v35  ;;  %v2645_v44 = vsel %vm1384_vm3, %v2643_v63, %v2644_v50  ;;  %v1123_v48 = vrot.slane %v1009_v0, 1  ;;  %v1909_v49 = vmul.f32 %v7481_v25, %v7623_v22  ;;  %v557_v63 = vld [vmem:[%s7451_s26 + $0x30] sm:$0xff] }
  0x44   : > { %v6878_v34 = vpop.eup %6877  ;;  %v1398_v54 = vrot.slane %v1284_v47, 2  ;;  %v1748_v61 = vrot.slane %v1635_v29, 1  ;;  %v2180_v62 = vmul.f32 %v7521_v45, %v7651_v26  ;;  %v2259_v31 = vmul.f32 %v7525_v46, %v7707_v23  ;;  %v7732_v29 = vld [vmem:[%s7451_s26 + $0x38] sm:$0xff] }
  0x45   : > { %v2947_v38 = vadd.f32 1.0, %v6878_v34  ;;  %v2215_v36 = vadd.f32 %v2179_v41, %v2139_v30  ;;  %v1124_v58 = vsel %vm1109_vm2, %v1121_v51, %v1123_v48  ;;  %v2022_v35 = vrot.slane %v1909_v49, 2 }
  0x46   : > { %v6880_v0 = vpop.eup %6879  ;;  %v1241_v15 = vadd.f32 %v1124_v58, %v966_v17  ;;  %v1399_v11 = vsel %vm1384_vm3, %v1396_v28, %v1398_v54  ;;  %v1749_v13 = vsel %vm1109_vm2, %v1746_v37, %v1748_v61  ;;  %v2372_v47 = vrot.slane %v2259_v31, 1 }
  0x47   : > { %6885 = vrcp.f32 %v2947_v38  ;;  %v2948_v12 = vadd.f32 1.0, %v6880_v0  ;;  %v2489_v8 = vadd.f32 %v2371_v55, %v2215_v36  ;;  %v2023_v10 = vsel %vm1384_vm3, %v2020_v40, %v2022_v35 }
  0x48   : > { %v1516_v34 = vadd.f32 %v1399_v11, %v1241_v15  ;;  %v2373_v41 = vsel %vm1109_vm2, %v2370_v2, %v2372_v47  ;;  %v2533_v51 = vmul.f32 %v7514_v42, %v7707_v23  ;;  %v810_v30 = vrot.slane %v557_v63, 7 }
  0x49   : > { %6887 = vrcp.f32 %v2948_v12  ;;  %v2763_v17 = vadd.f32 %v2645_v44, %v2489_v8  ;;  %v811_v28 = vrot.slane %v7732_v29, 7  ;;  %v967_v37 = vmul.f32 %v7461_v18, %v7595_v16 }
  0x4a   : > { %v6882_v48 = vpop.eup %6881  ;;  %v1592_v49 = vadd.f32 %v1556_v1, %v1516_v34  ;;  %v2646_v54 = vrot.slane %v2533_v51, 2  ;;  %v7742_v55 = vsel %vm794_vm1, 0.0, %v810_v30  ;;  %v1010_v11 = vmul.f32 %v7465_v19, %v7595_v16 }
  0x4b   : > { %v3054_v15 = vmul.f32 %v6882_v48, %v7609_v39  ;;  %v7748_v40 = vadd.f32 %v7588_v53, %v2763_v17  ;;  %v7753_v8 = vsel %vm794_vm1, %v810_v30, %v811_v28  ;;  %v7757_v12 = vmul.f32 %v7465_v19, %v7592_v52 }
  0x4c   : > { %v1866_v2 = vadd.f32 %v1749_v13, %v1592_v49  ;;  %v2647_v1 = vsel %vm1384_vm3, %v2644_v50, %v2646_v54  ;;  %v1125_v44 = vrot.slane %v1010_v11, 1  ;;  %v1285_v61 = vmul.f32 %v7469_v20, %v7595_v16 }
  0x4d   : > { %6742 = vmatprep.mubr.msk.f32.mxu0 %vm3098_vm4, %v3054_v15  ;;  %v6490_v39 = vmul.f32 -1.442695, %v7748_v40  ;;  %v1126_v31 = vrot.slane %v7757_v12, 1  ;;  %v7767_v38 = vmul.f32 %v7469_v20, %v7592_v52  ;;  %v1557_v36 = vmul.f32 %v7473_v21, %v7654_v32 }
  0x4e   : > { %v6884_v13 = vpop.eup %6883  ;;  %v2140_v58 = vadd.f32 %v2023_v10, %v1866_v2  ;;  %v1400_v50 = vrot.slane %v1285_v61, 2  ;;  %v1636_v35 = vmul.f32 %v7477_v24, %v7654_v32  ;;  %v7775_v16 = vmul.f32 %v7477_v24, %v7651_v26 }
  0x4f   : > { %v2949_v63 = vadd.f32 1.0, %v6884_v13  ;;  %6889 = vpow2.f32 %v6490_v39  ;;  %v1127_v0 = vsel %vm1109_vm2, %v1125_v44, %v1126_v31  ;;  %v1401_v47 = vrot.slane %v7767_v38, 2 }
  0x50   : > { %v2216_v34 = vadd.f32 %v2180_v62, %v2140_v58  ;;  %v1242_v51 = vadd.f32 %v1127_v0, %v967_v37  ;;  %v1750_v30 = vrot.slane %v1636_v35, 1  ;;  %v1751_v10 = vrot.slane %v7775_v16, 1 }
  0x51   : > { %6891 = vrcp.f32 %v2949_v63  ;;  %v1402_v17 = vsel %vm1384_vm3, %v1400_v50, %v1401_v47  ;;  %v1910_v48 = vmul.f32 %v7481_v25, %v7654_v32  ;;  %v7787_v49 = vmul.f32 %v7481_v25, %v7651_v26 }
  0x52   : > { %v2490_v54 = vadd.f32 %v2373_v41, %v2216_v34  ;;  %v1517_v11 = vadd.f32 %v1402_v17, %v1242_v51  ;;  %v1752_v15 = vsel %vm1109_vm2, %v1750_v30, %v1751_v10  ;;  %v2181_v62 = vmul.f32 %v7521_v45, %v7742_v55 }
  0x53   : > { %v2024_v37 = vrot.slane %v1910_v48, 2  ;;  %v2025_v2 = vrot.slane %v7787_v49, 2  ;;  %v2260_v44 = vmul.f32 %v7525_v46, %v7742_v55  ;;  %v2261_v61 = vmul.f32 %v7525_v46, %v7753_v8 }
  0x54   : > { %v6886_v39 = vpop.eup %6885  ;;  %v2764_v38 = vadd.f32 %v2647_v1, %v2490_v54  ;;  %v1593_v13 = vadd.f32 %v1557_v36, %v1517_v11  ;;  %v2534_v41 = vmul.f32 %v7514_v42, %v7742_v55  ;;  %v2535_v58 = vmul.f32 %v7514_v42, %v7753_v8 }
  0x55   : > { %v3055_v50 = vmul.f32 %v6886_v39, %v7647_v14  ;;  %v2026_v35 = vsel %vm1384_vm3, %v2024_v37, %v2025_v2  ;;  %v2374_v16 = vrot.slane %v2260_v44, 1  ;;  %v2375_v63 = vrot.slane %v2261_v61, 1  ;;  %v559_v61 = vld [vmem:[%s7451_s26 + $0x40] sm:$0xff] }
  0x56   : > { %v6888_v0 = vpop.eup %6887  ;;  %v7804_v34 = vadd.f32 %v7588_v53, %v2764_v38  ;;  %v1867_v51 = vadd.f32 %v1752_v15, %v1593_v13  ;;  %v2648_v30 = vrot.slane %v2534_v41, 2  ;;  %v2649_v1 = vrot.slane %v2535_v58, 2 }
  0x57   : > { %6743 = vmatmul.mubr.msk.f32.vlgmr.msra.gmra.mxu0 %vm3098_vm4, %v3055_v50  ;;  %v3056_v36 = vmul.f32 %v6888_v0, %v7660_v6  ;;  %v2376_v17 = vsel %vm1109_vm2, %v2374_v16, %v2375_v63  ;;  %v7812_v14 = vsel %vm794_vm1, %v811_v28, 0.0  ;;  %v968_v54 = vmul.f32 %v7461_v18, %v7592_v52  ;;  %v7840_v16 = vld [vmem:[%s7451_s26 + $0x48] sm:$0xff] }
  0x58   : > { %v6491_v48 = vmul.f32 -1.442695, %v7804_v34  ;;  %v2141_v49 = vadd.f32 %v2026_v35, %v1867_v51  ;;  %v1012_v11 = vmul.f32 %v7465_v19, %v7623_v22  ;;  %v2650_v6 = vsel %vm1384_vm3, %v2648_v30, %v2649_v1 }
  0x59   : > { %6745 = vmatprep.mubr.msk.f32.mxu0 %vm3098_vm4, %v3056_v36  ;;  %v1287_v15 = vmul.f32 %v7469_v20, %v7623_v22  ;;  %v1638_v29 = vmul.f32 %v7477_v24, %v7707_v23  ;;  %v1912_v28 = vmul.f32 %v7481_v25, %v7707_v23  ;;  %v1558_v44 = vmul.f32 %v7473_v21, %v7651_v26 }
  0x5a   : > { %6893 = vpow2.f32 %v6491_v48  ;;  %v2217_v37 = vadd.f32 %v2181_v62, %v2141_v49  ;;  %v1128_v52 = vrot.slane %v1012_v11, 1  ;;  %v2182_v13 = vmul.f32 %v7521_v45, %v7753_v8 }
  0x5b   : > { %v1403_v39 = vrot.slane %v1287_v15, 2  ;;  %v1753_v38 = vrot.slane %v1638_v29, 1  ;;  %v2262_v22 = vmul.f32 %v7525_v46, %v7812_v14  ;;  %v2027_v62 = vrot.slane %v1912_v28, 2 }
  0x5c   : > { %v6890_v41 = vpop.eup %6889  ;;  %v2491_v58 = vadd.f32 %v2376_v17, %v2217_v37  ;;  %v1129_v50 = vsel %vm1109_vm2, %v1126_v31, %v1128_v52  ;;  %v2536_v35 = vmul.f32 %v7514_v42, %v7812_v14  ;;  %v813_v36 = vrot.slane %v559_v61, 7 }
  0x5d   : > { %v2950_v0 = vadd.f32 1.0, %v6890_v41  ;;  %v1243_v51 = vadd.f32 %v1129_v50, %v968_v54  ;;  %v1404_v30 = vsel %vm1384_vm3, %v1401_v47, %v1403_v39  ;;  %v1754_v11 = vsel %vm1109_vm2, %v1751_v10, %v1753_v38 }
  0x5e   : > { %v6892_v48 = vpop.eup %6891  ;;  %v2765_v49 = vadd.f32 %v2650_v6, %v2491_v58  ;;  %v2377_v17 = vrot.slane %v2262_v22, 1  ;;  %v2651_v15 = vrot.slane %v2536_v35, 2  ;;  %v814_v29 = vrot.slane %v7840_v16, 7 }
  0x5f   : > { %v3057_v12 = vmul.f32 %v6892_v48, %v7693_v43  ;;  %6895 = vrcp.f32 %v2950_v0  ;;  %v1518_v31 = vadd.f32 %v1404_v30, %v1243_v51  ;;  %v2028_v54 = vsel %vm1384_vm3, %v2025_v2, %v2027_v62 }
  0x60   : > { %v7847_v28 = vadd.f32 %v7588_v53, %v2765_v49  ;;  %v2378_v47 = vsel %vm1109_vm2, %v2375_v63, %v2377_v17  ;;  %v2652_v37 = vsel %vm1384_vm3, %v2649_v1, %v2651_v15  ;;  %v7854_v6 = vsel %vm794_vm1, %v813_v36, %v814_v29 }
  0x61   : > { %6746 = vmatmul.mubr.msk.f32.gmra.mxu0 %vm3098_vm4, %v3057_v12  ;;  %v1594_v10 = vadd.f32 %v1558_v44, %v1518_v31  ;;  %v7857_v43 = vsel %vm794_vm1, 0.0, %v813_v36  ;;  %v1013_v52 = vmul.f32 %v7465_v19, %v7654_v32  ;;  %v1014_v2 = vmul.f32 %v7465_v19, %v7651_v26 }
  0x62   : > { %v6492_v61 = vmul.f32 -1.442695, %v7847_v28  ;;  %v1288_v63 = vmul.f32 %v7469_v20, %v7654_v32  ;;  %v7868_v1 = vmul.f32 %v7469_v20, %v7651_v26  ;;  %v969_v39 = vmul.f32 %v7461_v18, %v7654_v32 }
  0x63   : > { %v1868_v44 = vadd.f32 %v1754_v11, %v1594_v10  ;;  %v1130_v38 = vrot.slane %v1013_v52, 1  ;;  %v1639_v22 = vmul.f32 %v7477_v24, %v7742_v55  ;;  %v1131_v41 = vrot.slane %v1014_v2, 1 }
  0x64   : > { %6897 = vpow2.f32 %v6492_v61  ;;  %v1405_v58 = vrot.slane %v1288_v63, 2  ;;  %v1406_v50 = vrot.slane %v7868_v1, 2  ;;  %v1559_v35 = vmul.f32 %v7473_v21, %v7742_v55 }
  0x65   : > { %v2142_v62 = vadd.f32 %v2028_v54, %v1868_v44  ;;  %v7879_v16 = vmul.f32 %v7477_v24, %v7753_v8  ;;  %v1913_v32 = vmul.f32 %v7481_v25, %v7742_v55  ;;  %v1132_v0 = vsel %vm1109_vm2, %v1130_v38, %v1131_v41 }
  0x66   : > { %v1407_v51 = vsel %vm1384_vm3, %v1405_v58, %v1406_v50  ;;  %v1755_v30 = vrot.slane %v1639_v22, 1  ;;  %v7887_v36 = vmul.f32 %v7481_v25, %v7753_v8  ;;  %v1244_v11 = vadd.f32 %v1132_v0, %v969_v39 }
  0x67   : > { %v6894_v48 = vpop.eup %6893  ;;  %v2218_v49 = vadd.f32 %v2182_v13, %v2142_v62  ;;  %v1756_v17 = vrot.slane %v7879_v16, 1  ;;  %v2029_v15 = vrot.slane %v1913_v32, 2  ;;  %v2263_v54 = vmul.f32 %v7525_v46, %v7857_v43 }
  0x68   : > { %v2951_v12 = vadd.f32 1.0, %v6894_v48  ;;  %v2030_v31 = vrot.slane %v7887_v36, 2  ;;  %v2264_v10 = vmul.f32 %v7525_v46, %v7854_v6  ;;  %v1519_v61 = vadd.f32 %v1407_v51, %v1244_v11 }
  0x69   : > { %v2492_v52 = vadd.f32 %v2378_v47, %v2218_v49  ;;  %v2183_v2 = vmul.f32 %v7521_v45, %v7857_v43  ;;  %v2537_v13 = vmul.f32 %v7514_v42, %v7857_v43  ;;  %v1757_v63 = vsel %vm1109_vm2, %v1755_v30, %v1756_v17 }
  0x6a   : > { %6899 = vrcp.f32 %v2951_v12  ;;  %v2379_v1 = vrot.slane %v2263_v54, 1  ;;  %v2380_v44 = vrot.slane %v2264_v10, 1  ;;  %v1595_v38 = vadd.f32 %v1559_v35, %v1519_v61 }
  0x6b   : > { %v2766_v39 = vadd.f32 %v2652_v37, %v2492_v52  ;;  %v2031_v22 = vsel %vm1384_vm3, %v2029_v15, %v2030_v31  ;;  %v2538_v58 = vmul.f32 %v7514_v42, %v7854_v6  ;;  %v2653_v16 = vrot.slane %v2537_v13, 2 }
  0x6c   : > { %v6896_v47 = vpop.eup %6895  ;;  %v2381_v62 = vsel %vm1109_vm2, %v2379_v1, %v2380_v44  ;;  %v970_v32 = vmul.f32 %v7461_v18, %v7651_v26  ;;  %v1015_v0 = vmul.f32 %v7465_v19, %v7707_v23  ;;  %v1869_v35 = vadd.f32 %v1757_v63, %v1595_v38  ;;  %v561_v1 = vld [vmem:[%s7451_s26 + $0x50] sm:$0xff] }
  0x6d   : > { %v3058_v51 = vmul.f32 %v6896_v47, %v7748_v40  ;;  %v7910_v37 = vadd.f32 %v7588_v53, %v2766_v39  ;;  %v2654_v30 = vrot.slane %v2538_v58, 2  ;;  %v7913_v36 = vsel %vm794_vm1, %v814_v29, 0.0  ;;  %v7929_v39 = vld [vmem:[%s7451_s26 + $0x58] sm:$0xff] }
  0x6e   : > { %v1133_v48 = vrot.slane %v1015_v0, 1  ;;  %v1290_v49 = vmul.f32 %v7469_v20, %v7707_v23  ;;  %v1641_v26 = vmul.f32 %v7477_v24, %v7812_v14  ;;  %v2143_v11 = vadd.f32 %v2031_v22, %v1869_v35 }
  0x6f   : > { %6748 = vmatprep.mubr.msk.f32.mxu0 %vm3098_vm4, %v3058_v51  ;;  %v6493_v40 = vmul.f32 -1.442695, %v7910_v37  ;;  %v1560_v15 = vmul.f32 %v7473_v21, %v7753_v8  ;;  %v1915_v29 = vmul.f32 %v7481_v25, %v7812_v14  ;;  %v2655_v12 = vsel %vm1384_vm3, %v2653_v16, %v2654_v30 }
  0x70   : > { %v1134_v23 = vsel %vm1109_vm2, %v1131_v41, %v1133_v48  ;;  %v1408_v54 = vrot.slane %v1290_v49, 2  ;;  %v1758_v10 = vrot.slane %v1641_v26, 1  ;;  %v2219_v61 = vadd.f32 %v2183_v2, %v2143_v11 }
  0x71   : > { %v6898_v52 = vpop.eup %6897  ;;  %6901 = vpow2.f32 %v6493_v40  ;;  %v1245_v13 = vadd.f32 %v1134_v23, %v970_v32  ;;  %v2032_v63 = vrot.slane %v1915_v29, 2  ;;  %v2184_v58 = vmul.f32 %v7521_v45, %v7854_v6 }
  0x72   : > { %v2952_v38 = vadd.f32 1.0, %v6898_v52  ;;  %v1409_v22 = vsel %vm1384_vm3, %v1406_v50, %v1408_v54  ;;  %v2265_v47 = vmul.f32 %v7525_v46, %v7913_v36  ;;  %v2493_v41 = vadd.f32 %v2381_v62, %v2219_v61 }
  0x73   : > { %v1520_v16 = vadd.f32 %v1409_v22, %v1245_v13  ;;  %v1759_v0 = vsel %vm1109_vm2, %v1756_v17, %v1758_v10  ;;  %v2539_v2 = vmul.f32 %v7514_v42, %v7913_v36  ;;  %v816_v51 = vrot.slane %v561_v1, 7 }
  0x74   : > { %6903 = vrcp.f32 %v2952_v38  ;;  %v2382_v32 = vrot.slane %v2265_v47, 1  ;;  %v817_v35 = vrot.slane %v7929_v39, 7  ;;  %v2767_v48 = vadd.f32 %v2655_v12, %v2493_v41 }
  0x75   : > { %v1596_v50 = vadd.f32 %v1560_v15, %v1520_v16  ;;  %v2033_v49 = vsel %vm1384_vm3, %v2030_v31, %v2032_v63  ;;  %v2656_v26 = vrot.slane %v2539_v2, 2  ;;  %v971_v17 = vmul.f32 %v7461_v18, %v7742_v55 }
  0x76   : > { %v2383_v40 = vsel %vm1109_vm2, %v2380_v44, %v2382_v32  ;;  %v7945_v62 = vsel %vm794_vm1, %v816_v51, %v817_v35  ;;  %v1016_v11 = vmul.f32 %v7465_v19, %v7742_v55  ;;  %v7952_v12 = vadd.f32 %v7588_v53, %v2767_v48 }
  0x77   : > { %v6900_v29 = vpop.eup %6899  ;;  %v1870_v15 = vadd.f32 %v1759_v0, %v1596_v50  ;;  %v2657_v31 = vsel %vm1384_vm3, %v2654_v30, %v2656_v26  ;;  %v7957_v44 = vmul.f32 %v7465_v19, %v7753_v8  ;;  %v1291_v10 = vmul.f32 %v7469_v20, %v7742_v55 }
  0x78   : > { %v3059_v23 = vmul.f32 %v6900_v29, %v7804_v34  ;;  %v1135_v54 = vrot.slane %v1016_v11, 1  ;;  %v7964_v52 = vmul.f32 %v7469_v20, %v7753_v8  ;;  %v6494_v61 = vmul.f32 -1.442695, %v7952_v12 }
  0x79   : > { %v2144_v13 = vadd.f32 %v2033_v49, %v1870_v15  ;;  %v1136_v63 = vrot.slane %v7957_v44, 1  ;;  %v1561_v30 = vmul.f32 %v7473_v21, %v7857_v43  ;;  %v1410_v1 = vrot.slane %v1291_v10, 2 }
  0x7a   : > { %6749 = vmatmul.mubr.msk.f32.gmra.mxu0 %vm3098_vm4, %v3059_v23  ;;  %v1411_v34 = vrot.slane %v7964_v52, 2  ;;  %v1642_v55 = vmul.f32 %v7477_v24, %v7857_v43  ;;  %v7976_v38 = vmul.f32 %v7477_v24, %v7854_v6  ;;  %6905 = vpow2.f32 %v6494_v61 }
  0x7b   : > { %v2220_v22 = vadd.f32 %v2184_v58, %v2144_v13  ;;  %v1137_v47 = vsel %vm1109_vm2, %v1135_v54, %v1136_v63  ;;  %v1916_v41 = vmul.f32 %v7481_v25, %v7857_v43  ;;  %v7986_v50 = vsel %vm794_vm1, 0.0, %v816_v51 }
  0x7c   : > { %v1246_v16 = vadd.f32 %v1137_v47, %v971_v17  ;;  %v1412_v0 = vsel %vm1384_vm3, %v1410_v1, %v1411_v34  ;;  %v1760_v2 = vrot.slane %v1642_v55, 1  ;;  %v1761_v32 = vrot.slane %v7976_v38, 1 }
  0x7d   : > { %v2494_v48 = vadd.f32 %v2383_v40, %v2220_v22  ;;  %v1917_v58 = vmul.f32 %v7481_v25, %v7854_v6  ;;  %v2034_v49 = vrot.slane %v1916_v41, 2  ;;  %v2266_v17 = vmul.f32 %v7525_v46, %v7986_v50 }
  0x7e   : > { %v6902_v26 = vpop.eup %6901  ;;  %v1521_v11 = vadd.f32 %v1412_v0, %v1246_v16  ;;  %v1762_v29 = vsel %vm1109_vm2, %v1760_v2, %v1761_v32  ;;  %v2267_v15 = vmul.f32 %v7525_v46, %v7945_v62  ;;  %v2540_v51 = vmul.f32 %v7514_v42, %v7986_v50 }
  0x7f   : > { %v2953_v44 = vadd.f32 1.0, %v6902_v26  ;;  %v2768_v23 = vadd.f32 %v2657_v31, %v2494_v48  ;;  %v2035_v40 = vrot.slane %v1917_v58, 2  ;;  %v2384_v10 = vrot.slane %v2266_v17, 1 }
  0x80   : > { %v1597_v54 = vadd.f32 %v1561_v30, %v1521_v11  ;;  %v2385_v61 = vrot.slane %v2267_v15, 1  ;;  %v2541_v13 = vmul.f32 %v7514_v42, %v7945_v62  ;;  %v2658_v22 = vrot.slane %v2540_v51, 2 }
  0x81   : > { %v6904_v1 = vpop.eup %6903  ;;  %6907 = vrcp.f32 %v2953_v44  ;;  %v8000_v55 = vadd.f32 %v7588_v53, %v2768_v23  ;;  %v2036_v38 = vsel %vm1384_vm3, %v2034_v49, %v2035_v40  ;;  %v2185_v41 = vmul.f32 %v7521_v45, %v7986_v50 }
  0x82   : > { %v3060_v31 = vmul.f32 %v6904_v1, %v7847_v28  ;;  %v1871_v47 = vadd.f32 %v1762_v29, %v1597_v54  ;;  %v2659_v30 = vrot.slane %v2541_v13, 2  ;;  %v2386_v0 = vsel %vm1109_vm2, %v2384_v10, %v2385_v61  ;;  %v563_v54 = vld [vmem:[%s7451_s26 + $0x60] sm:$0xff] }
  0x83   : > { %v6495_v16 = vmul.f32 -1.442695, %v8000_v55  ;;  %v8011_v2 = vsel %vm794_vm1, %v817_v35, 0.0  ;;  %v1018_v48 = vmul.f32 %v7465_v19, %v7812_v14  ;;  %v972_v49 = vmul.f32 %v7461_v18, %v7753_v8 }
  0x84   : > { %6751 = vmatprep.mubr.msk.f32.mxu0 %vm3098_vm4, %v3060_v31  ;;  %v2145_v28 = vadd.f32 %v2036_v38, %v1871_v47  ;;  %v2660_v58 = vsel %vm1384_vm3, %v2658_v22, %v2659_v30  ;;  %v1293_v26 = vmul.f32 %v7469_v20, %v7812_v14  ;;  %v1644_v35 = vmul.f32 %v7477_v24, %v7913_v36  ;;  %v8037_v31 = vld [vmem:[%s7451_s26 + $0x68] sm:$0xff] }
  0x85   : > { %6909 = vpow2.f32 %v6495_v16  ;;  %v1138_v39 = vrot.slane %v1018_v48, 1  ;;  %v1918_v11 = vmul.f32 %v7481_v25, %v7913_v36  ;;  %v1562_v15 = vmul.f32 %v7473_v21, %v7854_v6 }
  0x86   : > { %v2221_v29 = vadd.f32 %v2185_v41, %v2145_v28  ;;  %v1413_v17 = vrot.slane %v1293_v26, 2  ;;  %v2268_v8 = vmul.f32 %v7525_v46, %v8011_v2  ;;  %v1763_v14 = vrot.slane %v1644_v35, 1 }
  0x87   : > { %v1139_v44 = vsel %vm1109_vm2, %v1136_v63, %v1138_v39  ;;  %v2037_v23 = vrot.slane %v1918_v11, 2  ;;  %v2542_v51 = vmul.f32 %v7514_v42, %v8011_v2  ;;  %v6906_v10 = vpop.eup %6905  ;;  %v2186_v63 = vmul.f32 %v7521_v45, %v7945_v62 }
  0x88   : > { %v2495_v13 = vadd.f32 %v2386_v0, %v2221_v29  ;;  %v1247_v1 = vadd.f32 %v1139_v44, %v972_v49  ;;  %v1414_v38 = vsel %vm1384_vm3, %v1411_v34, %v1413_v17  ;;  %v2387_v22 = vrot.slane %v2268_v8, 1 }
  0x89   : > { %v2954_v47 = vadd.f32 1.0, %v6906_v10  ;;  %v1764_v41 = vsel %vm1109_vm2, %v1761_v32, %v1763_v14  ;;  %v2661_v16 = vrot.slane %v2542_v51, 2  ;;  %v2038_v28 = vsel %vm1384_vm3, %v2035_v40, %v2037_v23 }
  0x8a   : > { %v2769_v48 = vadd.f32 %v2660_v58, %v2495_v13  ;;  %v1522_v42 = vadd.f32 %v1414_v38, %v1247_v1  ;;  %v819_v0 = vrot.slane %v563_v54, 7  ;;  %v2388_v52 = vsel %vm1109_vm2, %v2385_v61, %v2387_v22 }
  0x8b   : > { %6911 = vrcp.f32 %v2954_v47  ;;  %v2662_v34 = vsel %vm1384_vm3, %v2659_v30, %v2661_v16  ;;  %v820_v49 = vrot.slane %v8037_v31, 7  ;;  %v973_v39 = vmul.f32 %v7461_v18, %v7857_v43 }
  0x8c   : > { %v8047_v26 = vadd.f32 %v7588_v53, %v2769_v48  ;;  %v1598_v32 = vadd.f32 %v1562_v15, %v1522_v42  ;;  %v1019_v58 = vmul.f32 %v7465_v19, %v7857_v43  ;;  %v8054_v40 = vsel %vm794_vm1, 0.0, %v819_v0 }
  0x8d   : > { %v8058_v61 = vmul.f32 %v7465_v19, %v7854_v6  ;;  %v1294_v30 = vmul.f32 %v7469_v20, %v7857_v43  ;;  %v8064_v35 = vmul.f32 %v7469_v20, %v7854_v6  ;;  %v1563_v8 = vmul.f32 %v7473_v21, %v7986_v50 }
  0x8e   : > { %v6908_v11 = vpop.eup %6907  ;;  %v6496_v29 = vmul.f32 -1.442695, %v8047_v26  ;;  %v1872_v17 = vadd.f32 %v1764_v41, %v1598_v32  ;;  %v1140_v15 = vrot.slane %v1019_v58, 1  ;;  %v1645_v54 = vmul.f32 %v7477_v24, %v7986_v50 }
  0x8f   : > { %v3061_v44 = vmul.f32 %v6908_v11, %v7910_v37  ;;  %v1141_v14 = vrot.slane %v8058_v61, 1  ;;  %v1415_v23 = vrot.slane %v1294_v30, 2  ;;  %v1416_v51 = vrot.slane %v8064_v35, 2 }
  0x90   : > { %6913 = vpow2.f32 %v6496_v29  ;;  %v2146_v43 = vadd.f32 %v2038_v28, %v1872_v17  ;;  %v8076_v10 = vmul.f32 %v7477_v24, %v7945_v62  ;;  %v1919_v1 = vmul.f32 %v7481_v25, %v7986_v50 }
  0x91   : > { %6752 = vmatmul.mubr.msk.f32.gmra.mxu0 %vm3098_vm4, %v3061_v44  ;;  %v1142_v13 = vsel %vm1109_vm2, %v1140_v15, %v1141_v14  ;;  %v1417_v37 = vsel %vm1384_vm3, %v1415_v23, %v1416_v51  ;;  %v8085_v38 = vmul.f32 %v7481_v25, %v7945_v62  ;;  %v1765_v41 = vrot.slane %v1645_v54, 1 }
  0x92   : > { %v6910_v22 = vpop.eup %6909  ;;  %v2222_v31 = vadd.f32 %v2186_v63, %v2146_v43  ;;  %v1248_v47 = vadd.f32 %v1142_v13, %v973_v39  ;;  %v1766_v16 = vrot.slane %v8076_v10, 1  ;;  %v8089_v42 = vsel %vm794_vm1, %v819_v0, %v820_v49  ;;  %v8102_v0 = vld [vmem:[%s11869_s3 + $0x8] ss:$0 sm:$0xff] }
  0x93   : > { %v2955_v48 = vadd.f32 1.0, %v6910_v22  ;;  %v2039_v28 = vrot.slane %v1919_v1, 2  ;;  %v2040_v32 = vrot.slane %v8085_v38, 2  ;;  %v2187_v30 = vmul.f32 %v7521_v45, %v8054_v40 }
  0x94   : > { %v2496_v58 = vadd.f32 %v2388_v52, %v2222_v31  ;;  %v1523_v61 = vadd.f32 %v1417_v37, %v1248_v47  ;;  %v2269_v35 = vmul.f32 %v7525_v46, %v8054_v40  ;;  %v1767_v63 = vsel %vm1109_vm2, %v1765_v41, %v1766_v16 }
  0x95   : > { %6915 = vrcp.f32 %v2955_v48  ;;  %v2270_v39 = vmul.f32 %v7525_v46, %v8089_v42  ;;  %v2543_v52 = vmul.f32 %v8102_v0, %v8054_v40  ;;  %v2544_v15 = vmul.f32 %v8102_v0, %v8089_v42 }
  0x96   : > { %v2770_v11 = vadd.f32 %v2662_v34, %v2496_v58  ;;  %v1599_v29 = vadd.f32 %v1563_v8, %v1523_v61  ;;  %v2389_v17 = vrot.slane %v2269_v35, 1  ;;  %v2041_v44 = vsel %vm1384_vm3, %v2039_v28, %v2040_v32  ;;  %v565_v35 = vld [vmem:[%s7451_s26 + $0x70] sm:$0xff] }
  0x97   : > { %v2390_v23 = vrot.slane %v2270_v39, 1  ;;  %v2663_v43 = vrot.slane %v2543_v52, 2  ;;  %v8110_v54 = vsel %vm794_vm1, %v820_v49, 0.0  ;;  %v2664_v1 = vrot.slane %v2544_v15, 2 }
  0x98   : > { %v6912_v10 = vpop.eup %6911  ;;  %v8113_v13 = vadd.f32 %v7588_v53, %v2770_v11  ;;  %v1873_v37 = vadd.f32 %v1767_v63, %v1599_v29  ;;  %v1021_v34 = vmul.f32 %v7465_v19, %v7913_v36  ;;  %v974_v22 = vmul.f32 %v7461_v18, %v7854_v6 }
  0x99   : > { %v3062_v8 = vmul.f32 %v6912_v10, %v7952_v12  ;;  %v2391_v38 = vsel %vm1109_vm2, %v2389_v17, %v2390_v23  ;;  %v1296_v49 = vmul.f32 %v7469_v20, %v7913_v36  ;;  %v1564_v41 = vmul.f32 %v7473_v21, %v7945_v62  ;;  %v8140_v10 = vld [vmem:[%s7451_s26 + $0x78] sm:$0xff] }
  0x9a   : > { %v6497_v31 = vmul.f32 -1.442695, %v8113_v13  ;;  %v2147_v53 = vadd.f32 %v2041_v44, %v1873_v37  ;;  %v1143_v47 = vrot.slane %v1021_v34, 1  ;;  %v2665_v12 = vsel %vm1384_vm3, %v2663_v43, %v2664_v1 }
  0x9b   : > { %6754 = vmatprep.mubr.msk.f32.mxu0 %vm3098_vm4, %v3062_v8  ;;  %v1418_v48 = vrot.slane %v1296_v49, 2  ;;  %v1647_v28 = vmul.f32 %v7477_v24, %v8011_v2  ;;  %v1921_v6 = vmul.f32 %v7481_v25, %v8011_v2  ;;  %v2271_v61 = vmul.f32 %v7525_v46, %v8110_v54 }
  0x9c   : > { %6917 = vpow2.f32 %v6497_v31  ;;  %v2223_v36 = vadd.f32 %v2187_v30, %v2147_v53  ;;  %v1144_v58 = vsel %vm1109_vm2, %v1141_v14, %v1143_v47  ;;  %v2545_v43 = vmul.f32 %v8102_v0, %v8110_v54 }
  0x9d   : > { %v6914_v63 = vpop.eup %6913  ;;  %v1249_v39 = vadd.f32 %v1144_v58, %v974_v22  ;;  %v1419_v52 = vsel %vm1384_vm3, %v1416_v51, %v1418_v48  ;;  %v1768_v11 = vrot.slane %v1647_v28, 1  ;;  %v2042_v29 = vrot.slane %v1921_v6, 2 }
  0x9e   : > { %v2956_v17 = vadd.f32 1.0, %v6914_v63  ;;  %v2497_v15 = vadd.f32 %v2391_v38, %v2223_v36  ;;  %v2392_v44 = vrot.slane %v2271_v61, 1  ;;  %v2188_v37 = vmul.f32 %v7521_v45, %v8089_v42 }
  0x9f   : > { %v1524_v30 = vadd.f32 %v1419_v52, %v1249_v39  ;;  %v1769_v14 = vsel %vm1109_vm2, %v1766_v16, %v1768_v11  ;;  %v822_v34 = vrot.slane %v565_v35, 7  ;;  %v2043_v51 = vsel %vm1384_vm3, %v2040_v32, %v2042_v29  ;;  %v8154_v16 = vld [vmem:[%s11870_s4] ss:$0 sm:$0xff] }
  0xa0   : > { %6919 = vrcp.f32 %v2956_v17  ;;  %v2771_v8 = vadd.f32 %v2665_v12, %v2497_v15  ;;  %v2666_v22 = vrot.slane %v2545_v43, 2  ;;  %v2393_v38 = vsel %vm1109_vm2, %v2390_v23, %v2392_v44 }
  0xa1   : > { %v1600_v49 = vadd.f32 %v1564_v41, %v1524_v30  ;;  %v823_v31 = vrot.slane %v8140_v10, 7  ;;  %v8149_v53 = vsel %vm794_vm1, 0.0, %v822_v34  ;;  %v975_v32 = vmul.f32 %v7461_v18, %v7986_v50 }
  0xa2   : > { %v6916_v47 = vpop.eup %6915  ;;  %v8157_v48 = vadd.f32 %v8154_v16, %v2771_v8  ;;  %v1022_v23 = vmul.f32 %v7465_v19, %v7986_v50  ;;  %v8165_v41 = vmul.f32 %v7465_v19, %v7945_v62  ;;  %v2667_v6 = vsel %vm1384_vm3, %v2664_v1, %v2666_v22 }
  0xa3   : > { %v3063_v12 = vmul.f32 %v6916_v47, %v8000_v55  ;;  %v1874_v28 = vadd.f32 %v1769_v14, %v1600_v49  ;;  %v1297_v36 = vmul.f32 %v7469_v20, %v7986_v50  ;;  %v8175_v63 = vmul.f32 %v7469_v20, %v7945_v62 }
  0xa4   : > { %v6498_v58 = vmul.f32 -1.442695, %v8157_v48  ;;  %v1145_v61 = vrot.slane %v1022_v23, 1  ;;  %v1146_v35 = vrot.slane %v8165_v41, 1  ;;  %v1565_v55 = vmul.f32 %v7473_v21, %v8054_v40 }
  0xa5   : > { %6755 = vmatmul.mubr.msk.f32.gmra.mxu0 %vm3098_vm4, %v3063_v12  ;;  %v2148_v39 = vadd.f32 %v2043_v51, %v1874_v28  ;;  %v1420_v52 = vrot.slane %v1297_v36, 2  ;;  %v1648_v1 = vmul.f32 %v7477_v24, %v8054_v40  ;;  %v1421_v11 = vrot.slane %v8175_v63, 2 }
  0xa6   : > { %6921 = vpow2.f32 %v6498_v58  ;;  %v1147_v50 = vsel %vm1109_vm2, %v1145_v61, %v1146_v35  ;;  %v8188_v29 = vmul.f32 %v7477_v24, %v8089_v42  ;;  %v1922_v43 = vmul.f32 %v7481_v25, %v8054_v40 }
  0xa7   : > { %v2224_v17 = vadd.f32 %v2188_v37, %v2148_v39  ;;  %v1250_v15 = vadd.f32 %v1147_v50, %v975_v32  ;;  %v1770_v44 = vrot.slane %v1648_v1, 1  ;;  %v8193_v10 = vsel %vm794_vm1, %v822_v34, %v823_v31 }
  0xa8   : > { %v1422_v30 = vsel %vm1384_vm3, %v1420_v52, %v1421_v11  ;;  %v1771_v14 = vrot.slane %v8188_v29, 1  ;;  %v8199_v8 = vmul.f32 %v7481_v25, %v8089_v42  ;;  %v2044_v37 = vrot.slane %v1922_v43, 2 }
  0xa9   : > { %v6918_v51 = vpop.eup %6917  ;;  %v2498_v22 = vadd.f32 %v2393_v38, %v2224_v17  ;;  %v1525_v49 = vadd.f32 %v1422_v30, %v1250_v15  ;;  %v2272_v47 = vmul.f32 %v7525_v46, %v8149_v53  ;;  %v2273_v12 = vmul.f32 %v7525_v46, %v8193_v10 }
  0xaa   : > { %v2957_v32 = vadd.f32 1.0, %v6918_v51  ;;  %v1772_v23 = vsel %vm1109_vm2, %v1770_v44, %v1771_v14  ;;  %v2045_v34 = vrot.slane %v8199_v8, 2  ;;  %v2546_v61 = vmul.f32 %v8102_v0, %v8149_v53 }
  0xab   : > { %v2772_v28 = vadd.f32 %v2667_v6, %v2498_v22  ;;  %v1601_v36 = vadd.f32 %v1565_v55, %v1525_v49  ;;  %v2394_v58 = vrot.slane %v2272_v47, 1  ;;  %v2395_v63 = vrot.slane %v2273_v12, 1 }
  0xac   : > { %6923 = vrcp.f32 %v2957_v32  ;;  %v2046_v38 = vsel %vm1384_vm3, %v2044_v37, %v2045_v34  ;;  %v2547_v39 = vmul.f32 %v8102_v0, %v8193_v10  ;;  %v2189_v6 = vmul.f32 %v7521_v45, %v8149_v53 }
  0xad   : > { %v6920_v52 = vpop.eup %6919  ;;  %v8213_v1 = vadd.f32 %v8154_v16, %v2772_v28  ;;  %v1875_v50 = vadd.f32 %v1772_v23, %v1601_v36  ;;  %v2668_v55 = vrot.slane %v2546_v61, 2  ;;  %v2396_v17 = vsel %vm1109_vm2, %v2394_v58, %v2395_v63 }
  0xae   : > { %v3064_v29 = vmul.f32 %v6920_v52, %v8047_v26  ;;  %v2669_v15 = vrot.slane %v2547_v39, 2  ;;  %v8220_v44 = vsel %vm794_vm1, %v823_v31, 0.0  ;;  %v1024_v8 = vmul.f32 %v7465_v19, %v8011_v2  ;;  %v8247_v52 = vld [vmem:[%s7451_s26 + $0x88] sm:$0xff] }
  0xaf   : > { %v6499_v43 = vmul.f32 -1.442695, %v8213_v1  ;;  %v2149_v30 = vadd.f32 %v2046_v38, %v1875_v50  ;;  %v1299_v51 = vmul.f32 %v7469_v20, %v8011_v2  ;;  %v976_v22 = vmul.f32 %v7461_v18, %v7945_v62  ;;  %v567_v62 = vld [vmem:[%s7451_s26 + $0x80] sm:$0xff] }
  0xb0   : > { %6757 = vmatprep.mubr.msk.f32.mxu0 %vm3098_vm4, %v3064_v29  ;;  %v2670_v26 = vsel %vm1384_vm3, %v2668_v55, %v2669_v15  ;;  %v1650_v31 = vmul.f32 %v7477_v24, %v8110_v54  ;;  %v1924_v49 = vmul.f32 %v7481_v25, %v8110_v54  ;;  %v1148_v47 = vrot.slane %v1024_v8, 1 }
  0xb1   : > { %6925 = vpow2.f32 %v6499_v43  ;;  %v2225_v37 = vadd.f32 %v2189_v6, %v2149_v30  ;;  %v1423_v32 = vrot.slane %v1299_v51, 2  ;;  %v1566_v2 = vmul.f32 %v7473_v21, %v8089_v42 }
  0xb2   : > { %v1773_v23 = vrot.slane %v1650_v31, 1  ;;  %v2047_v12 = vrot.slane %v1924_v49, 2  ;;  %v2274_v28 = vmul.f32 %v7525_v46, %v8220_v44  ;;  %v1149_v61 = vsel %vm1109_vm2, %v1146_v35, %v1148_v47 }
  0xb3   : > { %v6922_v36 = vpop.eup %6921  ;;  %v2499_v58 = vadd.f32 %v2396_v17, %v2225_v37  ;;  %v1424_v38 = vsel %vm1384_vm3, %v1421_v11, %v1423_v32  ;;  %v2548_v39 = vmul.f32 %v8102_v0, %v8220_v44  ;;  %v1251_v6 = vadd.f32 %v1149_v61, %v976_v22 }
  0xb4   : > { %v2958_v50 = vadd.f32 1.0, %v6922_v36  ;;  %v1774_v55 = vsel %vm1109_vm2, %v1771_v14, %v1773_v23  ;;  %v2190_v29 = vmul.f32 %v7521_v45, %v8193_v10  ;;  %v2397_v17 = vrot.slane %v2274_v28, 1 }
  0xb5   : > { %v2773_v43 = vadd.f32 %v2670_v26, %v2499_v58  ;;  %v2671_v30 = vrot.slane %v2548_v39, 2  ;;  %v825_v41 = vrot.slane %v567_v62, 7  ;;  %v1526_v35 = vadd.f32 %v1424_v38, %v1251_v6 }
  0xb6   : > { %6927 = vrcp.f32 %v2958_v50  ;;  %v2048_v11 = vsel %vm1384_vm3, %v2045_v34, %v2047_v12  ;;  %v826_v8 = vrot.slane %v8247_v52, 7  ;;  %v2398_v22 = vsel %vm1109_vm2, %v2395_v63, %v2397_v17 }
  0xb7   : > { %v8255_v51 = vadd.f32 %v8154_v16, %v2773_v43  ;;  %v2672_v14 = vsel %vm1384_vm3, %v2669_v15, %v2671_v30  ;;  %v977_v31 = vmul.f32 %v7461_v18, %v8054_v40  ;;  %v1602_v26 = vadd.f32 %v1566_v2, %v1526_v35 }
  0xb8   : > { %v8262_v49 = vsel %vm794_vm1, 0.0, %v825_v41  ;;  %v1025_v37 = vmul.f32 %v7465_v19, %v8054_v40  ;;  %v8268_v34 = vmul.f32 %v7465_v19, %v8089_v42  ;;  %v1300_v63 = vmul.f32 %v7469_v20, %v8054_v40 }
  0xb9   : > { %v6924_v47 = vpop.eup %6923  ;;  %v6500_v32 = vmul.f32 -1.442695, %v8255_v51  ;;  %v8275_v15 = vmul.f32 %v7469_v20, %v8089_v42  ;;  %v1567_v2 = vmul.f32 %v7473_v21, %v8149_v53  ;;  %v1876_v12 = vadd.f32 %v1774_v55, %v1602_v26 }
  0xba   : > { %v3065_v23 = vmul.f32 %v6924_v47, %v8113_v13  ;;  %v1150_v28 = vrot.slane %v1025_v37, 1  ;;  %v1151_v62 = vrot.slane %v8268_v34, 1  ;;  %v1425_v36 = vrot.slane %v1300_v63, 2 }
  0xbb   : > { %6929 = vpow2.f32 %v6500_v32  ;;  %v1426_v58 = vrot.slane %v8275_v15, 2  ;;  %v1651_v40 = vmul.f32 %v7477_v24, %v8149_v53  ;;  %v2150_v61 = vadd.f32 %v2048_v11, %v1876_v12 }
  0xbc   : > { %6758 = vmatmul.mubr.msk.f32.gmra.mxu0 %vm3098_vm4, %v3065_v23  ;;  %v1152_v38 = vsel %vm1109_vm2, %v1150_v28, %v1151_v62  ;;  %v8288_v39 = vmul.f32 %v7477_v24, %v8193_v10  ;;  %v1925_v13 = vmul.f32 %v7481_v25, %v8149_v53  ;;  %v8297_v55 = vmul.f32 %v7481_v25, %v8193_v10 }
  0xbd   : > { %v1252_v52 = vadd.f32 %v1152_v38, %v977_v31  ;;  %v1427_v50 = vsel %vm1384_vm3, %v1425_v36, %v1426_v58  ;;  %v1775_v6 = vrot.slane %v1651_v40, 1  ;;  %v2226_v17 = vadd.f32 %v2190_v29, %v2150_v61 }
  0xbe   : > { %v6926_v43 = vpop.eup %6925  ;;  %v8300_v30 = vsel %vm794_vm1, %v825_v41, %v826_v8  ;;  %v1776_v35 = vrot.slane %v8288_v39, 1  ;;  %v2049_v11 = vrot.slane %v1925_v13, 2  ;;  %v2050_v31 = vrot.slane %v8297_v55, 2 }
  0xbf   : > { %v2959_v26 = vadd.f32 1.0, %v6926_v43  ;;  %v1527_v37 = vadd.f32 %v1427_v50, %v1252_v52  ;;  %v2275_v34 = vmul.f32 %v7525_v46, %v8262_v49  ;;  %v2500_v47 = vadd.f32 %v2398_v22, %v2226_v17 }
  0xc0   : > { %v1777_v32 = vsel %vm1109_vm2, %v1775_v6, %v1776_v35  ;;  %v2276_v63 = vmul.f32 %v7525_v46, %v8300_v30  ;;  %v2549_v29 = vmul.f32 %v8102_v0, %v8262_v49  ;;  %v2191_v23 = vmul.f32 %v7521_v45, %v8262_v49 }
  0xc1   : > { %6931 = vrcp.f32 %v2959_v26  ;;  %v1603_v41 = vadd.f32 %v1567_v2, %v1527_v37  ;;  %v2399_v12 = vrot.slane %v2275_v34, 1  ;;  %v2774_v28 = vadd.f32 %v2672_v14, %v2500_v47 }
  0xc2   : > { %v2051_v36 = vsel %vm1384_vm3, %v2049_v11, %v2050_v31  ;;  %v2400_v40 = vrot.slane %v2276_v63, 1  ;;  %v2550_v22 = vmul.f32 %v8102_v0, %v8300_v30  ;;  %v2673_v39 = vrot.slane %v2549_v29, 2 }
  0xc3   : > { %v6928_v61 = vpop.eup %6927  ;;  %v1877_v38 = vadd.f32 %v1777_v32, %v1603_v41  ;;  %v8317_v13 = vsel %vm794_vm1, %v826_v8, 0.0  ;;  %v1027_v2 = vmul.f32 %v7465_v19, %v8110_v54  ;;  %v8323_v50 = vadd.f32 %v8154_v16, %v2774_v28 }
  0xc4   : > { %v3066_v52 = vmul.f32 %v6928_v61, %v8157_v48  ;;  %v2674_v14 = vrot.slane %v2550_v22, 2  ;;  %v978_v6 = vmul.f32 %v7461_v18, %v8089_v42  ;;  %v2401_v43 = vsel %vm1109_vm2, %v2399_v12, %v2400_v40  ;;  %v569_v12 = vld [vmem:[%s7451_s26 + $0x90] sm:$0xff]  ;;  %v8347_v61 = vld [vmem:[%s7451_s26 + $0x98] sm:$0xff] }
  0xc5   : > { %v2151_v55 = vadd.f32 %v2051_v36, %v1877_v38  ;;  %v1153_v17 = vrot.slane %v1027_v2, 1  ;;  %v1302_v8 = vmul.f32 %v7469_v20, %v8110_v54  ;;  %v6501_v11 = vmul.f32 -1.442695, %v8323_v50 }
  0xc6   : > { %6760 = vmatprep.mubr.msk.f32.mxu0 %vm3098_vm4, %v3066_v52  ;;  %v1568_v48 = vmul.f32 %v7473_v21, %v8193_v10  ;;  %v1653_v26 = vmul.f32 %v7477_v24, %v8220_v44  ;;  %v1927_v42 = vmul.f32 %v7481_v25, %v8220_v44  ;;  %v2675_v34 = vsel %vm1384_vm3, %v2673_v39, %v2674_v14 }
  0xc7   : > { %v2227_v37 = vadd.f32 %v2191_v23, %v2151_v55  ;;  %v1154_v47 = vsel %vm1109_vm2, %v1151_v62, %v1153_v17  ;;  %v1428_v54 = vrot.slane %v1302_v8, 2  ;;  %6933 = vpow2.f32 %v6501_v11 }
  0xc8   : > { %v6930_v32 = vpop.eup %6929  ;;  %v1253_v63 = vadd.f32 %v1154_v47, %v978_v6  ;;  %v1778_v29 = vrot.slane %v1653_v26, 1  ;;  %v2052_v41 = vrot.slane %v1927_v42, 2  ;;  %v2277_v23 = vmul.f32 %v7525_v46, %v8317_v13 }
  0xc9   : > { %v2960_v28 = vadd.f32 1.0, %v6930_v32  ;;  %v2501_v36 = vadd.f32 %v2401_v43, %v2227_v37  ;;  %v1429_v22 = vsel %vm1384_vm3, %v1426_v58, %v1428_v54  ;;  %v2192_v39 = vmul.f32 %v7521_v45, %v8300_v30 }
  0xca   : > { %v1528_v38 = vadd.f32 %v1429_v22, %v1253_v63  ;;  %v1779_v62 = vsel %vm1109_vm2, %v1776_v35, %v1778_v29  ;;  %v2551_v2 = vmul.f32 %v8102_v0, %v8317_v13  ;;  %v2402_v6 = vrot.slane %v2277_v23, 1 }
  0xcb   : > { %6935 = vrcp.f32 %v2960_v28  ;;  %v2775_v52 = vadd.f32 %v2675_v34, %v2501_v36  ;;  %v828_v15 = vrot.slane %v569_v12, 7  ;;  %v2053_v58 = vsel %vm1384_vm3, %v2050_v31, %v2052_v41 }
  0xcc   : > { %v1604_v55 = vadd.f32 %v1568_v48, %v1528_v38  ;;  %v2676_v43 = vrot.slane %v2551_v2, 2  ;;  %v829_v17 = vrot.slane %v8347_v61, 7  ;;  %v2403_v35 = vsel %vm1109_vm2, %v2400_v40, %v2402_v6 }
  0xcd   : > { %v8357_v8 = vadd.f32 %v8154_v16, %v2775_v52  ;;  %v979_v11 = vmul.f32 %v7461_v18, %v8149_v53  ;;  %v1028_v26 = vmul.f32 %v7465_v19, %v8149_v53  ;;  %v8366_v31 = vsel %vm794_vm1, 0.0, %v828_v15 }
  0xce   : > { %v6932_v42 = vpop.eup %6931  ;;  %v1878_v37 = vadd.f32 %v1779_v62, %v1604_v55  ;;  %v2677_v48 = vsel %vm1384_vm3, %v2674_v14, %v2676_v43  ;;  %v8370_v34 = vmul.f32 %v7465_v19, %v8193_v10  ;;  %v1303_v32 = vmul.f32 %v7469_v20, %v8149_v53 }
  0xcf   : > { %v3067_v47 = vmul.f32 %v6932_v42, %v8213_v1  ;;  %v6502_v40 = vmul.f32 -1.442695, %v8357_v8  ;;  %v1155_v54 = vrot.slane %v1028_v26, 1  ;;  %v8379_v14 = vmul.f32 %v7469_v20, %v8193_v10 }
  0xd0   : > { %v2152_v63 = vadd.f32 %v2053_v58, %v1878_v37  ;;  %v1156_v29 = vrot.slane %v8370_v34, 1  ;;  %v1569_v41 = vmul.f32 %v7473_v21, %v8262_v49  ;;  %v1430_v1 = vrot.slane %v1303_v32, 2 }
  0xd1   : > { %6761 = vmatmul.mubr.msk.f32.gmra.mxu0 %vm3098_vm4, %v3067_v47  ;;  %6937 = vpow2.f32 %v6502_v40  ;;  %v1654_v12 = vmul.f32 %v7477_v24, %v8262_v49  ;;  %v8388_v53 = vmul.f32 %v7477_v24, %v8300_v30  ;;  %v1431_v22 = vrot.slane %v8379_v14, 2 }
  0xd2   : > { %v2228_v28 = vadd.f32 %v2192_v39, %v2152_v63  ;;  %v1157_v36 = vsel %vm1109_vm2, %v1155_v54, %v1156_v29  ;;  %v1928_v23 = vmul.f32 %v7481_v25, %v8262_v49  ;;  %v8397_v2 = vmul.f32 %v7481_v25, %v8300_v30 }
  0xd3   : > { %v1254_v61 = vadd.f32 %v1157_v36, %v979_v11  ;;  %v1780_v38 = vrot.slane %v1654_v12, 1  ;;  %v1781_v62 = vrot.slane %v8388_v53, 1  ;;  %v8400_v6 = vsel %vm794_vm1, %v828_v15, %v829_v17 }
  0xd4   : > { %v2502_v52 = vadd.f32 %v2403_v35, %v2228_v28  ;;  %v1432_v39 = vsel %vm1384_vm3, %v1430_v1, %v1431_v22  ;;  %v2054_v55 = vrot.slane %v1928_v23, 2  ;;  %v6934_v58 = vpop.eup %6933  ;;  %v2055_v11 = vrot.slane %v8397_v2, 2 }
  0xd5   : > { %v1529_v43 = vadd.f32 %v1432_v39, %v1254_v61  ;;  %v1782_v26 = vsel %vm1109_vm2, %v1780_v38, %v1781_v62  ;;  %v2278_v42 = vmul.f32 %v7525_v46, %v8366_v31  ;;  %v2961_v37 = vadd.f32 1.0, %v6934_v58 }
  0xd6   : > { %v2776_v34 = vadd.f32 %v2677_v48, %v2502_v52  ;;  %v2279_v35 = vmul.f32 %v7525_v46, %v8400_v6  ;;  %v2552_v15 = vmul.f32 %v8102_v0, %v8366_v31  ;;  %v2056_v40 = vsel %vm1384_vm3, %v2054_v55, %v2055_v11 }
  0xd7   : > { %v1605_v47 = vadd.f32 %v1569_v41, %v1529_v43  ;;  %v2404_v54 = vrot.slane %v2278_v42, 1  ;;  %v2553_v32 = vmul.f32 %v8102_v0, %v8400_v6  ;;  %6939 = vrcp.f32 %v2961_v37 }
  0xd8   : > { %v6936_v63 = vpop.eup %6935  ;;  %v8415_v14 = vadd.f32 %v8154_v16, %v2776_v34  ;;  %v2405_v1 = vrot.slane %v2279_v35, 1  ;;  %v2678_v48 = vrot.slane %v2552_v15, 2  ;;  %v2193_v28 = vmul.f32 %v7521_v45, %v8366_v31 }
  0xd9   : > { %v3068_v12 = vmul.f32 %v6936_v63, %v8255_v51  ;;  %v1879_v53 = vadd.f32 %v1782_v26, %v1605_v47  ;;  %v2679_v41 = vrot.slane %v2553_v32, 2  ;;  %v8423_v61 = vsel %vm794_vm1, %v829_v17, 0.0  ;;  %v571_v47 = vld [vmem:[%s7451_s26 + $0xa0] sm:$0xff] }
  0xda   : > { %v6503_v36 = vmul.f32 -1.442695, %v8415_v14  ;;  %v2406_v23 = vsel %vm1109_vm2, %v2404_v54, %v2405_v1  ;;  %v1030_v38 = vmul.f32 %v7465_v19, %v8220_v44  ;;  %v980_v52 = vmul.f32 %v7461_v18, %v8193_v10 }
  0xdb   : > { %6763 = vmatprep.mubr.msk.f32.mxu0 %vm3098_vm4, %v3068_v12  ;;  %v2153_v2 = vadd.f32 %v2056_v40, %v1879_v53  ;;  %v2680_v51 = vsel %vm1384_vm3, %v2678_v48, %v2679_v41  ;;  %v1305_v39 = vmul.f32 %v7469_v20, %v8220_v44  ;;  %v1656_v17 = vmul.f32 %v7477_v24, %v8317_v13  ;;  %v8447_v48 = vld [vmem:[%s7451_s26 + $0xa8] sm:$0xff] }
  0xdc   : > { %6941 = vpow2.f32 %v6503_v36  ;;  %v1158_v55 = vrot.slane %v1030_v38, 1  ;;  %v1930_v58 = vmul.f32 %v7481_v25, %v8317_v13  ;;  %v1570_v42 = vmul.f32 %v7473_v21, %v8300_v30 }
  0xdd   : > { %v2229_v43 = vadd.f32 %v2193_v28, %v2153_v2  ;;  %v1433_v26 = vrot.slane %v1305_v39, 2  ;;  %v2280_v10 = vmul.f32 %v7525_v46, %v8423_v61  ;;  %v1783_v34 = vrot.slane %v1656_v17, 1 }
  0xde   : > { %v6938_v37 = vpop.eup %6937  ;;  %v1159_v44 = vsel %vm1109_vm2, %v1156_v29, %v1158_v55  ;;  %v2057_v35 = vrot.slane %v1930_v58, 2  ;;  %v2554_v15 = vmul.f32 %v8102_v0, %v8423_v61  ;;  %v2194_v53 = vmul.f32 %v7521_v45, %v8400_v6 }
  0xdf   : > { %v2962_v40 = vadd.f32 1.0, %v6938_v37  ;;  %v2503_v54 = vadd.f32 %v2406_v23, %v2229_v43  ;;  %v1255_v32 = vadd.f32 %v1159_v44, %v980_v52  ;;  %v1434_v63 = vsel %vm1384_vm3, %v1431_v22, %v1433_v26 }
  0xe0   : > { %v1784_v12 = vsel %vm1109_vm2, %v1781_v62, %v1783_v34  ;;  %v2407_v28 = vrot.slane %v2280_v10, 1  ;;  %v2681_v29 = vrot.slane %v2554_v15, 2  ;;  %v831_v2 = vrot.slane %v571_v47, 7 }
  0xe1   : > { %6943 = vrcp.f32 %v2962_v40  ;;  %v2777_v36 = vadd.f32 %v2680_v51, %v2503_v54  ;;  %v1530_v38 = vadd.f32 %v1434_v63, %v1255_v32  ;;  %v2058_v39 = vsel %vm1384_vm3, %v2055_v11, %v2057_v35 }
  0xe2   : > { %v2408_v23 = vsel %vm1109_vm2, %v2405_v1, %v2407_v28  ;;  %v2682_v52 = vsel %vm1384_vm3, %v2679_v41, %v2681_v29  ;;  %v832_v22 = vrot.slane %v8447_v48, 7  ;;  %v981_v17 = vmul.f32 %v7461_v18, %v8262_v49 }
  0xe3   : > { %v8457_v55 = vadd.f32 %v8154_v16, %v2777_v36  ;;  %v1606_v62 = vadd.f32 %v1570_v42, %v1530_v38  ;;  %v1031_v51 = vmul.f32 %v7465_v19, %v8262_v49  ;;  %v8464_v58 = vsel %vm794_vm1, 0.0, %v831_v2 }
  0xe4   : > { %v8468_v11 = vmul.f32 %v7465_v19, %v8300_v30  ;;  %v1306_v1 = vmul.f32 %v7469_v20, %v8262_v49  ;;  %v8474_v41 = vmul.f32 %v7469_v20, %v8300_v30  ;;  %v6940_v43 = vpop.eup %6939  ;;  %v1571_v37 = vmul.f32 %v7473_v21, %v8366_v31 }
  0xe5   : > { %v6504_v26 = vmul.f32 -1.442695, %v8457_v55  ;;  %v1880_v42 = vadd.f32 %v1784_v12, %v1606_v62  ;;  %v1160_v10 = vrot.slane %v1031_v51, 1  ;;  %v3069_v44 = vmul.f32 %v6940_v43, %v8323_v50 }
  0xe6   : > { %v1161_v34 = vrot.slane %v8468_v11, 1  ;;  %v1435_v35 = vrot.slane %v1306_v1, 2  ;;  %v1436_v15 = vrot.slane %v8474_v41, 2  ;;  %v1657_v47 = vmul.f32 %v7477_v24, %v8366_v31 }
  0xe7   : > { %6945 = vpow2.f32 %v6504_v26  ;;  %v2154_v49 = vadd.f32 %v2058_v39, %v1880_v42  ;;  %v8486_v40 = vmul.f32 %v7477_v24, %v8400_v6  ;;  %6764 = vmatmul.mubr.msk.f32.gmra.mxu0 %vm3098_vm4, %v3069_v44  ;;  %v1931_v32 = vmul.f32 %v7481_v25, %v8366_v31 }
  0xe8   : > { %v1162_v54 = vsel %vm1109_vm2, %v1160_v10, %v1161_v34  ;;  %v1437_v50 = vsel %vm1384_vm3, %v1435_v35, %v1436_v15  ;;  %v8495_v63 = vmul.f32 %v7481_v25, %v8400_v6  ;;  %v1785_v29 = vrot.slane %v1657_v47, 1 }
  0xe9   : > { %v6942_v48 = vpop.eup %6941  ;;  %v2230_v12 = vadd.f32 %v2194_v53, %v2154_v49  ;;  %v1256_v28 = vadd.f32 %v1162_v54, %v981_v17  ;;  %v1786_v36 = vrot.slane %v8486_v40, 1  ;;  %v8499_v39 = vsel %vm794_vm1, %v831_v2, %v832_v22 }
  0xea   : > { %v2963_v38 = vadd.f32 1.0, %v6942_v48  ;;  %v2059_v62 = vrot.slane %v1931_v32, 2  ;;  %v2060_v51 = vrot.slane %v8495_v63, 2  ;;  %v2195_v41 = vmul.f32 %v7521_v45, %v8464_v58 }
  0xeb   : > { %v2504_v11 = vadd.f32 %v2408_v23, %v2230_v12  ;;  %v1531_v1 = vadd.f32 %v1437_v50, %v1256_v28  ;;  %v2281_v43 = vmul.f32 %v7525_v46, %v8464_v58  ;;  %v1787_v53 = vsel %vm1109_vm2, %v1785_v29, %v1786_v36 }
  0xec   : > { %6947 = vrcp.f32 %v2963_v38  ;;  %v2282_v17 = vmul.f32 %v7525_v46, %v8499_v39  ;;  %v2555_v2 = vmul.f32 %v8102_v0, %v8464_v58  ;;  %v2556_v23 = vmul.f32 %v8102_v0, %v8499_v39 }
  0xed   : > { %v2778_v26 = vadd.f32 %v2682_v52, %v2504_v11  ;;  %v1607_v42 = vadd.f32 %v1571_v37, %v1531_v1  ;;  %v2409_v10 = vrot.slane %v2281_v43, 1  ;;  %v2061_v35 = vsel %vm1384_vm3, %v2059_v62, %v2060_v51 }
  0xee   : > { %v6944_v44 = vpop.eup %6943  ;;  %v2410_v49 = vrot.slane %v2282_v17, 1  ;;  %v2683_v47 = vrot.slane %v2555_v2, 2  ;;  %v8515_v40 = vsel %vm794_vm1, %v832_v22, 0.0  ;;  %v2684_v52 = vrot.slane %v2556_v23, 2  ;;  %v8545_v23 = vld [vmem:[%s7451_s26 + $0xb8] sm:$0xff] }
  0xef   : > { %v3070_v54 = vmul.f32 %v6944_v44, %v8357_v8  ;;  %v8519_v50 = vadd.f32 %v8154_v16, %v2778_v26  ;;  %v1881_v32 = vadd.f32 %v1787_v53, %v1607_v42  ;;  %v982_v63 = vmul.f32 %v7461_v18, %v8300_v30  ;;  %v573_v53 = vld [vmem:[%s7451_s26 + $0xb0] sm:$0xff] }
  0xf0   : > { %v2411_v37 = vsel %vm1109_vm2, %v2409_v10, %v2410_v49  ;;  %v1033_v48 = vmul.f32 %v7465_v19, %v8317_v13  ;;  %v1308_v22 = vmul.f32 %v7469_v20, %v8317_v13  ;;  %v1572_v28 = vmul.f32 %v7473_v21, %v8400_v6 }
  0xf1   : > { %6766 = vmatprep.mubr.msk.f32.mxu0 %vm3098_vm4, %v3070_v54  ;;  %v6505_v8 = vmul.f32 -1.442695, %v8519_v50  ;;  %v2155_v12 = vadd.f32 %v2061_v35, %v1881_v32  ;;  %v1659_v29 = vmul.f32 %v7477_v24, %v8423_v61  ;;  %v2685_v30 = vsel %vm1384_vm3, %v2683_v47, %v2684_v52 }
  0xf2   : > { %v1163_v38 = vrot.slane %v1033_v48, 1  ;;  %v1438_v62 = vrot.slane %v1308_v22, 2  ;;  %v1933_v11 = vmul.f32 %v7481_v25, %v8423_v61  ;;  %v2283_v43 = vmul.f32 %v7525_v46, %v8515_v40 }
  0xf3   : > { %6949 = vpow2.f32 %v6505_v8  ;;  %v2231_v13 = vadd.f32 %v2195_v41, %v2155_v12  ;;  %v1788_v1 = vrot.slane %v1659_v29, 1  ;;  %v2557_v10 = vmul.f32 %v8102_v0, %v8515_v40 }
  0xf4   : > { %v6946_v17 = vpop.eup %6945  ;;  %v1164_v2 = vsel %vm1109_vm2, %v1161_v34, %v1163_v38  ;;  %v1439_v26 = vsel %vm1384_vm3, %v1436_v15, %v1438_v62  ;;  %v2062_v42 = vrot.slane %v1933_v11, 2  ;;  %v2196_v41 = vmul.f32 %v7521_v45, %v8499_v39 }
  0xf5   : > { %v2964_v44 = vadd.f32 1.0, %v6946_v17  ;;  %v2505_v35 = vadd.f32 %v2411_v37, %v2231_v13  ;;  %v1257_v47 = vadd.f32 %v1164_v2, %v982_v63  ;;  %v1789_v54 = vsel %vm1109_vm2, %v1786_v36, %v1788_v1 }
  0xf6   : > { %v2412_v32 = vrot.slane %v2283_v43, 1  ;;  %v2686_v48 = vrot.slane %v2557_v10, 2  ;;  %v834_v22 = vrot.slane %v573_v53, 7  ;;  %v835_v8 = vrot.slane %v8545_v23, 7 }
  0xf7   : > { %6951 = vrcp.f32 %v2964_v44  ;;  %v2779_v34 = vadd.f32 %v2685_v30, %v2505_v35  ;;  %v1532_v15 = vadd.f32 %v1439_v26, %v1257_v47  ;;  %v2063_v12 = vsel %vm1384_vm3, %v2060_v51, %v2062_v42 }
  0xf8   : > { %v2413_v29 = vsel %vm1109_vm2, %v2410_v49, %v2412_v32  ;;  %v2687_v37 = vsel %vm1384_vm3, %v2684_v52, %v2686_v48  ;;  %v8555_v63 = vsel %vm794_vm1, 0.0, %v834_v22  ;;  %v983_v30 = vmul.f32 %v7461_v18, %v8366_v31 }
  0xf9   : > { %v6948_v38 = vpop.eup %6947  ;;  %v8558_v36 = vadd.f32 %v8154_v16, %v2779_v34  ;;  %v1608_v62 = vadd.f32 %v1572_v28, %v1532_v15  ;;  %v1034_v11 = vmul.f32 %v7465_v19, %v8366_v31  ;;  %v8567_v49 = vmul.f32 %v7465_v19, %v8400_v6 }
  0xfa   : > { %v3071_v51 = vmul.f32 %v6948_v38, %v8415_v14  ;;  %v1309_v52 = vmul.f32 %v7469_v20, %v8366_v31  ;;  %v8573_v13 = vmul.f32 %v7469_v20, %v8400_v6  ;;  %v8577_v43 = vsel %vm794_vm1, %v834_v22, %v835_v8 }
  0xfb   : > { %v6506_v28 = vmul.f32 -1.442695, %v8558_v36  ;;  %v1882_v1 = vadd.f32 %v1789_v54, %v1608_v62  ;;  %v1165_v53 = vrot.slane %v1034_v11, 1  ;;  %v1166_v14 = vrot.slane %v8567_v49, 1 }
  0xfc   : > { %6767 = vmatmul.mubr.msk.f32.gmra.mxu0 %vm3098_vm4, %v3071_v51  ;;  %v1440_v17 = vrot.slane %v1309_v52, 2  ;;  %v1441_v2 = vrot.slane %v8573_v13, 2  ;;  %v1660_v31 = vmul.f32 %v7477_v24, %v8464_v58  ;;  %v8586_v42 = vmul.f32 %v7477_v24, %v8499_v39 }
  0xfd   : > { %6953 = vpow2.f32 %v6506_v28  ;;  %v2156_v26 = vadd.f32 %v2063_v12, %v1882_v1  ;;  %v1934_v10 = vmul.f32 %v7481_v25, %v8464_v58  ;;  %v1167_v23 = vsel %vm1109_vm2, %v1165_v53, %v1166_v14 }
  0xfe   : > { %v1442_v44 = vsel %vm1384_vm3, %v1440_v17, %v1441_v2  ;;  %v1790_v35 = vrot.slane %v1660_v31, 1  ;;  %v8596_v47 = vmul.f32 %v7481_v25, %v8499_v39  ;;  %v1258_v32 = vadd.f32 %v1167_v23, %v983_v30 }
  0xff   : > { %v2232_v54 = vadd.f32 %v2196_v41, %v2156_v26  ;;  %v1573_v48 = vmul.f32 %v7473_v21, %v8464_v58  ;;  %v1791_v22 = vrot.slane %v8586_v42, 1  ;;  %v2064_v15 = vrot.slane %v1934_v10, 2 }
 0x100   : > { %v6950_v34 = vpop.eup %6949  ;;  %v2065_v12 = vrot.slane %v8596_v47, 2  ;;  %v2284_v38 = vmul.f32 %v7525_v46, %v8555_v63  ;;  %v2285_v62 = vmul.f32 %v7525_v46, %v8577_v43  ;;  %v1533_v52 = vadd.f32 %v1442_v44, %v1258_v32 }
 0x101   : > { %v2965_v11 = vadd.f32 1.0, %v6950_v34  ;;  %v2506_v51 = vadd.f32 %v2413_v29, %v2232_v54  ;;  %v2197_v41 = vmul.f32 %v7521_v45, %v8555_v63  ;;  %v1792_v30 = vsel %vm1109_vm2, %v1790_v35, %v1791_v22 }
 0x102   : > { %v2414_v13 = vrot.slane %v2284_v38, 1  ;;  %v2415_v28 = vrot.slane %v2285_v62, 1  ;;  %v2558_v1 = vmul.f32 %v8102_v0, %v8555_v63  ;;  %v1609_v17 = vadd.f32 %v1573_v48, %v1533_v52 }
 0x103   : > { %6955 = vrcp.f32 %v2965_v11  ;;  %v2780_v53 = vadd.f32 %v2687_v37, %v2506_v51  ;;  %v2559_v31 = vmul.f32 %v8102_v0, %v8577_v43  ;;  %v2066_v29 = vsel %vm1384_vm3, %v2064_v15, %v2065_v12 }
 0x104   : > { %v6952_v26 = vpop.eup %6951  ;;  %v2416_v42 = vsel %vm1109_vm2, %v2414_v13, %v2415_v28  ;;  %v2688_v10 = vrot.slane %v2558_v1, 2  ;;  %v8616_v23 = vsel %vm794_vm1, %v835_v8, 0.0  ;;  %v1883_v47 = vadd.f32 %v1792_v30, %v1609_v17  ;;  %v575_v30 = vld [vmem:[%s7451_s26 + $0xc0] sm:$0xff]  ;;  %v8641_v13 = vld [vmem:[%s7451_s26 + $0xc8] sm:$0xff] }
 0x105   : > { %v3072_v44 = vmul.f32 %v6952_v26, %v8457_v55  ;;  %v8620_v35 = vadd.f32 %v8154_v16, %v2780_v53  ;;  %v2689_v37 = vrot.slane %v2559_v31, 2  ;;  %v984_v54 = vmul.f32 %v7461_v18, %v8400_v6 }
 0x106   : > { %v1036_v0 = vmul.f32 %v7465_v19, %v8423_v61  ;;  %v1311_v32 = vmul.f32 %v7469_v20, %v8423_v61  ;;  %v1662_v8 = vmul.f32 %v7477_v24, %v8515_v40  ;;  %v2157_v48 = vadd.f32 %v2066_v29, %v1883_v47 }
 0x107   : > { %6769 = vmatprep.mubr.msk.f32.mxu0 %vm3098_vm4, %v3072_v44  ;;  %v6507_v55 = vmul.f32 -1.442695, %v8620_v35  ;;  %v1574_v34 = vmul.f32 %v7473_v21, %v8499_v39  ;;  %v1936_v6 = vmul.f32 %v7481_v25, %v8515_v40  ;;  %v2690_v15 = vsel %vm1384_vm3, %v2688_v10, %v2689_v37 }
 0x108   : > { %v1168_v38 = vrot.slane %v1036_v0, 1  ;;  %v1443_v62 = vrot.slane %v1311_v32, 2  ;;  %v1793_v61 = vrot.slane %v1662_v8, 1  ;;  %v2233_v11 = vadd.f32 %v2197_v41, %v2157_v48  ;;  %v8652_v41 = vld [vmem:[%s11869_s3 + $0x8] ss:$0 sm:$0xff] }
 0x109   : > { %6957 = vpow2.f32 %v6507_v55  ;;  %v2067_v51 = vrot.slane %v1936_v6, 2  ;;  %v2286_v52 = vmul.f32 %v7525_v46, %v8616_v23  ;;  %v2198_v31 = vmul.f32 %v7521_v45, %v8577_v43 }
 0x10a   : > { %v6954_v1 = vpop.eup %6953  ;;  %v1169_v53 = vsel %vm1109_vm2, %v1166_v14, %v1168_v38  ;;  %v1444_v17 = vsel %vm1384_vm3, %v1441_v2, %v1443_v62  ;;  %v2560_v26 = vmul.f32 %v8652_v41, %v8616_v23  ;;  %v2507_v10 = vadd.f32 %v2416_v42, %v2233_v11 }
 0x10b   : > { %v2966_v29 = vadd.f32 1.0, %v6954_v1  ;;  %v1259_v44 = vadd.f32 %v1169_v53, %v984_v54  ;;  %v1794_v49 = vsel %vm1109_vm2, %v1791_v22, %v1793_v61  ;;  %v2417_v47 = vrot.slane %v2286_v52, 1 }
 0x10c   : > { %v2691_v14 = vrot.slane %v2560_v26, 2  ;;  %v837_v0 = vrot.slane %v575_v30, 7  ;;  %v838_v2 = vrot.slane %v8641_v13, 7  ;;  %v2781_v32 = vadd.f32 %v2690_v15, %v2507_v10 }
 0x10d   : > { %6959 = vrcp.f32 %v2966_v29  ;;  %v1534_v8 = vadd.f32 %v1444_v17, %v1259_v44  ;;  %v2068_v55 = vsel %vm1384_vm3, %v2065_v12, %v2067_v51  ;;  %v2418_v48 = vsel %vm1109_vm2, %v2415_v28, %v2417_v47 }
 0x10e   : > { %v2692_v6 = vsel %vm1384_vm3, %v2689_v37, %v2691_v14  ;;  %v8662_v38 = vsel %vm794_vm1, %v837_v0, %v838_v2  ;;  %v985_v22 = vmul.f32 %v7461_v18, %v8464_v58  ;;  %v8667_v42 = vadd.f32 %v8154_v16, %v2781_v32 }
 0x10f   : > { %v1610_v54 = vadd.f32 %v1574_v34, %v1534_v8  ;;  %v1037_v15 = vmul.f32 %v7465_v19, %v8464_v58  ;;  %v8673_v12 = vmul.f32 %v7465_v19, %v8499_v39  ;;  %v8676_v37 = vsel %vm794_vm1, 0.0, %v837_v0 }
 0x110   : > { %v6956_v28 = vpop.eup %6955  ;;  %v1312_v62 = vmul.f32 %v7469_v20, %v8464_v58  ;;  %v8682_v61 = vmul.f32 %v7469_v20, %v8499_v39  ;;  %v1663_v16 = vmul.f32 %v7477_v24, %v8555_v63  ;;  %v6508_v11 = vmul.f32 -1.442695, %v8667_v42 }
 0x111   : > { %v3073_v34 = vmul.f32 %v6956_v28, %v8519_v50  ;;  %v1884_v51 = vadd.f32 %v1794_v49, %v1610_v54  ;;  %v1170_v52 = vrot.slane %v1037_v15, 1  ;;  %v1171_v30 = vrot.slane %v8673_v12, 1 }
 0x112   : > { %v1445_v13 = vrot.slane %v1312_v62, 2  ;;  %v1446_v1 = vrot.slane %v8682_v61, 2  ;;  %v8692_v58 = vmul.f32 %v7477_v24, %v8577_v43  ;;  %6961 = vpow2.f32 %v6508_v11 }
 0x113   : > { %6770 = vmatmul.mubr.msk.f32.gmra.mxu0 %vm3098_vm4, %v3073_v34  ;;  %v2158_v53 = vadd.f32 %v2068_v55, %v1884_v51  ;;  %v1795_v17 = vrot.slane %v1663_v16, 1  ;;  %v1937_v50 = vmul.f32 %v7481_v25, %v8555_v63  ;;  %v1172_v26 = vsel %vm1109_vm2, %v1170_v52, %v1171_v30 }
 0x114   : > { %v1447_v29 = vsel %vm1384_vm3, %v1445_v13, %v1446_v1  ;;  %v1796_v10 = vrot.slane %v8692_v58, 1  ;;  %v8704_v44 = vmul.f32 %v7481_v25, %v8577_v43  ;;  %v1260_v47 = vadd.f32 %v1172_v26, %v985_v22 }
 0x115   : > { %v2234_v49 = vadd.f32 %v2198_v31, %v2158_v53  ;;  %v1575_v14 = vmul.f32 %v7473_v21, %v8555_v63  ;;  %v2069_v0 = vrot.slane %v1937_v50, 2  ;;  %v2199_v55 = vmul.f32 %v7521_v45, %v8676_v37 }
 0x116   : > { %v6958_v32 = vpop.eup %6957  ;;  %v2070_v8 = vrot.slane %v8704_v44, 2  ;;  %v2287_v54 = vmul.f32 %v7525_v46, %v8676_v37  ;;  %v2288_v15 = vmul.f32 %v7525_v46, %v8662_v38  ;;  %v1535_v31 = vadd.f32 %v1447_v29, %v1260_v47 }
 0x117   : > { %v2967_v12 = vadd.f32 1.0, %v6958_v32  ;;  %v2508_v28 = vadd.f32 %v2418_v48, %v2234_v49  ;;  %v2561_v22 = vmul.f32 %v8652_v41, %v8676_v37  ;;  %v6744_v62 = vpop.f32.mrf.mxu0  ;;  %v1797_v16 = vsel %vm1109_vm2, %v1795_v17, %v1796_v10  ;;  %v8732_v49 = vld [vmem:[%s11870_s4] ss:$0 sm:$0xff] }
 0x118   : > { %v2419_v34 = vrot.slane %v2287_v54, 1  ;;  %v2420_v11 = vrot.slane %v2288_v15, 1  ;;  %v8720_v51 = vmul.f32 %v8652_v41, %v8662_v38  ;;  %v1611_v13 = vadd.f32 %v1575_v14, %v1535_v31 }
 0x119   : > { %6963 = vrcp.f32 %v2967_v12  ;;  %v2782_v52 = vadd.f32 %v2692_v6, %v2508_v28  ;;  %v2693_v58 = vrot.slane %v2561_v22, 2  ;;  %v3277_v53 = vpop.f32.mrf.mxu0  ;;  %v2071_v48 = vsel %vm1384_vm3, %v2069_v0, %v2070_v8 }
 0x11a   : > { %v6960_v50 = vpop.eup %6959  ;;  %v2421_v26 = vsel %vm1109_vm2, %v2419_v34, %v2420_v11  ;;  %v2694_v29 = vrot.slane %v8720_v51, 2  ;;  %v8726_v17 = vsel %vm794_vm1, %v838_v2, 0.0  ;;  %v1885_v47 = vadd.f32 %v1797_v16, %v1611_v13  ;;  %v8759_v13 = vld [vmem:[%s7451_s26 + $0xd8] sm:$0xff] }
 0x11b   : > { %v3074_v44 = vmul.f32 %v6960_v50, %v8558_v36  ;;  %v8735_v6 = vadd.f32 %v8732_v49, %v2782_v52  ;;  %v1039_v14 = vmul.f32 %v7465_v19, %v8515_v40  ;;  %v986_v2 = vmul.f32 %v7461_v18, %v8499_v39  ;;  %v577_v52 = vld [vmem:[%s7451_s26 + $0xd0] sm:$0xff] }
 0x11c   : > { %v2695_v0 = vsel %vm1384_vm3, %v2693_v58, %v2694_v29  ;;  %v1314_v36 = vmul.f32 %v7469_v20, %v8515_v40  ;;  %v1665_v32 = vmul.f32 %v7477_v24, %v8616_v23  ;;  %v2159_v15 = vadd.f32 %v2071_v48, %v1885_v47 }
 0x11d   : > { %6772 = vmatprep.mubr.msk.f32.mxu0 %vm3098_vm4, %v3074_v44  ;;  %v6509_v54 = vmul.f32 -1.442695, %v8735_v6  ;;  %v1173_v12 = vrot.slane %v1039_v14, 1  ;;  %v1939_v28 = vmul.f32 %v7481_v25, %v8616_v23  ;;  %v1576_v39 = vmul.f32 %v7473_v21, %v8577_v43 }
 0x11e   : > { %v1448_v31 = vrot.slane %v1314_v36, 2  ;;  %v1798_v22 = vrot.slane %v1665_v32, 1  ;;  %v2289_v40 = vmul.f32 %v7525_v46, %v8726_v17  ;;  %v2235_v62 = vadd.f32 %v2199_v55, %v2159_v15 }
 0x11f   : > { %6965 = vpow2.f32 %v6509_v54  ;;  %v1174_v16 = vsel %vm1109_vm2, %v1171_v30, %v1173_v12  ;;  %v2072_v34 = vrot.slane %v1939_v28, 2  ;;  %v6962_v58 = vpop.eup %6961  ;;  %v2200_v48 = vmul.f32 %v7521_v45, %v8662_v38 }
 0x120   : > { %v1261_v53 = vadd.f32 %v1174_v16, %v986_v2  ;;  %v1449_v50 = vsel %vm1384_vm3, %v1446_v1, %v1448_v31  ;;  %v2422_v44 = vrot.slane %v2289_v40, 1  ;;  %v2968_v47 = vadd.f32 1.0, %v6962_v58 }
 0x121   : > { %v2509_v14 = vadd.f32 %v2421_v26, %v2235_v62  ;;  %v1799_v55 = vsel %vm1109_vm2, %v1796_v10, %v1798_v22  ;;  %v2563_v30 = vmul.f32 %v8652_v41, %v8726_v17  ;;  %v2073_v32 = vsel %vm1384_vm3, %v2070_v8, %v2072_v34 }
 0x122   : > { %v1536_v36 = vadd.f32 %v1449_v50, %v1261_v53  ;;  %v840_v54 = vrot.slane %v577_v52, 7  ;;  %v841_v2 = vrot.slane %v8759_v13, 7  ;;  %6967 = vrcp.f32 %v2968_v47 }
 0x123   : > { %v2783_v61 = vadd.f32 %v2695_v0, %v2509_v14  ;;  %v2423_v1 = vsel %vm1109_vm2, %v2420_v11, %v2422_v44  ;;  %v2696_v15 = vrot.slane %v2563_v30, 2  ;;  %v987_v10 = vmul.f32 %v7461_v18, %v8555_v63 }
 0x124   : > { %v1612_v12 = vadd.f32 %v1576_v39, %v1536_v36  ;;  %v8773_v28 = vsel %vm794_vm1, %v840_v54, %v841_v2  ;;  %v1040_v26 = vmul.f32 %v7465_v19, %v8555_v63  ;;  %v8783_v31 = vsel %vm794_vm1, 0.0, %v840_v54 }
 0x125   : > { %v8780_v8 = vadd.f32 %v8732_v49, %v2783_v61  ;;  %v8787_v11 = vmul.f32 %v7465_v19, %v8577_v43  ;;  %v1315_v0 = vmul.f32 %v7469_v20, %v8555_v63  ;;  %v8793_v62 = vmul.f32 %v7469_v20, %v8577_v43 }
 0x126   : > { %v6964_v39 = vpop.eup %6963  ;;  %v1886_v22 = vadd.f32 %v1799_v55, %v1612_v12  ;;  %v1175_v40 = vrot.slane %v1040_v26, 1  ;;  %v1577_v16 = vmul.f32 %v7473_v21, %v8676_v37  ;;  %v1666_v50 = vmul.f32 %v7477_v24, %v8676_v37 }
 0x127   : > { %v3075_v34 = vmul.f32 %v6964_v39, %v8620_v35  ;;  %v6510_v52 = vmul.f32 -1.442695, %v8780_v8  ;;  %v1176_v13 = vrot.slane %v8787_v11, 1  ;;  %v1450_v58 = vrot.slane %v1315_v0, 2 }
 0x128   : > { %v2160_v53 = vadd.f32 %v2073_v32, %v1886_v22  ;;  %v1451_v63 = vrot.slane %v8793_v62, 2  ;;  %v8805_v44 = vmul.f32 %v7477_v24, %v8662_v38  ;;  %v1940_v47 = vmul.f32 %v7481_v25, %v8676_v37 }
 0x129   : > { %6773 = vmatmul.mubr.msk.f32.gmra.mxu0 %vm3098_vm4, %v3075_v34  ;;  %6969 = vpow2.f32 %v6510_v52  ;;  %v1177_v35 = vsel %vm1109_vm2, %v1175_v40, %v1176_v13  ;;  %v8813_v14 = vmul.f32 %v7481_v25, %v8662_v38  ;;  %v1800_v32 = vrot.slane %v1666_v50, 1 }
 0x12a   : > { %v2236_v55 = vadd.f32 %v2200_v48, %v2160_v53  ;;  %v1262_v30 = vadd.f32 %v1177_v35, %v987_v10  ;;  %v1452_v36 = vsel %vm1384_vm3, %v1450_v58, %v1451_v63  ;;  %v2697_v54 = vsel %vm1384_vm3, %v2694_v29, %v2696_v15 }
 0x12b   : > { %v1801_v61 = vrot.slane %v8805_v44, 1  ;;  %v2074_v12 = vrot.slane %v1940_v47, 2  ;;  %v2075_v26 = vrot.slane %v8813_v14, 2  ;;  %v2290_v22 = vmul.f32 %v7525_v46, %v8783_v31 }
 0x12c   : > { %v6966_v11 = vpop.eup %6965  ;;  %v2510_v0 = vadd.f32 %v2423_v1, %v2236_v55  ;;  %v1537_v39 = vadd.f32 %v1452_v36, %v1262_v30  ;;  %v2291_v48 = vmul.f32 %v7525_v46, %v8773_v28  ;;  %v2201_v51 = vmul.f32 %v7521_v45, %v8783_v31 }
 0x12d   : > { %v2969_v10 = vadd.f32 1.0, %v6966_v11  ;;  %v1802_v40 = vsel %vm1109_vm2, %v1800_v32, %v1801_v61  ;;  %v2564_v29 = vmul.f32 %v8652_v41, %v8783_v31  ;;  %v2424_v34 = vrot.slane %v2290_v22, 1 }
 0x12e   : > { %v2784_v15 = vadd.f32 %v2697_v54, %v2510_v0  ;;  %v1613_v62 = vadd.f32 %v1577_v16, %v1537_v39  ;;  %v2425_v1 = vrot.slane %v2291_v48, 1  ;;  %v2076_v52 = vsel %vm1384_vm3, %v2074_v12, %v2075_v26 }
 0x12f   : > { %6971 = vrcp.f32 %v2969_v10  ;;  %v2565_v58 = vmul.f32 %v8652_v41, %v8773_v28  ;;  %v2698_v53 = vrot.slane %v2564_v29, 2  ;;  %v6968_v50 = vpop.eup %6967  ;;  %v8838_v14 = vsel %vm794_vm1, %v841_v2, 0.0 }
 0x130   : > { %v8834_v44 = vadd.f32 %v8732_v49, %v2784_v15  ;;  %v1887_v35 = vadd.f32 %v1802_v40, %v1613_v62  ;;  %v2426_v47 = vsel %vm1109_vm2, %v2424_v34, %v2425_v1  ;;  %v3076_v16 = vmul.f32 %v6968_v50, %v8667_v42 }
 0x131   : > { %v2699_v55 = vrot.slane %v2565_v58, 2  ;;  %v1042_v30 = vmul.f32 %v7465_v19, %v8616_v23  ;;  %v1317_v36 = vmul.f32 %v7469_v20, %v8616_v23  ;;  %v988_v12 = vmul.f32 %v7461_v18, %v8577_v43  ;;  %v579_v43 = vld [vmem:[%s7451_s26 + $0xe0] sm:$0xff] }
 0x132   : > { %v6511_v32 = vmul.f32 -1.442695, %v8834_v44  ;;  %v2161_v54 = vadd.f32 %v2076_v52, %v1887_v35  ;;  %v1668_v2 = vmul.f32 %v7477_v24, %v8726_v17  ;;  %6775 = vmatprep.mubr.msk.f32.mxu0 %vm3098_vm4, %v3076_v16  ;;  %v1578_v0 = vmul.f32 %v7473_v21, %v8662_v38 }
 0x133   : > { %v1178_v42 = vrot.slane %v1042_v30, 1  ;;  %v1453_v11 = vrot.slane %v1317_v36, 2  ;;  %v1942_v23 = vmul.f32 %v7481_v25, %v8726_v17  ;;  %v2700_v22 = vsel %vm1384_vm3, %v2698_v53, %v2699_v55  ;;  %v8866_v53 = vld [vmem:[%s7451_s26 + $0xe8] sm:$0xff] }
 0x134   : > { %6973 = vpow2.f32 %v6511_v32  ;;  %v2237_v39 = vadd.f32 %v2201_v51, %v2161_v54  ;;  %v1803_v48 = vrot.slane %v1668_v2, 1  ;;  %v2292_v15 = vmul.f32 %v7525_v46, %v8838_v14 }
 0x135   : > { %v1179_v10 = vsel %vm1109_vm2, %v1176_v13, %v1178_v42  ;;  %v1454_v40 = vsel %vm1384_vm3, %v1451_v63, %v1453_v11  ;;  %v2077_v29 = vrot.slane %v1942_v23, 2  ;;  %v2202_v58 = vmul.f32 %v7521_v45, %v8773_v28 }
 0x136   : > { %v6970_v62 = vpop.eup %6969  ;;  %v2511_v34 = vadd.f32 %v2426_v47, %v2237_v39  ;;  %v1263_v52 = vadd.f32 %v1179_v10, %v988_v12  ;;  %v2566_v51 = vmul.f32 %v8652_v41, %v8838_v14  ;;  %v1804_v13 = vsel %vm1109_vm2, %v1801_v61, %v1803_v48 }
 0x137   : > { %v2970_v50 = vadd.f32 1.0, %v6970_v62  ;;  %v2427_v35 = vrot.slane %v2292_v15, 1  ;;  %v843_v63 = vrot.slane %v579_v43, 7  ;;  %v2078_v36 = vsel %vm1384_vm3, %v2075_v26, %v2077_v29 }
 0x138   : > { %v2785_v16 = vadd.f32 %v2700_v22, %v2511_v34  ;;  %v1538_v30 = vadd.f32 %v1454_v40, %v1263_v52  ;;  %v2701_v32 = vrot.slane %v2566_v51, 2  ;;  %v844_v54 = vrot.slane %v8866_v53, 7 }
 0x139   : > { %6975 = vrcp.f32 %v2970_v50  ;;  %v2428_v47 = vsel %vm1109_vm2, %v2425_v1, %v2427_v35  ;;  %v8873_v12 = vsel %vm794_vm1, 0.0, %v843_v63  ;;  %v989_v11 = vmul.f32 %v7461_v18, %v8676_v37 }
 0x13a   : > { %v8876_v2 = vadd.f32 %v8732_v49, %v2785_v16  ;;  %v1614_v42 = vadd.f32 %v1578_v0, %v1538_v30  ;;  %v2702_v61 = vsel %vm1384_vm3, %v2699_v55, %v2701_v32  ;;  %v1043_v26 = vmul.f32 %v7465_v19, %v8676_v37 }
 0x13b   : > { %v8885_v1 = vmul.f32 %v7465_v19, %v8662_v38  ;;  %v1318_v23 = vmul.f32 %v7469_v20, %v8676_v37  ;;  %v8891_v39 = vmul.f32 %v7469_v20, %v8662_v38  ;;  %v1579_v48 = vmul.f32 %v7473_v21, %v8783_v31 }
 0x13c   : > { %v6972_v0 = vpop.eup %6971  ;;  %v6512_v55 = vmul.f32 -1.442695, %v8876_v2  ;;  %v1888_v22 = vadd.f32 %v1804_v13, %v1614_v42  ;;  %v1669_v43 = vmul.f32 %v7477_v24, %v8783_v31  ;;  %v1180_v40 = vrot.slane %v1043_v26, 1 }
 0x13d   : > { %v3077_v10 = vmul.f32 %v6972_v0, %v8735_v6  ;;  %v1181_v29 = vrot.slane %v8885_v1, 1  ;;  %v1455_v37 = vrot.slane %v1318_v23, 2  ;;  %v1456_v62 = vrot.slane %v8891_v39, 2 }
 0x13e   : > { %6977 = vpow2.f32 %v6512_v55  ;;  %v2162_v15 = vadd.f32 %v2078_v36, %v1888_v22  ;;  %v8903_v34 = vmul.f32 %v7477_v24, %v8773_v28  ;;  %v1805_v51 = vrot.slane %v1669_v43, 1 }
 0x13f   : > { %6776 = vmatmul.mubr.msk.f32.gmra.mxu0 %vm3098_vm4, %v3077_v10  ;;  %v1182_v52 = vsel %vm1109_vm2, %v1180_v40, %v1181_v29  ;;  %v1943_v6 = vmul.f32 %v7481_v25, %v8783_v31  ;;  %v8911_v53 = vmul.f32 %v7481_v25, %v8773_v28  ;;  %v1457_v35 = vsel %vm1384_vm3, %v1455_v37, %v1456_v62 }
 0x140   : > { %v2238_v50 = vadd.f32 %v2202_v58, %v2162_v15  ;;  %v1264_v13 = vadd.f32 %v1182_v52, %v989_v11  ;;  %v1806_v16 = vrot.slane %v8903_v34, 1  ;;  %v8916_v36 = vsel %vm794_vm1, %v843_v63, %v844_v54 }
 0x141   : > { %v6974_v30 = vpop.eup %6973  ;;  %v2079_v32 = vrot.slane %v1943_v6, 2  ;;  %v2080_v42 = vrot.slane %v8911_v53, 2  ;;  %v2293_v26 = vmul.f32 %v7525_v46, %v8873_v12  ;;  %v2203_v58 = vmul.f32 %v7521_v45, %v8873_v12 }
 0x142   : > { %v2971_v1 = vadd.f32 1.0, %v6974_v30  ;;  %v2512_v23 = vadd.f32 %v2428_v47, %v2238_v50  ;;  %v1539_v39 = vadd.f32 %v1457_v35, %v1264_v13  ;;  %v1807_v11 = vsel %vm1109_vm2, %v1805_v51, %v1806_v16 }
 0x143   : > { %v2294_v0 = vmul.f32 %v7525_v46, %v8916_v36  ;;  %v2429_v55 = vrot.slane %v2293_v26, 1  ;;  %v2567_v63 = vmul.f32 %v8652_v41, %v8873_v12  ;;  %v2568_v10 = vmul.f32 %v8652_v41, %v8916_v36 }
 0x144   : > { %6979 = vrcp.f32 %v2971_v1  ;;  %v2786_v22 = vadd.f32 %v2702_v61, %v2512_v23  ;;  %v1615_v43 = vadd.f32 %v1579_v48, %v1539_v39  ;;  %v2081_v47 = vsel %vm1384_vm3, %v2079_v32, %v2080_v42 }
 0x145   : > { %v2430_v40 = vrot.slane %v2294_v0, 1  ;;  %v2703_v37 = vrot.slane %v2567_v63, 2  ;;  %v8932_v15 = vsel %vm794_vm1, %v844_v54, 0.0  ;;  %v2704_v6 = vrot.slane %v2568_v10, 2 }
 0x146   : > { %v6976_v34 = vpop.eup %6975  ;;  %v8935_v52 = vadd.f32 %v8732_v49, %v2786_v22  ;;  %v1889_v51 = vadd.f32 %v1807_v11, %v1615_v43  ;;  %v1045_v61 = vmul.f32 %v7465_v19, %v8726_v17  ;;  %v990_v50 = vmul.f32 %v7461_v18, %v8662_v38  ;;  %v581_v11 = vld [vmem:[%s7451_s26 + $0xf0] sm:$0xff] }
 0x147   : > { %v3078_v48 = vmul.f32 %v6976_v34, %v8780_v8  ;;  %v2431_v53 = vsel %vm1109_vm2, %v2429_v55, %v2430_v40  ;;  %v1320_v54 = vmul.f32 %v7469_v20, %v8726_v17  ;;  %v1580_v32 = vmul.f32 %v7473_v21, %v8773_v28 }
 0x148   : > { %v6513_v13 = vmul.f32 -1.442695, %v8935_v52  ;;  %v2163_v35 = vadd.f32 %v2081_v47, %v1889_v51  ;;  %v1183_v30 = vrot.slane %v1045_v61, 1  ;;  %v2705_v8 = vsel %vm1384_vm3, %v2703_v37, %v2704_v6  ;;  %v8962_v51 = vld [vmem:[%s7451_s26 + $0xf8] sm:$0xff] }
 0x149   : > { %6778 = vmatprep.mubr.msk.f32.mxu0 %vm3098_vm4, %v3078_v48  ;;  %v1458_v26 = vrot.slane %v1320_v54, 2  ;;  %v1671_v1 = vmul.f32 %v7477_v24, %v8838_v14  ;;  %v1945_v38 = vmul.f32 %v7481_v25, %v8838_v14  ;;  %v2295_v39 = vmul.f32 %v7525_v46, %v8932_v15 }
 0x14a   : > { %6981 = vpow2.f32 %v6513_v13  ;;  %v2239_v17 = vadd.f32 %v2203_v58, %v2163_v35  ;;  %v1184_v23 = vsel %vm1109_vm2, %v1181_v29, %v1183_v30  ;;  %v2569_v34 = vmul.f32 %v8652_v41, %v8932_v15 }
 0x14b   : > { %v6978_v0 = vpop.eup %6977  ;;  %v1265_v55 = vadd.f32 %v1184_v23, %v990_v50  ;;  %v1459_v63 = vsel %vm1384_vm3, %v1456_v62, %v1458_v26  ;;  %v1808_v22 = vrot.slane %v1671_v1, 1  ;;  %v2082_v43 = vrot.slane %v1945_v38, 2 }
 0x14c   : > { %v2972_v10 = vadd.f32 1.0, %v6978_v0  ;;  %v2513_v47 = vadd.f32 %v2431_v53, %v2239_v17  ;;  %v2432_v37 = vrot.slane %v2295_v39, 1  ;;  %v2204_v61 = vmul.f32 %v7521_v45, %v8916_v36 }
 0x14d   : > { %v1540_v58 = vadd.f32 %v1459_v63, %v1265_v55  ;;  %v1809_v29 = vsel %vm1109_vm2, %v1806_v16, %v1808_v22  ;;  %v846_v48 = vrot.slane %v581_v11, 7  ;;  %v2083_v62 = vsel %vm1384_vm3, %v2080_v42, %v2082_v43 }
 0x14e   : > { %6983 = vrcp.f32 %v2972_v10  ;;  %v2787_v50 = vadd.f32 %v2705_v8, %v2513_v47  ;;  %v2706_v54 = vrot.slane %v2569_v34, 2  ;;  %v2433_v53 = vsel %vm1109_vm2, %v2430_v40, %v2432_v37 }
 0x14f   : > { %v1616_v13 = vadd.f32 %v1580_v32, %v1540_v58  ;;  %v847_v35 = vrot.slane %v8962_v51, 7  ;;  %v8971_v30 = vsel %vm794_vm1, 0.0, %v846_v48  ;;  %v991_v16 = vmul.f32 %v7461_v18, %v8783_v31 }
 0x150   : > { %v8974_v26 = vadd.f32 %v8732_v49, %v2787_v50  ;;  %v1046_v8 = vmul.f32 %v7465_v19, %v8783_v31  ;;  %v8982_v42 = vmul.f32 %v7465_v19, %v8773_v28  ;;  %v2707_v1 = vsel %vm1384_vm3, %v2704_v6, %v2706_v54 }
 0x151   : > { %v6980_v32 = vpop.eup %6979  ;;  %v1890_v40 = vadd.f32 %v1809_v29, %v1616_v13  ;;  %v1321_v38 = vmul.f32 %v7469_v20, %v8783_v31  ;;  %v8989_v17 = vmul.f32 %v7469_v20, %v8773_v28  ;;  %v1581_v6 = vmul.f32 %v7473_v21, %v8873_v12 }
 0x152   : > { %v3079_v23 = vmul.f32 %v6980_v32, %v8834_v44  ;;  %v6514_v39 = vmul.f32 -1.442695, %v8974_v26  ;;  %v1185_v11 = vrot.slane %v1046_v8, 1  ;;  %v1186_v0 = vrot.slane %v8982_v42, 1 }
 0x153   : > { %v2164_v55 = vadd.f32 %v2083_v62, %v1890_v40  ;;  %v1460_v63 = vrot.slane %v1321_v38, 2  ;;  %v1461_v22 = vrot.slane %v8989_v17, 2  ;;  %v1672_v44 = vmul.f32 %v7477_v24, %v8873_v12 }
 0x154   : > { %6779 = vmatmul.mubr.msk.f32.gmra.mxu0 %vm3098_vm4, %v3079_v23  ;;  %6985 = vpow2.f32 %v6514_v39  ;;  %v1187_v31 = vsel %vm1109_vm2, %v1185_v11, %v1186_v0  ;;  %v1673_v43 = vmul.f32 %v7477_v24, %v8916_v36  ;;  %v1946_v34 = vmul.f32 %v7481_v25, %v8873_v12 }
 0x155   : > { %v2240_v10 = vadd.f32 %v2204_v61, %v2164_v55  ;;  %v1266_v47 = vadd.f32 %v1187_v31, %v991_v16  ;;  %v1462_v37 = vsel %vm1384_vm3, %v1460_v63, %v1461_v22  ;;  %v9009_v51 = vsel %vm794_vm1, %v846_v48, %v847_v35 }
 0x156   : > { %v1810_v58 = vrot.slane %v1672_v44, 1  ;;  %v1811_v29 = vrot.slane %v1673_v43, 1  ;;  %v1947_v50 = vmul.f32 %v7481_v25, %v8916_v36  ;;  %v2084_v8 = vrot.slane %v1946_v34, 2 }
 0x157   : > { %v6982_v62 = vpop.eup %6981  ;;  %v2514_v54 = vadd.f32 %v2433_v53, %v2240_v10  ;;  %v1541_v13 = vadd.f32 %v1462_v37, %v1266_v47  ;;  %v2296_v61 = vmul.f32 %v7525_v46, %v8971_v30  ;;  %v2297_v48 = vmul.f32 %v7525_v46, %v9009_v51 }
 0x158   : > { %v2973_v16 = vadd.f32 1.0, %v6982_v62  ;;  %v1812_v32 = vsel %vm1109_vm2, %v1810_v58, %v1811_v29  ;;  %v2085_v40 = vrot.slane %v1947_v50, 2  ;;  %v2570_v39 = vmul.f32 %v8652_v41, %v8971_v30 }
 0x159   : > { %v2788_v38 = vadd.f32 %v2707_v1, %v2514_v54  ;;  %v1617_v17 = vadd.f32 %v1581_v6, %v1541_v13  ;;  %v2434_v23 = vrot.slane %v2296_v61, 1  ;;  %v2435_v11 = vrot.slane %v2297_v48, 1 }
 0x15a   : > { %6987 = vrcp.f32 %v2973_v16  ;;  %v2086_v53 = vsel %vm1384_vm3, %v2084_v8, %v2085_v40  ;;  %v9023_v55 = vmul.f32 %v8652_v41, %v9009_v51  ;;  %v2205_v1 = vmul.f32 %v7521_v45, %v8971_v30 }
 0x15b   : > { %v6984_v63 = vpop.eup %6983  ;;  %v9026_v31 = vadd.f32 %v8732_v49, %v2788_v38  ;;  %v1891_v44 = vadd.f32 %v1812_v32, %v1617_v17  ;;  %v2708_v6 = vrot.slane %v2570_v39, 2  ;;  %v2436_v10 = vsel %vm1109_vm2, %v2434_v23, %v2435_v11 }
 0x15c   : > { %v3080_v43 = vmul.f32 %v6984_v63, %v8876_v2  ;;  %v2709_v47 = vrot.slane %v9023_v55, 2  ;;  %v9034_v37 = vsel %vm794_vm1, %v847_v35, 0.0  ;;  %v1048_v50 = vmul.f32 %v7465_v19, %v8838_v14 }
 0x15d   : > { %v6515_v34 = vmul.f32 -1.442695, %v9026_v31  ;;  %v2165_v58 = vadd.f32 %v2086_v53, %v1891_v44  ;;  %v1323_v62 = vmul.f32 %v7469_v20, %v8838_v14  ;;  %v992_v54 = vmul.f32 %v7461_v18, %v8773_v28 }
 0x15e   : > { %6781 = vmatprep.mubr.msk.f32.mxu0 %vm3098_vm4, %v3080_v43  ;;  %v2710_v2 = vsel %vm1384_vm3, %v2708_v6, %v2709_v47  ;;  %v1674_v35 = vmul.f32 %v7477_v24, %v8932_v15  ;;  %v1948_v13 = vmul.f32 %v7481_v25, %v8932_v15  ;;  %v1188_v61 = vrot.slane %v1048_v50, 1 }
 0x15f   : > { %6989 = vpow2.f32 %v6515_v34  ;;  %v2241_v8 = vadd.f32 %v2205_v1, %v2165_v58  ;;  %v1463_v16 = vrot.slane %v1323_v62, 2  ;;  %v1582_v14 = vmul.f32 %v7473_v21, %v8916_v36 }
 0x160   : > { %v1813_v32 = vrot.slane %v1674_v35, 1  ;;  %v2087_v48 = vrot.slane %v1948_v13, 2  ;;  %v2298_v38 = vmul.f32 %v7525_v46, %v9034_v37  ;;  %v1189_v23 = vsel %vm1109_vm2, %v1186_v0, %v1188_v61 }
 0x161   : > { %v6986_v17 = vpop.eup %6985  ;;  %v2515_v28 = vadd.f32 %v2436_v10, %v2241_v8  ;;  %v1464_v39 = vsel %vm1384_vm3, %v1461_v22, %v1463_v16  ;;  %v2572_v53 = vmul.f32 %v8652_v41, %v9034_v37  ;;  %v1267_v44 = vadd.f32 %v1189_v23, %v992_v54 }
 0x162   : > { %v2974_v63 = vadd.f32 1.0, %v6986_v17  ;;  %v1814_v1 = vsel %vm1109_vm2, %v1811_v29, %v1813_v32  ;;  %v2206_v6 = vmul.f32 %v7521_v45, %v9009_v51  ;;  %v2088_v34 = vsel %vm1384_vm3, %v2085_v40, %v2087_v48 }
 0x163   : > { %v2789_v43 = vadd.f32 %v2710_v2, %v2515_v28  ;;  %v2437_v10 = vrot.slane %v2298_v38, 1  ;;  %v2711_v58 = vrot.slane %v2572_v53, 2  ;;  %v1542_v42 = vadd.f32 %v1464_v39, %v1267_v44 }
 0x164   : > { %6991 = vrcp.f32 %v2974_v63  ;;  %v1049_v0 = vmul.f32 %v7465_v19, %v8873_v12  ;;  %v9069_v22 = vmul.f32 %v7465_v19, %v8916_v36  ;;  %v993_v62 = vmul.f32 %v7461_v18, %v8873_v12 }
 0x165   : > { %v9072_v50 = vadd.f32 %v8732_v49, %v2789_v43  ;;  %v2438_v29 = vsel %vm1109_vm2, %v2435_v11, %v2437_v10  ;;  %v1324_v40 = vmul.f32 %v7469_v20, %v8873_v12  ;;  %v1618_v2 = vadd.f32 %v1582_v14, %v1542_v42 }
 0x166   : > { %v1190_v54 = vrot.slane %v1049_v0, 1  ;;  %v1191_v35 = vrot.slane %v9069_v22, 1  ;;  %v9082_v13 = vmul.f32 %v7469_v20, %v8916_v36  ;;  %v1583_v11 = vmul.f32 %v7473_v21, %v8971_v30 }
 0x167   : > { %v6988_v8 = vpop.eup %6987  ;;  %v6516_v61 = vmul.f32 -1.442695, %v9072_v50  ;;  %v1465_v16 = vrot.slane %v1324_v40, 2  ;;  %v1675_v32 = vmul.f32 %v7477_v24, %v8971_v30  ;;  %v1892_v14 = vadd.f32 %v1814_v1, %v1618_v2 }
 0x168   : > { %v3081_v12 = vmul.f32 %v6988_v8, %v8935_v52  ;;  %v1192_v48 = vsel %vm1109_vm2, %v1190_v54, %v1191_v35  ;;  %v1466_v38 = vrot.slane %v9082_v13, 2  ;;  %v9096_v28 = vmul.f32 %v7477_v24, %v9009_v51 }
 0x169   : > { %6993 = vpow2.f32 %v6516_v61  ;;  %v1268_v17 = vadd.f32 %v1192_v48, %v993_v62  ;;  %v1815_v23 = vrot.slane %v1675_v32, 1  ;;  %v2166_v39 = vadd.f32 %v2088_v34, %v1892_v14 }
 0x16a   : > { %6782 = vmatmul.mubr.msk.f32.gmra.mxu0 %vm3098_vm4, %v3081_v12  ;;  %v1467_v53 = vsel %vm1384_vm3, %v1465_v16, %v1466_v38  ;;  %v1949_v52 = vmul.f32 %v7481_v25, %v8971_v30  ;;  %v9104_v63 = vmul.f32 %v7481_v25, %v9009_v51  ;;  %v2712_v44 = vsel %vm1384_vm3, %v2709_v47, %v2711_v58  ;;  %v6747_v58 = vpop.f32.mrf.mxu0 }
 0x16b   : > { %v1543_v1 = vadd.f32 %v1467_v53, %v1268_v17  ;;  %v1816_v43 = vrot.slane %v9096_v28, 1  ;;  %v2299_v10 = vmul.f32 %v7525_v46, %v7432_v5  ;;  %v2242_v42 = vadd.f32 %v2206_v6, %v2166_v39 }
 0x16c   : > { %v6990_v34 = vpop.eup %6989  ;;  %v2089_v0 = vrot.slane %v1949_v52, 2  ;;  %v2090_v62 = vrot.slane %v9104_v63, 2  ;;  %v9115_v40 = vmul.f32 %v7525_v46, %v7424_v3  ;;  %v2573_v6 = vmul.f32 %v8652_v41, %v7432_v5  ;;  %v3287_v52 = vpop.f32.mrf.mxu0 }
 0x16d   : > { %v2975_v2 = vadd.f32 1.0, %v6990_v34  ;;  %v1619_v54 = vadd.f32 %v1583_v11, %v1543_v1  ;;  %v1817_v55 = vsel %vm1109_vm2, %v1815_v23, %v1816_v43  ;;  %v2439_v47 = vrot.slane %v2299_v10, 1 }
 0x16e   : > { %v2516_v13 = vadd.f32 %v2438_v29, %v2242_v42  ;;  %v2091_v8 = vsel %vm1384_vm3, %v2089_v0, %v2090_v62  ;;  %v2440_v61 = vrot.slane %v9115_v40, 1  ;;  %v9124_v32 = vmul.f32 %v7521_v45, %v7432_v5 }
 0x16f   : > { %6995 = vrcp.f32 %v2975_v2  ;;  %v1893_v16 = vadd.f32 %v1817_v55, %v1619_v54  ;;  %v9128_v11 = vmul.f32 %v8652_v41, %v7424_v3  ;;  %v2713_v14 = vrot.slane %v2573_v6, 2 }
 0x170   : > { %12083 = vst [vmem:[#allocation6_spill] sm:$0xff] %v9124_v32  ;;  %v2790_v12 = vadd.f32 %v2712_v44, %v2516_v13  ;;  %v994_v29 = vmul.f32 %v7461_v18, %v8916_v36  ;;  %v1051_v48 = vmul.f32 %v7465_v19, %v8932_v15  ;;  %v9137_v23 = vsel %vm1109_vm2, %v2439_v47, %v2440_v61  ;;  %v9166_v47 = vld [vmem:[%s11872_s6] ss:$0 sm:$0xff]  ;;  %v6750_v13 = vpop.f32.mrf.mxu0 }
 0x171   : > { %v6992_v17 = vpop.eup %6991  ;;  %v2167_v28 = vadd.f32 %v2091_v8, %v1893_v16  ;;  %12084 = vst [vmem:[#allocation7_spill] sm:$0xff] %v9137_v23  ;;  %v2714_v39 = vrot.slane %v9128_v11, 2  ;;  %v1326_v53 = vmul.f32 %v7469_v20, %v8932_v15  ;;  %v1677_v1 = vmul.f32 %v7477_v24, %v9034_v37 }
 0x172   : > { %v3082_v63 = vmul.f32 %v6992_v17, %v8974_v26  ;;  %v9144_v36 = vadd.f32 %v8732_v49, %v2790_v12  ;;  %v1193_v44 = vrot.slane %v1051_v48, 1  ;;  %v1951_v42 = vmul.f32 %v7481_v25, %v9034_v37  ;;  %v3297_v48 = vpop.f32.mrf.mxu0 }
 0x173   : > { %v2243_v10 = vadd.f32 %v9124_v32, %v2167_v28  ;;  %v1468_v34 = vrot.slane %v1326_v53, 2  ;;  %v9154_v0 = vsel %vm1384_vm3, %v2713_v14, %v2714_v39  ;;  %v1818_v2 = vrot.slane %v1677_v1, 1 }
 0x174   : > { %6784 = vmatprep.mubr.msk.f32.mxu0 %vm3098_vm4, %v3082_v63  ;;  %v6517_v15 = vmul.f32 -1.442695, %v9144_v36  ;;  %12085 = vst [vmem:[#allocation8_spill] sm:$0xff] %v9154_v0  ;;  %v1194_v26 = vsel %vm1109_vm2, %v1191_v35, %v1193_v44  ;;  %v1584_v25 = vmul.f32 %v7473_v21, %v9009_v51  ;;  %v2092_v22 = vrot.slane %v1951_v42, 2 }
 0x175   : > { %v2517_v24 = vadd.f32 %v9137_v23, %v2243_v10  ;;  %v1269_v54 = vadd.f32 %v1194_v26, %v994_v29  ;;  %v1469_v55 = vsel %vm1384_vm3, %v1466_v38, %v1468_v34  ;;  %v2301_v35 = vmul.f32 %v7525_v46, %v7439_v7  ;;  %v6753_v34 = vpop.f32.mrf.mxu0 }
 0x176   : > { %v6994_v8 = vpop.eup %6993  ;;  %6997 = vpow2.f32 %v6517_v15  ;;  %v1819_v38 = vsel %vm1109_vm2, %v1816_v43, %v1818_v2  ;;  %v2575_v21 = vmul.f32 %v8652_v41, %v7439_v7  ;;  %v9175_v12 = vadd.f32 %v6747_v58, %v9166_v47 }
 0x177   : > { %v2976_v6 = vadd.f32 1.0, %v6994_v8  ;;  %v2791_v16 = vadd.f32 %v9154_v0, %v2517_v24  ;;  %v1544_v11 = vadd.f32 %v1469_v55, %v1269_v54  ;;  %v2093_v46 = vsel %vm1384_vm3, %v2090_v62, %v2092_v22  ;;  %v3307_v26 = vpop.f32.mrf.mxu0 }
 0x178   : > { %v2442_v17 = vrot.slane %v2301_v35, 1  ;;  %v6563_v28 = vmul.f32 -1.442695, %v9175_v12  ;;  %v9185_v41 = vmul.f32 %v7521_v45, %v7424_v3  ;;  %v9188_v58 = vadd.f32 %v9166_v47, %v3287_v52 }
 0x179   : > { %6999 = vrcp.f32 %v2976_v6  ;;  %v9178_v14 = vadd.f32 %v8732_v49, %v2791_v16  ;;  %v1620_v29 = vadd.f32 %v1584_v25, %v1544_v11  ;;  %v2716_v44 = vrot.slane %v2575_v21, 2 }
 0x17a   : > { %12086 = vst [vmem:[#allocation9_spill] sm:$0xff] %v9185_v41  ;;  %7001 = vpow2.f32 %v6563_v28  ;;  %v6562_v10 = vmul.f32 -1.442695, %v9188_v58  ;;  %v9195_v42 = vsel %vm1109_vm2, %v2440_v61, %v2442_v17  ;;  %v9204_v15 = vadd.f32 %v6750_v13, %v9166_v47 }
 0x17b   : > { %v6518_v53 = vmul.f32 -1.442695, %v9178_v14  ;;  %v1894_v43 = vadd.f32 %v1819_v38, %v1620_v29  ;;  %12087 = vst [vmem:[#allocation10_spill] sm:$0xff] %v9195_v42  ;;  %v9200_v52 = vsel %vm1384_vm3, %v2714_v39, %v2716_v44  ;;  %v9209_v54 = vadd.f32 %v9166_v47, %v3297_v48  ;;  %v6756_v39 = vpop.f32.mrf.mxu0 }
 0x17c   : > { %v6996_v63 = vpop.eup %6995  ;;  %12088 = vst [vmem:[#allocation11_spill] sm:$0xff] %v9200_v52  ;;  %v6565_v61 = vmul.f32 -1.442695, %v9204_v15  ;;  %v9216_v8 = vadd.f32 %v6753_v34, %v9166_v47  ;;  %v9226_v48 = vadd.f32 %v6756_v39, %v9166_v47 }
 0x17d   : > { %v3083_v1 = vmul.f32 %v6996_v63, %v9026_v31  ;;  %7003 = vpow2.f32 %v6518_v53  ;;  %v2168_v62 = vadd.f32 %v2093_v46, %v1894_v43  ;;  %v6564_v13 = vmul.f32 -1.442695, %v9209_v54  ;;  %v3317_v11 = vpop.f32.mrf.mxu0  ;;  %v9236_v63 = vld [vmem:[%s11873_s7] sm:$0xff] }
 0x17e   : > { %7005 = vpow2.f32 %v6562_v10  ;;  %v6567_v6 = vmul.f32 -1.442695, %v9216_v8  ;;  %v9229_v46 = vadd.f32 %v9166_v47, %v3317_v11  ;;  %v6569_v43 = vmul.f32 -1.442695, %v9226_v48 }
 0x17f   : > { %6785 = vmatmul.mubr.msk.f32.gmra.mxu0 %vm3098_vm4, %v3083_v1  ;;  %v2244_v45 = vadd.f32 %v9185_v41, %v2168_v62  ;;  %7007 = vpow2.f32 %v6565_v61  ;;  %v6759_v53 = vpop.f32.mrf.mxu0  ;;  %v9242_v34 = vrot.slane %v9236_v63, %v999_v9 }
 0x180   : > { %v6568_v44 = vmul.f32 -1.442695, %v9229_v46 }
 0x181   : > { %v2518_v31 = vadd.f32 %v9195_v42, %v2244_v45  ;;  %v3327_v1 = vpop.f32.mrf.mxu0  ;;  %v9245_v45 = vadd.f32 %v6759_v53, %v9166_v47  ;;  %v4075_v9 = vmul.f32 %v9242_v34, %v7432_v5  ;;  %v4076_v39 = vmul.f32 %v9242_v34, %v7424_v3 }
 0x183   : > { %v6998_v2 = vpop.eup %6997  ;;  %v2792_v40 = vadd.f32 %v9200_v52, %v2518_v31  ;;  %v4172_v53 = vrot.slane %v4076_v39, 1 }
 0x184   : > { %v2977_v24 = vadd.f32 1.0, %v6998_v2 }
 0x185   : > { %v9212_v55 = vadd.f32 %v8732_v49, %v2792_v40  ;;  %v9223_v49 = vadd.f32 %v9166_v47, %v3307_v26  ;;  %v9249_v26 = vadd.f32 %v9166_v47, %v3327_v1 }
 0x186   : > { %v7000_v25 = vpop.eup %6999  ;;  %7009 = vrcp.f32 %v2977_v24 }
 0x187   : > { %v3084_v22 = vmul.f32 %v7000_v25, %v9072_v50  ;;  %v6519_v35 = vmul.f32 -1.442695, %v9212_v55  ;;  %v7002_v16 = vpop.eup %7001  ;;  %v6566_v28 = vmul.f32 -1.442695, %v9223_v49  ;;  %v6571_v25 = vmul.f32 -1.442695, %v9245_v45 }
 0x188   : > { %v3567_v21 = vadd.f32 1.0, %v7002_v16  ;;  %v4077_v16 = vmul.f32 %v9242_v34, %v7439_v7 }
 0x189   : > { %6787 = vmatprep.mubr.msk.f32.mxu0 %vm3098_vm4, %v3084_v22  ;;  %7011 = vpow2.f32 %v6519_v35  ;;  %v6570_v35 = vmul.f32 -1.442695, %v9249_v26 }
 0x18a   : > { %v7004_v38 = vpop.eup %7003  ;;  %7013 = vpow2.f32 %v6564_v13 }
 0x18b   : > { %v2978_v29 = vadd.f32 1.0, %v7004_v38  ;;  %7015 = vpow2.f32 %v6567_v6  ;;  %v7006_v50 = vpop.eup %7005  ;;  %v12090_v38 = vsub.s32 0, %v7428_v4 }
 0x18c   : > { %7017 = vrcp.f32 %v3567_v21  ;;  %v3566_v17 = vadd.f32 1.0, %v7006_v50  ;;  %v7008_v62 = vpop.eup %7007 }
 0x18d   : > { %7019 = vrcp.f32 %v2978_v29  ;;  %v3569_v40 = vadd.f32 1.0, %v7008_v62  ;;  %v9268_v21 = vrot.slane %v9236_v63, %v12090_v38 }
 0x18e   : > { %7021 = vrcp.f32 %v3566_v17 }
 0x18f   : > { %7023 = vpow2.f32 %v6566_v28  ;;  %v4171_v28 = vrot.slane %v4075_v9, 1  ;;  %v4040_v9 = vmul.f32 %v9268_v21, %v7424_v3 }
 0x190   : > { %7025 = vpow2.f32 %v6569_v43 }
 0x191   : > { %7027 = vpow2.f32 %v6568_v44  ;;  %v6762_v50 = vpop.f32.mrf.mxu0  ;;  %v4173_v39 = vsel %vm1109_vm2, %v4171_v28, %v4172_v53 }
 0x193   : > { %v7010_v10 = vpop.eup %7009 }
 0x194   : > { %v3085_v31 = vmul.f32 %v7010_v10, %v9144_v36  ;;  %v12089_v36 = vsub.s32 2, %v7428_v4 }
 0x196   : > { %v7012_v2 = vpop.eup %7011  ;;  %6788 = vmatmul.mubr.msk.f32.gmra.mxu0 %vm3098_vm4, %v3085_v31  ;;  %v9260_v22 = vrot.slane %v9236_v63, %v12089_v36  ;;  %v4174_v31 = vrot.slane %v4077_v16, 1 }
 0x197   : > { %v7014_v61 = vpop.eup %7013  ;;  %v2979_v24 = vadd.f32 1.0, %v7012_v2 }
 0x198   : > { %v7016_v13 = vpop.eup %7015  ;;  %v3568_v29 = vadd.f32 1.0, %v7014_v61  ;;  %v4319_v1 = vmul.f32 %v9260_v22, %v7432_v5  ;;  %v4320_v62 = vmul.f32 %v9260_v22, %v7424_v3  ;;  %v3337_v61 = vpop.f32.mrf.mxu0  ;;  %v4175_v16 = vsel %vm1109_vm2, %v4172_v53, %v4174_v31 }
 0x199   : > { %v7018_v6 = vpop.eup %7017  ;;  %7029 = vrcp.f32 %v2979_v24  ;;  %v3571_v2 = vadd.f32 1.0, %v7016_v13  ;;  %v4039_v24 = vmul.f32 %v9268_v21, %v7432_v5  ;;  %v9290_v38 = vadd.f32 %v9166_v47, %v3337_v61 }
 0x19a   : > { %v7020_v11 = vpop.eup %7019  ;;  %7031 = vrcp.f32 %v3569_v40  ;;  %v3675_v44 = vmul.f32 %v7018_v6, %v9175_v12  ;;  %v4321_v40 = vmul.f32 %v9260_v22, %v7439_v7  ;;  %v9281_v12 = vadd.f32 %v6762_v50, %v9166_v47 }
 0x19b   : > { %v3086_v17 = vmul.f32 %v7020_v11, %v9178_v14  ;;  %7033 = vpow2.f32 %v6571_v25  ;;  %v7022_v43 = vpop.eup %7021  ;;  %v4415_v36 = vrot.slane %v4319_v1, 2 }
 0x19c   : > { %7035 = vpow2.f32 %v6570_v35  ;;  %v3674_v10 = vmul.f32 %v7022_v43, %v9188_v58  ;;  %v7024_v14 = vpop.eup %7023  ;;  %v3893_v25 = vrot.slane %v3675_v44, 7  ;;  %v4416_v35 = vrot.slane %v4320_v62, 2 }
 0x19d   : > { %6790 = vmatprep.mubr.msk.f32.mxu0 %vm3098_vm4, %v3086_v17  ;;  %7037 = vrcp.f32 %v3568_v29  ;;  %v7026_v58 = vpop.eup %7025  ;;  %v3570_v11 = vadd.f32 1.0, %v7024_v14  ;;  %v4418_v17 = vrot.slane %v4321_v40, 2  ;;  %v6573_v28 = vmul.f32 -1.442695, %v9281_v12 }
 0x19e   : > { %v3892_v13 = vrot.slane %v3674_v10, 7  ;;  %v7028_v6 = vpop.eup %7027  ;;  %7039 = vrcp.f32 %v3571_v2  ;;  %v4283_v43 = vadd.f32 %v4173_v39, %v4039_v24  ;;  %v3573_v44 = vadd.f32 1.0, %v7026_v58 }
 0x19f   : > { %v4016_v1 = vsel %vm794_vm1, %v3893_v25, 0.0  ;;  %v4284_v62 = vadd.f32 %v4175_v16, %v4040_v9  ;;  %v4417_v10 = vsel %vm1384_vm3, %v4415_v36, %v4416_v35  ;;  %v3572_v53 = vadd.f32 1.0, %v7028_v6 }
 0x1a0   : > { %v3894_v29 = vsel %vm794_vm1, %v3892_v13, %v3893_v25  ;;  %v3998_v50 = vsel %vm794_vm1, 0.0, %v3892_v13  ;;  %7041 = vrcp.f32 %v3570_v11  ;;  %v6572_v14 = vmul.f32 -1.442695, %v9290_v38 }
 0x1a1   : > { %v4078_v31 = vmul.f32 %v9242_v34, %v3998_v50  ;;  %v4079_v2 = vmul.f32 %v9242_v34, %v3894_v29  ;;  %v12091_v40 = vsub.s32 4, %v7428_v4  ;;  %v4419_v24 = vsel %vm1384_vm3, %v4416_v35, %v4418_v17 }
 0x1a2   : > { %7043 = vpow2.f32 %v6573_v28  ;;  %v4080_v58 = vmul.f32 %v9242_v34, %v4016_v1  ;;  %v12092_v25 = vsub.s32 5, %v7428_v4  ;;  %v4527_v16 = vadd.f32 %v4417_v10, %v4283_v43 }
 0x1a3   : > { %v9303_v13 = vrot.slane %v9236_v63, %v12091_v40  ;;  %7045 = vrcp.f32 %v3573_v44  ;;  %v12093_v11 = vsub.s32 3, %v7428_v4  ;;  %v12094_v35 = vsub.s32 7, %v7428_v4 }
 0x1a4   : > { %v9311_v36 = vrot.slane %v9236_v63, %v12092_v25  ;;  %7047 = vrcp.f32 %v3572_v53  ;;  %v4176_v28 = vrot.slane %v4078_v31, 1  ;;  %v4528_v25 = vadd.f32 %v4419_v24, %v4284_v62 }
 0x1a5   : > { %v9316_v40 = vrot.slane %v9236_v63, %v12093_v11  ;;  %v9321_v17 = vrot.slane %v9236_v63, %v12094_v35  ;;  %7049 = vpow2.f32 %v6572_v14  ;;  %v4324_v43 = vmul.f32 %v9260_v22, %v4016_v1 }
 0x1a6   : > { %v7030_v61 = vpop.eup %7029  ;;  %v4631_v44 = vmul.f32 %v9303_v13, %v3998_v50  ;;  %v4632_v10 = vmul.f32 %v9303_v13, %v3894_v29  ;;  %v4179_v35 = vrot.slane %v4080_v58, 1  ;;  %v4633_v53 = vmul.f32 %v9303_v13, %v4016_v1 }
 0x1a7   : > { %v7032_v9 = vpop.eup %7031  ;;  %v3087_v39 = vmul.f32 %v7030_v61, %v9212_v55  ;;  %v4177_v61 = vrot.slane %v4079_v2, 1  ;;  %v4322_v3 = vmul.f32 %v9260_v22, %v3998_v50  ;;  %v4323_v31 = vmul.f32 %v9260_v22, %v3894_v29 }
 0x1a8   : > { %v7034_v6 = vpop.eup %7033  ;;  %v9328_v11 = vmul.f32 %v7032_v9, %v9204_v15  ;;  %v4877_v62 = vmul.f32 %v9311_v36, %v4016_v1  ;;  %v4041_v2 = vmul.f32 %v9268_v21, %v3998_v50  ;;  %v4563_v9 = vmul.f32 %v9316_v40, %v3998_v50 }
 0x1a9   : > { %v7036_v55 = vpop.eup %7035  ;;  %6791 = vmatmul.mubr.msk.f32.gmra.mxu0 %vm3098_vm4, %v3087_v39  ;;  %v3575_v14 = vadd.f32 1.0, %v7034_v6  ;;  %v4042_v39 = vmul.f32 %v9268_v21, %v3894_v29  ;;  %v4178_v5 = vsel %vm1109_vm2, %v4176_v28, %v4177_v61  ;;  %v4180_v15 = vsel %vm1109_vm2, %v4177_v61, %v4179_v35 }
 0x1aa   : > { %v7038_v7 = vpop.eup %7037  ;;  %v3574_v24 = vadd.f32 1.0, %v7036_v55  ;;  %v4727_v52 = vrot.slane %v4631_v44, 1  ;;  %v4728_v42 = vrot.slane %v4632_v10, 1  ;;  %v3896_v41 = vrot.slane %v9328_v11, 7 }
 0x1ab   : > { %v7040_v58 = vpop.eup %7039  ;;  %v3676_v0 = vmul.f32 %v7038_v7, %v9209_v54  ;;  %v4420_v1 = vrot.slane %v4322_v3, 2  ;;  %v4421_v23 = vrot.slane %v4323_v31, 2  ;;  %v4564_v6 = vmul.f32 %v9316_v40, %v3894_v29 }
 0x1ac   : > { %v9343_v55 = vmul.f32 %v9311_v36, %v3894_v29  ;;  %v4423_v60 = vrot.slane %v4324_v43, 2  ;;  %v4285_v28 = vadd.f32 %v4178_v5, %v4041_v2  ;;  %v4286_v32 = vadd.f32 %v4180_v15, %v4042_v39 }
 0x1ad   : > { %v9346_v61 = vmul.f32 %v9311_v36, %v3998_v50  ;;  %v4730_v35 = vrot.slane %v4633_v53, 1  ;;  %v4974_v44 = vrot.slane %v4877_v62, 2  ;;  %v4595_v10 = vadd.f32 %v4563_v9, %v4527_v16  ;;  %v7042_v7 = vpop.eup %7041 }
 0x1ae   : > { %v9349_v11 = vmul.f32 %v7040_v58, %v9216_v8  ;;  %v4729_v3 = vsel %vm1109_vm2, %v4727_v52, %v4728_v42  ;;  %v4017_v54 = vsel %vm794_vm1, %v3896_v41, 0.0  ;;  %v3895_v31 = vrot.slane %v3676_v0, 7 }
 0x1af   : > { %7051 = vrcp.f32 %v3575_v14  ;;  %v7044_v29 = vpop.eup %7043  ;;  %v4422_v5 = vsel %vm1384_vm3, %v4420_v1, %v4421_v23  ;;  %v4424_v43 = vsel %vm1384_vm3, %v4421_v23, %v4423_v60  ;;  %v4596_v50 = vadd.f32 %v4564_v6, %v4528_v25  ;;  %v9367_v14 = vld [vmem:[%s11873_s7 + $0x8] ss:$0 sm:$0xff] }
 0x1b0   : > { %v11898_v53 = vrot.slane %v9343_v55, 2  ;;  %v7046_v62 = vpop.eup %7045  ;;  %v9356_v16 = vadd.f32 %v4422_v5, %v4285_v28  ;;  %v9358_v8 = vadd.f32 %v4424_v43, %v4286_v32  ;;  %v4731_v2 = vsel %vm1109_vm2, %v4728_v42, %v4730_v35  ;;  %v6765_v35 = vpop.f32.mrf.mxu0 }
 0x1b1   : > { %v7048_v39 = vpop.eup %7047  ;;  %v9362_v0 = vadd.f32 %v4729_v3, %v4595_v10  ;;  %v9370_v60 = vmul.f32 %v9242_v34, %v4017_v54  ;;  %v3899_v23 = vrot.slane %v9349_v11, 7  ;;  %v3678_v32 = vmul.f32 %v7042_v7, %v9223_v49 }
 0x1b2   : > { %12095 = vst [vmem:[#allocation12_spill] sm:$0xff] %v9356_v16  ;;  %12096 = vst [vmem:[#allocation13_spill] sm:$0xff] %v9358_v8  ;;  %v7050_v25 = vpop.eup %7049  ;;  %v9375_v42 = vmul.f32 %v9260_v22, %v4017_v54  ;;  %v9378_v15 = vmul.f32 %v9303_v13, %v4017_v54  ;;  %v9381_v9 = vmul.f32 %v9311_v36, %v4017_v54  ;;  %v9384_v58 = vsel %vm794_vm1, 0.0, %v3895_v31 }
 0x1b3   : > { %12097 = vst [vmem:[#allocation14_spill] sm:$0xff] %v9370_v60  ;;  %v9386_v1 = vadd.f32 %v4731_v2, %v4596_v50  ;;  %v9391_v6 = vsel %vm1384_vm3, %v11898_v53, %v4974_v44  ;;  %v9394_v49 = vmul.f32 %v9321_v17, %v4017_v54  ;;  %v9397_v28 = vmul.f32 %v7046_v62, %v9226_v48  ;;  %v3347_v2 = vpop.f32.mrf.mxu0 }
 0x1b4   : > { %12098 = vst [vmem:[#allocation15_spill] sm:$0xff] %v9375_v42  ;;  %12099 = vst [vmem:[#allocation16_spill] sm:$0xff] %v9378_v15  ;;  %v9400_v10 = vmul.f32 %v9367_v14, %v4017_v54  ;;  %v9403_v11 = vsel %vm794_vm1, %v3895_v31, %v3896_v41  ;;  %v9406_v7 = vmul.f32 %v7048_v39, %v9229_v46  ;;  %7053 = vrcp.f32 %v3574_v24 }
 0x1b5   : > { %12100 = vst [vmem:[#allocation17_spill] sm:$0xff] %v9381_v9  ;;  %v9411_v3 = vmul.f32 %v9268_v21, %v9384_v58  ;;  %v9415_v48 = vmul.f32 %v9242_v34, %v9384_v58  ;;  %v4018_v54 = vsel %vm794_vm1, %v3899_v23, 0.0  ;;  %v3898_v31 = vrot.slane %v3678_v32, 7 }
 0x1b6   : > { %v9424_v43 = vmul.f32 %v9242_v34, %v9403_v11  ;;  %v9428_v50 = vmul.f32 %v9260_v22, %v9384_v58  ;;  %v9432_v62 = vmul.f32 %v9260_v22, %v9403_v11  ;;  %v9435_v39 = vmul.f32 %v9242_v34, %v4018_v54 }
 0x1b7   : > { %12101 = vst [vmem:[#allocation18_spill] sm:$0xff] %v9411_v3  ;;  %12102 = vst [vmem:[#allocation19_spill] sm:$0xff] %v9415_v48  ;;  %v9438_v32 = vmul.f32 %v9260_v22, %v4018_v54  ;;  %v9441_v5 = vmul.f32 %v9303_v13, %v4018_v54  ;;  %v9444_v44 = vmul.f32 %v9311_v36, %v4018_v54  ;;  %v3902_v52 = vrot.slane %v9397_v28, 7 }
 0x1b8   : > { %12103 = vst [vmem:[#allocation20_spill] sm:$0xff] %v9428_v50  ;;  %12104 = vst [vmem:[#allocation21_spill] sm:$0xff] %v9432_v62  ;;  %v9448_v41 = vmul.f32 %v9321_v17, %v4018_v54  ;;  %v9451_v24 = vmul.f32 %v9367_v14, %v4018_v54  ;;  %v9457_v42 = vmul.f32 %v9303_v13, %v9384_v58  ;;  %v9460_v60 = vsel %vm794_vm1, 0.0, %v3898_v31 }
 0x1b9   : > { %12105 = vst [vmem:[#allocation22_spill] sm:$0xff] %v9435_v39  ;;  %12106 = vst [vmem:[#allocation23_spill] sm:$0xff] %v9438_v32  ;;  %v3577_v3 = vadd.f32 1.0, %v7044_v29  ;;  %v9466_v15 = vsel %vm794_vm1, %v3898_v31, %v3899_v23  ;;  %v9476_v8 = vmul.f32 %v9242_v34, %v9460_v60  ;;  %v4019_v23 = vsel %vm794_vm1, %v3902_v52, 0.0 }
 0x1ba   : > { %12107 = vst [vmem:[#allocation24_spill] sm:$0xff] %v9441_v5  ;;  %12108 = vst [vmem:[#allocation25_spill] sm:$0xff] %v9444_v44  ;;  %v9481_v31 = vmul.f32 %v9242_v34, %v9466_v15  ;;  %v3576_v53 = vadd.f32 1.0, %v7050_v25  ;;  %v9486_v16 = vmul.f32 %v9260_v22, %v9460_v60  ;;  %v3901_v54 = vrot.slane %v9406_v7, 7 }
 0x1bb   : > { %12109 = vst [vmem:[#allocation26_spill] sm:$0xff] %v9457_v42  ;;  %12110 = vst [vmem:[#allocation27_spill] sm:$0xff] %v9476_v8  ;;  %7055 = vrcp.f32 %v3577_v3  ;;  %v9490_v42 = vmul.f32 %v9260_v22, %v9466_v15  ;;  %v9494_v46 = vadd.f32 %v6765_v35, %v9166_v47  ;;  %v9498_v32 = vmul.f32 %v9268_v21, %v9460_v60 }
 0x1bc   : > { %v7052_v9 = vpop.eup %7051  ;;  %v6768_v28 = vpop.f32.mrf.mxu0  ;;  %12111 = vst [vmem:[#allocation28_spill] sm:$0xff] %v9481_v31  ;;  %12112 = vst [vmem:[#allocation29_spill] sm:$0xff] %v9486_v16  ;;  %v9505_v25 = vmul.f32 %v9242_v34, %v4019_v23  ;;  %7057 = vrcp.f32 %v3576_v53  ;;  %v9509_v7 = vmul.f32 %v9260_v22, %v4019_v23  ;;  %v9512_v35 = vadd.f32 %v9166_v47, %v3347_v2 }
 0x1bd   : > { %v3683_v48 = vmul.f32 %v7052_v9, %v9245_v45  ;;  %12113 = vst [vmem:[#allocation30_spill] sm:$0xff] %v9490_v42  ;;  %12114 = vst [vmem:[#allocation31_spill] sm:$0xff] %v9498_v32  ;;  %v9502_v45 = vmul.f32 %v9303_v13, %v9460_v60  ;;  %v9515_v39 = vadd.f32 %v6768_v28, %v9166_v47  ;;  %v6575_v5 = vmul.f32 -1.442695, %v9494_v46 }
 0x1be   : > { %v3357_v29 = vpop.f32.mrf.mxu0  ;;  %12116 = vst [vmem:[#allocation33_spill] sm:$0xff] %v9505_v25  ;;  %12117 = vst [vmem:[#allocation34_spill] sm:$0xff] %v9509_v7  ;;  %v9525_v8 = vmul.f32 %v9303_v13, %v4019_v23  ;;  %v9528_v2 = vmul.f32 %v9311_v36, %v4019_v23  ;;  %v9531_v28 = vmul.f32 %v9321_v17, %v4019_v23  ;;  %v6574_v16 = vmul.f32 -1.442695, %v9512_v35 }
 0x1bf   : > { %12115 = vst [vmem:[#allocation32_spill] sm:$0xff] %v9502_v45  ;;  %v3905_v44 = vrot.slane %v3683_v48, 7  ;;  %v9520_v45 = vadd.f32 %v9166_v47, %v3357_v29  ;;  %v9534_v48 = vmul.f32 %v9367_v14, %v4019_v23  ;;  %v9537_v32 = vsel %vm794_vm1, %v3901_v54, %v3902_v52 }
 0x1c0   : > { %12118 = vst [vmem:[#allocation35_spill] sm:$0xff] %v9525_v8  ;;  %12119 = vst [vmem:[#allocation36_spill] sm:$0xff] %v9528_v2  ;;  %v6577_v42 = vmul.f32 -1.442695, %v9515_v39  ;;  %v9545_v31 = vsel %vm794_vm1, 0.0, %v3901_v54  ;;  %7059 = vpow2.f32 %v6575_v5  ;;  %v9557_v3 = vmul.f32 %v9260_v22, %v9537_v32 }
 0x1c1   : > { %v7054_v9 = vpop.eup %7053  ;;  %12120 = vst [vmem:[#allocation37_spill] sm:$0xff] %v9531_v28  ;;  %12121 = vst [vmem:[#allocation38_spill] sm:$0xff] %v9534_v48  ;;  %v4020_v50 = vsel %vm794_vm1, %v3905_v44, 0.0  ;;  %v6576_v23 = vmul.f32 -1.442695, %v9520_v45  ;;  %7061 = vpow2.f32 %v6574_v16  ;;  %v9563_v5 = vmul.f32 %v9242_v34, %v9545_v31 }
 0x1c2   : > { %12122 = vst [vmem:[#allocation39_spill] sm:$0xff] %v9537_v32  ;;  %v3682_v29 = vmul.f32 %v7054_v9, %v9249_v26  ;;  %12123 = vst [vmem:[#allocation40_spill] sm:$0xff] %v9545_v31  ;;  %v9553_v9 = vmul.f32 %v9242_v34, %v9537_v32  ;;  %v9567_v26 = vmul.f32 %v9260_v22, %v9545_v31  ;;  %7063 = vpow2.f32 %v6577_v42 }
 0x1c3   : > { %12125 = vst [vmem:[#allocation42_spill] sm:$0xff] %v9557_v3  ;;  %12126 = vst [vmem:[#allocation43_spill] sm:$0xff] %v9563_v5  ;;  %v9570_v52 = vmul.f32 %v9242_v34, %v4020_v50  ;;  %v9574_v25 = vmul.f32 %v9268_v21, %v9545_v31  ;;  %v9577_v53 = vmul.f32 %v9260_v22, %v4020_v50  ;;  %7065 = vpow2.f32 %v6576_v23 }
 0x1c4   : > { %12124 = vst [vmem:[#allocation41_spill] sm:$0xff] %v9553_v9  ;;  %v3904_v7 = vrot.slane %v3682_v29, 7  ;;  %12127 = vst [vmem:[#allocation44_spill] sm:$0xff] %v9567_v26  ;;  %v9580_v16 = vmul.f32 %v9303_v13, %v4020_v50  ;;  %v9586_v8 = vmul.f32 %v9303_v13, %v9545_v31  ;;  %v9589_v42 = vmul.f32 %v9311_v36, %v4020_v50 }
 0x1c5   : > { %12128 = vst [vmem:[#allocation45_spill] sm:$0xff] %v9570_v52  ;;  %12129 = vst [vmem:[#allocation46_spill] sm:$0xff] %v9574_v25  ;;  %v9592_v25 = vmul.f32 %v9321_v17, %v4020_v50  ;;  %v9605_v28 = vmul.f32 %v9367_v14, %v4020_v50 }
 0x1c6   : > { %12130 = vst [vmem:[#allocation47_spill] sm:$0xff] %v9577_v53  ;;  %12131 = vst [vmem:[#allocation48_spill] sm:$0xff] %v9580_v16  ;;  %v9595_v48 = vsel %vm794_vm1, %v3904_v7, %v3905_v44  ;;  %v9598_v23 = vsel %vm794_vm1, 0.0, %v3904_v7 }
 0x1c7   : > { %12132 = vst [vmem:[#allocation49_spill] sm:$0xff] %v9586_v8  ;;  %12133 = vst [vmem:[#allocation50_spill] sm:$0xff] %v9589_v42  ;;  %v9621_v50 = vmul.f32 %v9260_v22, %v9598_v23  ;;  %v9644_v53 = vmul.f32 %v9268_v21, %v9598_v23  ;;  %v9657_v32 = vmul.f32 %v9303_v13, %v9598_v23 }
 0x1c8   : > { %v7056_v29 = vpop.eup %7055  ;;  %12134 = vst [vmem:[#allocation51_spill] sm:$0xff] %v9592_v25  ;;  %12135 = vst [vmem:[#allocation52_spill] sm:$0xff] %v9595_v48 }
 0x1c9   : > { %v3685_v54 = vmul.f32 %v7056_v29, %v9281_v12  ;;  %v7058_v9 = vpop.eup %7057  ;;  %12136 = vst [vmem:[#allocation53_spill] sm:$0xff] %v9605_v28  ;;  %v9613_v12 = vmul.f32 %v9242_v34, %v9598_v23  ;;  %v9617_v29 = vmul.f32 %v9242_v34, %v9595_v48  ;;  %12139 = vst [vmem:[#allocation56_spill] sm:$0xff] %v9621_v50 }
 0x1ca   : > { %v3684_v7 = vmul.f32 %v7058_v9, %v9290_v38  ;;  %12145 = vst [vmem:[#allocation62_spill] sm:$0xff] %v9644_v53  ;;  %12148 = vst [vmem:[#allocation65_spill] sm:$0xff] %v9657_v32 }
 0x1cb   : > { %v3908_v31 = vrot.slane %v3685_v54, 7  ;;  %12137 = vst [vmem:[#allocation54_spill] sm:$0xff] %v9613_v12  ;;  %12138 = vst [vmem:[#allocation55_spill] sm:$0xff] %v9617_v29  ;;  %v9626_v54 = vmul.f32 %v9260_v22, %v9595_v48 }
 0x1cc   : > { %v3907_v9 = vrot.slane %v3684_v7, 7 }
 0x1cd   : > { %12140 = vst [vmem:[#allocation57_spill] sm:$0xff] %v9626_v54  ;;  %v4021_v38 = vsel %vm794_vm1, %v3908_v31, 0.0  ;;  %v7060_v42 = vpop.eup %7059 }
 0x1ce   : > { %v9630_v8 = vmul.f32 %v9242_v34, %v4021_v38  ;;  %v9633_v62 = vmul.f32 %v9260_v22, %v4021_v38  ;;  %v9636_v44 = vmul.f32 %v9303_v13, %v4021_v38  ;;  %v9639_v3 = vmul.f32 %v9311_v36, %v4021_v38  ;;  %v7062_v16 = vpop.eup %7061 }
 0x1cf   : > { %v9647_v7 = vmul.f32 %v9321_v17, %v4021_v38  ;;  %v9650_v52 = vmul.f32 %v9367_v14, %v4021_v38  ;;  %v9661_v53 = vsel %vm794_vm1, %v3907_v9, %v3908_v31  ;;  %v9664_v25 = vsel %vm794_vm1, 0.0, %v3907_v9  ;;  %v7064_v28 = vpop.eup %7063 }
 0x1d0   : > { %12141 = vst [vmem:[#allocation58_spill] sm:$0xff] %v9630_v8  ;;  %12142 = vst [vmem:[#allocation59_spill] sm:$0xff] %v9633_v62  ;;  %v3579_v9 = vadd.f32 1.0, %v7060_v42  ;;  %v3578_v32 = vadd.f32 1.0, %v7062_v16  ;;  %v7066_v48 = vpop.eup %7065  ;;  %v9681_v5 = vmul.f32 %v9242_v34, %v9664_v25  ;;  %v9685_v26 = vmul.f32 %v9242_v34, %v9661_v53 }
 0x1d1   : > { %12143 = vst [vmem:[#allocation60_spill] sm:$0xff] %v9636_v44  ;;  %12144 = vst [vmem:[#allocation61_spill] sm:$0xff] %v9639_v3  ;;  %v3581_v12 = vadd.f32 1.0, %v7064_v28  ;;  %v3580_v50 = vadd.f32 1.0, %v7066_v48  ;;  %v1052_v42 = vmul.f32 %v7465_v19, %v8971_v30  ;;  %v1053_v31 = vmul.f32 %v7465_v19, %v9009_v51 }
 0x1d2   : > { %12146 = vst [vmem:[#allocation63_spill] sm:$0xff] %v9647_v7  ;;  %12147 = vst [vmem:[#allocation64_spill] sm:$0xff] %v9650_v52  ;;  %7067 = vrcp.f32 %v3579_v9  ;;  %v1327_v62 = vmul.f32 %v7469_v20, %v8971_v30  ;;  %v9699_v28 = vmul.f32 %v9260_v22, %v9664_v25  ;;  %v995_v48 = vmul.f32 %v7461_v18, %v8971_v30 }
 0x1d3   : > { %v6771_v2 = vpop.f32.mrf.mxu0  ;;  %7069 = vrcp.f32 %v3578_v32  ;;  %v1328_v32 = vmul.f32 %v7469_v20, %v9009_v51  ;;  %v1196_v9 = vrot.slane %v1053_v31, 1  ;;  %v1054_v44 = vmul.f32 %v7465_v19, %v9034_v37 }
 0x1d4   : > { %v9667_v38 = vadd.f32 %v6771_v2, %v9166_v47  ;;  %v9677_v2 = vmul.f32 %v9268_v21, %v9664_v25  ;;  %12150 = vst [vmem:[#allocation67_spill] sm:$0xff] %v9699_v28  ;;  %7071 = vrcp.f32 %v3581_v12  ;;  %v1470_v8 = vrot.slane %v1327_v62, 2 }
 0x1d5   : > { %v3367_v29 = vpop.f32.mrf.mxu0  ;;  %7073 = vrcp.f32 %v3580_v50  ;;  %v1471_v3 = vrot.slane %v1328_v32, 2  ;;  %v996_v52 = vmul.f32 %v7461_v18, %v9009_v51  ;;  %v1329_v50 = vmul.f32 %v7469_v20, %v9034_v37 }
 0x1d6   : > { %12149 = vst [vmem:[#allocation66_spill] sm:$0xff] %v9677_v2  ;;  %v6579_v54 = vmul.f32 -1.442695, %v9667_v38  ;;  %v9689_v16 = vadd.f32 %v9166_v47, %v3367_v29  ;;  %v1195_v29 = vrot.slane %v1052_v42, 1  ;;  %v9707_v2 = vmul.f32 %v9260_v22, %v9661_v53 }
 0x1d7   : > { %v9719_v62 = vmul.f32 %v9303_v13, %v9664_v25  ;;  %v1198_v42 = vrot.slane %v1054_v44, 1  ;;  %v1473_v18 = vrot.slane %v1329_v50, 2  ;;  %v12154_v19 = vrot.slane %v9346_v61, 2 }
 0x1d8   : > { %12151 = vst [vmem:[#allocation68_spill] sm:$0xff] %v9707_v2  ;;  %7075 = vpow2.f32 %v6579_v54  ;;  %v6578_v12 = vmul.f32 -1.442695, %v9689_v16  ;;  %v1197_v30 = vsel %vm1109_vm2, %v1195_v29, %v1196_v9  ;;  %v1472_v54 = vsel %vm1384_vm3, %v1470_v8, %v1471_v3 }
 0x1d9   : > { %v1270_v31 = vadd.f32 %v1197_v30, %v995_v48  ;;  %v12152_v29 = vsub.s32 6, %v7428_v4  ;;  %v1199_v48 = vsel %vm1109_vm2, %v1196_v9, %v1198_v42  ;;  %v1474_v44 = vsel %vm1384_vm3, %v1471_v3, %v1473_v18 }
 0x1da   : > { %7077 = vpow2.f32 %v6578_v12  ;;  %v1271_v8 = vadd.f32 %v1199_v48, %v996_v52  ;;  %v12153_v30 = vrot.slane %v9343_v55, 2  ;;  %v5187_v50 = vmul.f32 %v9321_v17, %v9384_v58 }
 0x1db   : > { %v9727_v7 = vrot.slane %v9236_v63, %v12152_v29  ;;  %v1545_v37 = vadd.f32 %v1472_v54, %v1270_v31  ;;  %v9743_v31 = vmul.f32 %v9321_v17, %v9403_v11  ;;  %v5431_v52 = vmul.f32 %v9367_v14, %v9384_v58 }
 0x1dc   : > { %v4973_v4 = vsel %vm1384_vm3, %v12154_v19, %v12153_v30  ;;  %v1546_v9 = vadd.f32 %v1474_v44, %v1271_v8  ;;  %v9751_v61 = vmul.f32 %v9367_v14, %v9403_v11  ;;  %v5283_v54 = vrot.slane %v5187_v50, 1 }
 0x1dd   : > { %v1621_v63 = vadd.f32 %v7501_v33, %v1545_v37  ;;  %v5119_v55 = vmul.f32 %v9727_v7, %v9384_v58  ;;  %v9755_v33 = vmul.f32 %v9727_v7, %v9403_v11  ;;  %v5083_v12 = vadd.f32 %v4973_v4, %v9362_v0 }
 0x1de   : > { %v11954_v42 = vrot.slane %v9743_v31, 1  ;;  %v1622_v18 = vadd.f32 %v7558_v27, %v1546_v9  ;;  %v5527_v37 = vrot.slane %v5431_v52, 2  ;;  %v11953_v48 = vrot.slane %v9751_v61, 2 }
 0x1df   : > { %v1895_v3 = vadd.f32 %v7533_v56, %v1621_v63  ;;  %v7068_v19 = vpop.eup %7067  ;;  %v9764_v8 = vmul.f32 %v9316_v40, %v9384_v58  ;;  %v9773_v4 = vadd.f32 %v9391_v6, %v9386_v1  ;;  %v9777_v9 = vadd.f32 %v5119_v55, %v5083_v12  ;;  %v12155_v12 = vld [vmem:[#allocation6_spill] sm:$0xff] }
 0x1e0   : > { %v7070_v44 = vpop.eup %7069  ;;  %v3687_v30 = vmul.f32 %v7068_v19, %v9494_v46  ;;  %v1896_v52 = vadd.f32 %v7577_v57, %v1622_v18  ;;  %v9782_v46 = vsel %vm1109_vm2, %v5283_v54, %v11954_v42  ;;  %v9789_v6 = vsel %vm1384_vm3, %v5527_v37, %v11953_v48 }
 0x1e1   : > { %v2169_v0 = vadd.f32 %v7540_v59, %v1895_v3  ;;  %v7072_v27 = vpop.eup %7071  ;;  %v3686_v63 = vmul.f32 %v7070_v44, %v9512_v35 }
 0x1e2   : > { %v7074_v19 = vpop.eup %7073  ;;  %v3689_v59 = vmul.f32 %v7072_v27, %v9515_v39 }
 0x1e3   : > { %v3910_v57 = vrot.slane %v3686_v63, 7  ;;  %v3688_v55 = vmul.f32 %v7074_v19, %v9520_v45  ;;  %v2245_v54 = vadd.f32 %v12155_v12, %v2169_v0 }
 0x1e4   : > { %v3914_v44 = vrot.slane %v3689_v59, 7 }
 0x1e5   : > { %v7076_v35 = vpop.eup %7075 }
 0x1e6   : > { %v3583_v39 = vadd.f32 1.0, %v7076_v35  ;;  %v12160_v35 = vld [vmem:[#allocation5_spill] sm:$0xff]  ;;  %v4023_v51 = vsel %vm794_vm1, %v3914_v44, 0.0 }
 0x1e7   : > { %v2170_v12 = vadd.f32 %v12160_v35, %v1896_v52  ;;  %v7078_v20 = vpop.eup %7077  ;;  %v9857_v42 = vmul.f32 %v9242_v34, %v4023_v51  ;;  %v9873_v32 = vmul.f32 %v9367_v14, %v4023_v51 }
 0x1e9   : > { %v6774_v29 = vpop.f32.mrf.mxu0  ;;  %12167 = vst [vmem:[#allocation77_spill] sm:$0xff] %v9857_v42  ;;  %12172 = vst [vmem:[#allocation82_spill] sm:$0xff] %v9873_v32  ;;  %v12181_v42 = vld [vmem:[#allocation7_spill] sm:$0xff]  ;;  %v12182_v32 = vld [vmem:[#allocation8_spill] sm:$0xff] }
 0x1ea   : > { %v9768_v56 = vadd.f32 %v6774_v29, %v9166_v47  ;;  %v3911_v29 = vrot.slane %v3687_v30, 7 }
 0x1eb   : > { %v3377_v50 = vpop.f32.mrf.mxu0 }
 0x1ec   : > { %v6581_v1 = vmul.f32 -1.442695, %v9768_v56  ;;  %v9793_v3 = vadd.f32 %v9166_v47, %v3377_v50  ;;  %v4022_v18 = vsel %vm794_vm1, %v3911_v29, 0.0  ;;  %v9816_v63 = vsel %vm794_vm1, %v3910_v57, %v3911_v29 }
 0x1ed   : > { %v9798_v30 = vmul.f32 %v9242_v34, %v4022_v18  ;;  %v9801_v37 = vmul.f32 %v9260_v22, %v4022_v18  ;;  %v9804_v27 = vmul.f32 %v9303_v13, %v4022_v18  ;;  %v9807_v45 = vmul.f32 %v9311_v36, %v4022_v18 }
 0x1ee   : > { %7079 = vpow2.f32 %v6581_v1  ;;  %v9810_v47 = vmul.f32 %v9321_v17, %v4022_v18  ;;  %v9813_v0 = vmul.f32 %v9367_v14, %v4022_v18  ;;  %v9819_v50 = vsel %vm794_vm1, 0.0, %v3910_v57 }
 0x1ef   : > { %12156 = vst [vmem:[#allocation6_spill] sm:$0xff] %v9798_v30  ;;  %12157 = vst [vmem:[#allocation69_spill] sm:$0xff] %v9801_v37  ;;  %v9830_v29 = vmul.f32 %v9242_v34, %v9819_v50  ;;  %v9834_v57 = vmul.f32 %v9268_v21, %v9819_v50  ;;  %v9838_v59 = vmul.f32 %v9242_v34, %v9816_v63  ;;  %v3913_v1 = vrot.slane %v3688_v55, 7 }
 0x1f0   : > { %12158 = vst [vmem:[#allocation70_spill] sm:$0xff] %v9804_v27  ;;  %12159 = vst [vmem:[#allocation71_spill] sm:$0xff] %v9807_v45  ;;  %v9842_v52 = vmul.f32 %v9260_v22, %v9819_v50  ;;  %v9846_v35 = vmul.f32 %v9260_v22, %v9816_v63  ;;  %v9850_v19 = vmul.f32 %v9303_v13, %v9819_v50  ;;  %7081 = vrcp.f32 %v3583_v39 }
 0x1f1   : > { %12161 = vst [vmem:[#allocation5_spill] sm:$0xff] %v9830_v29  ;;  %12162 = vst [vmem:[#allocation72_spill] sm:$0xff] %v9834_v57  ;;  %v9860_v37 = vmul.f32 %v9260_v22, %v4023_v51  ;;  %v9863_v30 = vmul.f32 %v9303_v13, %v4023_v51  ;;  %v9866_v57 = vmul.f32 %v9311_v36, %v4023_v51  ;;  %v9879_v18 = vsel %vm794_vm1, 0.0, %v3913_v1 }
 0x1f2   : > { %12163 = vst [vmem:[#allocation73_spill] sm:$0xff] %v9838_v59  ;;  %12164 = vst [vmem:[#allocation74_spill] sm:$0xff] %v9842_v52  ;;  %v9869_v55 = vmul.f32 %v9321_v17, %v4023_v51  ;;  %v9876_v48 = vsel %vm794_vm1, %v3913_v1, %v3914_v44  ;;  %v9889_v51 = vmul.f32 %v9242_v34, %v9879_v18  ;;  %v3582_v45 = vadd.f32 1.0, %v7078_v20 }
 0x1f3   : > { %12165 = vst [vmem:[#allocation75_spill] sm:$0xff] %v9846_v35  ;;  %12166 = vst [vmem:[#allocation76_spill] sm:$0xff] %v9850_v19  ;;  %v9893_v44 = vmul.f32 %v9242_v34, %v9876_v48  ;;  %v9897_v1 = vmul.f32 %v9268_v21, %v9879_v18  ;;  %v9901_v29 = vmul.f32 %v9260_v22, %v9879_v18 }
 0x1f4   : > { %12168 = vst [vmem:[#allocation78_spill] sm:$0xff] %v9860_v37  ;;  %12169 = vst [vmem:[#allocation79_spill] sm:$0xff] %v9863_v30  ;;  %v9905_v52 = vmul.f32 %v9260_v22, %v9876_v48  ;;  %v9910_v27 = vmul.f32 %v9303_v13, %v9879_v18  ;;  %v6580_v37 = vmul.f32 -1.442695, %v9793_v3  ;;  %7083 = vrcp.f32 %v3582_v45 }
 0x1f5   : > { %12170 = vst [vmem:[#allocation80_spill] sm:$0xff] %v9866_v57  ;;  %12171 = vst [vmem:[#allocation81_spill] sm:$0xff] %v9869_v55  ;;  %v12183_v55 = vld [vmem:[#allocation9_spill] sm:$0xff]  ;;  %v5395_v39 = vadd.f32 %v9782_v46, %v9777_v9  ;;  %v7279_v9 = vld [vmem:[%s11870_s4] ss:$0 sm:$0xff]  ;;  %v10018_v57 = vmul.f32 %v9321_v17, %v9460_v60 }
 0x1f6   : > { %12173 = vst [vmem:[#allocation83_spill] sm:$0xff] %v9876_v48  ;;  %12174 = vst [vmem:[#allocation84_spill] sm:$0xff] %v9879_v18  ;;  %7085 = vpow2.f32 %v6580_v37  ;;  %v2246_v48 = vadd.f32 %v12183_v55, %v2170_v12  ;;  %v12184_v37 = vrot.slane %v9394_v49, 1  ;;  %v12186_v12 = vld [vmem:[#allocation10_spill] sm:$0xff] }
 0x1f7   : > { %12175 = vst [vmem:[#allocation85_spill] sm:$0xff] %v9889_v51  ;;  %12176 = vst [vmem:[#allocation86_spill] sm:$0xff] %v9893_v44  ;;  %v5639_v55 = vadd.f32 %v9789_v6, %v5395_v39  ;;  %v9957_v6 = vmul.f32 %v9303_v13, %v9403_v11  ;;  %v5121_v44 = vmul.f32 %v9727_v7, %v9460_v60 }
 0x1f8   : > { %12177 = vst [vmem:[#allocation87_spill] sm:$0xff] %v9897_v1  ;;  %12178 = vst [vmem:[#allocation88_spill] sm:$0xff] %v9901_v29  ;;  %v2519_v1 = vadd.f32 %v12181_v42, %v2245_v54  ;;  %v9924_v42 = vld [vmem:[%s11874_s8] ss:$0 sm:$0xff]  ;;  %v5152_v54 = vadd.f32 %v9755_v33, %v9773_v4  ;;  %v12188_v33 = vrot.slane %v9751_v61, 2 }
 0x1f9   : > { %12179 = vst [vmem:[#allocation89_spill] sm:$0xff] %v9905_v52  ;;  %12180 = vst [vmem:[#allocation90_spill] sm:$0xff] %v9910_v27 }
 0x1fa   : > { %v2793_v20 = vadd.f32 %v12182_v32, %v2519_v1  ;;  %v12185_v32 = vrot.slane %v9743_v31, 1  ;;  %v12187_v1 = vrot.slane %v9400_v10, 2  ;;  %v9948_v31 = vld [vmem:[%s11872_s6] ss:$0 sm:$0xff] }
 0x1fb   : > { %v7080_v59 = vpop.eup %7079 }
 0x1fc   : > { %v3585_v35 = vadd.f32 1.0, %v7080_v59  ;;  %v5287_v45 = vsel %vm1109_vm2, %v12185_v32, %v12184_v37  ;;  %v9936_v46 = vadd.f32 %v7279_v9, %v2793_v20  ;;  %v5531_v49 = vsel %vm1384_vm3, %v12188_v33, %v12187_v1  ;;  %v12189_v37 = vld [vmem:[#allocation12_spill] sm:$0xff]  ;;  %v12190_v32 = vld [vmem:[#allocation11_spill] sm:$0xff]  ;;  %v12191_v33 = vld [vmem:[#allocation26_spill] sm:$0xff] }
 0x1fd   : > { %v5396_v20 = vadd.f32 %v5287_v45, %v5152_v54  ;;  %v7082_v10 = vpop.eup %7081  ;;  %v9962_v1 = vadd.f32 %v9924_v42, %v5639_v55 }
 0x1fe   : > { %7087 = vrcp.f32 %v3585_v35  ;;  %v2520_v35 = vadd.f32 %v12186_v12, %v2246_v48  ;;  %v4597_v48 = vadd.f32 %v9764_v8, %v12189_v37  ;;  %v6520_v39 = vmul.f32 -1.442695, %v9936_v46 }
 0x1ff   : > { %v6777_v59 = vpop.f32.mrf.mxu0  ;;  %v3691_v54 = vmul.f32 %v7082_v10, %v9667_v38  ;;  %v5640_v37 = vadd.f32 %v5531_v49, %v5396_v20  ;;  %v6598_v51 = vmul.f32 -1.442695, %v9962_v1 }
 0x200   : > { %v9951_v4 = vadd.f32 %v9948_v31, %v6777_v59  ;;  %v2794_v12 = vadd.f32 %v12190_v32, %v2520_v35  ;;  %v4732_v59 = vrot.slane %v12191_v33, 1  ;;  %7089 = vpow2.f32 %v6520_v39 }
 0x201   : > { %v3387_v61 = vpop.f32.mrf.mxu0  ;;  %v11974_v35 = vrot.slane %v9957_v6, 1  ;;  %v3917_v32 = vrot.slane %v3691_v54, 7  ;;  %v9976_v33 = vadd.f32 %v9924_v42, %v5640_v37  ;;  %v7084_v37 = vpop.eup %7083 }
 0x202   : > { %v6583_v45 = vmul.f32 -1.442695, %v9951_v4  ;;  %v9968_v8 = vadd.f32 %v9948_v31, %v3387_v61  ;;  %v9970_v30 = vadd.f32 %v7279_v9, %v2794_v12  ;;  %v4878_v9 = vmul.f32 %v9311_v36, %v9384_v58 }
 0x203   : > { %v4734_v49 = vsel %vm1109_vm2, %v4732_v59, %v11974_v35  ;;  %v4024_v20 = vsel %vm794_vm1, %v3917_v32, 0.0  ;;  %v6599_v10 = vmul.f32 -1.442695, %v9976_v33  ;;  %v9988_v61 = vmul.f32 %v9311_v36, %v9403_v11  ;;  %v7086_v52 = vpop.eup %7085 }
 0x204   : > { %7091 = vpow2.f32 %v6583_v45  ;;  %v6582_v55 = vmul.f32 -1.442695, %v9968_v8  ;;  %v6521_v38 = vmul.f32 -1.442695, %v9970_v30  ;;  %v9991_v39 = vmul.f32 %v9242_v34, %v4024_v20 }
 0x205   : > { %7093 = vpow2.f32 %v6598_v51  ;;  %v9994_v51 = vmul.f32 %v9260_v22, %v4024_v20  ;;  %v9997_v12 = vmul.f32 %v9303_v13, %v4024_v20  ;;  %v10000_v58 = vmul.f32 %v9311_v36, %v4024_v20 }
 0x206   : > { %7095 = vpow2.f32 %v6582_v55  ;;  %12192 = vst [vmem:[#allocation7_spill] sm:$0xff] %v9991_v39  ;;  %v10003_v59 = vmul.f32 %v9321_v17, %v4024_v20  ;;  %v10006_v54 = vmul.f32 %v9367_v14, %v4024_v20  ;;  %v4841_v45 = vadd.f32 %v4734_v49, %v4597_v48 }
 0x207   : > { %12193 = vst [vmem:[#allocation8_spill] sm:$0xff] %v9994_v51  ;;  %12194 = vst [vmem:[#allocation9_spill] sm:$0xff] %v9997_v12  ;;  %7097 = vpow2.f32 %v6521_v38  ;;  %v4976_v29 = vrot.slane %v4878_v9, 2  ;;  %v3690_v18 = vmul.f32 %v7084_v37, %v9689_v16  ;;  %v3584_v48 = vadd.f32 1.0, %v7086_v52 }
 0x208   : > { %12195 = vst [vmem:[#allocation10_spill] sm:$0xff] %v10000_v58  ;;  %12196 = vst [vmem:[#allocation12_spill] sm:$0xff] %v10003_v59  ;;  %7099 = vpow2.f32 %v6599_v10  ;;  %v11982_v49 = vrot.slane %v9988_v61, 2  ;;  %v10027_v16 = vmul.f32 %v9321_v17, %v9466_v15  ;;  %v5288_v10 = vrot.slane %v10018_v57, 1 }
 0x209   : > { %12197 = vst [vmem:[#allocation11_spill] sm:$0xff] %v10006_v54  ;;  %v3916_v55 = vrot.slane %v3690_v18, 7  ;;  %7101 = vrcp.f32 %v3584_v48  ;;  %v10035_v18 = vmul.f32 %v9367_v14, %v9460_v60 }
 0x20a   : > { %v4978_v52 = vsel %vm1384_vm3, %v4976_v29, %v11982_v49  ;;  %v10078_v49 = vld [vmem:[%s11875_s9 + $0x8] sm:$0xff]  ;;  %v5289_v2 = vrot.slane %v10027_v16, 1  ;;  %v12212_v16 = vld [vmem:[#allocation16_spill] sm:$0xff] }
 0x20b   : > { %v7088_v20 = vpop.eup %7087  ;;  %v10041_v37 = vsel %vm794_vm1, 0.0, %v3916_v55  ;;  %v5085_v35 = vadd.f32 %v4978_v52, %v4841_v45  ;;  %6796 = vmatprep.subr.mxu1 %v10078_v49 }
 0x20c   : > { %v10021_v9 = vmul.f32 %v7088_v20, %v9768_v56  ;;  %v10038_v56 = vsel %vm794_vm1, %v3916_v55, %v3917_v32  ;;  %12199 = vst [vmem:[#allocation91_spill] sm:$0xff] %v10041_v37  ;;  %v10046_v48 = vmul.f32 %v9242_v34, %v10041_v37  ;;  %v10054_v57 = vmul.f32 %v9260_v22, %v10041_v37 }
 0x20d   : > { %12198 = vst [vmem:[#allocation26_spill] sm:$0xff] %v10038_v56  ;;  %v10050_v29 = vmul.f32 %v9242_v34, %v10038_v56  ;;  %v10058_v32 = vmul.f32 %v9367_v14, %v9466_v15  ;;  %v7090_v55 = vpop.eup %7089  ;;  %v10062_v45 = vmul.f32 %v9268_v21, %v10041_v37  ;;  %v10066_v52 = vmul.f32 %v9260_v22, %v10038_v56 }
 0x20e   : > { %v11988_v20 = vrot.slane %v10021_v9, 7  ;;  %12200 = vst [vmem:[#allocation92_spill] sm:$0xff] %v10046_v48  ;;  %12202 = vst [vmem:[#allocation94_spill] sm:$0xff] %v10054_v57  ;;  %v10070_v38 = vmul.f32 %v9303_v13, %v10041_v37  ;;  %v5153_v12 = vadd.f32 %v5121_v44, %v5085_v35 }
 0x20f   : > { %12201 = vst [vmem:[#allocation93_spill] sm:$0xff] %v10050_v29  ;;  %12203 = vst [vmem:[#allocation95_spill] sm:$0xff] %v10062_v45  ;;  %v5533_v45 = vrot.slane %v10058_v32, 2  ;;  %v12215_v32 = vld [vmem:[#allocation13_spill] sm:$0xff] }
 0x210   : > { %12204 = vst [vmem:[#allocation96_spill] sm:$0xff] %v10066_v52  ;;  %12205 = vst [vmem:[#allocation97_spill] sm:$0xff] %v10070_v38  ;;  %v4025_v27 = vsel %vm794_vm1, %v11988_v20, 0.0 }
 0x211   : > { %v7092_v51 = vpop.eup %7091  ;;  %v10083_v58 = vmul.f32 %v9242_v34, %v4025_v27  ;;  %v10088_v20 = vmul.f32 %v9260_v22, %v4025_v27  ;;  %v10091_v59 = vmul.f32 %v9303_v13, %v4025_v27  ;;  %v10094_v56 = vmul.f32 %v9311_v36, %v4025_v27 }
 0x212   : > { %v7094_v38 = vpop.eup %7093  ;;  %v10098_v48 = vmul.f32 %v9321_v17, %v4025_v27  ;;  %v10101_v44 = vmul.f32 %v9367_v14, %v4025_v27  ;;  %v3587_v35 = vadd.f32 1.0, %v7092_v51  ;;  %v2980_v51 = vadd.f32 1.0, %v7090_v55 }
 0x213   : > { %12206 = vst [vmem:[#allocation98_spill] sm:$0xff] %v10083_v58  ;;  %12207 = vst [vmem:[#allocation99_spill] sm:$0xff] %v10088_v20  ;;  %v7096_v39 = vpop.eup %7095  ;;  %v5806_v20 = vadd.f32 1.0, %v7094_v38  ;;  %v4566_v55 = vmul.f32 %v9316_v40, %v9403_v11 }
 0x214   : > { %12208 = vst [vmem:[#allocation100_spill] sm:$0xff] %v10091_v59  ;;  %12209 = vst [vmem:[#allocation101_spill] sm:$0xff] %v10094_v56  ;;  %v3586_v37 = vadd.f32 1.0, %v7096_v39  ;;  %v6780_v19 = vpop.f32.mrf.mxu0  ;;  %v7098_v28 = vpop.eup %7097  ;;  %7103 = vrcp.f32 %v3587_v35  ;;  %v12218_v59 = vrot.slane %v9988_v61, 2 }
 0x215   : > { %12210 = vst [vmem:[#allocation102_spill] sm:$0xff] %v10098_v48  ;;  %12211 = vst [vmem:[#allocation103_spill] sm:$0xff] %v10101_v44  ;;  %v10109_v52 = vadd.f32 %v9948_v31, %v6780_v19  ;;  %v2981_v54 = vadd.f32 1.0, %v7098_v28  ;;  %v7100_v57 = vpop.eup %7099  ;;  %v5532_v19 = vrot.slane %v10035_v18, 2  ;;  %v5290_v28 = vsel %vm1109_vm2, %v5288_v10, %v5289_v2  ;;  %v12216_v10 = vld [vmem:[#allocation17_spill] sm:$0xff]  ;;  %v5934_v48 = vld [vmem:[%s11875_s9] sm:$0xff] }
 0x216   : > { %7105 = vrcp.f32 %v3586_v37  ;;  %v3397_v27 = vpop.f32.mrf.mxu0  ;;  %v5807_v35 = vadd.f32 1.0, %v7100_v57  ;;  %v7102_v14 = vpop.eup %7101  ;;  %v12214_v57 = vrot.slane %v9957_v6, 1  ;;  %v4598_v58 = vadd.f32 %v4566_v55, %v12215_v32 }
 0x217   : > { %v6585_v29 = vmul.f32 -1.442695, %v10109_v52  ;;  %v10114_v39 = vadd.f32 %v9948_v31, %v3397_v27  ;;  %7107 = vrcp.f32 %v2980_v51  ;;  %v5397_v27 = vadd.f32 %v5290_v28, %v5153_v12 }
 0x218   : > { %v5534_v38 = vsel %vm1384_vm3, %v5532_v19, %v5533_v45  ;;  %v12213_v51 = vrot.slane %v12212_v16, 1  ;;  %v12217_v56 = vrot.slane %v12216_v10, 2  ;;  %v5122_v19 = vmul.f32 %v9727_v7, %v9466_v15 }
 0x219   : > { %7109 = vpow2.f32 %v6585_v29  ;;  %v6584_v37 = vmul.f32 -1.442695, %v10114_v39  ;;  %v3692_v29 = vmul.f32 %v7102_v14, %v9793_v3  ;;  %v5641_v12 = vadd.f32 %v5534_v38, %v5397_v27  ;;  %v12224_v27 = vld [vmem:[#allocation21_spill] sm:$0xff]  ;;  %v12226_v38 = vld [vmem:[#allocation20_spill] sm:$0xff] }
 0x21a   : > { %7111 = vrcp.f32 %v2981_v54  ;;  %v4736_v18 = vsel %vm1109_vm2, %v12214_v57, %v12213_v51  ;;  %v4980_v54 = vsel %vm1384_vm3, %v12218_v59, %v12217_v56  ;;  %v12219_v6 = vrot.slane %v9448_v41, 1  ;;  %v12222_v56 = vld [vmem:[#allocation19_spill] sm:$0xff] }
 0x21b   : > { %7113 = vpow2.f32 %v6584_v37  ;;  %v3919_v16 = vrot.slane %v3692_v29, 7  ;;  %v4842_v3 = vadd.f32 %v4736_v18, %v4598_v58  ;;  %v12220_v14 = vrot.slane %v9451_v24, 2  ;;  %v12231_v18 = vld [vmem:[#allocation18_spill] sm:$0xff] }
 0x21c   : > { %7115 = vrcp.f32 %v5806_v20  ;;  %v5292_v28 = vsel %vm1109_vm2, %v5289_v2, %v12219_v6  ;;  %v10145_v61 = vadd.f32 %v9924_v42, %v5641_v12  ;;  %v12221_v59 = vrot.slane %v9424_v43, 1 }
 0x21d   : > { %7117 = vrcp.f32 %v5807_v35  ;;  %v5536_v37 = vsel %vm1384_vm3, %v5533_v45, %v12220_v14  ;;  %v12223_v20 = vrot.slane %v12222_v56, 1  ;;  %v12225_v41 = vrot.slane %v12224_v27, 2 }
 0x21e   : > { %v12227_v2 = vrot.slane %v12226_v38, 2  ;;  %v4567_v24 = vmul.f32 %v9316_v40, %v9460_v60  ;;  %v12228_v58 = vrot.slane %v10021_v9, 7  ;;  %v10165_v51 = vsel %vm794_vm1, 0.0, %v3919_v16 }
 0x21f   : > { %v4183_v55 = vsel %vm1109_vm2, %v12223_v20, %v12221_v59  ;;  %12230 = vst [vmem:[#allocation13_spill] sm:$0xff] %v10165_v51  ;;  %v5086_v57 = vadd.f32 %v4980_v54, %v4842_v3  ;;  %v10170_v32 = vmul.f32 %v9268_v21, %v10165_v51  ;;  %v10174_v10 = vmul.f32 %v9242_v34, %v10165_v51 }
 0x220   : > { %v4427_v35 = vsel %vm1384_vm3, %v12227_v2, %v12225_v41  ;;  %v10162_v45 = vsel %vm794_vm1, %v3919_v16, %v12228_v58  ;;  %v4287_v29 = vadd.f32 %v4183_v55, %v12231_v18  ;;  %v10182_v12 = vmul.f32 %v9260_v22, %v10165_v51 }
 0x221   : > { %12229 = vst [vmem:[#allocation16_spill] sm:$0xff] %v10162_v45  ;;  %12232 = vst [vmem:[#allocation17_spill] sm:$0xff] %v10170_v32  ;;  %v10178_v9 = vmul.f32 %v9242_v34, %v10162_v45  ;;  %v10186_v54 = vmul.f32 %v9260_v22, %v10162_v45  ;;  %v10190_v6 = vmul.f32 %v9303_v13, %v10165_v51  ;;  %v6600_v16 = vmul.f32 -1.442695, %v10145_v61  ;;  %v7104_v14 = vpop.eup %7103 }
 0x222   : > { %12233 = vst [vmem:[#allocation19_spill] sm:$0xff] %v10174_v10  ;;  %12235 = vst [vmem:[#allocation20_spill] sm:$0xff] %v10182_v12  ;;  %v5154_v3 = vadd.f32 %v5122_v19, %v5086_v57  ;;  %v4531_v55 = vadd.f32 %v4427_v35, %v4287_v29  ;;  %v3695_v2 = vmul.f32 %v7104_v14, %v9951_v4  ;;  %v12238_v57 = vld [vmem:[#allocation32_spill] sm:$0xff] }
 0x223   : > { %12234 = vst [vmem:[#allocation21_spill] sm:$0xff] %v10178_v9  ;;  %12236 = vst [vmem:[#allocation18_spill] sm:$0xff] %v10186_v54  ;;  %v7106_v41 = vpop.eup %7105  ;;  %7119 = vpow2.f32 %v6600_v16  ;;  %v10203_v19 = vmul.f32 %v9303_v13, %v9466_v15  ;;  %v4737_v59 = vrot.slane %v12238_v57, 1  ;;  %v10208_v29 = vmul.f32 %v9311_v36, %v9460_v60 }
 0x224   : > { %12237 = vst [vmem:[#allocation104_spill] sm:$0xff] %v10190_v6  ;;  %v5398_v58 = vadd.f32 %v5292_v28, %v5154_v3  ;;  %v3694_v18 = vmul.f32 %v7106_v41, %v9968_v8  ;;  %v10199_v32 = vadd.f32 %v4567_v24, %v4531_v55  ;;  %v7108_v56 = vpop.eup %7107  ;;  %v3923_v20 = vrot.slane %v3695_v2, 7  ;;  %v12239_v3 = vld [vmem:[#allocation40_spill] sm:$0xff] }
 0x225   : > { %v10212_v4 = vmul.f32 %v9311_v36, %v9466_v15  ;;  %v3088_v24 = vmul.f32 %v7108_v56, %v9936_v46  ;;  %v10218_v14 = vmul.f32 %v9727_v7, %v12239_v3  ;;  %v4981_v2 = vrot.slane %v10208_v29, 2  ;;  %v10244_v29 = vld [vmem:[%s11873_s7 + $0x8] ss:$0 sm:$0xff] }
 0x226   : > { %v5642_v35 = vadd.f32 %v5536_v37, %v5398_v58  ;;  %v7110_v8 = vpop.eup %7109  ;;  %v3922_v28 = vrot.slane %v3694_v18, 7  ;;  %v4026_v37 = vsel %vm794_vm1, %v3923_v20, 0.0 }
 0x227   : > { %v7112_v55 = vpop.eup %7111  ;;  %v3589_v41 = vadd.f32 1.0, %v7110_v8  ;;  %v10226_v18 = vmul.f32 %v9242_v34, %v4026_v37  ;;  %v10229_v46 = vmul.f32 %v9260_v22, %v4026_v37  ;;  %v10232_v56 = vmul.f32 %v9303_v13, %v4026_v37  ;;  %6793 = vmatprep.mubr.msk.f32.mxu1 %vm3098_vm4, %v3088_v24 }
 0x228   : > { %v10222_v60 = vadd.f32 %v9924_v42, %v5642_v35  ;;  %v7114_v58 = vpop.eup %7113  ;;  %v10235_v57 = vmul.f32 %v9311_v36, %v4026_v37  ;;  %v10239_v35 = vmul.f32 %v9321_v17, %v4026_v37  ;;  %v10247_v38 = vmul.f32 %v10244_v29, %v4026_v37 }
 0x229   : > { %12240 = vst [vmem:[#allocation32_spill] sm:$0xff] %v10226_v18  ;;  %12241 = vst [vmem:[#allocation40_spill] sm:$0xff] %v10229_v46  ;;  %v7116_v8 = vpop.eup %7115  ;;  %v10250_v16 = vsel %vm794_vm1, %v3922_v28, %v3923_v20  ;;  %v10253_v12 = vsel %vm794_vm1, 0.0, %v3922_v28  ;;  %7121 = vrcp.f32 %v3589_v41  ;;  %v3588_v46 = vadd.f32 1.0, %v7114_v58 }
 0x22a   : > { %12242 = vst [vmem:[#allocation105_spill] sm:$0xff] %v10232_v56  ;;  %12243 = vst [vmem:[#allocation106_spill] sm:$0xff] %v10235_v57  ;;  %v7118_v54 = vpop.eup %7117  ;;  %v6783_v44 = vpop.f32.mrf.mxu0  ;;  %v10263_v20 = vmul.f32 %v9268_v21, %v10253_v12  ;;  %v10267_v28 = vmul.f32 %v9242_v34, %v10253_v12  ;;  %v10271_v10 = vmul.f32 %v9242_v34, %v10250_v16  ;;  %v6601_v56 = vmul.f32 -1.442695, %v10222_v60 }
 0x22b   : > { %12244 = vst [vmem:[#allocation107_spill] sm:$0xff] %v10239_v35  ;;  %12245 = vst [vmem:[#allocation108_spill] sm:$0xff] %v10247_v38  ;;  %v10275_v24 = vmul.f32 %v9260_v22, %v10253_v12  ;;  %v10279_v6 = vmul.f32 %v9260_v22, %v10250_v16  ;;  %v10283_v9 = vmul.f32 %v9303_v13, %v10253_v12  ;;  %7123 = vrcp.f32 %v3588_v46 }
 0x22c   : > { %12246 = vst [vmem:[#allocation109_spill] sm:$0xff] %v10250_v16  ;;  %12247 = vst [vmem:[#allocation110_spill] sm:$0xff] %v10253_v12  ;;  %v3407_v37 = vpop.f32.mrf.mxu0  ;;  %v10287_v18 = vadd.f32 %v9948_v31, %v6783_v44  ;;  %v3089_v35 = vmul.f32 %v7112_v55, %v9970_v30  ;;  %v5902_v41 = vmul.f32 %v7116_v8, %v9962_v1  ;;  %v4982_v55 = vrot.slane %v10212_v4, 2 }
 0x22d   : > { %12248 = vst [vmem:[#allocation111_spill] sm:$0xff] %v10263_v20  ;;  %12249 = vst [vmem:[#allocation112_spill] sm:$0xff] %v10267_v28  ;;  %v10293_v38 = vadd.f32 %v9948_v31, %v3407_v37  ;;  %v5903_v57 = vmul.f32 %v7118_v54, %v9976_v33  ;;  %v12254_v37 = vrot.slane %v10203_v19, 1  ;;  %v5193_v33 = vmul.f32 %v9321_v17, %v12239_v3  ;;  %v12255_v54 = vld [vmem:[#allocation39_spill] sm:$0xff] }
 0x22e   : > { %12250 = vst [vmem:[#allocation113_spill] sm:$0xff] %v10271_v10  ;;  %12251 = vst [vmem:[#allocation114_spill] sm:$0xff] %v10275_v24  ;;  %6794 = vmatmul.mubr.msk.f32.vlgmr.msra.gmra.mxu1 %vm3098_vm4, %v3089_v35  ;;  %v5194_v8 = vmul.f32 %v9321_v17, %v12255_v54  ;;  %v12259_v20 = vld [vmem:[#allocation15_spill] sm:$0xff] }
 0x22f   : > { %12252 = vst [vmem:[#allocation115_spill] sm:$0xff] %v10279_v6  ;;  %12253 = vst [vmem:[#allocation116_spill] sm:$0xff] %v10283_v9  ;;  %v6587_v9 = vmul.f32 -1.442695, %v10287_v18  ;;  %v6586_v44 = vmul.f32 -1.442695, %v10293_v38  ;;  %v4739_v46 = vsel %vm1109_vm2, %v4737_v59, %v12254_v37  ;;  %6797 = vmatpush3.msra.mxu1 %v10078_v49  ;;  %6800 = vmatprep.mubr.msk.f32.mxu1 %vm5943_vm5, %v5902_v41 }
 0x230   : > { %v7120_v58 = vpop.eup %7119  ;;  %v4843_v1 = vadd.f32 %v4739_v46, %v10199_v32  ;;  %6798 = vmatprep.subr.mxu1 %v5934_v48  ;;  %v4983_v32 = vsel %vm1384_vm3, %v4981_v2, %v4982_v55  ;;  %v5438_v59 = vmul.f32 %v10244_v29, %v12255_v54  ;;  %v4044_v49 = vmul.f32 %v9268_v21, %v9403_v11  ;;  %v12256_v37 = vld [vmem:[#allocation14_spill] sm:$0xff] }
 0x231   : > { %7125 = vpow2.f32 %v6587_v9  ;;  %v5808_v30 = vadd.f32 1.0, %v7120_v58  ;;  %v5437_v9 = vmul.f32 %v10244_v29, %v12239_v3  ;;  %6799 = vmatpush3.msra.mxu1 %v5934_v48  ;;  %v5293_v35 = vrot.slane %v5193_v33, 1 }
 0x232   : > { %7127 = vpow2.f32 %v6586_v44  ;;  %v5087_v4 = vadd.f32 %v4983_v32, %v4843_v1  ;;  %v5294_v41 = vrot.slane %v5194_v8, 1  ;;  %6801 = vmatmul.mubr.msk.f32.vlgmr.msra.gmra.mxu1 %vm5943_vm5, %v5903_v57  ;;  %v5538_v44 = vrot.slane %v5438_v59, 2  ;;  %v12262_v8 = vld [vmem:[#allocation24_spill] sm:$0xff]  ;;  %v12265_v32 = vld [vmem:[#allocation25_spill] sm:$0xff] }
 0x233   : > { %7129 = vrcp.f32 %v5808_v30  ;;  %v5537_v58 = vrot.slane %v5437_v9, 2  ;;  %v12257_v46 = vrot.slane %v12256_v37, 1  ;;  %v12258_v30 = vrot.slane %v9424_v43, 1 }
 0x234   : > { %7131 = vpow2.f32 %v6601_v56  ;;  %v12260_v24 = vrot.slane %v12259_v20, 2  ;;  %v12261_v6 = vrot.slane %v12224_v27, 2  ;;  %v5155_v48 = vadd.f32 %v10218_v14, %v5087_v4 }
 0x235   : > { %v4185_v2 = vsel %vm1109_vm2, %v12258_v30, %v12257_v46  ;;  %v5295_v56 = vsel %vm1109_vm2, %v5293_v35, %v5294_v41  ;;  %v4568_v57 = vmul.f32 %v9316_v40, %v9466_v15  ;;  %v5539_v33 = vsel %vm1384_vm3, %v5537_v58, %v5538_v44  ;;  %v12269_v58 = vld [vmem:[#allocation38_spill] sm:$0xff]  ;;  %v12271_v46 = vld [vmem:[#allocation28_spill] sm:$0xff] }
 0x236   : > { %v4429_v11 = vsel %vm1384_vm3, %v12261_v6, %v12260_v24  ;;  %v4288_v1 = vadd.f32 %v4185_v2, %v4044_v49  ;;  %v12263_v43 = vrot.slane %v12262_v8, 1  ;;  %v12264_v9 = vrot.slane %v10203_v19, 1  ;;  %v12267_v49 = vld [vmem:[#allocation37_spill] sm:$0xff]  ;;  %v12273_v2 = vld [vmem:[#allocation27_spill] sm:$0xff] }
 0x237   : > { %v12266_v27 = vrot.slane %v12265_v32, 2  ;;  %v10349_v14 = vmul.f32 %v9727_v7, %v12255_v54  ;;  %v5399_v24 = vadd.f32 %v5295_v56, %v5155_v48  ;;  %v12268_v4 = vrot.slane %v12267_v49, 1  ;;  %v12277_v48 = vld [vmem:[#allocation29_spill] sm:$0xff]  ;;  %v12279_v49 = vld [vmem:[#allocation31_spill] sm:$0xff] }
 0x238   : > { %v4741_v20 = vsel %vm1109_vm2, %v12264_v9, %v12263_v43  ;;  %v4532_v59 = vadd.f32 %v4429_v11, %v4288_v1  ;;  %v12270_v37 = vrot.slane %v12269_v58, 2  ;;  %v12272_v30 = vrot.slane %v12271_v46, 1  ;;  %v12275_v43 = vld [vmem:[#allocation30_spill] sm:$0xff]  ;;  %v12280_v58 = vld [vmem:[#allocation49_spill] sm:$0xff] }
 0x239   : > { %v4985_v6 = vsel %vm1384_vm3, %v4982_v55, %v12266_v27  ;;  %v10354_v35 = vsel %vm1109_vm2, %v5294_v41, %v12268_v4  ;;  %v12274_v55 = vrot.slane %v12273_v2, 1  ;;  %v12276_v9 = vrot.slane %v12275_v43, 2 }
 0x23a   : > { %v10359_v19 = vsel %vm1384_vm3, %v5538_v44, %v12270_v37  ;;  %v12278_v11 = vrot.slane %v12277_v48, 2  ;;  %v4569_v41 = vmul.f32 %v9316_v40, %v12239_v3  ;;  %v10375_v1 = vmul.f32 %v9303_v13, %v12255_v54  ;;  %v7122_v44 = vpop.eup %7121 }
 0x23b   : > { %v4188_v8 = vsel %vm1109_vm2, %v12274_v55, %v12272_v30  ;;  %v5643_v32 = vadd.f32 %v5539_v33, %v5399_v24  ;;  %v4600_v27 = vadd.f32 %v4568_v57, %v4532_v59  ;;  %v4742_v37 = vrot.slane %v12280_v58, 1  ;;  %v7124_v48 = vpop.eup %7123 }
 0x23c   : > { %v4432_v56 = vsel %vm1384_vm3, %v12278_v11, %v12276_v9  ;;  %v4289_v4 = vadd.f32 %v4188_v8, %v12279_v49  ;;  %v3697_v30 = vmul.f32 %v7122_v44, %v10109_v52  ;;  %v12025_v2 = vrot.slane %v10375_v1, 1 }
 0x23d   : > { %v10383_v55 = vmul.f32 %v9311_v36, %v12239_v3  ;;  %v10387_v9 = vmul.f32 %v9311_v36, %v12255_v54  ;;  %v10390_v33 = vadd.f32 %v9924_v42, %v5643_v32  ;;  %v4844_v57 = vadd.f32 %v4741_v20, %v4600_v27 }
 0x23e   : > { %v4533_v24 = vadd.f32 %v4432_v56, %v4289_v4  ;;  %v10394_v59 = vmul.f32 %v9727_v7, %v9598_v23  ;;  %v3926_v52 = vrot.slane %v3697_v30, 7  ;;  %v3696_v8 = vmul.f32 %v7124_v48, %v10114_v39  ;;  %v7126_v44 = vpop.eup %7125 }
 0x23f   : > { %v4744_v3 = vsel %vm1109_vm2, %v4742_v37, %v12025_v2  ;;  %v4986_v11 = vrot.slane %v10383_v55, 2  ;;  %v6602_v49 = vmul.f32 -1.442695, %v10390_v33  ;;  %v5088_v32 = vadd.f32 %v4985_v6, %v4844_v57  ;;  %v7128_v56 = vpop.eup %7127  ;;  %v6786_v28 = vpop.f32.mrf.mxu0 }
 0x240   : > { %v4601_v58 = vadd.f32 %v4569_v41, %v4533_v24  ;;  %v4027_v27 = vsel %vm794_vm1, %v3926_v52, 0.0  ;;  %v3925_v4 = vrot.slane %v3696_v8, 7  ;;  %v3591_v30 = vadd.f32 1.0, %v7126_v44  ;;  %v7130_v48 = vpop.eup %7129 }
 0x241   : > { %v5196_v39 = vmul.f32 %v9321_v17, %v9598_v23  ;;  %v10407_v37 = vmul.f32 %v9242_v34, %v4027_v27  ;;  %v10410_v55 = vmul.f32 %v9260_v22, %v4027_v27  ;;  %v10413_v6 = vmul.f32 %v9303_v13, %v4027_v27  ;;  %v7132_v57 = vpop.eup %7131 }
 0x242   : > { %v10416_v41 = vmul.f32 %v9311_v36, %v4027_v27  ;;  %v10419_v24 = vmul.f32 %v9321_v17, %v4027_v27  ;;  %v10422_v8 = vmul.f32 %v10244_v29, %v4027_v27  ;;  %v10425_v44 = vsel %vm794_vm1, %v3925_v4, %v3926_v52 }
 0x243   : > { %12281 = vst [vmem:[#allocation39_spill] sm:$0xff] %v10407_v37  ;;  %12282 = vst [vmem:[#allocation14_spill] sm:$0xff] %v10410_v55  ;;  %v10428_v2 = vsel %vm794_vm1, 0.0, %v3925_v4  ;;  %v3417_v4 = vpop.f32.mrf.mxu0  ;;  %v10446_v10 = vmul.f32 %v9242_v34, %v10425_v44  ;;  %v10454_v12 = vmul.f32 %v9260_v22, %v10425_v44  ;;  %7133 = vrcp.f32 %v3591_v30 }
 0x244   : > { %12283 = vst [vmem:[#allocation15_spill] sm:$0xff] %v10413_v6  ;;  %12284 = vst [vmem:[#allocation24_spill] sm:$0xff] %v10416_v41  ;;  %v10438_v27 = vmul.f32 %v9268_v21, %v10428_v2  ;;  %v10442_v52 = vmul.f32 %v9242_v34, %v10428_v2  ;;  %v10450_v20 = vmul.f32 %v9260_v22, %v10428_v2  ;;  %v3590_v45 = vadd.f32 1.0, %v7128_v56  ;;  %v12293_v41 = vld [vmem:[#allocation52_spill] sm:$0xff] }
 0x245   : > { %12285 = vst [vmem:[#allocation25_spill] sm:$0xff] %v10422_v8  ;;  %12288 = vst [vmem:[#allocation28_spill] sm:$0xff] %v10446_v10  ;;  %v10458_v16 = vmul.f32 %v9303_v13, %v10428_v2  ;;  %v10462_v55 = vadd.f32 %v9948_v31, %v6786_v28  ;;  %v10468_v6 = vadd.f32 %v9948_v31, %v3417_v4  ;;  %v5809_v51 = vadd.f32 1.0, %v7132_v57 }
 0x246   : > { %12286 = vst [vmem:[#allocation37_spill] sm:$0xff] %v10438_v27  ;;  %12287 = vst [vmem:[#allocation38_spill] sm:$0xff] %v10442_v52  ;;  %7135 = vrcp.f32 %v3590_v45  ;;  %v5156_v28 = vadd.f32 %v10349_v14, %v5088_v32  ;;  %v4845_v30 = vadd.f32 %v4744_v3, %v4601_v58  ;;  %v12292_v27 = vrot.slane %v10387_v9, 2 }
 0x247   : > { %12289 = vst [vmem:[#allocation27_spill] sm:$0xff] %v10450_v20  ;;  %12290 = vst [vmem:[#allocation30_spill] sm:$0xff] %v10454_v12  ;;  %v6589_v8 = vmul.f32 -1.442695, %v10462_v55  ;;  %v6588_v56 = vmul.f32 -1.442695, %v10468_v6  ;;  %7137 = vpow2.f32 %v6602_v49  ;;  %v5197_v45 = vmul.f32 %v9321_v17, %v12293_v41 }
 0x248   : > { %12291 = vst [vmem:[#allocation29_spill] sm:$0xff] %v10458_v16  ;;  %v5904_v16 = vmul.f32 %v7130_v48, %v10145_v61  ;;  %v4988_v4 = vsel %vm1384_vm3, %v4986_v11, %v12292_v27  ;;  %v5298_v37 = vrot.slane %v5196_v39, 1  ;;  %v5400_v61 = vadd.f32 %v10354_v35, %v5156_v28  ;;  %v12294_v39 = vld [vmem:[#allocation22_spill] sm:$0xff]  ;;  %v12297_v28 = vld [vmem:[#allocation23_spill] sm:$0xff] }
 0x249   : > { %7139 = vpow2.f32 %v6589_v8  ;;  %v5089_v48 = vadd.f32 %v4988_v4, %v4845_v30  ;;  %v5440_v49 = vmul.f32 %v10244_v29, %v9598_v23  ;;  %v5299_v14 = vrot.slane %v5197_v45, 1 }
 0x24a   : > { %6803 = vmatprep.mubr.msk.f32.mxu1 %vm5943_vm5, %v5904_v16  ;;  %7141 = vpow2.f32 %v6588_v56  ;;  %v5441_v16 = vmul.f32 %v10244_v29, %v12293_v41  ;;  %v4046_v3 = vmul.f32 %v9268_v21, %v9466_v15  ;;  %v5644_v11 = vadd.f32 %v10359_v19, %v5400_v61 }
 0x24b   : > { %7143 = vrcp.f32 %v5809_v51  ;;  %v5157_v32 = vadd.f32 %v10394_v59, %v5089_v48  ;;  %v5542_v58 = vrot.slane %v5440_v49, 2  ;;  %v12295_v57 = vrot.slane %v12294_v39, 1 }
 0x24c   : > { %v12296_v35 = vrot.slane %v12271_v46, 1  ;;  %v5300_v51 = vsel %vm1109_vm2, %v5298_v37, %v5299_v14  ;;  %v5543_v27 = vrot.slane %v5441_v16, 2  ;;  %v12298_v30 = vrot.slane %v12297_v28, 2  ;;  %v12300_v46 = vld [vmem:[#allocation35_spill] sm:$0xff] }
 0x24d   : > { %v12299_v4 = vrot.slane %v12275_v43, 2  ;;  %v10501_v19 = vadd.f32 %v9924_v42, %v5644_v11  ;;  %v5401_v59 = vadd.f32 %v5300_v51, %v5157_v32  ;;  %v4570_v45 = vmul.f32 %v9316_v40, %v12255_v54 }
 0x24e   : > { %v4190_v8 = vsel %vm1109_vm2, %v12296_v35, %v12295_v57  ;;  %v12301_v61 = vrot.slane %v12300_v46, 1  ;;  %v12302_v48 = vrot.slane %v10375_v1, 1  ;;  %v5544_v49 = vsel %vm1384_vm3, %v5542_v58, %v5543_v27  ;;  %v12308_v58 = vld [vmem:[#allocation53_spill] sm:$0xff] }
 0x24f   : > { %v4290_v56 = vadd.f32 %v4190_v8, %v4046_v3  ;;  %v4434_v15 = vsel %vm1384_vm3, %v12299_v4, %v12298_v30  ;;  %v12303_v3 = vld [vmem:[#allocation36_spill] sm:$0xff]  ;;  %v12305_v39 = vrot.slane %v10387_v9, 2  ;;  %v10518_v32 = vmul.f32 %v9727_v7, %v12293_v41  ;;  %v12306_v8 = vld [vmem:[#allocation51_spill] sm:$0xff]  ;;  %v12310_v30 = vld [vmem:[#allocation41_spill] sm:$0xff] }
 0x250   : > { %v4746_v37 = vsel %vm1109_vm2, %v12302_v48, %v12301_v61  ;;  %v12304_v43 = vrot.slane %v12303_v3, 2  ;;  %v6603_v57 = vmul.f32 -1.442695, %v10501_v19  ;;  %v5645_v35 = vadd.f32 %v5544_v49, %v5401_v59  ;;  %v12314_v48 = vld [vmem:[#allocation42_spill] sm:$0xff]  ;;  %v12316_v59 = vld [vmem:[#allocation44_spill] sm:$0xff] }
 0x251   : > { %v4534_v16 = vadd.f32 %v4434_v15, %v4290_v56  ;;  %v12307_v1 = vrot.slane %v12306_v8, 1  ;;  %v12309_v56 = vrot.slane %v12308_v58, 2  ;;  %v12311_v4 = vrot.slane %v12310_v30, 1  ;;  %v12312_v15 = vld [vmem:[#allocation43_spill] sm:$0xff] }
 0x252   : > { %v4990_v11 = vsel %vm1384_vm3, %v12305_v39, %v12304_v43  ;;  %v12313_v46 = vrot.slane %v12312_v15, 1  ;;  %v12315_v3 = vrot.slane %v12314_v48, 2  ;;  %v12317_v49 = vrot.slane %v12316_v59, 2  ;;  %v7134_v39 = vpop.eup %7133 }
 0x253   : > { %v10524_v51 = vsel %vm1109_vm2, %v5299_v14, %v12307_v1  ;;  %v10529_v28 = vsel %vm1384_vm3, %v5543_v27, %v12309_v56  ;;  %v4602_v9 = vadd.f32 %v4570_v45, %v4534_v16  ;;  %v4571_v14 = vmul.f32 %v9316_v40, %v9598_v23  ;;  %v12318_v45 = vld [vmem:[#allocation46_spill] sm:$0xff]  ;;  %v12319_v56 = vld [vmem:[#allocation65_spill] sm:$0xff] }
 0x254   : > { %v4193_v61 = vsel %vm1109_vm2, %v12313_v46, %v12311_v4  ;;  %v4437_v43 = vsel %vm1384_vm3, %v12317_v49, %v12315_v3  ;;  %7145 = vpow2.f32 %v6603_v57  ;;  %v10544_v27 = vadd.f32 %v9924_v42, %v5645_v35  ;;  %v7136_v46 = vpop.eup %7135 }
 0x255   : > { %v4291_v16 = vadd.f32 %v4193_v61, %v12318_v45  ;;  %v10549_v8 = vmul.f32 %v9303_v13, %v12293_v41  ;;  %v3699_v1 = vmul.f32 %v7134_v39, %v10287_v18  ;;  %v4846_v58 = vadd.f32 %v4746_v37, %v4602_v9  ;;  %v7138_v59 = vpop.eup %7137 }
 0x256   : > { %v4747_v4 = vrot.slane %v12319_v56, 1  ;;  %v10555_v15 = vmul.f32 %v9311_v36, %v9598_v23  ;;  %v6604_v57 = vmul.f32 -1.442695, %v10544_v27  ;;  %v10561_v61 = vmul.f32 %v9311_v36, %v12293_v41  ;;  %v7140_v39 = vpop.eup %7139  ;;  %v6789_v23 = vpop.f32.mrf.mxu0 }
 0x257   : > { %v4535_v35 = vadd.f32 %v4437_v43, %v4291_v16  ;;  %v12045_v3 = vrot.slane %v10549_v8, 1  ;;  %v3929_v49 = vrot.slane %v3699_v1, 7  ;;  %v3698_v18 = vmul.f32 %v7136_v46, %v10293_v38  ;;  %v7142_v16 = vpop.eup %7141 }
 0x258   : > { %v5090_v37 = vadd.f32 %v4990_v11, %v4846_v58  ;;  %v4991_v9 = vrot.slane %v10555_v15, 2  ;;  %v5810_v45 = vadd.f32 1.0, %v7138_v59  ;;  %7147 = vpow2.f32 %v6604_v57  ;;  %v7144_v38 = vpop.eup %7143 }
 0x259   : > { %v4603_v56 = vadd.f32 %v4571_v14, %v4535_v35  ;;  %v4749_v43 = vsel %vm1109_vm2, %v4747_v4, %v12045_v3  ;;  %v4028_v20 = vsel %vm794_vm1, %v3929_v49, 0.0  ;;  %v3928_v12 = vrot.slane %v3698_v18, 7 }
 0x25a   : > { %v3593_v52 = vadd.f32 1.0, %v7140_v39  ;;  %v10570_v1 = vadd.f32 %v9948_v31, %v6789_v23  ;;  %v10573_v11 = vmul.f32 %v9242_v34, %v4028_v20  ;;  %v10576_v58 = vmul.f32 %v9260_v22, %v4028_v20 }
 0x25b   : > { %v10579_v14 = vmul.f32 %v9303_v13, %v4028_v20  ;;  %v10582_v4 = vmul.f32 %v9311_v36, %v4028_v20  ;;  %v10585_v15 = vmul.f32 %v9321_v17, %v4028_v20  ;;  %v10588_v46 = vmul.f32 %v10244_v29, %v4028_v20 }
 0x25c   : > { %12320 = vst [vmem:[#allocation31_spill] sm:$0xff] %v10573_v11  ;;  %12321 = vst [vmem:[#allocation49_spill] sm:$0xff] %v10576_v58  ;;  %v10591_v57 = vsel %vm794_vm1, %v3928_v12, %v3929_v49  ;;  %v10594_v35 = vsel %vm794_vm1, 0.0, %v3928_v12  ;;  %v3427_v49 = vpop.f32.mrf.mxu0  ;;  %7149 = vrcp.f32 %v3593_v52  ;;  %v3592_v3 = vadd.f32 1.0, %v7142_v16 }
 0x25d   : > { %12322 = vst [vmem:[#allocation52_spill] sm:$0xff] %v10579_v14  ;;  %12323 = vst [vmem:[#allocation22_spill] sm:$0xff] %v10582_v4  ;;  %v10604_v20 = vmul.f32 %v9268_v21, %v10594_v35  ;;  %v10608_v12 = vmul.f32 %v9242_v34, %v10594_v35  ;;  %v10612_v18 = vmul.f32 %v9242_v34, %v10591_v57  ;;  %v6591_v58 = vmul.f32 -1.442695, %v10570_v1 }
 0x25e   : > { %12324 = vst [vmem:[#allocation23_spill] sm:$0xff] %v10585_v15  ;;  %12325 = vst [vmem:[#allocation35_spill] sm:$0xff] %v10588_v46  ;;  %v10616_v59 = vmul.f32 %v9260_v22, %v10594_v35  ;;  %v10620_v23 = vmul.f32 %v9260_v22, %v10591_v57  ;;  %v10624_v39 = vmul.f32 %v9303_v13, %v10594_v35  ;;  %7151 = vrcp.f32 %v3592_v3 }
 0x25f   : > { %12326 = vst [vmem:[#allocation36_spill] sm:$0xff] %v10604_v20  ;;  %12327 = vst [vmem:[#allocation51_spill] sm:$0xff] %v10608_v12  ;;  %v10632_v14 = vadd.f32 %v9948_v31, %v3427_v49  ;;  %v5905_v15 = vmul.f32 %v7144_v38, %v10222_v60  ;;  %v4847_v10 = vadd.f32 %v4749_v43, %v4603_v56  ;;  %7153 = vpow2.f32 %v6591_v58 }
 0x260   : > { %12328 = vst [vmem:[#allocation53_spill] sm:$0xff] %v10612_v18  ;;  %12329 = vst [vmem:[#allocation41_spill] sm:$0xff] %v10616_v59  ;;  %v4992_v11 = vrot.slane %v10561_v61, 2  ;;  %7155 = vrcp.f32 %v5810_v45  ;;  %v5127_v49 = vmul.f32 %v9727_v7, %v9664_v25  ;;  %v5199_v60 = vmul.f32 %v9321_v17, %v9664_v25 }
 0x261   : > { %12330 = vst [vmem:[#allocation43_spill] sm:$0xff] %v10620_v23  ;;  %12331 = vst [vmem:[#allocation42_spill] sm:$0xff] %v10624_v39  ;;  %v7146_v46 = vpop.eup %7145  ;;  %v5158_v39 = vadd.f32 %v10518_v32, %v5090_v37  ;;  %v6590_v52 = vmul.f32 -1.442695, %v10632_v14  ;;  %6804 = vmatmul.mubr.msk.f32.gmra.mxu1 %vm5943_vm5, %v5905_v15  ;;  %v5200_v3 = vmul.f32 %v9321_v17, %v9661_v53 }
 0x262   : > { %v5811_v16 = vadd.f32 1.0, %v7146_v46  ;;  %v4993_v32 = vsel %vm1384_vm3, %v4991_v9, %v4992_v11  ;;  %v5443_v61 = vmul.f32 %v10244_v29, %v9664_v25  ;;  %v5303_v56 = vrot.slane %v5199_v60, 1  ;;  %v12335_v60 = vld [vmem:[#allocation34_spill] sm:$0xff] }
 0x263   : > { %v5402_v20 = vadd.f32 %v10524_v51, %v5158_v39  ;;  %7157 = vpow2.f32 %v6590_v52  ;;  %v5091_v51 = vadd.f32 %v4993_v32, %v4847_v10  ;;  %v5304_v38 = vrot.slane %v5200_v3, 1  ;;  %v12332_v52 = vld [vmem:[#allocation33_spill] sm:$0xff] }
 0x264   : > { %7159 = vrcp.f32 %v5811_v16  ;;  %v5444_v58 = vmul.f32 %v10244_v29, %v9661_v53  ;;  %v5547_v15 = vrot.slane %v5443_v61, 2  ;;  %v4048_v39 = vmul.f32 %v9268_v21, %v12255_v54 }
 0x265   : > { %v7148_v37 = vpop.eup %7147  ;;  %v5646_v45 = vadd.f32 %v10529_v28, %v5402_v20  ;;  %v5159_v46 = vadd.f32 %v5127_v49, %v5091_v51  ;;  %v12333_v4 = vrot.slane %v12332_v52, 1  ;;  %v12334_v16 = vrot.slane %v12310_v30, 1 }
 0x266   : > { %v5812_v43 = vadd.f32 1.0, %v7148_v37  ;;  %v5305_v28 = vsel %vm1109_vm2, %v5303_v56, %v5304_v38  ;;  %v5548_v20 = vrot.slane %v5444_v58, 2  ;;  %v12336_v32 = vrot.slane %v12335_v60, 2  ;;  %v12341_v58 = vld [vmem:[#allocation50_spill] sm:$0xff] }
 0x267   : > { %v10653_v9 = vadd.f32 %v9924_v42, %v5646_v45  ;;  %v4195_v10 = vsel %vm1109_vm2, %v12334_v16, %v12333_v4  ;;  %v12337_v3 = vrot.slane %v12314_v48, 2  ;;  %v5403_v37 = vadd.f32 %v5305_v28, %v5159_v46  ;;  %v12338_v4 = vld [vmem:[#allocation48_spill] sm:$0xff] }
 0x268   : > { %7161 = vrcp.f32 %v5812_v43  ;;  %v4292_v54 = vadd.f32 %v4195_v10, %v4048_v39  ;;  %v4572_v45 = vmul.f32 %v9316_v40, %v12293_v41  ;;  %v5549_v30 = vsel %vm1384_vm3, %v5547_v15, %v5548_v20  ;;  %v12343_v15 = vld [vmem:[#allocation63_spill] sm:$0xff] }
 0x269   : > { %v4439_v61 = vsel %vm1384_vm3, %v12337_v3, %v12336_v32  ;;  %v6605_v49 = vmul.f32 -1.442695, %v10653_v9  ;;  %v12339_v51 = vrot.slane %v12338_v4, 1  ;;  %v12340_v56 = vrot.slane %v10549_v8, 1  ;;  %v6792_v39 = vpop.f32.mrf.mxu0  ;;  %v7150_v8 = vpop.eup %7149  ;;  %v12345_v3 = vld [vmem:[#allocation64_spill] sm:$0xff] }
 0x26a   : > { %v12342_v52 = vrot.slane %v12341_v58, 2  ;;  %v10684_v46 = vmul.f32 %v9727_v7, %v9661_v53  ;;  %v5647_v16 = vadd.f32 %v5549_v30, %v5403_v37  ;;  %v4536_v10 = vadd.f32 %v4439_v61, %v4292_v54  ;;  %v12349_v58 = vld [vmem:[#allocation54_spill] sm:$0xff]  ;;  %v12351_v37 = vld [vmem:[#allocation57_spill] sm:$0xff]  ;;  %v12353_v30 = vld [vmem:[#allocation56_spill] sm:$0xff] }
 0x26b   : > { %v4751_v43 = vsel %vm1109_vm2, %v12340_v56, %v12339_v51  ;;  %7163 = vpow2.f32 %v6605_v49  ;;  %v12344_v28 = vrot.slane %v12343_v15, 1  ;;  %v10692_v32 = vadd.f32 %v9948_v31, %v6792_v39  ;;  %v12347_v51 = vld [vmem:[#allocation55_spill] sm:$0xff]  ;;  %v3437_v15 = vpop.f32.mrf.mxu0  ;;  %v7152_v59 = vpop.eup %7151 }
 0x26c   : > { %v10680_v48 = vsel %vm1384_vm3, %v4992_v11, %v12342_v52  ;;  %v12346_v11 = vrot.slane %v12345_v3, 2  ;;  %v12348_v56 = vrot.slane %v12347_v51, 1  ;;  %v12350_v49 = vrot.slane %v12349_v58, 1  ;;  %v12355_v3 = vld [vmem:[#allocation62_spill] sm:$0xff] }
 0x26d   : > { %v10689_v60 = vsel %vm1109_vm2, %v5304_v38, %v12344_v28  ;;  %v12352_v54 = vrot.slane %v12351_v37, 2  ;;  %v12354_v38 = vrot.slane %v12353_v30, 2  ;;  %v3701_v39 = vmul.f32 %v7150_v8, %v10462_v55  ;;  %v7154_v55 = vpop.eup %7153 }
 0x26e   : > { %v10697_v4 = vsel %vm1384_vm3, %v5548_v20, %v12346_v11  ;;  %v4198_v61 = vsel %vm1109_vm2, %v12350_v49, %v12348_v56  ;;  %v10711_v28 = vadd.f32 %v9924_v42, %v5647_v16  ;;  %v4604_v20 = vadd.f32 %v4572_v45, %v4536_v10  ;;  %v7156_v10 = vpop.eup %7155 }
 0x26f   : > { %v4442_v52 = vsel %vm1384_vm3, %v12354_v38, %v12352_v54  ;;  %v4293_v11 = vadd.f32 %v4198_v61, %v12355_v3  ;;  %v6593_v58 = vmul.f32 -1.442695, %v10692_v32  ;;  %v10716_v56 = vadd.f32 %v9948_v31, %v3437_v15 }
 0x270   : > { %v4573_v49 = vmul.f32 %v9316_v40, %v9664_v25  ;;  %v10722_v54 = vmul.f32 %v9303_v13, %v9661_v53  ;;  %v3932_v8 = vrot.slane %v3701_v39, 7  ;;  %v3700_v42 = vmul.f32 %v7152_v59, %v10468_v6  ;;  %v7158_v38 = vpop.eup %7157 }
 0x271   : > { %v6606_v45 = vmul.f32 -1.442695, %v10711_v28  ;;  %v4848_v16 = vadd.f32 %v4751_v43, %v4604_v20  ;;  %v3595_v61 = vadd.f32 1.0, %v7154_v55  ;;  %7165 = vpow2.f32 %v6593_v58  ;;  %v7160_v12 = vpop.eup %7159 }
 0x272   : > { %v6592_v31 = vmul.f32 -1.442695, %v10716_v56  ;;  %v4537_v30 = vadd.f32 %v4442_v52, %v4293_v11  ;;  %v4029_v15 = vsel %vm794_vm1, %v3932_v8, 0.0  ;;  %v3931_v3 = vrot.slane %v3700_v42, 7 }
 0x273   : > { %v5906_v23 = vmul.f32 %v7156_v10, %v10390_v33  ;;  %7167 = vpow2.f32 %v6606_v45  ;;  %v10730_v39 = vmul.f32 %v9242_v34, %v4029_v15  ;;  %v10733_v6 = vmul.f32 %v9260_v22, %v4029_v15 }
 0x274   : > { %v10736_v59 = vmul.f32 %v9303_v13, %v4029_v15  ;;  %v10739_v43 = vmul.f32 %v9311_v36, %v4029_v15  ;;  %v10742_v52 = vmul.f32 %v9321_v17, %v4029_v15  ;;  %v10745_v20 = vmul.f32 %v10244_v29, %v4029_v15 }
 0x275   : > { %12356 = vst [vmem:[#allocation44_spill] sm:$0xff] %v10730_v39  ;;  %12357 = vst [vmem:[#allocation46_spill] sm:$0xff] %v10733_v6  ;;  %v10748_v33 = vsel %vm794_vm1, %v3931_v3, %v3932_v8  ;;  %v10751_v11 = vsel %vm794_vm1, 0.0, %v3931_v3  ;;  %6806 = vmatprep.mubr.msk.f32.mxu1 %vm5943_vm5, %v5906_v23  ;;  %v7162_v10 = vpop.eup %7161  ;;  %7169 = vrcp.f32 %v3595_v61  ;;  %v3594_v18 = vadd.f32 1.0, %v7158_v38 }
 0x276   : > { %12358 = vst [vmem:[#allocation65_spill] sm:$0xff] %v10736_v59  ;;  %12359 = vst [vmem:[#allocation33_spill] sm:$0xff] %v10739_v43  ;;  %v10762_v8 = vmul.f32 %v9268_v21, %v10751_v11  ;;  %v10766_v23 = vmul.f32 %v9242_v34, %v10751_v11  ;;  %v10770_v3 = vmul.f32 %v9242_v34, %v10748_v33  ;;  %7171 = vpow2.f32 %v6592_v31 }
 0x277   : > { %v10774_v55 = vmul.f32 %v9260_v22, %v10751_v11  ;;  %v10778_v58 = vmul.f32 %v9260_v22, %v10748_v33  ;;  %v10782_v45 = vmul.f32 %v9303_v13, %v10751_v11  ;;  %v5907_v15 = vmul.f32 %v7160_v12, %v10501_v19 }
 0x278   : > { %12360 = vst [vmem:[#allocation34_spill] sm:$0xff] %v10762_v8  ;;  %v7164_v6 = vpop.eup %7163  ;;  %7173 = vrcp.f32 %v3594_v18  ;;  %v5908_v59 = vmul.f32 %v7162_v10, %v10544_v27  ;;  %v5092_v42 = vadd.f32 %v10680_v48, %v4848_v16  ;;  %v4605_v61 = vadd.f32 %v4573_v49, %v4537_v30 }
 0x279   : > { %12361 = vst [vmem:[#allocation48_spill] sm:$0xff] %v10774_v55  ;;  %12362 = vst [vmem:[#allocation50_spill] sm:$0xff] %v10778_v58  ;;  %6807 = vmatmul.mubr.msk.f32.gmra.mxu1 %vm5943_vm5, %v5907_v15  ;;  %v4752_v38 = vrot.slane %v9719_v62, 1  ;;  %v4753_v19 = vrot.slane %v10722_v54, 1  ;;  %v4890_v12 = vmul.f32 %v9311_v36, %v9664_v25  ;;  %v4891_v31 = vmul.f32 %v9311_v36, %v9661_v53 }
 0x27a   : > { %12363 = vst [vmem:[#allocation63_spill] sm:$0xff] %v10782_v45  ;;  %v5813_v45 = vadd.f32 1.0, %v7164_v6  ;;  %6809 = vmatprep.mubr.msk.f32.mxu1 %vm5943_vm5, %v5908_v59  ;;  %v5160_v18 = vadd.f32 %v10684_v46, %v5092_v42  ;;  %v5129_v27 = vmul.f32 %v9727_v7, %v9819_v50  ;;  %v5202_v62 = vmul.f32 %v9321_v17, %v9819_v50 }
 0x27b   : > { %v4754_v48 = vsel %vm1109_vm2, %v4752_v38, %v4753_v19  ;;  %v4996_v49 = vrot.slane %v4890_v12, 2  ;;  %v5203_v25 = vmul.f32 %v9321_v17, %v9816_v63  ;;  %v4997_v46 = vrot.slane %v4891_v31, 2  ;;  %v10818_v31 = vld [vmem:[%s11874_s8] ss:$0 sm:$0xff] }
 0x27c   : > { %7175 = vrcp.f32 %v5813_v45  ;;  %v5404_v16 = vadd.f32 %v10689_v60, %v5160_v18  ;;  %v4849_v30 = vadd.f32 %v4754_v48, %v4605_v61  ;;  %v5446_v6 = vmul.f32 %v10244_v29, %v9819_v50 }
 0x27d   : > { %v5308_v45 = vrot.slane %v5202_v62, 1  ;;  %v5309_v10 = vrot.slane %v5203_v25, 1  ;;  %v5447_v15 = vmul.f32 %v10244_v29, %v9816_v63  ;;  %v4998_v8 = vsel %vm1384_vm3, %v4996_v49, %v4997_v46  ;;  %v12364_v62 = vld [vmem:[#allocation45_spill] sm:$0xff] }
 0x27e   : > { %v7166_v54 = vpop.eup %7165  ;;  %v5648_v12 = vadd.f32 %v10697_v4, %v5404_v16  ;;  %v5552_v43 = vrot.slane %v5446_v6, 2  ;;  %v5093_v60 = vadd.f32 %v4998_v8, %v4849_v30  ;;  %v4050_v4 = vmul.f32 %v9268_v21, %v12293_v41  ;;  %v12367_v30 = vld [vmem:[#allocation47_spill] sm:$0xff] }
 0x27f   : > { %v3597_v42 = vadd.f32 1.0, %v7166_v54  ;;  %v5310_v61 = vsel %vm1109_vm2, %v5308_v45, %v5309_v10  ;;  %v5553_v18 = vrot.slane %v5447_v15, 2  ;;  %v12365_v49 = vrot.slane %v12364_v62, 1  ;;  %v12372_v62 = vld [vmem:[#allocation61_spill] sm:$0xff] }
 0x280   : > { %v7168_v59 = vpop.eup %7167  ;;  %v10821_v48 = vadd.f32 %v10818_v31, %v5648_v12  ;;  %v12366_v25 = vrot.slane %v12347_v51, 1  ;;  %v5161_v54 = vadd.f32 %v5129_v27, %v5093_v60  ;;  %v12368_v6 = vrot.slane %v12367_v30, 2 }
 0x281   : > { %v5814_v38 = vadd.f32 1.0, %v7168_v59  ;;  %7177 = vrcp.f32 %v3597_v42  ;;  %v5554_v16 = vsel %vm1384_vm3, %v5552_v43, %v5553_v18  ;;  %v12369_v59 = vrot.slane %v12351_v37, 2 }
 0x282   : > { %v4200_v8 = vsel %vm1109_vm2, %v12366_v25, %v12365_v49  ;;  %v4574_v45 = vmul.f32 %v9316_v40, %v9661_v53  ;;  %v6607_v41 = vmul.f32 -1.442695, %v10821_v48  ;;  %v12373_v27 = vrot.slane %v12372_v62, 2  ;;  %v7170_v60 = vpop.eup %7169 }
 0x283   : > { %7179 = vrcp.f32 %v5814_v38  ;;  %v4444_v42 = vsel %vm1384_vm3, %v12369_v59, %v12368_v6  ;;  %v4294_v15 = vadd.f32 %v4200_v8, %v4050_v4  ;;  %v12370_v38 = vld [vmem:[#allocation60_spill] sm:$0xff]  ;;  %v5405_v49 = vadd.f32 %v5310_v61, %v5161_v54 }
 0x284   : > { %v12371_v12 = vrot.slane %v12370_v38, 1  ;;  %v5000_v43 = vsel %vm1384_vm3, %v4997_v46, %v12373_v27  ;;  %v10847_v37 = vmul.f32 %v9727_v7, %v9816_v63  ;;  %v12374_v25 = vrot.slane %v9810_v47, 1 }
 0x285   : > { %v12375_v4 = vrot.slane %v9813_v0, 2  ;;  %v3703_v6 = vmul.f32 %v7170_v60, %v10570_v1  ;;  %7181 = vpow2.f32 %v6607_v41  ;;  %v4538_v46 = vadd.f32 %v4444_v42, %v4294_v15  ;;  %v12379_v0 = vld [vmem:[#allocation68_spill] sm:$0xff] }
 0x286   : > { %v4756_v51 = vsel %vm1109_vm2, %v4753_v19, %v12371_v12  ;;  %v10852_v30 = vsel %vm1109_vm2, %v5309_v10, %v12374_v25  ;;  %v7172_v19 = vpop.eup %7171  ;;  %v12376_v61 = vrot.slane %v9685_v26, 1  ;;  %v12377_v54 = vrot.slane %v9681_v5, 1  ;;  %v12378_v12 = vld [vmem:[#allocation66_spill] sm:$0xff] }
 0x287   : > { %v10857_v8 = vsel %vm1384_vm3, %v5553_v18, %v12375_v4  ;;  %v7174_v47 = vpop.eup %7173  ;;  %v3596_v38 = vadd.f32 1.0, %v7172_v19  ;;  %v5649_v10 = vadd.f32 %v5554_v16, %v5405_v49  ;;  %v12380_v27 = vrot.slane %v12379_v0, 2  ;;  %v12381_v18 = vld [vmem:[#allocation67_spill] sm:$0xff] }
 0x288   : > { %v4203_v59 = vsel %vm1109_vm2, %v12377_v54, %v12376_v61  ;;  %v12382_v25 = vrot.slane %v12381_v18, 2  ;;  %v3935_v1 = vrot.slane %v3703_v6, 7  ;;  %v3702_v42 = vmul.f32 %v7174_v47, %v10632_v14 }
 0x289   : > { %v4295_v62 = vadd.f32 %v4203_v59, %v12378_v12  ;;  %v4606_v41 = vadd.f32 %v4574_v45, %v4538_v46  ;;  %v4575_v5 = vmul.f32 %v9316_v40, %v9819_v50  ;;  %v7176_v15 = vpop.eup %7175  ;;  %7183 = vrcp.f32 %v3596_v38 }
 0x28a   : > { %v4447_v4 = vsel %vm1384_vm3, %v12382_v25, %v12380_v27  ;;  %v10875_v60 = vadd.f32 %v10818_v31, %v5649_v10  ;;  %v10879_v49 = vmul.f32 %v9303_v13, %v9816_v63  ;;  %v4030_v19 = vsel %vm794_vm1, %v3935_v1, 0.0 }
 0x28b   : > { %v4539_v16 = vadd.f32 %v4447_v4, %v4295_v62  ;;  %v3934_v61 = vrot.slane %v3702_v42, 7  ;;  %v5909_v6 = vmul.f32 %v7176_v15, %v10653_v9  ;;  %v4850_v14 = vadd.f32 %v4756_v51, %v4606_v41 }
 0x28c   : > { %v4122_v45 = vmul.f32 %v9242_v34, %v4030_v19  ;;  %v4366_v46 = vmul.f32 %v9260_v22, %v4030_v19  ;;  %v10886_v54 = vmul.f32 %v9303_v13, %v4030_v19  ;;  %v10889_v59 = vmul.f32 %v9311_v36, %v4030_v19 }
 0x28d   : > { %v10892_v47 = vmul.f32 %v9321_v17, %v4030_v19  ;;  %v10895_v38 = vmul.f32 %v10244_v29, %v4030_v19  ;;  %v10898_v10 = vsel %vm794_vm1, %v3934_v61, %v3935_v1  ;;  %v10901_v9 = vsel %vm794_vm1, 0.0, %v3934_v61  ;;  %6810 = vmatmul.mubr.msk.f32.gmra.mxu1 %vm5943_vm5, %v5909_v6 }
 0x28e   : > { %12383 = vst [vmem:[#allocation64_spill] sm:$0xff] %v10886_v54  ;;  %12384 = vst [vmem:[#allocation55_spill] sm:$0xff] %v10889_v59  ;;  %v4249_v51 = vrot.slane %v4122_v45, 1  ;;  %v4493_v12 = vrot.slane %v4366_v46, 2  ;;  %v7178_v18 = vpop.eup %7177  ;;  %v4120_v1 = vmul.f32 %v9242_v34, %v10901_v9  ;;  %v10912_v42 = vmul.f32 %v9303_v13, %v10901_v9 }
 0x28f   : > { %v3705_v15 = vmul.f32 %v7178_v18, %v10692_v32  ;;  %v4069_v19 = vmul.f32 %v9268_v21, %v10901_v9  ;;  %v4070_v61 = vmul.f32 %v9268_v21, %v10898_v10  ;;  %v4121_v6 = vmul.f32 %v9242_v34, %v10898_v10  ;;  %v12386_v34 = vld [vmem:[#allocation76_spill] sm:$0xff] }
 0x290   : > { %12385 = vst [vmem:[#allocation54_spill] sm:$0xff] %v10912_v42  ;;  %v7180_v41 = vpop.eup %7179  ;;  %v4246_v45 = vrot.slane %v4120_v1, 1  ;;  %v4364_v46 = vmul.f32 %v9260_v22, %v10901_v9  ;;  %v4365_v27 = vmul.f32 %v9260_v22, %v10898_v10  ;;  %v6608_v18 = vmul.f32 -1.442695, %v10875_v60 }
 0x291   : > { %v5910_v62 = vmul.f32 %v7180_v41, %v10711_v28  ;;  %v3938_v39 = vrot.slane %v3705_v15, 7  ;;  %v4247_v32 = vrot.slane %v4121_v6, 1  ;;  %v5094_v4 = vadd.f32 %v5000_v43, %v4850_v14 }
 0x292   : > { %v4490_v25 = vrot.slane %v4364_v46, 2  ;;  %v4491_v59 = vrot.slane %v4365_v27, 2  ;;  %v4607_v54 = vadd.f32 %v4575_v5, %v4539_v16  ;;  %v4757_v1 = vrot.slane %v12386_v34, 1  ;;  %v7182_v42 = vpop.eup %7181 }
 0x293   : > { %6812 = vmatprep.mubr.msk.f32.mxu1 %vm5943_vm5, %v5910_v62  ;;  %v4031_v55 = vsel %vm794_vm1, %v3938_v39, 0.0  ;;  %v4248_v58 = vsel %vm1109_vm2, %v4246_v45, %v4247_v32  ;;  %v4250_v22 = vsel %vm1109_vm2, %v4247_v32, %v4249_v51  ;;  %7185 = vpow2.f32 %v6608_v18 }
 0x294   : > { %v10933_v28 = vmul.f32 %v9303_v13, %v4031_v55  ;;  %v10936_v43 = vmul.f32 %v9311_v36, %v4031_v55  ;;  %v10939_v14 = vmul.f32 %v9321_v17, %v4031_v55  ;;  %v10942_v5 = vmul.f32 %v10244_v29, %v4031_v55 }
 0x295   : > { %v4313_v16 = vadd.f32 %v4248_v58, %v4069_v19  ;;  %v4314_v62 = vadd.f32 %v4250_v22, %v4070_v61  ;;  %v4492_v27 = vsel %vm1384_vm3, %v4490_v25, %v4491_v59  ;;  %v4494_v41 = vsel %vm1384_vm3, %v4491_v59, %v4493_v12  ;;  %v12391_v61 = vld [vmem:[#allocation84_spill] sm:$0xff] }
 0x296   : > { %12387 = vst [vmem:[#allocation57_spill] sm:$0xff] %v10933_v28  ;;  %12388 = vst [vmem:[#allocation56_spill] sm:$0xff] %v10936_v43  ;;  %v7184_v51 = vpop.eup %7183  ;;  %v5815_v55 = vadd.f32 1.0, %v7182_v42  ;;  %v5162_v58 = vadd.f32 %v10847_v37, %v5094_v4  ;;  %v12069_v25 = vrot.slane %v10879_v49, 1  ;;  %v4893_v59 = vmul.f32 %v9311_v36, %v9819_v50 }
 0x297   : > { %12389 = vst [vmem:[#allocation62_spill] sm:$0xff] %v10939_v14  ;;  %12390 = vst [vmem:[#allocation45_spill] sm:$0xff] %v10942_v5  ;;  %v3704_v32 = vmul.f32 %v7184_v51, %v10716_v56  ;;  %v4557_v18 = vadd.f32 %v4492_v27, %v4313_v16  ;;  %v4558_v29 = vadd.f32 %v4494_v41, %v4314_v62  ;;  %v12392_v27 = vld [vmem:[#allocation83_spill] sm:$0xff]  ;;  %v12405_v15 = vrot.slane %v12379_v0, 2 }
 0x298   : > { %v10957_v12 = vmul.f32 %v9311_v36, %v9816_v63  ;;  %7187 = vrcp.f32 %v5815_v55  ;;  %v5131_v34 = vmul.f32 %v9727_v7, %v12391_v61  ;;  %v5205_v56 = vmul.f32 %v9321_v17, %v12391_v61 }
 0x299   : > { %v3937_v19 = vrot.slane %v3704_v32, 7  ;;  %v5406_v42 = vadd.f32 %v10852_v30, %v5162_v58  ;;  %v4759_v37 = vsel %vm1109_vm2, %v4757_v1, %v12069_v25  ;;  %v5001_v4 = vrot.slane %v4893_v59, 2 }
 0x29a   : > { %v5002_v50 = vrot.slane %v10957_v12, 2  ;;  %v4851_v62 = vadd.f32 %v4759_v37, %v4607_v54  ;;  %v5206_v41 = vmul.f32 %v9321_v17, %v12392_v27 }
 0x29b   : > { %v3939_v22 = vsel %vm794_vm1, %v3937_v19, %v3938_v39  ;;  %v4013_v16 = vsel %vm794_vm1, 0.0, %v3937_v19 }
 0x29c   : > { %v4593_v51 = vmul.f32 %v9316_v40, %v4013_v16  ;;  %v4594_v32 = vmul.f32 %v9316_v40, %v3939_v22  ;;  %v4676_v30 = vmul.f32 %v9303_v13, %v4013_v16  ;;  %v10976_v55 = vmul.f32 %v9303_v13, %v3939_v22 }
 0x29d   : > { %v10979_v1 = vmul.f32 %v9311_v36, %v4013_v16  ;;  %v10982_v39 = vmul.f32 %v9311_v36, %v3939_v22  ;;  %v10985_v54 = vmul.f32 %v9727_v7, %v4013_v16  ;;  %v10988_v58 = vmul.f32 %v9727_v7, %v3939_v22 }
 0x29e   : > { %12393 = vst [vmem:[#allocation47_spill] sm:$0xff] %v10976_v55  ;;  %v4625_v59 = vadd.f32 %v4593_v51, %v4557_v18  ;;  %v10990_v12 = vadd.f32 %v4594_v32, %v4558_v29  ;;  %v4802_v19 = vrot.slane %v4676_v30, 1  ;;  %v12070_v37 = vrot.slane %v10976_v55, 1  ;;  %v11007_v29 = vld [vmem:[%s11873_s7 + $0x8] ss:$0 sm:$0xff] }
 0x29f   : > { %12394 = vst [vmem:[#allocation60_spill] sm:$0xff] %v10979_v1  ;;  %12395 = vst [vmem:[#allocation61_spill] sm:$0xff] %v10982_v39  ;;  %v10996_v46 = vmul.f32 %v9321_v17, %v4013_v16  ;;  %v10999_v45 = vmul.f32 %v9321_v17, %v3939_v22  ;;  %v11010_v51 = vmul.f32 %v11007_v29, %v4013_v16  ;;  %v5314_v55 = vrot.slane %v5206_v41, 1  ;;  %v12426_v1 = vld [vmem:[#allocation26_spill] sm:$0xff] }
 0x2a0   : > { %12396 = vst [vmem:[#allocation66_spill] sm:$0xff] %v10985_v54  ;;  %12397 = vst [vmem:[#allocation68_spill] sm:$0xff] %v10988_v58  ;;  %v7186_v25 = vpop.eup %7185  ;;  %v4804_v18 = vsel %vm1109_vm2, %v4802_v19, %v12070_v37  ;;  %v11013_v32 = vmul.f32 %v11007_v29, %v3939_v22  ;;  %v5650_v30 = vadd.f32 %v10857_v8, %v5406_v42  ;;  %v12402_v37 = vrot.slane %v9685_v26, 1 }
 0x2a1   : > { %12398 = vst [vmem:[#allocation67_spill] sm:$0xff] %v10990_v12  ;;  %v11016_v6 = vadd.f32 %v4804_v18, %v4625_v59  ;;  %v5816_v19 = vadd.f32 1.0, %v7186_v25  ;;  %v5003_v16 = vsel %vm1384_vm3, %v5001_v4, %v5002_v50  ;;  %v5313_v12 = vrot.slane %v5205_v56, 1  ;;  %v12400_v18 = vld [vmem:[#allocation58_spill] sm:$0xff] }
 0x2a2   : > { %v11022_v43 = vadd.f32 %v10818_v31, %v5650_v30  ;;  %v5095_v22 = vadd.f32 %v5003_v16, %v4851_v62  ;;  %v5449_v8 = vmul.f32 %v11007_v29, %v12391_v61  ;;  %v5450_v59 = vmul.f32 %v11007_v29, %v12392_v27 }
 0x2a3   : > { %12399 = vst [vmem:[#allocation76_spill] sm:$0xff] %v11016_v6  ;;  %7189 = vrcp.f32 %v5816_v19  ;;  %v4052_v25 = vmul.f32 %v9268_v21, %v9661_v53  ;;  %v12401_v30 = vrot.slane %v12400_v18, 1  ;;  %v5315_v62 = vsel %vm1109_vm2, %v5313_v12, %v5314_v55  ;;  %v12403_v19 = vld [vmem:[#allocation59_spill] sm:$0xff] }
 0x2a4   : > { %v6609_v42 = vmul.f32 -1.442695, %v11022_v43  ;;  %v5163_v4 = vadd.f32 %v5131_v34, %v5095_v22  ;;  %v5557_v41 = vrot.slane %v5449_v8, 2  ;;  %v12404_v16 = vrot.slane %v12403_v19, 2  ;;  %v12406_v34 = vld [vmem:[#allocation70_spill] sm:$0xff] }
 0x2a5   : > { %v4205_v56 = vsel %vm1109_vm2, %v12402_v37, %v12401_v30  ;;  %v7188_v28 = vpop.eup %7187  ;;  %v5558_v6 = vrot.slane %v5450_v59, 2  ;;  %v4576_v18 = vmul.f32 %v9316_v40, %v9816_v63  ;;  %v12407_v22 = vrot.slane %v12406_v34, 1  ;;  %v12409_v30 = vld [vmem:[#allocation71_spill] sm:$0xff] }
 0x2a6   : > { %v4449_v58 = vsel %vm1384_vm3, %v12405_v15, %v12404_v16  ;;  %7191 = vpow2.f32 %v6609_v42  ;;  %v4296_v53 = vadd.f32 %v4205_v56, %v4052_v25  ;;  %v5911_v26 = vmul.f32 %v7188_v28, %v10821_v48  ;;  %v12411_v56 = vld [vmem:[#allocation81_spill] sm:$0xff] }
 0x2a7   : > { %v5407_v37 = vadd.f32 %v5315_v62, %v5163_v4  ;;  %v12408_v12 = vrot.slane %v10879_v49, 1  ;;  %v12410_v0 = vrot.slane %v12409_v30, 2  ;;  %v5559_v42 = vsel %vm1384_vm3, %v5557_v41, %v5558_v6  ;;  %v12413_v49 = vld [vmem:[#allocation82_spill] sm:$0xff]  ;;  %v12415_v16 = vld [vmem:[#allocation73_spill] sm:$0xff]  ;;  %v12419_v41 = vld [vmem:[#allocation75_spill] sm:$0xff] }
 0x2a8   : > { %v4540_v59 = vadd.f32 %v4449_v58, %v4296_v53  ;;  %v5132_v25 = vmul.f32 %v9727_v7, %v12392_v27  ;;  %v12412_v19 = vrot.slane %v12411_v56, 1  ;;  %6813 = vmatmul.mubr.msk.f32.gmra.mxu1 %vm5943_vm5, %v5911_v26  ;;  %v12414_v4 = vrot.slane %v12413_v49, 2  ;;  %v12423_v56 = vld [vmem:[#allocation72_spill] sm:$0xff] }
 0x2a9   : > { %v4761_v8 = vsel %vm1109_vm2, %v12408_v12, %v12407_v22  ;;  %v5005_v15 = vsel %vm1384_vm3, %v5002_v50, %v12410_v0  ;;  %v5651_v28 = vadd.f32 %v5559_v42, %v5407_v37  ;;  %v12416_v34 = vrot.slane %v12415_v16, 1  ;;  %v12417_v50 = vld [vmem:[#allocation5_spill] sm:$0xff]  ;;  %v12421_v12 = vld [vmem:[#allocation74_spill] sm:$0xff] }
 0x2aa   : > { %v5317_v48 = vsel %vm1109_vm2, %v5314_v55, %v12412_v19  ;;  %v5561_v62 = vsel %vm1384_vm3, %v5558_v6, %v12414_v4  ;;  %v12418_v22 = vrot.slane %v12417_v50, 1  ;;  %v12420_v53 = vrot.slane %v12419_v41, 2  ;;  %v12424_v19 = vld [vmem:[#allocation90_spill] sm:$0xff] }
 0x2ab   : > { %v12422_v30 = vrot.slane %v12421_v12, 2  ;;  %v4608_v55 = vadd.f32 %v4576_v18, %v4540_v59  ;;  %v4577_v37 = vmul.f32 %v9316_v40, %v12391_v61  ;;  %v4653_v6 = vmul.f32 %v9303_v13, %v12392_v27 }
 0x2ac   : > { %v4208_v58 = vsel %vm1109_vm2, %v12418_v22, %v12416_v34  ;;  %v11080_v42 = vadd.f32 %v10818_v31, %v5651_v28  ;;  %v4762_v49 = vrot.slane %v12424_v19, 1  ;;  %v4896_v4 = vmul.f32 %v9311_v36, %v12391_v61  ;;  %v12425_v22 = vld [vmem:[#allocation91_spill] sm:$0xff] }
 0x2ad   : > { %v4452_v0 = vsel %vm1384_vm3, %v12422_v30, %v12420_v53  ;;  %v4297_v26 = vadd.f32 %v4208_v58, %v12423_v56  ;;  %v4897_v34 = vmul.f32 %v9311_v36, %v12392_v27  ;;  %v4852_v18 = vadd.f32 %v4761_v8, %v4608_v55 }
 0x2ae   : > { %v4763_v50 = vrot.slane %v4653_v6, 1  ;;  %v5133_v58 = vmul.f32 %v9727_v7, %v12425_v22  ;;  %v6610_v53 = vmul.f32 -1.442695, %v11080_v42  ;;  %v5006_v12 = vrot.slane %v4896_v4, 2 }
 0x2af   : > { %v4541_v59 = vadd.f32 %v4452_v0, %v4297_v26  ;;  %v5007_v30 = vrot.slane %v4897_v34, 2  ;;  %v5208_v28 = vmul.f32 %v9321_v17, %v12425_v22  ;;  %v5096_v56 = vadd.f32 %v5005_v15, %v4852_v18 }
 0x2b0   : > { %v4764_v61 = vsel %vm1109_vm2, %v4762_v49, %v4763_v50  ;;  %v5209_v39 = vmul.f32 %v9321_v17, %v12426_v1  ;;  %7193 = vpow2.f32 %v6610_v53  ;;  %v5452_v55 = vmul.f32 %v11007_v29, %v12425_v22  ;;  %v7190_v26 = vpop.eup %7189 }
 0x2b1   : > { %v4609_v19 = vadd.f32 %v4577_v37, %v4541_v59  ;;  %v5008_v8 = vsel %vm1384_vm3, %v5006_v12, %v5007_v30  ;;  %v5318_v0 = vrot.slane %v5208_v28, 1  ;;  %v5164_v6 = vadd.f32 %v5132_v25, %v5096_v56  ;;  %v12427_v59 = vld [vmem:[#allocation6_spill] sm:$0xff] }
 0x2b2   : > { %v5319_v34 = vrot.slane %v5209_v39, 1  ;;  %v5453_v15 = vmul.f32 %v11007_v29, %v12426_v1  ;;  %v5912_v37 = vmul.f32 %v7190_v26, %v10875_v60  ;;  %v5562_v49 = vrot.slane %v5452_v55, 2  ;;  %v12430_v60 = vld [vmem:[#allocation69_spill] sm:$0xff]  ;;  %v12433_v26 = vld [vmem:[#allocation79_spill] sm:$0xff] }
 0x2b3   : > { %v4853_v4 = vadd.f32 %v4764_v61, %v4609_v19  ;;  %v4054_v18 = vmul.f32 %v9268_v21, %v9816_v63  ;;  %v12428_v53 = vrot.slane %v12427_v59, 1  ;;  %v12429_v12 = vrot.slane %v12415_v16, 1  ;;  %v7192_v56 = vpop.eup %7191 }
 0x2b4   : > { %v5408_v5 = vadd.f32 %v5317_v48, %v5164_v6  ;;  %v5320_v25 = vsel %vm1109_vm2, %v5318_v0, %v5319_v34  ;;  %v5563_v39 = vrot.slane %v5453_v15, 2  ;;  %6815 = vmatprep.mubr.msk.f32.mxu1 %vm5943_vm5, %v5912_v37  ;;  %v12431_v61 = vrot.slane %v12430_v60, 2  ;;  %v12435_v37 = vld [vmem:[#allocation80_spill] sm:$0xff] }
 0x2b5   : > { %v4210_v28 = vsel %vm1109_vm2, %v12429_v12, %v12428_v53  ;;  %v5097_v14 = vadd.f32 %v5008_v8, %v4853_v4  ;;  %v12432_v55 = vrot.slane %v12419_v41, 2  ;;  %v4578_v16 = vmul.f32 %v9316_v40, %v12392_v27  ;;  %v12437_v12 = vld [vmem:[#allocation12_spill] sm:$0xff] }
 0x2b6   : > { %v4298_v19 = vadd.f32 %v4210_v28, %v4054_v18  ;;  %v12434_v59 = vrot.slane %v12433_v26, 1  ;;  %v5817_v8 = vadd.f32 1.0, %v7192_v56  ;;  %v5652_v0 = vadd.f32 %v5561_v62, %v5408_v5  ;;  %v12441_v56 = vld [vmem:[#allocation86_spill] sm:$0xff] }
 0x2b7   : > { %v4454_v63 = vsel %vm1384_vm3, %v12432_v55, %v12431_v61  ;;  %v5165_v6 = vadd.f32 %v5133_v58, %v5097_v14  ;;  %v5564_v4 = vsel %vm1384_vm3, %v5562_v49, %v5563_v39  ;;  %v12436_v18 = vrot.slane %v12435_v37, 2  ;;  %v12439_v14 = vld [vmem:[#allocation11_spill] sm:$0xff] }
 0x2b8   : > { %v4766_v48 = vsel %vm1109_vm2, %v4763_v50, %v12434_v59  ;;  %v4542_v15 = vadd.f32 %v4454_v63, %v4298_v19  ;;  %v5134_v41 = vmul.f32 %v9727_v7, %v12426_v1  ;;  %v12438_v28 = vrot.slane %v12437_v12, 1  ;;  %v12445_v63 = vld [vmem:[#allocation89_spill] sm:$0xff]  ;;  %v12447_v59 = vld [vmem:[#allocation88_spill] sm:$0xff] }
 0x2b9   : > { %v5010_v53 = vsel %vm1384_vm3, %v5007_v30, %v12436_v18  ;;  %7195 = vrcp.f32 %v5817_v8  ;;  %v11130_v50 = vadd.f32 %v10818_v31, %v5652_v0  ;;  %v5409_v5 = vadd.f32 %v5320_v25, %v5165_v6  ;;  %v12443_v30 = vld [vmem:[#allocation85_spill] sm:$0xff] }
 0x2ba   : > { %v5322_v60 = vsel %vm1109_vm2, %v5319_v34, %v12438_v28  ;;  %v12440_v62 = vrot.slane %v12439_v14, 2  ;;  %v4610_v49 = vadd.f32 %v4578_v16, %v4542_v15  ;;  %v12442_v19 = vrot.slane %v12441_v56, 1  ;;  %v12450_v18 = vld [vmem:[#allocation97_spill] sm:$0xff] }
 0x2bb   : > { %v12444_v61 = vrot.slane %v12443_v30, 1  ;;  %v12446_v26 = vrot.slane %v12445_v63, 2  ;;  %v12448_v34 = vrot.slane %v12447_v59, 2  ;;  %v4579_v25 = vmul.f32 %v9316_v40, %v12425_v22 }
 0x2bc   : > { %v5566_v58 = vsel %vm1384_vm3, %v5563_v39, %v12440_v62  ;;  %v6611_v0 = vmul.f32 -1.442695, %v11130_v50  ;;  %v5653_v6 = vadd.f32 %v5564_v4, %v5409_v5  ;;  %v12449_v39 = vld [vmem:[#allocation87_spill] sm:$0xff]  ;;  %v4656_v15 = vmul.f32 %v9303_v13, %v12426_v1 }
 0x2bd   : > { %v4213_v55 = vsel %vm1109_vm2, %v12444_v61, %v12442_v19  ;;  %v4457_v8 = vsel %vm1384_vm3, %v12448_v34, %v12446_v26  ;;  %v4854_v37 = vadd.f32 %v4766_v48, %v4610_v49  ;;  %v4767_v12 = vrot.slane %v12450_v18, 1  ;;  %v7194_v49 = vpop.eup %7193 }
 0x2be   : > { %v4299_v16 = vadd.f32 %v4213_v55, %v12449_v39  ;;  %v4899_v28 = vmul.f32 %v9311_v36, %v12425_v22  ;;  %v4900_v14 = vmul.f32 %v9311_v36, %v12426_v1  ;;  %7197 = vpow2.f32 %v6611_v0  ;;  %v12451_v55 = vld [vmem:[#allocation13_spill] sm:$0xff]  ;;  %v12452_v39 = vld [vmem:[#allocation16_spill] sm:$0xff] }
 0x2bf   : > { %v11157_v62 = vadd.f32 %v10818_v31, %v5653_v6  ;;  %v4768_v4 = vrot.slane %v4656_v15, 1  ;;  %v5098_v5 = vadd.f32 %v5010_v53, %v4854_v37  ;;  %v5135_v48 = vmul.f32 %v9727_v7, %v12451_v55 }
 0x2c0   : > { %v4543_v19 = vadd.f32 %v4457_v8, %v4299_v16  ;;  %v5011_v30 = vrot.slane %v4899_v28, 2  ;;  %v5012_v61 = vrot.slane %v4900_v14, 2  ;;  %v5211_v34 = vmul.f32 %v9321_v17, %v12451_v55 }
 0x2c1   : > { %v6612_v26 = vmul.f32 -1.442695, %v11157_v62  ;;  %v4769_v22 = vsel %vm1109_vm2, %v4767_v12, %v4768_v4  ;;  %v5818_v0 = vadd.f32 1.0, %v7194_v49  ;;  %v5166_v6 = vadd.f32 %v5134_v41, %v5098_v5 }
 0x2c2   : > { %v4611_v59 = vadd.f32 %v4579_v25, %v4543_v19  ;;  %v5013_v8 = vsel %vm1384_vm3, %v5011_v30, %v5012_v61  ;;  %v5212_v53 = vmul.f32 %v9321_v17, %v12452_v39  ;;  %v5323_v15 = vrot.slane %v5211_v34, 1  ;;  %v12453_v19 = vld [vmem:[#allocation77_spill] sm:$0xff] }
 0x2c3   : > { %7199 = vpow2.f32 %v6612_v26  ;;  %v5455_v37 = vmul.f32 %v11007_v29, %v12451_v55  ;;  %v5410_v25 = vadd.f32 %v5322_v60, %v5166_v6  ;;  %v5456_v12 = vmul.f32 %v11007_v29, %v12452_v39  ;;  %v12456_v60 = vld [vmem:[#allocation78_spill] sm:$0xff] }
 0x2c4   : > { %v4855_v16 = vadd.f32 %v4769_v22, %v4611_v59  ;;  %7201 = vrcp.f32 %v5818_v0  ;;  %v5324_v18 = vrot.slane %v5212_v53, 1  ;;  %v4056_v41 = vmul.f32 %v9268_v21, %v12392_v27 }
 0x2c5   : > { %v5567_v14 = vrot.slane %v5455_v37, 2  ;;  %v12454_v5 = vrot.slane %v12453_v19, 1  ;;  %v12455_v30 = vrot.slane %v12441_v56, 1  ;;  %v5654_v26 = vadd.f32 %v5566_v58, %v5410_v25  ;;  %v12461_v25 = vld [vmem:[#allocation10_spill] sm:$0xff] }
 0x2c6   : > { %v5099_v28 = vadd.f32 %v5013_v8, %v4855_v16  ;;  %v5325_v59 = vsel %vm1109_vm2, %v5323_v15, %v5324_v18  ;;  %v5568_v22 = vrot.slane %v5456_v12, 2  ;;  %v12457_v34 = vrot.slane %v12456_v60, 2  ;;  %v12459_v16 = vld [vmem:[#allocation9_spill] sm:$0xff]  ;;  %v7196_v19 = vpop.eup %7195  ;;  %v12465_v60 = vld [vmem:[#allocation103_spill] sm:$0xff] }
 0x2c7   : > { %v4215_v49 = vsel %vm1109_vm2, %v12455_v30, %v12454_v5  ;;  %v12458_v0 = vrot.slane %v12445_v63, 2  ;;  %v4580_v27 = vmul.f32 %v9316_v40, %v12426_v1  ;;  %v12460_v37 = vrot.slane %v12459_v16, 1  ;;  %v12463_v30 = vld [vmem:[#allocation102_spill] sm:$0xff] }
 0x2c8   : > { %v5167_v8 = vadd.f32 %v5135_v48, %v5099_v28  ;;  %v4300_v53 = vadd.f32 %v4215_v49, %v4056_v41  ;;  %v11191_v58 = vadd.f32 %v10818_v31, %v5654_v26  ;;  %v5569_v15 = vsel %vm1384_vm3, %v5567_v14, %v5568_v22 }
 0x2c9   : > { %v4459_v6 = vsel %vm1384_vm3, %v12458_v0, %v12457_v34  ;;  %v4771_v56 = vsel %vm1109_vm2, %v4768_v4, %v12460_v37  ;;  %v12462_v12 = vrot.slane %v12461_v25, 2  ;;  %v5136_v48 = vmul.f32 %v9727_v7, %v12452_v39  ;;  %v12467_v0 = vld [vmem:[#allocation93_spill] sm:$0xff] }
 0x2ca   : > { %v5913_v28 = vmul.f32 %v7196_v19, %v11022_v43  ;;  %v5411_v41 = vadd.f32 %v5325_v59, %v5167_v8  ;;  %v4544_v5 = vadd.f32 %v4459_v6, %v4300_v53  ;;  %v12464_v49 = vrot.slane %v12463_v30, 1  ;;  %v12473_v59 = vld [vmem:[#allocation94_spill] sm:$0xff]  ;;  %v12475_v19 = vld [vmem:[#allocation95_spill] sm:$0xff] }
 0x2cb   : > { %v5015_v63 = vsel %vm1384_vm3, %v5012_v61, %v12462_v12  ;;  %v6613_v26 = vmul.f32 -1.442695, %v11191_v58  ;;  %v12466_v34 = vrot.slane %v12465_v60, 2  ;;  %v12468_v16 = vrot.slane %v12467_v0, 1  ;;  %v12469_v61 = vld [vmem:[#allocation92_spill] sm:$0xff] }
 0x2cc   : > { %v5327_v4 = vsel %vm1109_vm2, %v5324_v18, %v12464_v49  ;;  %v12470_v37 = vrot.slane %v12469_v61, 1  ;;  %v12471_v12 = vld [vmem:[#allocation96_spill] sm:$0xff]  ;;  %v12474_v6 = vrot.slane %v12473_v59, 2  ;;  %6816 = vmatmul.mubr.msk.f32.gmra.mxu1 %vm5943_vm5, %v5913_v28  ;;  %v5655_v18 = vadd.f32 %v5569_v15, %v5411_v41  ;;  %v7198_v49 = vpop.eup %7197 }
 0x2cd   : > { %v5571_v14 = vsel %vm1384_vm3, %v5568_v22, %v12466_v34  ;;  %v12472_v43 = vrot.slane %v12471_v12, 2  ;;  %v4612_v53 = vadd.f32 %v4580_v27, %v4544_v5  ;;  %v4581_v22 = vmul.f32 %v9316_v40, %v12451_v55  ;;  %v12476_v34 = vld [vmem:[#allocation104_spill] sm:$0xff] }
 0x2ce   : > { %v4218_v25 = vsel %vm1109_vm2, %v12470_v37, %v12468_v16  ;;  %7203 = vpow2.f32 %v6613_v26  ;;  %v4659_v60 = vmul.f32 %v9303_v13, %v12452_v39  ;;  %v4772_v16 = vrot.slane %v12476_v34, 1  ;;  %v12477_v26 = vld [vmem:[#allocation110_spill] sm:$0xff] }
 0x2cf   : > { %v4462_v8 = vsel %vm1384_vm3, %v12474_v6, %v12472_v43  ;;  %v4301_v30 = vadd.f32 %v4218_v25, %v12475_v19  ;;  %v4902_v61 = vmul.f32 %v9311_v36, %v12451_v55  ;;  %v5819_v37 = vadd.f32 1.0, %v7198_v49 }
 0x2d0   : > { %v11227_v28 = vadd.f32 %v10818_v31, %v5655_v18  ;;  %v4856_v27 = vadd.f32 %v4771_v56, %v4612_v53  ;;  %v4773_v41 = vrot.slane %v4659_v60, 1  ;;  %v4903_v5 = vmul.f32 %v9311_v36, %v12452_v39  ;;  %v7200_v55 = vpop.eup %7199 }
 0x2d1   : > { %v4545_v15 = vadd.f32 %v4462_v8, %v4301_v30  ;;  %v5016_v25 = vrot.slane %v4902_v61, 2  ;;  %v5137_v43 = vmul.f32 %v9727_v7, %v12477_v26  ;;  %7205 = vrcp.f32 %v5819_v37  ;;  %v12478_v8 = vld [vmem:[#allocation109_spill] sm:$0xff]  ;;  %v7202_v30 = vpop.eup %7201 }
 0x2d2   : > { %v6614_v59 = vmul.f32 -1.442695, %v11227_v28  ;;  %v5100_v6 = vadd.f32 %v5015_v63, %v4856_v27  ;;  %v4774_v49 = vsel %vm1109_vm2, %v4772_v16, %v4773_v41  ;;  %v5017_v18 = vrot.slane %v4903_v5, 2 }
 0x2d3   : > { %v4613_v19 = vadd.f32 %v4581_v22, %v4545_v15  ;;  %v5214_v56 = vmul.f32 %v9321_v17, %v12477_v26  ;;  %v5215_v53 = vmul.f32 %v9321_v17, %v12478_v8  ;;  %v5820_v60 = vadd.f32 1.0, %v7200_v55 }
 0x2d4   : > { %7207 = vpow2.f32 %v6614_v59  ;;  %v5168_v34 = vadd.f32 %v5136_v48, %v5100_v6  ;;  %v5914_v37 = vmul.f32 %v7202_v30, %v11080_v42  ;;  %v5018_v63 = vsel %vm1384_vm3, %v5016_v25, %v5017_v18  ;;  %v12479_v59 = vld [vmem:[#allocation7_spill] sm:$0xff] }
 0x2d5   : > { %v4857_v61 = vadd.f32 %v4774_v49, %v4613_v19  ;;  %v5328_v22 = vrot.slane %v5214_v56, 1  ;;  %v5329_v27 = vrot.slane %v5215_v53, 1  ;;  %7209 = vrcp.f32 %v5820_v60  ;;  %v12482_v56 = vld [vmem:[#allocation8_spill] sm:$0xff] }
 0x2d6   : > { %v5412_v16 = vadd.f32 %v5327_v4, %v5168_v34  ;;  %v5458_v5 = vmul.f32 %v11007_v29, %v12477_v26  ;;  %6818 = vmatprep.mubr.msk.f32.mxu1 %vm5943_vm5, %v5914_v37  ;;  %v5459_v48 = vmul.f32 %v11007_v29, %v12478_v8  ;;  %v4058_v42 = vmul.f32 %v9268_v21, %v12426_v1  ;;  %v12485_v37 = vld [vmem:[#allocation100_spill] sm:$0xff] }
 0x2d7   : > { %v5101_v15 = vadd.f32 %v5018_v63, %v4857_v61  ;;  %v5330_v54 = vsel %vm1109_vm2, %v5328_v22, %v5329_v27  ;;  %v12480_v25 = vrot.slane %v12479_v59, 1  ;;  %v12481_v6 = vrot.slane %v12467_v0, 1 }
 0x2d8   : > { %v5656_v19 = vadd.f32 %v5571_v14, %v5412_v16  ;;  %v5572_v49 = vrot.slane %v5458_v5, 2  ;;  %v12483_v53 = vrot.slane %v12482_v56, 2  ;;  %v12484_v30 = vrot.slane %v12471_v12, 2  ;;  %v12493_v56 = vld [vmem:[#allocation21_spill] sm:$0xff] }
 0x2d9   : > { %v4220_v4 = vsel %vm1109_vm2, %v12481_v6, %v12480_v25  ;;  %v5169_v55 = vadd.f32 %v5137_v43, %v5101_v15  ;;  %v5573_v34 = vrot.slane %v5459_v48, 2  ;;  %v4582_v1 = vmul.f32 %v9316_v40, %v12452_v39  ;;  %v12487_v43 = vld [vmem:[#allocation101_spill] sm:$0xff]  ;;  %v12491_v6 = vld [vmem:[#allocation108_spill] sm:$0xff] }
 0x2da   : > { %v4464_v60 = vsel %vm1384_vm3, %v12484_v30, %v12483_v53  ;;  %v4302_v61 = vadd.f32 %v4220_v4, %v4058_v42  ;;  %v12486_v63 = vrot.slane %v12485_v37, 1  ;;  %v11265_v22 = vadd.f32 %v10818_v31, %v5656_v19  ;;  %v12489_v42 = vld [vmem:[#allocation107_spill] sm:$0xff] }
 0x2db   : > { %v5413_v14 = vadd.f32 %v5330_v54, %v5169_v55  ;;  %v12488_v16 = vrot.slane %v12487_v43, 2  ;;  %v5138_v12 = vmul.f32 %v9727_v7, %v12478_v8  ;;  %v5574_v5 = vsel %vm1384_vm3, %v5572_v49, %v5573_v34  ;;  %v7204_v19 = vpop.eup %7203  ;;  %v12495_v53 = vld [vmem:[#allocation19_spill] sm:$0xff]  ;;  %v12497_v49 = vld [vmem:[#allocation18_spill] sm:$0xff] }
 0x2dc   : > { %v4776_v0 = vsel %vm1109_vm2, %v4773_v41, %v12486_v63  ;;  %v4546_v48 = vadd.f32 %v4464_v60, %v4302_v61  ;;  %v12490_v59 = vrot.slane %v12489_v42, 1  ;;  %v12492_v41 = vrot.slane %v12491_v6, 2  ;;  %v12499_v61 = vld [vmem:[#allocation20_spill] sm:$0xff]  ;;  %v12501_v42 = vld [vmem:[#allocation17_spill] sm:$0xff] }
 0x2dd   : > { %v5020_v15 = vsel %vm1384_vm3, %v5017_v18, %v12488_v16  ;;  %v6615_v54 = vmul.f32 -1.442695, %v11265_v22  ;;  %v5657_v55 = vadd.f32 %v5574_v5, %v5413_v14  ;;  %v12494_v18 = vrot.slane %v12493_v56, 1  ;;  %v12502_v6 = vld [vmem:[#allocation116_spill] sm:$0xff] }
 0x2de   : > { %v5332_v25 = vsel %vm1109_vm2, %v5329_v27, %v12490_v59  ;;  %v5576_v4 = vsel %vm1384_vm3, %v5573_v34, %v12492_v41  ;;  %v12496_v30 = vrot.slane %v12495_v53, 1  ;;  %v12498_v60 = vrot.slane %v12497_v49, 2 }
 0x2df   : > { %v12500_v63 = vrot.slane %v12499_v61, 2  ;;  %v5821_v43 = vadd.f32 1.0, %v7204_v19  ;;  %v4614_v16 = vadd.f32 %v4582_v1, %v4546_v48  ;;  %v4583_v59 = vmul.f32 %v9316_v40, %v12477_v26 }
 0x2e0   : > { %v4223_v37 = vsel %vm1109_vm2, %v12496_v30, %v12494_v18  ;;  %7211 = vpow2.f32 %v6615_v54  ;;  %v11294_v14 = vadd.f32 %v10818_v31, %v5657_v55  ;;  %v4662_v5 = vmul.f32 %v9303_v13, %v12478_v8  ;;  %v7206_v18 = vpop.eup %7205 }
 0x2e1   : > { %v4467_v27 = vsel %vm1384_vm3, %v12500_v63, %v12498_v60  ;;  %v4303_v34 = vadd.f32 %v4223_v37, %v12501_v42  ;;  %v4777_v41 = vrot.slane %v12502_v6, 1  ;;  %7213 = vrcp.f32 %v5821_v43  ;;  %v7208_v37 = vpop.eup %7207 }
 0x2e2   : > { %v4858_v53 = vadd.f32 %v4776_v0, %v4614_v16  ;;  %v4905_v1 = vmul.f32 %v9311_v36, %v12477_v26  ;;  %v5915_v48 = vmul.f32 %v7206_v18, %v11130_v50  ;;  %v6616_v19 = vmul.f32 -1.442695, %v11294_v14 }
 0x2e3   : > { %v4547_v30 = vadd.f32 %v4467_v27, %v4303_v34  ;;  %v4778_v54 = vrot.slane %v4662_v5, 1  ;;  %v4906_v55 = vmul.f32 %v9311_v36, %v12478_v8  ;;  %v5139_v43 = vmul.f32 %v9727_v7, %v10428_v2  ;;  %v7210_v27 = vpop.eup %7209 }
 0x2e4   : > { %v5102_v60 = vadd.f32 %v5020_v15, %v4858_v53  ;;  %v5021_v63 = vrot.slane %v4905_v1, 2  ;;  %6819 = vmatmul.mubr.msk.f32.gmra.mxu1 %vm5943_vm5, %v5915_v48  ;;  %v5822_v0 = vadd.f32 1.0, %v7208_v37  ;;  %7215 = vpow2.f32 %v6616_v19 }
 0x2e5   : > { %v4615_v61 = vadd.f32 %v4583_v59, %v4547_v30  ;;  %v4779_v26 = vsel %vm1109_vm2, %v4777_v41, %v4778_v54  ;;  %v5022_v50 = vrot.slane %v4906_v55, 2  ;;  %v5217_v34 = vmul.f32 %v9321_v17, %v10428_v2 }
 0x2e6   : > { %v5170_v16 = vadd.f32 %v5138_v12, %v5102_v60  ;;  %v5218_v15 = vmul.f32 %v9321_v17, %v10425_v44  ;;  %v5916_v59 = vmul.f32 %v7210_v27, %v11157_v62  ;;  %7217 = vrcp.f32 %v5822_v0  ;;  %v12503_v62 = vld [vmem:[#allocation98_spill] sm:$0xff] }
 0x2e7   : > { %v4859_v42 = vadd.f32 %v4779_v26, %v4615_v61  ;;  %v5023_v5 = vsel %vm1384_vm3, %v5021_v63, %v5022_v50  ;;  %v5461_v6 = vmul.f32 %v11007_v29, %v10428_v2  ;;  %v5333_v53 = vrot.slane %v5217_v34, 1  ;;  %v12506_v63 = vld [vmem:[#allocation99_spill] sm:$0xff]  ;;  %v12509_v34 = vld [vmem:[#allocation105_spill] sm:$0xff] }
 0x2e8   : > { %v5414_v18 = vadd.f32 %v5332_v25, %v5170_v16  ;;  %v5334_v30 = vrot.slane %v5218_v15, 1  ;;  %6821 = vmatprep.mubr.msk.f32.mxu1 %vm5943_vm5, %v5916_v59  ;;  %v5462_v12 = vmul.f32 %v11007_v29, %v10425_v44  ;;  %v4060_v48 = vmul.f32 %v9268_v21, %v12452_v39  ;;  %v12511_v59 = vld [vmem:[#allocation106_spill] sm:$0xff] }
 0x2e9   : > { %v5103_v41 = vadd.f32 %v5023_v5, %v4859_v42  ;;  %v5577_v1 = vrot.slane %v5461_v6, 2  ;;  %v12504_v19 = vrot.slane %v12503_v62, 1  ;;  %v12505_v55 = vrot.slane %v12493_v56, 1 }
 0x2ea   : > { %v5658_v60 = vadd.f32 %v5576_v4, %v5414_v18  ;;  %v5335_v61 = vsel %vm1109_vm2, %v5333_v53, %v5334_v30  ;;  %v12507_v0 = vrot.slane %v12506_v63, 2  ;;  %v12508_v26 = vrot.slane %v12497_v49, 2 }
 0x2eb   : > { %v4225_v37 = vsel %vm1109_vm2, %v12505_v55, %v12504_v19  ;;  %v5171_v25 = vadd.f32 %v5139_v43, %v5103_v41  ;;  %v5578_v16 = vrot.slane %v5462_v12, 2  ;;  %v4584_v39 = vmul.f32 %v9316_v40, %v12478_v8 }
 0x2ec   : > { %v4469_v27 = vsel %vm1384_vm3, %v12508_v26, %v12507_v0  ;;  %v4304_v42 = vadd.f32 %v4225_v37, %v4060_v48  ;;  %v12510_v15 = vrot.slane %v12509_v34, 1  ;;  %v11339_v4 = vadd.f32 %v10818_v31, %v5658_v60  ;;  %v12514_v48 = vld [vmem:[#allocation25_spill] sm:$0xff]  ;;  %v12522_v26 = vld [vmem:[#allocation114_spill] sm:$0xff] }
 0x2ed   : > { %v5415_v43 = vadd.f32 %v5335_v61, %v5171_v25  ;;  %v12512_v5 = vrot.slane %v12511_v59, 2  ;;  %v5140_v49 = vmul.f32 %v9727_v7, %v10425_v44  ;;  %v5579_v18 = vsel %vm1384_vm3, %v5577_v1, %v5578_v16  ;;  %v7212_v19 = vpop.eup %7211  ;;  %v12516_v60 = vld [vmem:[#allocation113_spill] sm:$0xff]  ;;  %v12518_v25 = vld [vmem:[#allocation112_spill] sm:$0xff]  ;;  %v12520_v1 = vld [vmem:[#allocation115_spill] sm:$0xff] }
 0x2ee   : > { %v4781_v56 = vsel %vm1109_vm2, %v4778_v54, %v12510_v15  ;;  %v4548_v41 = vadd.f32 %v4469_v27, %v4304_v42  ;;  %v12513_v53 = vrot.slane %v10419_v24, 1  ;;  %v12515_v54 = vrot.slane %v12514_v48, 2  ;;  %v7214_v27 = vpop.eup %7213 }
 0x2ef   : > { %v5025_v6 = vsel %vm1384_vm3, %v5022_v50, %v12512_v5  ;;  %v6617_v55 = vmul.f32 -1.442695, %v11339_v4  ;;  %v5659_v37 = vadd.f32 %v5579_v18, %v5415_v43  ;;  %v12517_v50 = vrot.slane %v12516_v60, 1 }
 0x2f0   : > { %v5337_v12 = vsel %vm1109_vm2, %v5334_v30, %v12513_v53  ;;  %v5581_v62 = vsel %vm1384_vm3, %v5578_v16, %v12515_v54  ;;  %v12519_v61 = vrot.slane %v12518_v25, 1  ;;  %v12521_v0 = vrot.slane %v12520_v1, 2  ;;  %v12524_v16 = vld [vmem:[#allocation111_spill] sm:$0xff]  ;;  %v12525_v54 = vld [vmem:[#allocation29_spill] sm:$0xff] }
 0x2f1   : > { %v12523_v24 = vrot.slane %v12522_v26, 2  ;;  %v5823_v42 = vadd.f32 1.0, %v7212_v19  ;;  %v4616_v34 = vadd.f32 %v4584_v39, %v4548_v41  ;;  %v4585_v43 = vmul.f32 %v9316_v40, %v10428_v2  ;;  %v7216_v39 = vpop.eup %7215 }
 0x2f2   : > { %v4228_v63 = vsel %vm1109_vm2, %v12519_v61, %v12517_v50  ;;  %v5917_v59 = vmul.f32 %v7214_v27, %v11191_v58  ;;  %7219 = vpow2.f32 %v6617_v55  ;;  %v11369_v5 = vadd.f32 %v10818_v31, %v5659_v37 }
 0x2f3   : > { %v4472_v30 = vsel %vm1384_vm3, %v12523_v24, %v12521_v0  ;;  %v4305_v15 = vadd.f32 %v4228_v63, %v12524_v16  ;;  %v4665_v18 = vmul.f32 %v9303_v13, %v10425_v44  ;;  %7221 = vrcp.f32 %v5823_v42  ;;  %v7218_v63 = vpop.eup %7217 }
 0x2f4   : > { %v4860_v53 = vadd.f32 %v4781_v56, %v4616_v34  ;;  %v4782_v19 = vrot.slane %v12525_v54, 1  ;;  %6822 = vmatmul.mubr.msk.f32.gmra.mxu1 %vm5943_vm5, %v5917_v59  ;;  %v6618_v41 = vmul.f32 -1.442695, %v11369_v5  ;;  %v4908_v58 = vmul.f32 %v9311_v36, %v10428_v2 }
 0x2f5   : > { %v4549_v48 = vadd.f32 %v4472_v30, %v4305_v15  ;;  %v4783_v50 = vrot.slane %v4665_v18, 1  ;;  %v4909_v55 = vmul.f32 %v9311_v36, %v10425_v44  ;;  %v5824_v37 = vadd.f32 1.0, %v7216_v39 }
 0x2f6   : > { %v5104_v25 = vadd.f32 %v5025_v6, %v4860_v53  ;;  %v5141_v56 = vmul.f32 %v9727_v7, %v10594_v35  ;;  %7223 = vpow2.f32 %v6618_v41  ;;  %v5026_v26 = vrot.slane %v4908_v58, 2 }
 0x2f7   : > { %v4617_v61 = vadd.f32 %v4585_v43, %v4549_v48  ;;  %v4784_v0 = vsel %vm1109_vm2, %v4782_v19, %v4783_v50  ;;  %v5027_v24 = vrot.slane %v4909_v55, 2  ;;  %v5918_v30 = vmul.f32 %v7218_v63, %v11227_v28  ;;  %v12526_v48 = vld [vmem:[#allocation32_spill] sm:$0xff] }
 0x2f8   : > { %7225 = vrcp.f32 %v5824_v37  ;;  %v5172_v27 = vadd.f32 %v5140_v49, %v5104_v25  ;;  %v5220_v6 = vmul.f32 %v9321_v17, %v10594_v35  ;;  %v5221_v34 = vmul.f32 %v9321_v17, %v10591_v57  ;;  %v12529_v25 = vld [vmem:[#allocation40_spill] sm:$0xff] }
 0x2f9   : > { %v4861_v2 = vadd.f32 %v4784_v0, %v4617_v61  ;;  %v5028_v42 = vsel %vm1384_vm3, %v5026_v26, %v5027_v24  ;;  %v5464_v16 = vmul.f32 %v11007_v29, %v10594_v35  ;;  %6824 = vmatprep.mubr.msk.f32.mxu1 %vm5943_vm5, %v5918_v30  ;;  %v5465_v28 = vmul.f32 %v11007_v29, %v10591_v57  ;;  %v12532_v26 = vld [vmem:[#allocation15_spill] sm:$0xff] }
 0x2fa   : > { %v5416_v15 = vadd.f32 %v5337_v12, %v5172_v27  ;;  %v4062_v49 = vmul.f32 %v9268_v21, %v12478_v8  ;;  %v5338_v59 = vrot.slane %v5220_v6, 1  ;;  %v5339_v18 = vrot.slane %v5221_v34, 1 }
 0x2fb   : > { %v5105_v43 = vadd.f32 %v5028_v42, %v4861_v2  ;;  %v5582_v53 = vrot.slane %v5464_v16, 2  ;;  %v12527_v54 = vrot.slane %v12526_v48, 1  ;;  %v12528_v19 = vrot.slane %v12516_v60, 1  ;;  %v12534_v42 = vld [vmem:[#allocation24_spill] sm:$0xff]  ;;  %v12536_v16 = vld [vmem:[#allocation23_spill] sm:$0xff] }
 0x2fc   : > { %v5660_v41 = vadd.f32 %v5581_v62, %v5416_v15  ;;  %v5583_v55 = vrot.slane %v5465_v28, 2  ;;  %v5340_v37 = vsel %vm1109_vm2, %v5338_v59, %v5339_v18  ;;  %v12530_v61 = vrot.slane %v12529_v25, 2  ;;  %v12538_v28 = vld [vmem:[#allocation35_spill] sm:$0xff]  ;;  %v12544_v25 = vld [vmem:[#allocation37_spill] sm:$0xff] }
 0x2fd   : > { %v4230_v39 = vsel %vm1109_vm2, %v12528_v19, %v12527_v54  ;;  %v5173_v58 = vadd.f32 %v5141_v56, %v5105_v43  ;;  %v12531_v63 = vrot.slane %v12520_v1, 2  ;;  %v4586_v0 = vmul.f32 %v9316_v40, %v10425_v44  ;;  %v12540_v19 = vld [vmem:[#allocation28_spill] sm:$0xff] }
 0x2fe   : > { %v4306_v12 = vadd.f32 %v4230_v39, %v4062_v49  ;;  %v12533_v30 = vrot.slane %v12532_v26, 1  ;;  %v11413_v62 = vadd.f32 %v10818_v31, %v5660_v41  ;;  %v5584_v27 = vsel %vm1384_vm3, %v5582_v53, %v5583_v55  ;;  %v12542_v41 = vld [vmem:[#allocation38_spill] sm:$0xff] }
 0x2ff   : > { %v4474_v8 = vsel %vm1384_vm3, %v12531_v63, %v12530_v61  ;;  %v5417_v56 = vadd.f32 %v5340_v37, %v5173_v58  ;;  %v12535_v6 = vrot.slane %v12534_v42, 2  ;;  %v5142_v34 = vmul.f32 %v9727_v7, %v10591_v57  ;;  %v7220_v59 = vpop.eup %7219 }
 0x300   : > { %v4786_v60 = vsel %vm1109_vm2, %v4783_v50, %v12533_v30  ;;  %v4550_v2 = vadd.f32 %v4474_v8, %v4306_v12  ;;  %v12537_v15 = vrot.slane %v12536_v16, 1  ;;  %v12539_v50 = vrot.slane %v12538_v28, 2  ;;  %v7222_v12 = vpop.eup %7221  ;;  %v12547_v8 = vld [vmem:[#allocation27_spill] sm:$0xff]  ;;  %v12549_v16 = vld [vmem:[#allocation42_spill] sm:$0xff] }
 0x301   : > { %v5030_v1 = vsel %vm1384_vm3, %v5027_v24, %v12535_v6  ;;  %v6619_v48 = vmul.f32 -1.442695, %v11413_v62  ;;  %v5661_v53 = vadd.f32 %v5584_v27, %v5417_v56  ;;  %v12541_v39 = vrot.slane %v12540_v19, 1 }
 0x302   : > { %v5342_v43 = vsel %vm1109_vm2, %v5339_v18, %v12537_v15  ;;  %v5586_v49 = vsel %vm1384_vm3, %v5583_v55, %v12539_v50  ;;  %v4618_v54 = vadd.f32 %v4586_v0, %v4550_v2  ;;  %v12543_v24 = vrot.slane %v12542_v41, 1  ;;  %v12545_v18 = vld [vmem:[#allocation30_spill] sm:$0xff]  ;;  %v6795_v2 = vpop.f32.mrf.mxu1 }
 0x303   : > { %v5825_v37 = vadd.f32 1.0, %v7220_v59  ;;  %v12546_v63 = vrot.slane %v12545_v18, 2  ;;  %v12548_v26 = vrot.slane %v12547_v8, 2  ;;  %v4587_v30 = vmul.f32 %v9316_v40, %v10594_v35  ;;  %v7224_v28 = vpop.eup %7223 }
 0x304   : > { %v4233_v58 = vsel %vm1109_vm2, %v12543_v24, %v12541_v39  ;;  %v5919_v0 = vmul.f32 %v7222_v12, %v11265_v22  ;;  %7227 = vpow2.f32 %v6619_v48  ;;  %v11443_v56 = vadd.f32 %v10818_v31, %v5661_v53 }
 0x305   : > { %v4307_v61 = vadd.f32 %v4233_v58, %v12544_v25  ;;  %v4477_v55 = vsel %vm1384_vm3, %v12548_v26, %v12546_v63  ;;  %v4862_v27 = vadd.f32 %v4786_v60, %v4618_v54  ;;  %7229 = vrcp.f32 %v5825_v37  ;;  %v3447_v60 = vpop.f32.mrf.mxu1  ;;  %v7226_v48 = vpop.eup %7225 }
 0x306   : > { %v4668_v6 = vmul.f32 %v9303_v13, %v10591_v57  ;;  %v4787_v15 = vrot.slane %v12549_v16, 1  ;;  %6825 = vmatmul.mubr.msk.f32.gmra.mxu1 %vm5943_vm5, %v5919_v0  ;;  %v6620_v50 = vmul.f32 -1.442695, %v11443_v56  ;;  %v4911_v22 = vmul.f32 %v9311_v36, %v10594_v35 }
 0x307   : > { %v4551_v42 = vadd.f32 %v4477_v55, %v4307_v61  ;;  %v5106_v59 = vadd.f32 %v5030_v1, %v4862_v27  ;;  %v4912_v31 = vmul.f32 %v9311_v36, %v10591_v57  ;;  %v5826_v53 = vadd.f32 1.0, %v7224_v28  ;;  %v12553_v28 = vld [vmem:[#allocation14_spill] sm:$0xff] }
 0x308   : > { %v4788_v39 = vrot.slane %v4668_v6, 1  ;;  %v5143_v41 = vmul.f32 %v9727_v7, %v10751_v11  ;;  %v5920_v24 = vmul.f32 %v7226_v48, %v11294_v14  ;;  %7231 = vpow2.f32 %v6620_v50 }
 0x309   : > { %v4619_v54 = vadd.f32 %v4587_v30, %v4551_v42  ;;  %v5174_v58 = vadd.f32 %v5142_v34, %v5106_v59  ;;  %v5031_v12 = vrot.slane %v4911_v22, 2  ;;  %7233 = vrcp.f32 %v5826_v53  ;;  %v12550_v42 = vld [vmem:[#allocation39_spill] sm:$0xff] }
 0x30a   : > { %v4789_v1 = vsel %vm1109_vm2, %v4787_v15, %v4788_v39  ;;  %v5032_v35 = vrot.slane %v4912_v31, 2  ;;  %v5223_v37 = vmul.f32 %v9321_v17, %v10751_v11  ;;  %6827 = vmatprep.mubr.msk.f32.mxu1 %vm5943_vm5, %v5920_v24  ;;  %v5224_v63 = vmul.f32 %v9321_v17, %v10748_v33 }
 0x30b   : > { %v5418_v25 = vadd.f32 %v5342_v43, %v5174_v58  ;;  %v4863_v61 = vadd.f32 %v4789_v1, %v4619_v54  ;;  %v5467_v14 = vmul.f32 %v11007_v29, %v10751_v11  ;;  %v5468_v26 = vmul.f32 %v11007_v29, %v10748_v33  ;;  %v12558_v58 = vld [vmem:[#allocation22_spill] sm:$0xff] }
 0x30c   : > { %v5033_v34 = vsel %vm1384_vm3, %v5031_v12, %v5032_v35  ;;  %v5343_v8 = vrot.slane %v5223_v37, 1  ;;  %v4064_v55 = vmul.f32 %v9268_v21, %v10425_v44  ;;  %v5344_v27 = vrot.slane %v5224_v63, 1 }
 0x30d   : > { %v5662_v30 = vadd.f32 %v5586_v49, %v5418_v25  ;;  %v5107_v0 = vadd.f32 %v5033_v34, %v4863_v61  ;;  %v5587_v43 = vrot.slane %v5467_v14, 2  ;;  %v5588_v2 = vrot.slane %v5468_v26, 2  ;;  %v11485_v49 = vld [vmem:[%s11874_s8] ss:$0 sm:$0xff]  ;;  %v12562_v26 = vld [vmem:[#allocation53_spill] sm:$0xff] }
 0x30e   : > { %v12551_v6 = vrot.slane %v12550_v42, 1  ;;  %v12552_v16 = vrot.slane %v12540_v19, 1  ;;  %v12554_v50 = vrot.slane %v12553_v28, 2  ;;  %v12555_v59 = vrot.slane %v12545_v18, 2  ;;  %v12556_v18 = vld [vmem:[#allocation52_spill] sm:$0xff] }
 0x30f   : > { %v4588_v44 = vmul.f32 %v9316_v40, %v10591_v57  ;;  %v11488_v31 = vadd.f32 %v11485_v49, %v5662_v30  ;;  %v5175_v19 = vadd.f32 %v5143_v41, %v5107_v0  ;;  %v5345_v60 = vsel %vm1109_vm2, %v5343_v8, %v5344_v27  ;;  %v12564_v30 = vld [vmem:[#allocation51_spill] sm:$0xff] }
 0x310   : > { %v4235_v15 = vsel %vm1109_vm2, %v12552_v16, %v12551_v6  ;;  %v4479_v22 = vsel %vm1384_vm3, %v12555_v59, %v12554_v50  ;;  %v5589_v53 = vsel %vm1384_vm3, %v5587_v43, %v5588_v2  ;;  %v12557_v54 = vrot.slane %v12556_v18, 1  ;;  %v12566_v43 = vld [vmem:[#allocation43_spill] sm:$0xff]  ;;  %v12568_v6 = vld [vmem:[#allocation41_spill] sm:$0xff]  ;;  %v12570_v59 = vld [vmem:[#allocation36_spill] sm:$0xff] }
 0x311   : > { %v4308_v48 = vadd.f32 %v4235_v15, %v4064_v55  ;;  %v12559_v12 = vrot.slane %v12558_v58, 2  ;;  %v5144_v37 = vmul.f32 %v9727_v7, %v10748_v33  ;;  %v6621_v25 = vmul.f32 -1.442695, %v11488_v31  ;;  %v7228_v34 = vpop.eup %7227 }
 0x312   : > { %v4791_v24 = vsel %vm1109_vm2, %v4788_v39, %v12557_v54  ;;  %v5419_v61 = vadd.f32 %v5345_v60, %v5175_v19  ;;  %v12560_v63 = vrot.slane %v10742_v52, 1  ;;  %v12561_v8 = vrot.slane %v10745_v20, 2  ;;  %v12571_v60 = vld [vmem:[#allocation63_spill] sm:$0xff] }
 0x313   : > { %v5035_v1 = vsel %vm1384_vm3, %v5032_v35, %v12559_v12  ;;  %v4552_v41 = vadd.f32 %v4479_v22, %v4308_v48  ;;  %v12563_v55 = vrot.slane %v12562_v26, 1  ;;  %v12565_v35 = vrot.slane %v12564_v30, 1 }
 0x314   : > { %v5347_v14 = vsel %vm1109_vm2, %v5344_v27, %v12560_v63  ;;  %v5591_v39 = vsel %vm1384_vm3, %v5588_v2, %v12561_v8  ;;  %v12567_v42 = vrot.slane %v12566_v43, 2  ;;  %v12569_v16 = vrot.slane %v12568_v6, 2  ;;  %v7230_v27 = vpop.eup %7229 }
 0x315   : > { %v4238_v0 = vsel %vm1109_vm2, %v12565_v35, %v12563_v55  ;;  %v4589_v52 = vmul.f32 %v9316_v40, %v10751_v11  ;;  %v5827_v28 = vadd.f32 1.0, %v7228_v34  ;;  %7235 = vpow2.f32 %v6621_v25  ;;  %v7232_v12 = vpop.eup %7231 }
 0x316   : > { %v4482_v15 = vsel %vm1384_vm3, %v12569_v16, %v12567_v42  ;;  %v5663_v20 = vadd.f32 %v5589_v53, %v5419_v61  ;;  %v4620_v2 = vadd.f32 %v4588_v44, %v4552_v41  ;;  %v5921_v50 = vmul.f32 %v7230_v27, %v11339_v4  ;;  %v7234_v61 = vpop.eup %7233 }
 0x317   : > { %v4309_v22 = vadd.f32 %v4238_v0, %v12570_v59  ;;  %v4671_v19 = vmul.f32 %v9303_v13, %v10748_v33  ;;  %v4792_v48 = vrot.slane %v12571_v60, 1  ;;  %7237 = vrcp.f32 %v5827_v28 }
 0x318   : > { %v11525_v18 = vadd.f32 %v11485_v49, %v5663_v20  ;;  %v4864_v54 = vadd.f32 %v4791_v24, %v4620_v2  ;;  %v4914_v58 = vmul.f32 %v9311_v36, %v10751_v11  ;;  %6828 = vmatmul.mubr.msk.f32.gmra.mxu1 %vm5943_vm5, %v5921_v50  ;;  %v4915_v53 = vmul.f32 %v9311_v36, %v10748_v33  ;;  %v12572_v2 = vld [vmem:[#allocation31_spill] sm:$0xff] }
 0x319   : > { %v4553_v44 = vadd.f32 %v4482_v15, %v4309_v22  ;;  %v4793_v4 = vrot.slane %v4671_v19, 1  ;;  %v5145_v25 = vmul.f32 %v9727_v7, %v10901_v9  ;;  %v5828_v41 = vadd.f32 1.0, %v7232_v12 }
 0x31a   : > { %v6622_v63 = vmul.f32 -1.442695, %v11525_v18  ;;  %v5108_v34 = vadd.f32 %v5035_v1, %v4864_v54  ;;  %v5036_v24 = vrot.slane %v4914_v58, 2  ;;  %v5922_v8 = vmul.f32 %v7234_v61, %v11369_v5 }
 0x31b   : > { %v4621_v11 = vadd.f32 %v4589_v52, %v4553_v44  ;;  %v4794_v55 = vsel %vm1109_vm2, %v4792_v48, %v4793_v4  ;;  %v5037_v30 = vrot.slane %v4915_v53, 2  ;;  %7239 = vrcp.f32 %v5828_v41  ;;  %v12575_v48 = vld [vmem:[#allocation49_spill] sm:$0xff] }
 0x31c   : > { %v5176_v35 = vadd.f32 %v5144_v37, %v5108_v34  ;;  %v5226_v0 = vmul.f32 %v9321_v17, %v10901_v9  ;;  %v5227_v42 = vmul.f32 %v9321_v17, %v10898_v10  ;;  %6830 = vmatprep.mubr.msk.f32.mxu1 %vm5943_vm5, %v5922_v8  ;;  %7241 = vpow2.f32 %v6622_v63  ;;  %v12578_v53 = vld [vmem:[#allocation65_spill] sm:$0xff] }
 0x31d   : > { %v4865_v6 = vadd.f32 %v4794_v55, %v4621_v11  ;;  %v5038_v1 = vsel %vm1384_vm3, %v5036_v24, %v5037_v30  ;;  %v5470_v5 = vmul.f32 %v11007_v29, %v10901_v9  ;;  %v5471_v37 = vmul.f32 %v11007_v29, %v10898_v10  ;;  %v12580_v63 = vld [vmem:[#allocation33_spill] sm:$0xff] }
 0x31e   : > { %v5420_v16 = vadd.f32 %v5347_v14, %v5176_v35  ;;  %v5348_v15 = vrot.slane %v5226_v0, 1  ;;  %v5349_v52 = vrot.slane %v5227_v42, 1  ;;  %v4066_v20 = vmul.f32 %v9268_v21, %v10591_v57 }
 0x31f   : > { %v5109_v27 = vadd.f32 %v5038_v1, %v4865_v6  ;;  %v5592_v28 = vrot.slane %v5470_v5, 2  ;;  %v12573_v50 = vrot.slane %v12572_v2, 1  ;;  %v12574_v59 = vrot.slane %v12562_v26, 1 }
 0x320   : > { %v5664_v19 = vadd.f32 %v5591_v39, %v5420_v16  ;;  %v5350_v60 = vsel %vm1109_vm2, %v5348_v15, %v5349_v52  ;;  %v5593_v14 = vrot.slane %v5471_v37, 2  ;;  %v12576_v54 = vrot.slane %v12575_v48, 2  ;;  %v12586_v16 = vld [vmem:[#allocation50_spill] sm:$0xff]  ;;  %v12588_v37 = vld [vmem:[#allocation48_spill] sm:$0xff] }
 0x321   : > { %v4240_v22 = vsel %vm1109_vm2, %v12574_v59, %v12573_v50  ;;  %v12577_v58 = vrot.slane %v12566_v43, 2  ;;  %v5177_v12 = vadd.f32 %v5145_v25, %v5109_v27  ;;  %v4590_v57 = vmul.f32 %v9316_v40, %v10748_v33 }
 0x322   : > { %v4310_v44 = vadd.f32 %v4240_v22, %v4066_v20  ;;  %v12579_v61 = vrot.slane %v12578_v53, 1  ;;  %v11566_v39 = vadd.f32 %v11485_v49, %v5664_v19  ;;  %v5594_v41 = vsel %vm1384_vm3, %v5592_v28, %v5593_v14  ;;  %v7236_v24 = vpop.eup %7235  ;;  %v12590_v20 = vld [vmem:[#allocation34_spill] sm:$0xff] }
 0x323   : > { %v4484_v29 = vsel %vm1384_vm3, %v12577_v58, %v12576_v54  ;;  %v12581_v34 = vrot.slane %v12580_v63, 2  ;;  %v5146_v25 = vmul.f32 %v9727_v7, %v10898_v10  ;;  %v5421_v8 = vadd.f32 %v5350_v60, %v5177_v12  ;;  %v12591_v22 = vld [vmem:[#allocation54_spill] sm:$0xff] }
 0x324   : > { %v4796_v26 = vsel %vm1109_vm2, %v4793_v4, %v12579_v61  ;;  %v4554_v11 = vadd.f32 %v4484_v29, %v4310_v44  ;;  %v12582_v55 = vrot.slane %v10892_v47, 1  ;;  %v12583_v4 = vrot.slane %v10895_v38, 2 }
 0x325   : > { %v5040_v43 = vsel %vm1384_vm3, %v5037_v30, %v12581_v34  ;;  %v5829_v42 = vadd.f32 1.0, %v7236_v24  ;;  %v6623_v6 = vmul.f32 -1.442695, %v11566_v39  ;;  %v12584_v1 = vrot.slane %v10770_v3, 1  ;;  %v12602_v3 = vld [vmem:[#allocation55_spill] sm:$0xff] }
 0x326   : > { %v5352_v35 = vsel %vm1109_vm2, %v5349_v52, %v12582_v55  ;;  %v5596_v0 = vsel %vm1384_vm3, %v5593_v14, %v12583_v4  ;;  %v12585_v30 = vrot.slane %v10766_v23, 1  ;;  %v12587_v15 = vrot.slane %v12586_v16, 2  ;;  %v7238_v52 = vpop.eup %7237 }
 0x327   : > { %v12589_v27 = vrot.slane %v12588_v37, 2  ;;  %v5665_v28 = vadd.f32 %v5594_v41, %v5421_v8  ;;  %v4622_v38 = vadd.f32 %v4590_v57, %v4554_v11  ;;  %v4591_v50 = vmul.f32 %v9316_v40, %v10901_v9 }
 0x328   : > { %v4243_v5 = vsel %vm1109_vm2, %v12585_v30, %v12584_v1  ;;  %v5923_v59 = vmul.f32 %v7238_v52, %v11413_v62  ;;  %7243 = vrcp.f32 %v5829_v42  ;;  %v4674_v23 = vmul.f32 %v9303_v13, %v10898_v10  ;;  %v7240_v44 = vpop.eup %7239  ;;  %v12598_v30 = vld [vmem:[#allocation46_spill] sm:$0xff] }
 0x329   : > { %v4487_v47 = vsel %vm1384_vm3, %v12589_v27, %v12587_v15  ;;  %v4311_v2 = vadd.f32 %v4243_v5, %v12590_v20  ;;  %v4797_v19 = vrot.slane %v12591_v22, 1  ;;  %7245 = vpow2.f32 %v6623_v6  ;;  %v7242_v41 = vpop.eup %7241 }
 0x32a   : > { %v11599_v60 = vadd.f32 %v11485_v49, %v5665_v28  ;;  %v4866_v14 = vadd.f32 %v4796_v26, %v4622_v38  ;;  %6831 = vmatmul.mubr.msk.f32.gmra.mxu1 %vm5943_vm5, %v5923_v59  ;;  %v4798_v54 = vrot.slane %v4674_v23, 1  ;;  %v4917_v58 = vmul.f32 %v9311_v36, %v10901_v9  ;;  %v12604_v38 = vld [vmem:[#allocation66_spill] sm:$0xff]  ;;  %v12608_v23 = vld [vmem:[#allocation45_spill] sm:$0xff] }
 0x32b   : > { %v4555_v48 = vadd.f32 %v4487_v47, %v4311_v2  ;;  %v4918_v62 = vmul.f32 %v9311_v36, %v10898_v10  ;;  %v12592_v29 = vrot.slane %v10999_v45, 1  ;;  %v12593_v13 = vrot.slane %v10996_v46, 1  ;;  %v12605_v2 = vld [vmem:[#allocation62_spill] sm:$0xff] }
 0x32c   : > { %v6624_v57 = vmul.f32 -1.442695, %v11599_v60  ;;  %v5110_v53 = vadd.f32 %v5040_v43, %v4866_v14  ;;  %v5598_v26 = vrot.slane %v11013_v32, 2  ;;  %v5924_v63 = vmul.f32 %v7240_v44, %v11443_v56  ;;  %v12595_v56 = vld [vmem:[#allocation44_spill] sm:$0xff] }
 0x32d   : > { %v5355_v12 = vsel %vm1109_vm2, %v12593_v13, %v12592_v29  ;;  %v4623_v61 = vadd.f32 %v4591_v50, %v4555_v48  ;;  %v4799_v9 = vsel %vm1109_vm2, %v4797_v19, %v4798_v54  ;;  %v5041_v34 = vrot.slane %v4917_v58, 2  ;;  %v12610_v19 = vld [vmem:[#allocation61_spill] sm:$0xff]  ;;  %v12612_v48 = vld [vmem:[#allocation60_spill] sm:$0xff] }
 0x32e   : > { %v5042_v36 = vrot.slane %v4918_v62, 2  ;;  %v5830_v24 = vadd.f32 1.0, %v7242_v41  ;;  %7247 = vpow2.f32 %v6624_v57  ;;  %v5178_v8 = vadd.f32 %v5146_v25, %v5110_v53  ;;  %6833 = vmatprep.mubr.msk.f32.mxu1 %vm5943_vm5, %v5924_v63  ;;  %v12615_v44 = vld [vmem:[#allocation76_spill] sm:$0xff]  ;;  %v12616_v53 = vld [vmem:[#allocation2_spill] sm:$0xff]  ;;  %v7285_v63 = vld [vmem:[%s11873_s7 + $0x8] ss:$0 sm:$0xff] }
 0x32f   : > { %v4867_v46 = vadd.f32 %v4799_v9, %v4623_v61  ;;  %v12594_v43 = vrot.slane %v11010_v51, 2  ;;  %v4068_v32 = vmul.f32 %v9268_v21, %v10748_v33  ;;  %v12596_v4 = vrot.slane %v12595_v56, 1  ;;  %v12600_v21 = vld [vmem:[#allocation64_spill] sm:$0xff] }
 0x330   : > { %v5043_v11 = vsel %vm1384_vm3, %v5041_v34, %v5042_v36  ;;  %v12597_v42 = vmov %v12584_v1  ;;  %7249 = vrcp.f32 %v5830_v24  ;;  %v5422_v25 = vadd.f32 %v5352_v35, %v5178_v8 }
 0x331   : > { %v5599_v55 = vsel %vm1384_vm3, %v12594_v43, %v5598_v26  ;;  %v4245_v6 = vsel %vm1109_vm2, %v12597_v42, %v12596_v4  ;;  %v5111_v1 = vadd.f32 %v5043_v11, %v4867_v46  ;;  %v12599_v5 = vrot.slane %v12598_v30, 2 }
 0x332   : > { %v4312_v37 = vadd.f32 %v4245_v6, %v4068_v32  ;;  %v4592_v27 = vmul.f32 %v9316_v40, %v10898_v10  ;;  %v12601_v33 = vrot.slane %v12600_v21, 1  ;;  %v12603_v52 = vrot.slane %v12602_v3, 2 }
 0x333   : > { %v4489_v51 = vsel %vm1384_vm3, %v12587_v15, %v12599_v5  ;;  %v5666_v35 = vadd.f32 %v5596_v0, %v5422_v25  ;;  %v5179_v20 = vadd.f32 %v12604_v38, %v5111_v1  ;;  %v12606_v50 = vrot.slane %v12605_v2, 1  ;;  %v12614_v0 = vld [vmem:[#allocation3_spill] sm:$0xff]  ;;  %v12617_v15 = vld [vmem:[#allocation57_spill] sm:$0xff] }
 0x334   : > { %v4801_v47 = vsel %vm1109_vm2, %v4798_v54, %v12601_v33  ;;  %v5045_v28 = vsel %vm1384_vm3, %v5042_v36, %v12603_v52  ;;  %v12607_v16 = vmov %v12592_v29  ;;  %v12609_v22 = vrot.slane %v12608_v23, 2  ;;  %v6802_v36 = vpop.f32.mrf.mxu1  ;;  %v12622_v52 = vld [vmem:[#allocation56_spill] sm:$0xff] }
 0x335   : > { %v5357_v59 = vsel %vm1109_vm2, %v12607_v16, %v12606_v50  ;;  %v4556_v10 = vadd.f32 %v4489_v51, %v4312_v37  ;;  %v12611_v14 = vrot.slane %v12610_v19, 2  ;;  %v12613_v54 = vrot.slane %v12612_v48, 2  ;;  %v7244_v24 = vpop.eup %7243  ;;  %v12619_v37 = vld [vmem:[#allocation47_spill] sm:$0xff]  ;;  %v12625_v50 = vld [vmem:[#allocation68_spill] sm:$0xff] }
 0x336   : > { %v5601_v40 = vsel %vm1384_vm3, %v5598_v26, %v12609_v22  ;;  %v5149_v62 = vmul.f32 %v9727_v7, %v12614_v0  ;;  %v5232_v29 = vmul.f32 %v9321_v17, %v12614_v0  ;;  %v11659_v45 = vadd.f32 %v11485_v49, %v5666_v35  ;;  %v7246_v43 = vpop.eup %7245  ;;  %v6106_v21 = vpop.f32.mrf.mxu1 }
 0x337   : > { %v5048_v58 = vsel %vm1384_vm3, %v12613_v54, %v12611_v14  ;;  %v5423_v13 = vadd.f32 %v5355_v12, %v5179_v20  ;;  %v5233_v61 = vmul.f32 %v9321_v17, %v12616_v53  ;;  %v4624_v26 = vadd.f32 %v4592_v27, %v4556_v10  ;;  %v11692_v20 = vld [vmem:[%s11876_s10] ss:$0 sm:$0xff]  ;;  %v12626_v10 = vld [vmem:[#allocation4_spill] sm:$0xff] }
 0x338   : > { %v5113_v57 = vadd.f32 %v5048_v58, %v12615_v44  ;;  %v5358_v41 = vrot.slane %v5232_v29, 1  ;;  %v5476_v9 = vmul.f32 %v7285_v63, %v12614_v0  ;;  %v5477_v34 = vmul.f32 %v7285_v63, %v12616_v53  ;;  %v6805_v48 = vpop.f32.mrf.mxu1 }
 0x339   : > { %v6625_v8 = vmul.f32 -1.442695, %v11659_v45  ;;  %v5667_v12 = vadd.f32 %v5599_v55, %v5423_v13  ;;  %v5359_v11 = vrot.slane %v5233_v61, 1  ;;  %v5925_v32 = vmul.f32 %v7244_v24, %v11488_v31 }
 0x33a   : > { %v5181_v46 = vadd.f32 %v5149_v62, %v5113_v57  ;;  %v4868_v56 = vadd.f32 %v4801_v47, %v4624_v26  ;;  %v5602_v4 = vrot.slane %v5476_v9, 2  ;;  %v5603_v42 = vrot.slane %v5477_v34, 2  ;;  %v12621_v47 = vld [vmem:[#allocation67_spill] sm:$0xff] }
 0x33b   : > { %v5831_v6 = vadd.f32 1.0, %v7246_v43  ;;  %7251 = vpow2.f32 %v6625_v8  ;;  %v11672_v25 = vadd.f32 %v11485_v49, %v5667_v12  ;;  %v5360_v1 = vsel %vm1109_vm2, %v5358_v41, %v5359_v11  ;;  %6834 = vmatmul.mubr.msk.f32.gmra.mxu1 %vm5943_vm5, %v5925_v32  ;;  %v7248_v2 = vpop.eup %7247  ;;  %v7286_v41 = vld [vmem:[%s7451_s26 + $0x8] sm:$0xff]  ;;  %v7287_v12 = vld [vmem:[%s7451_s26] sm:$0xff] }
 0x33c   : > { %v5112_v30 = vadd.f32 %v5045_v28, %v4868_v56  ;;  %v5425_v5 = vadd.f32 %v5360_v1, %v5181_v46  ;;  %v5604_v55 = vsel %vm1384_vm3, %v5602_v4, %v5603_v42  ;;  %v12618_v51 = vrot.slane %v12617_v15, 1  ;;  %v7289_v56 = vld [vmem:[%s7451_s26 + $0x10] sm:$0xff] }
 0x33d   : > { %v12620_v31 = vrot.slane %v12619_v37, 1  ;;  %7253 = vrcp.f32 %v5831_v6  ;;  %v6626_v33 = vmul.f32 -1.442695, %v11672_v25  ;;  %v12623_v35 = vrot.slane %v12622_v52, 2  ;;  %v7250_v0 = vpop.eup %7249  ;;  %v7290_v52 = vld [vmem:[%s7451_s26 + $0x28] sm:$0xff] }
 0x33e   : > { %v12624_v38 = vmov %v12611_v14  ;;  %v5180_v16 = vadd.f32 %v12625_v50, %v5112_v30  ;;  %v5669_v23 = vadd.f32 %v5604_v55, %v5425_v5  ;;  %v5150_v22 = vmul.f32 %v9727_v7, %v12616_v53  ;;  %v6116_v53 = vpop.f32.mrf.mxu1  ;;  %v7291_v50 = vld [vmem:[%s7451_s26 + $0x20] sm:$0xff] }
 0x33f   : > { %v4806_v27 = vsel %vm1109_vm2, %v12620_v31, %v12618_v51  ;;  %v5050_v28 = vsel %vm1384_vm3, %v12624_v38, %v12623_v35  ;;  %v5234_v14 = vmul.f32 %v9321_v17, %v12626_v10  ;;  %v5832_v19 = vadd.f32 1.0, %v7248_v2 }
 0x340   : > { %v4870_v3 = vadd.f32 %v4806_v27, %v12621_v47  ;;  %7255 = vpow2.f32 %v6626_v33  ;;  %v5478_v58 = vmul.f32 %v7285_v63, %v12626_v10  ;;  %v5424_v62 = vadd.f32 %v5357_v59, %v5180_v16 }
 0x341   : > { %v11701_v29 = vadd.f32 %v11485_v49, %v5669_v23  ;;  %v5361_v13 = vrot.slane %v5234_v14, 1  ;;  %v6112_v44 = vadd.f32 %v6802_v36, %v11692_v20  ;;  %v5926_v7 = vmul.f32 %v7250_v0, %v11525_v18 }
 0x342   : > { %v5114_v54 = vadd.f32 %v5050_v28, %v4870_v3  ;;  %7257 = vrcp.f32 %v5832_v19  ;;  %v5605_v17 = vrot.slane %v5478_v58, 2  ;;  %v5668_v59 = vadd.f32 %v5601_v40, %v5424_v62 }
 0x343   : > { %v6628_v61 = vmul.f32 -1.442695, %v11701_v29  ;;  %v5362_v26 = vsel %vm1109_vm2, %v5359_v11, %v5361_v13  ;;  %v6266_v18 = vadd.f32 %v7286_v41, %v6112_v44  ;;  %6836 = vmatprep.mubr.msk.f32.mxu1 %vm5943_vm5, %v5926_v7  ;;  %v6107_v34 = vadd.f32 %v11692_v20, %v6106_v21  ;;  %v7288_v11 = vld [vmem:[%s7451_s26 + $0x18] sm:$0xff]  ;;  %v6808_v21 = vpop.f32.mrf.mxu1  ;;  %v7293_v7 = vld [vmem:[%s7451_s26 + $0x30] sm:$0xff] }
 0x344   : > { %v5182_v57 = vadd.f32 %v5150_v22, %v5114_v54  ;;  %v5606_v9 = vsel %vm1384_vm3, %v5603_v42, %v5605_v17  ;;  %v6122_v36 = vadd.f32 %v6805_v48, %v11692_v20  ;;  %v5707_v40 = vadd.f32 %v11485_v49, %v5668_v59 }
 0x345   : > { %7259 = vpow2.f32 %v6628_v61  ;;  %6298 = vst.msk [vmem:[%s11710_s22 + $0x8] sm:$0xff] %vm3098_vm4, %v6266_v18  ;;  %v6117_v24 = vadd.f32 %v11692_v20, %v6116_v53  ;;  %v6265_v46 = vadd.f32 %v7287_v12, %v6107_v34  ;;  %v6126_v3 = vpop.f32.mrf.mxu1  ;;  %v7294_v61 = vld [vmem:[%s7451_s26 + $0x48] sm:$0xff]  ;;  %v7295_v18 = vld [vmem:[%s7451_s26 + $0x40] sm:$0xff]  ;;  %v7297_v12 = vld [vmem:[%s7451_s26 + $0x50] sm:$0xff] }
 0x346   : > { %v5426_v63 = vadd.f32 %v5362_v26, %v5182_v57  ;;  %v6268_v43 = vadd.f32 %v7288_v11, %v6122_v36  ;;  %v6627_v32 = vmul.f32 -1.442695, %v5707_v40  ;;  %v6127_v38 = vadd.f32 %v11692_v20, %v6126_v3 }
 0x347   : > { %v6267_v4 = vadd.f32 %v7289_v56, %v6117_v24  ;;  %6297 = vst.msk [vmem:[%s11710_s22] sm:$0xff] %vm3098_vm4, %v6265_v46  ;;  %v7298_v56 = vld [vmem:[%s7451_s26 + $0x68] sm:$0xff] }
 0x348   : > { %v5670_v8 = vadd.f32 %v5606_v9, %v5426_v63  ;;  %6300 = vst.msk [vmem:[%s11710_s22 + $0x18] sm:$0xff] %vm3098_vm4, %v6268_v43  ;;  %v7252_v6 = vpop.eup %7251  ;;  %7261 = vpow2.f32 %v6627_v32  ;;  %v6269_v16 = vadd.f32 %v7291_v50, %v6127_v38 }
 0x349   : > { %6299 = vst.msk [vmem:[%s11710_s22 + $0x10] sm:$0xff] %vm3098_vm4, %v6267_v4  ;;  %v5833_v1 = vadd.f32 1.0, %v7252_v6  ;;  %v7299_v6 = vld [vmem:[%s7451_s26 + $0x60] sm:$0xff] }
 0x34a   : > { %v5709_v42 = vadd.f32 %v11485_v49, %v5670_v8  ;;  %v7254_v5 = vpop.eup %7253  ;;  %6301 = vst.msk [vmem:[%s11710_s22 + $0x20] sm:$0xff] %vm3098_vm4, %v6269_v16 }
 0x34b   : > { %v5927_v55 = vmul.f32 %v7254_v5, %v11566_v39  ;;  %7263 = vrcp.f32 %v5833_v1  ;;  %v6132_v39 = vadd.f32 %v6808_v21, %v11692_v20 }
 0x34c   : > { %v6629_v30 = vmul.f32 -1.442695, %v5709_v42 }
 0x34d   : > { %v7256_v15 = vpop.eup %7255  ;;  %6837 = vmatmul.mubr.msk.f32.gmra.mxu1 %vm5943_vm5, %v5927_v55  ;;  %v6270_v35 = vadd.f32 %v7290_v52, %v6132_v39  ;;  %v6811_v54 = vpop.f32.mrf.mxu1  ;;  %v7302_v39 = vld [vmem:[%s7451_s26 + $0x88] sm:$0xff]  ;;  %v7303_v52 = vld [vmem:[%s7451_s26 + $0x80] sm:$0xff] }
 0x34e   : > { %7265 = vpow2.f32 %v6629_v30  ;;  %v5834_v49 = vadd.f32 1.0, %v7256_v15  ;;  %v6142_v58 = vadd.f32 %v6811_v54, %v11692_v20  ;;  %v7300_v15 = vld [vmem:[%s7451_s26 + $0x78] sm:$0xff] }
 0x34f   : > { %v7258_v51 = vpop.eup %7257  ;;  %6302 = vst.msk [vmem:[%s11710_s22 + $0x28] sm:$0xff] %vm3098_vm4, %v6270_v35  ;;  %v6136_v0 = vpop.f32.mrf.mxu1 }
 0x350   : > { %v5928_v37 = vmul.f32 %v7258_v51, %v11599_v60  ;;  %7267 = vrcp.f32 %v5834_v49  ;;  %v6137_v44 = vadd.f32 %v11692_v20, %v6136_v0 }
 0x352   : > { %v7260_v31 = vpop.eup %7259  ;;  %6839 = vmatprep.mubr.msk.f32.mxu1 %vm5943_vm5, %v5928_v37  ;;  %v6271_v57 = vadd.f32 %v7293_v7, %v6137_v44  ;;  %v7301_v37 = vld [vmem:[%s7451_s26 + $0x70] sm:$0xff]  ;;  %v7308_v44 = vld [vmem:[%s7451_s26 + $0xb8] sm:$0xff] }
 0x353   : > { %v5836_v27 = vadd.f32 1.0, %v7260_v31 }
 0x354   : > { %6303 = vst.msk [vmem:[%s11710_s22 + $0x30] sm:$0xff] %vm3098_vm4, %v6271_v57  ;;  %v7309_v57 = vld [vmem:[%s7451_s26 + $0xb0] sm:$0xff] }
 0x355   : > { %v7262_v33 = vpop.eup %7261  ;;  %7269 = vrcp.f32 %v5836_v27 }
 0x356   : > { %v5835_v47 = vadd.f32 1.0, %v7262_v33 }
 0x358   : > { %v7264_v60 = vpop.eup %7263  ;;  %7271 = vrcp.f32 %v5835_v47 }
 0x359   : > { %v5929_v2 = vmul.f32 %v7264_v60, %v11659_v45 }
 0x35b   : > { %v7266_v28 = vpop.eup %7265  ;;  %6840 = vmatmul.mubr.msk.f32.gmra.mxu1 %vm5943_vm5, %v5929_v2  ;;  %v7304_v2 = vld [vmem:[%s7451_s26 + $0x98] sm:$0xff] }
 0x35c   : > { %v5837_v23 = vadd.f32 1.0, %v7266_v28 }
 0x35d   : > { %v7268_v22 = vpop.eup %7267 }
 0x35e   : > { %7273 = vrcp.f32 %v5837_v23  ;;  %v5930_v10 = vmul.f32 %v7268_v22, %v11672_v25  ;;  %v7292_v25 = vld [vmem:[%s7451_s26 + $0x38] sm:$0xff]  ;;  %v7305_v23 = vld [vmem:[%s7451_s26 + $0x90] sm:$0xff] }
 0x35f   : > { %v6272_v13 = vadd.f32 %v7292_v25, %v6142_v58  ;;  %v7307_v58 = vld [vmem:[%s7451_s26 + $0xa0] sm:$0xff] }
 0x360   : > { %6842 = vmatprep.mubr.msk.f32.mxu1 %vm5943_vm5, %v5930_v10 }
 0x361   : > { %6304 = vst.msk [vmem:[%s11710_s22 + $0x38] sm:$0xff] %vm3098_vm4, %v6272_v13 }
 0x362   : > { %v7270_v14 = vpop.eup %7269 }
 0x363   : > { %v5932_v48 = vmul.f32 %v7270_v14, %v11701_v29 }
 0x365   : > { %v7272_v45 = vpop.eup %7271 }
 0x366   : > { %v5931_v19 = vmul.f32 %v7272_v45, %v5707_v40  ;;  %v7296_v40 = vld [vmem:[%s7451_s26 + $0x58] sm:$0xff] }
 0x368   : > { %6843 = vmatmul.mubr.msk.f32.gmra.mxu1 %vm5943_vm5, %v5931_v19  ;;  %v6814_v17 = vpop.f32.mrf.mxu1 }
 0x369   : > { %6845 = vmatprep.mubr.msk.f32.mxu1 %vm5943_vm5, %v5932_v48  ;;  %v6152_v53 = vadd.f32 %v6814_v17, %v11692_v20  ;;  %v7306_v48 = vld [vmem:[%s7451_s26 + $0xa8] sm:$0xff] }
 0x36a   : > { %v6146_v59 = vpop.f32.mrf.mxu1 }
 0x36b   : > { %v7274_v62 = vpop.eup %7273  ;;  %v6274_v26 = vadd.f32 %v7294_v61, %v6152_v53  ;;  %v6147_v41 = vadd.f32 %v11692_v20, %v6146_v59 }
 0x36c   : > { %v5933_v29 = vmul.f32 %v7274_v62, %v5709_v42 }
 0x36d   : > { %6306 = vst.msk [vmem:[%s11710_s22 + $0x48] sm:$0xff] %vm3098_vm4, %v6274_v26  ;;  %v6273_v63 = vadd.f32 %v7295_v18, %v6147_v41  ;;  %v7310_v26 = vld [vmem:[%s7451_s26 + $0xc8] sm:$0xff] }
 0x36e   : > { %6846 = vmatmul.mubr.msk.f32.gmra.mxu1 %vm5943_vm5, %v5933_v29 }
 0x36f   : > { %6305 = vst.msk [vmem:[%s11710_s22 + $0x40] sm:$0xff] %vm3098_vm4, %v6273_v63  ;;  %v7311_v63 = vld [vmem:[%s7451_s26 + $0xc0] sm:$0xff] }
 0x38c   : > { %v6817_v9 = vpop.f32.mrf.mxu1 }
 0x38d   : > { %v6162_v34 = vadd.f32 %v6817_v9, %v11692_v20 }
 0x38e   : > { %v6156_v36 = vpop.f32.mrf.mxu1 }
 0x38f   : > { %v6276_v24 = vadd.f32 %v7296_v40, %v6162_v34  ;;  %v6157_v8 = vadd.f32 %v11692_v20, %v6156_v36 }
 0x391   : > { %6308 = vst.msk [vmem:[%s11710_s22 + $0x58] sm:$0xff] %vm3098_vm4, %v6276_v24  ;;  %v6275_v46 = vadd.f32 %v7297_v12, %v6157_v8  ;;  %v7312_v24 = vld [vmem:[%s7451_s26 + $0xd8] sm:$0xff] }
 0x393   : > { %6307 = vst.msk [vmem:[%s11710_s22 + $0x50] sm:$0xff] %vm3098_vm4, %v6275_v46  ;;  %v7313_v46 = vld [vmem:[%s7451_s26 + $0xd0] sm:$0xff] }
 0x3a4   : > { %v6820_v11 = vpop.f32.mrf.mxu1 }
 0x3a5   : > { %v6172_v43 = vadd.f32 %v6820_v11, %v11692_v20 }
 0x3a6   : > { %v6166_v32 = vpop.f32.mrf.mxu1 }
 0x3a7   : > { %v6278_v4 = vadd.f32 %v7298_v56, %v6172_v43  ;;  %v6167_v42 = vadd.f32 %v11692_v20, %v6166_v32 }
 0x3a9   : > { %6310 = vst.msk [vmem:[%s11710_s22 + $0x68] sm:$0xff] %vm3098_vm4, %v6278_v4  ;;  %v6277_v1 = vadd.f32 %v7299_v6, %v6167_v42  ;;  %v7314_v4 = vld [vmem:[%s7451_s26 + $0xe8] sm:$0xff] }
 0x3ab   : > { %6309 = vst.msk [vmem:[%s11710_s22 + $0x60] sm:$0xff] %vm3098_vm4, %v6277_v1 }
 0x3b4   : > { %v6823_v30 = vpop.f32.mrf.mxu1 }
 0x3b5   : > { %v6182_v5 = vadd.f32 %v6823_v30, %v11692_v20  ;;  %v7315_v30 = vld [vmem:[%s7451_s26 + $0xe0] sm:$0xff] }
 0x3b6   : > { %v6176_v55 = vpop.f32.mrf.mxu1 }
 0x3b7   : > { %v6280_v49 = vadd.f32 %v7300_v15, %v6182_v5  ;;  %v6177_v51 = vadd.f32 %v11692_v20, %v6176_v55 }
 0x3b9   : > { %6312 = vst.msk [vmem:[%s11710_s22 + $0x78] sm:$0xff] %vm3098_vm4, %v6280_v49  ;;  %v6279_v31 = vadd.f32 %v7301_v37, %v6177_v51  ;;  %v7316_v49 = vld [vmem:[%s7451_s26 + $0xf8] sm:$0xff] }
 0x3bb   : > { %6311 = vst.msk [vmem:[%s11710_s22 + $0x70] sm:$0xff] %vm3098_vm4, %v6279_v31  ;;  %v7317_v31 = vld [vmem:[%s7451_s26 + $0xf0] sm:$0xff] }
 0x3c6   : > { %v6826_v27 = vpop.f32.mrf.mxu1 }
 0x3c7   : > { %v6192_v21 = vadd.f32 %v6826_v27, %v11692_v20 }
 0x3c8   : > { %v6186_v33 = vpop.f32.mrf.mxu1 }
 0x3c9   : > { %v6282_v47 = vadd.f32 %v7302_v39, %v6192_v21  ;;  %v6187_v3 = vadd.f32 %v11692_v20, %v6186_v33 }
 0x3cb   : > { %6314 = vst.msk [vmem:[%s11710_s22 + $0x88] sm:$0xff] %vm3098_vm4, %v6282_v47  ;;  %v6281_v35 = vadd.f32 %v7303_v52, %v6187_v3 }
 0x3cd   : > { %6313 = vst.msk [vmem:[%s11710_s22 + $0x80] sm:$0xff] %vm3098_vm4, %v6281_v35 }
 0x3d8   : > { %v6829_v38 = vpop.f32.mrf.mxu1 }
 0x3d9   : > { %v6202_v60 = vadd.f32 %v6829_v38, %v11692_v20 }
 0x3da   : > { %v6196_v28 = vpop.f32.mrf.mxu1 }
 0x3db   : > { %v6284_v50 = vadd.f32 %v7304_v2, %v6202_v60  ;;  %v6197_v16 = vadd.f32 %v11692_v20, %v6196_v28 }
 0x3dd   : > { %6316 = vst.msk [vmem:[%s11710_s22 + $0x98] sm:$0xff] %vm3098_vm4, %v6284_v50  ;;  %v6283_v22 = vadd.f32 %v7305_v23, %v6197_v16 }
 0x3df   : > { %6315 = vst.msk [vmem:[%s11710_s22 + $0x90] sm:$0xff] %vm3098_vm4, %v6283_v22 }
 0x3ea   : > { %v6832_v10 = vpop.f32.mrf.mxu1 }
 0x3eb   : > { %v6212_v14 = vadd.f32 %v6832_v10, %v11692_v20 }
 0x3ec   : > { %v6206_v45 = vpop.f32.mrf.mxu1 }
 0x3ed   : > { %v6286_v19 = vadd.f32 %v7306_v48, %v6212_v14  ;;  %v6207_v54 = vadd.f32 %v11692_v20, %v6206_v45 }
 0x3ef   : > { %6318 = vst.msk [vmem:[%s11710_s22 + $0xa8] sm:$0xff] %vm3098_vm4, %v6286_v19  ;;  %v6285_v0 = vadd.f32 %v7307_v58, %v6207_v54 }
 0x3f1   : > { %6317 = vst.msk [vmem:[%s11710_s22 + $0xa0] sm:$0xff] %vm3098_vm4, %v6285_v0 }
 0x3fb   : > { %v6835_v62 = vpop.f32.mrf.mxu1 }
 0x3fc   : > { %v6222_v25 = vadd.f32 %v6835_v62, %v11692_v20 }
 0x3fd   : > { %v6216_v13 = vpop.f32.mrf.mxu1 }
 0x3fe   : > { %v6288_v29 = vadd.f32 %v7308_v44, %v6222_v25  ;;  %v6217_v7 = vadd.f32 %v11692_v20, %v6216_v13 }
 0x400   : > { %6320 = vst.msk [vmem:[%s11710_s22 + $0xb8] sm:$0xff] %vm3098_vm4, %v6288_v29  ;;  %v6287_v17 = vadd.f32 %v7309_v57, %v6217_v7 }
 0x402   : > { %6319 = vst.msk [vmem:[%s11710_s22 + $0xb0] sm:$0xff] %vm3098_vm4, %v6287_v17 }
 0x40d   : > { %v6838_v53 = vpop.f32.mrf.mxu1 }
 0x40e   : > { %v6232_v59 = vadd.f32 %v6838_v53, %v11692_v20 }
 0x40f   : > { %v6226_v61 = vpop.f32.mrf.mxu1 }
 0x410   : > { %v6290_v41 = vadd.f32 %v7310_v26, %v6232_v59  ;;  %v6227_v18 = vadd.f32 %v11692_v20, %v6226_v61 }
 0x412   : > { %6322 = vst.msk [vmem:[%s11710_s22 + $0xc8] sm:$0xff] %vm3098_vm4, %v6290_v41  ;;  %v6289_v9 = vadd.f32 %v7311_v63, %v6227_v18 }
 0x414   : > { %6321 = vst.msk [vmem:[%s11710_s22 + $0xc0] sm:$0xff] %vm3098_vm4, %v6289_v9 }
 0x41b   : > { %v6841_v34 = vpop.f32.mrf.mxu1 }
 0x41c   : > { %v6242_v36 = vadd.f32 %v6841_v34, %v11692_v20 }
 0x41d   : > { %v6236_v40 = vpop.f32.mrf.mxu1 }
 0x41e   : > { %v6292_v8 = vadd.f32 %v7312_v24, %v6242_v36  ;;  %v6237_v12 = vadd.f32 %v11692_v20, %v6236_v40 }
 0x420   : > { %6324 = vst.msk [vmem:[%s11710_s22 + $0xd8] sm:$0xff] %vm3098_vm4, %v6292_v8  ;;  %v6291_v11 = vadd.f32 %v7313_v46, %v6237_v12 }
 0x422   : > { %6323 = vst.msk [vmem:[%s11710_s22 + $0xd0] sm:$0xff] %vm3098_vm4, %v6291_v11 }
 0x428   : > { %v6844_v43 = vpop.f32.mrf.mxu1 }
 0x429   : > { %v6252_v32 = vadd.f32 %v6844_v43, %v11692_v20 }
 0x42a   : > { %v6246_v56 = vpop.f32.mrf.mxu1 }
 0x42b   : > { %v6294_v42 = vadd.f32 %v7314_v4, %v6252_v32  ;;  %v6247_v6 = vadd.f32 %v11692_v20, %v6246_v56 }
 0x42d   : > { %6326 = vst.msk [vmem:[%s11710_s22 + $0xe8] sm:$0xff] %vm3098_vm4, %v6294_v42  ;;  %v6293_v5 = vadd.f32 %v7315_v30, %v6247_v6 }
 0x42e   : > { %v6847_v1 = vpop.f32.mrf.mxu1 }
 0x42f   : > { %v6262_v55 = vadd.f32 %v6847_v1, %v11692_v20  ;;  %6325 = vst.msk [vmem:[%s11710_s22 + $0xe0] sm:$0xff] %vm3098_vm4, %v6293_v5 }
 0x430   : > { %v6256_v15 = vpop.f32.mrf.mxu1 }
 0x431   : > { %v6296_v51 = vadd.f32 %v7316_v49, %v6262_v55  ;;  %v6257_v37 = vadd.f32 %v11692_v20, %v6256_v15 }
 0x433   : > { %6328 = vst.msk [vmem:[%s11710_s22 + $0xf8] sm:$0xff] %vm3098_vm4, %v6296_v51  ;;  %v6295_v27 = vadd.f32 %v7317_v31, %v6257_v37 }
 0x435   : > { %6327 = vst.msk [vmem:[%s11710_s22 + $0xf0] sm:$0xff] %vm3098_vm4, %v6295_v27 }
 0x436 PF: > { %s21_s17 = sadd.s32 1, %s7340_s17   ;;  %s12627_s15 = smov %s7336_s16 }
 0x437   : > { %p18_p5 = scmp.ge.s32.totalorder %s21_s17, 4   ;;  %s12628_s16 = smov %s12630_s18 }
 0x439   :  { %20 = sbr.rel (!%p18_p5) target bundleno = 2 (0x2), region = 101 }

</bundles_post_ra>
